<compile_context>
chip_gen: v7x
topology: tpu7x:2x2x1
jax: 0.10.0
libtpu: 0.0.40
codegen_flags: <defaults>
</compile_context>

<pallas_src>
from functools import partial

import jax
import jax.numpy as jnp
from jax import lax
from jax.experimental import pallas as pl
from jax.experimental.pallas import tpu as pltpu

NEG_SLOPE = 0.01   # nn.LeakyReLU default negative_slope
BN_EPS = 1e-5      # nn.BatchNorm2d default eps


def _leaky(y):
    return jnp.where(y >= 0, y, NEG_SLOPE * y)


def _round_up(x, m):
    return ((x + m - 1) // m) * m


# --------------------------------------------------------------------------
# Fused kernel
# --------------------------------------------------------------------------
def _conv3x3_rows(xpad_ref, w_ref, H, W, Cp):
    """3x3 'same' conv as 3 accumulating MXU matmuls (one per kernel row).

    xpad_ref: (H+2, W+2, Cp) bf16 zero-haloed input (VMEM scratch).
    w_ref:    (3, 3*Cp, Cp) bf16 per-kernel-row weight matrices
              (rows ordered dx-major, input-channel-minor).
    Returns (H*W, Cp) f32 accumulator.
    """
    acc = None
    for dy in range(3):
        taps = [xpad_ref[dy:dy + H, dx:dx + W, :].reshape(H * W, Cp)
                for dx in range(3)]
        cols = jnp.concatenate(taps, axis=-1)                  # (HW, 3*Cp) bf16
        part = jnp.dot(cols, w_ref[dy], preferred_element_type=jnp.float32)
        acc = part if acc is None else acc + part
    return acc


def _residual_block_kernel(x_ref, w1_ref, s1_ref, b1_ref,
                           w2_ref, s2_ref, b2_ref,
                           o_ref, xpad1_ref, xpad2_ref):
    # x_ref : (H, W, C)  f32    unpadded NHWC input (one batch element)
    # w*_ref: (3, 3*Cp, Cp) bf16 per-row im2col weights (zero padded channels)
    # s*/b* : (1, Cp) f32        folded BN scale / shift (zero padded channels)
    # o_ref : (H, W, Cp)         lane-dense output
    # xpad1 : (H+2, W+2, Cp) bf16 scratch: spatially+channel padded x
    # xpad2 : (H+2, W+2, Cp) bf16 scratch: spatially padded conv1 output
    H, W, Cp = o_ref.shape
    C = x_ref.shape[-1]
    HW = H * W

    zrow = jnp.zeros((1, W + 2, Cp), jnp.bfloat16)
    zcol = jnp.zeros((H + 2, 1, Cp), jnp.bfloat16)

    x = x_ref[...]                                             # (H, W, C) f32

    # ---- xpad1: zero only the 1-px halo ring, interior = channel-padded x --
    xpad1_ref[0:1, :, :] = zrow
    xpad1_ref[H + 1:H + 2, :, :] = zrow
    xpad1_ref[:, 0:1, :] = zcol
    xpad1_ref[:, W + 1:W + 2, :] = zcol
    x_bf = x.astype(jnp.bfloat16)
    if Cp != C:
        x_bf = jnp.concatenate(
            [x_bf, jnp.zeros((H, W, Cp - C), jnp.bfloat16)], axis=-1)
    xpad1_ref[1:H + 1, 1:W + 1, :] = x_bf                      # one dense store

    # ---- conv1 -> folded BN -> LeakyReLU (intermediate never leaves VMEM) --
    y1 = _conv3x3_rows(xpad1_ref, w1_ref, H, W, Cp)            # (HW, Cp) f32
    y1 = _leaky(y1 * s1_ref[...] + b1_ref[...])

    # ---- xpad2: zero halo ring, interior = conv1 output (cast once) --------
    xpad2_ref[0:1, :, :] = zrow
    xpad2_ref[H + 1:H + 2, :, :] = zrow
    xpad2_ref[:, 0:1, :] = zcol
    xpad2_ref[:, W + 1:W + 2, :] = zcol
    xpad2_ref[1:H + 1, 1:W + 1, :] = y1.astype(jnp.bfloat16).reshape(H, W, Cp)

    # ---- conv2 -> folded BN -> + residual (f32, from x_ref) -> LeakyReLU ---
    y2 = _conv3x3_rows(xpad2_ref, w2_ref, H, W, Cp)
    y2 = y2 * s2_ref[...] + b2_ref[...]
    res = x
    if Cp != C:
        res = jnp.concatenate(
            [res, jnp.zeros((H, W, Cp - C), jnp.float32)], axis=-1)
    y2 = _leaky(y2 + res.reshape(HW, Cp))

    o_ref[...] = y2.reshape(H, W, Cp).astype(o_ref.dtype)


def _pick_vmem_limit_bytes():
    """Per-generation VMEM limit: physical capacity minus >=16 MiB headroom."""
    try:
        cap = pltpu.get_tpu_info().vmem_capacity_bytes
        return int(max(32 * 1024 * 1024, cap - 16 * 1024 * 1024))
    except Exception:
        return 48 * 1024 * 1024


def _fused_residual_block(x_nhwc, w1, s1, b1, w2, s2, b2, cp):
    N, H, W, C = x_nhwc.shape
    per_n = lambda n: (n, 0, 0, 0)
    rep2 = lambda n: (0, 0)
    rep3 = lambda n: (0, 0, 0)
    grid_spec = pltpu.PrefetchScalarGridSpec(
        num_scalar_prefetch=0,
        grid=(N,),
        in_specs=[
            pl.BlockSpec((pl.Squeezed(), H, W, C), per_n),
            pl.BlockSpec(w1.shape, rep3),
            pl.BlockSpec(s1.shape, rep2),
            pl.BlockSpec(b1.shape, rep2),
            pl.BlockSpec(w2.shape, rep3),
            pl.BlockSpec(s2.shape, rep2),
            pl.BlockSpec(b2.shape, rep2),
        ],
        out_specs=pl.BlockSpec((pl.Squeezed(), H, W, cp), per_n),
        scratch_shapes=[
            pltpu.VMEM((H + 2, W + 2, cp), jnp.bfloat16),   # padded x
            pltpu.VMEM((H + 2, W + 2, cp), jnp.bfloat16),   # padded conv1 out
        ],
    )
    return pl.pallas_call(
        _residual_block_kernel,
        out_shape=jax.ShapeDtypeStruct((N, H, W, cp), x_nhwc.dtype),
        grid_spec=grid_spec,
        compiler_params=pltpu.CompilerParams(
            dimension_semantics=("parallel",),
            vmem_limit_bytes=_pick_vmem_limit_bytes()),
    )(x_nhwc, w1, s1, b1, w2, s2, b2)


# --------------------------------------------------------------------------
# Parameter packing (one-time, hoisted out of the per-forward jit)
# --------------------------------------------------------------------------
def _pack_conv_weight_rows(w_oihw, cp):
    """OIHW 3x3 conv weight -> (3, 3*cp, cp) bf16 per-row im2col matrices."""
    co, ci, kh, kw = w_oihw.shape
    w_hwio = jnp.transpose(w_oihw, (2, 3, 1, 0))               # (3, 3, Ci, Co)
    w_pad = jnp.zeros((kh, kw, cp, cp), jnp.float32)
    w_pad = w_pad.at[:, :, :ci, :co].set(w_hwio)
    return w_pad.reshape(kh, kw * cp, cp).astype(jnp.bfloat16)


def _fold_bn_padded(conv_b, gamma, beta, mean, var, cp):
    """Eval-mode BN (+ conv bias) folded to scale/shift, zero-padded to cp."""
    scale = gamma / jnp.sqrt(var + BN_EPS)
    shift = beta + (conv_b - mean) * scale
    co = scale.shape[0]
    scale_p = jnp.zeros((1, cp), jnp.float32).at[0, :co].set(scale)
    shift_p = jnp.zeros((1, cp), jnp.float32).at[0, :co].set(shift)
    return scale_p, shift_p


def prepare_residual_block(params):
    """One-time packing (call once; reuse the result across forwards)."""
    co, ci = params["conv1_w"].shape[0], params["conv1_w"].shape[1]
    cp = _round_up(max(ci, co), 128)
    w1 = _pack_conv_weight_rows(params["conv1_w"], cp)
    s1, b1 = _fold_bn_padded(params["conv1_b"], params["bn1_gamma"],
                             params["bn1_beta"], params["bn1_mean"],
                             params["bn1_var"], cp)
    w2 = _pack_conv_weight_rows(params["conv2_w"], cp)
    s2, b2 = _fold_bn_padded(params["conv2_b"], params["bn2_gamma"],
                             params["bn2_beta"], params["bn2_mean"],
                             params["bn2_var"], cp)
    packed = dict(w1=w1, s1=s1, b1=b1, w2=w2, s2=s2, b2=b2)
    packed = jax.tree_util.tree_map(jax.device_put, packed)
    return packed, co


@partial(jax.jit, static_argnames=("out_channels",))
def residual_block_forward(x_nchw, packed, out_channels):
    """ResidualBlock.forward (eval-mode BN, stride=1, downsample=None)."""
    N, C, H, W = x_nchw.shape
    cp = packed["s1"].shape[1]
    x_nhwc = jnp.transpose(x_nchw, (0, 2, 3, 1))
    out_p = _fused_residual_block(x_nhwc, packed["w1"], packed["s1"],
                                  packed["b1"], packed["w2"], packed["s2"],
                                  packed["b2"], cp)
    # TODO(synk): NHWC consumers should take out_p[..., :out_channels] directly;
    # the slice + transpose below only exist to match the PyTorch NCHW contract.
    out = out_p[..., :out_channels]
    return jnp.transpose(out, (0, 3, 1, 2)).astype(x_nchw.dtype)


# --------------------------------------------------------------------------
# Pure-JAX (XLA) reference + test harness
# --------------------------------------------------------------------------
def _reference_forward(x, p):
    """Pure-JAX reference matching PyTorch eval-mode semantics, NCHW."""
    def conv(x, w, b):
        y = lax.conv_general_dilated(
            x, w, window_strides=(1, 1), padding=((1, 1), (1, 1)),
            dimension_numbers=("NCHW", "OIHW", "NCHW"))
        return y + b[None, :, None, None]

    def bn(x, g, be, m, v):
        return ((x - m[None, :, None, None])
                / jnp.sqrt(v[None, :, None, None] + BN_EPS)
                * g[None, :, None, None] + be[None, :, None, None])

    out = _leaky(bn(conv(x, p["conv1_w"], p["conv1_b"]),
                    p["bn1_gamma"], p["bn1_beta"], p["bn1_mean"], p["bn1_var"]))
    out = bn(conv(out, p["conv2_w"], p["conv2_b"]),
             p["bn2_gamma"], p["bn2_beta"], p["bn2_mean"], p["bn2_var"])
    out = out + x
    return _leaky(out)


def _init_params(key, cin, cout):
    keys = jax.random.split(key, 12)
    u = lambda k, s, lo, hi: jax.random.uniform(k, s, jnp.float32, lo, hi)
    n = lambda k, s, sc: sc * jax.random.normal(k, s, jnp.float32)
    return {
        "conv1_w": n(keys[0], (cout, cin, 3, 3), 0.1),
        "conv1_b": n(keys[1], (cout,), 0.1),
        "bn1_gamma": u(keys[2], (cout,), 0.5, 1.5),
        "bn1_beta": n(keys[3], (cout,), 0.1),
        "bn1_mean": n(keys[4], (cout,), 0.1),
        "bn1_var": u(keys[5], (cout,), 0.5, 1.5),
        "conv2_w": n(keys[6], (cout, cout, 3, 3), 0.1),
        "conv2_b": n(keys[7], (cout,), 0.1),
        "bn2_gamma": u(keys[8], (cout,), 0.5, 1.5),
        "bn2_beta": n(keys[9], (cout,), 0.1),
        "bn2_mean": n(keys[10], (cout,), 0.1),
        "bn2_var": u(keys[11], (cout,), 0.5, 1.5),
    }


if __name__ == "__main__":
    N, C, H, W = 2, 8, 16, 16   # in_channels == out_channels, stride=1, downsample=None
    key = jax.random.PRNGKey(0)
    kx, kp = jax.random.split(key)
    x = jax.random.normal(kx, (N, C, H, W), jnp.float32)
    params = _init_params(kp, C, C)

    packed, co = prepare_residual_block(params)          # one-time packing
    out = residual_block_forward(x, packed, out_channels=co)
    out = jax.block_until_ready(out)

    ref = _reference_forward(x, params)
    assert out.shape == ref.shape == (N, C, H, W)
    max_err = float(jnp.max(jnp.abs(out - ref)))
    # bf16 MXU operands (f32 accumulation) => small rounding error vs f32 ref.
    assert max_err < 5e-2, f"Pallas output mismatch vs reference (max err {max_err})"
    print("KERNEL_OK")
</pallas_src>

<mosaic_0001>
module attributes {stable_mosaic.version = 11 : i64} {
  func.func @_residual_block_kernel(%arg0: i32, %arg1: memref<1x16x16x8xf32, #tpu.memory_space<vmem>>, %arg2: memref<3x384x128xbf16, #tpu.memory_space<vmem>>, %arg3: memref<1x128xf32, #tpu.memory_space<vmem>>, %arg4: memref<1x128xf32, #tpu.memory_space<vmem>>, %arg5: memref<3x384x128xbf16, #tpu.memory_space<vmem>>, %arg6: memref<1x128xf32, #tpu.memory_space<vmem>>, %arg7: memref<1x128xf32, #tpu.memory_space<vmem>>, %arg8: memref<1x16x16x128xf32, #tpu.memory_space<vmem>>, %arg9: memref<18x18x128xbf16, #tpu.memory_space<vmem>>, %arg10: memref<18x18x128xbf16, #tpu.memory_space<vmem>>) attributes {dimension_semantics = [#tpu.dimension_semantics<parallel>], iteration_bounds = array<i64: 2>, scalar_prefetch = 0 : i64, scratch_operands = 2 : i64, tpu.core_type = #tpu.core_type<tc>, window_params = [{transform_indices = @transform_0, window_bounds = array<i64: 1, 16, 16, 8>}, {pipeline_mode = #tpu.pipeline_mode<synchronous>, transform_indices = @transform_1, window_bounds = array<i64: 3, 384, 128>}, {pipeline_mode = #tpu.pipeline_mode<synchronous>, transform_indices = @transform_2, window_bounds = array<i64: 1, 128>}, {pipeline_mode = #tpu.pipeline_mode<synchronous>, transform_indices = @transform_3, window_bounds = array<i64: 1, 128>}, {pipeline_mode = #tpu.pipeline_mode<synchronous>, transform_indices = @transform_4, window_bounds = array<i64: 3, 384, 128>}, {pipeline_mode = #tpu.pipeline_mode<synchronous>, transform_indices = @transform_5, window_bounds = array<i64: 1, 128>}, {pipeline_mode = #tpu.pipeline_mode<synchronous>, transform_indices = @transform_6, window_bounds = array<i64: 1, 128>}, {transform_indices = @transform_7, window_bounds = array<i64: 1, 16, 16, 128>}]} {
    %cst = arith.constant 0.000000e+00 : bf16
    %0 = vector.broadcast %cst : bf16 to vector<1x18x128xbf16>
    %cst_0 = arith.constant 0.000000e+00 : bf16
    %1 = vector.broadcast %cst_0 : bf16 to vector<18x1x128xbf16>
    %c0 = arith.constant 0 : index
    %c0_1 = arith.constant 0 : index
    %c0_2 = arith.constant 0 : index
    %c0_3 = arith.constant 0 : index
    %2 = vector.load %arg1[%c0, %c0_1, %c0_2, %c0_3] : memref<1x16x16x8xf32, #tpu.memory_space<vmem>>, vector<1x16x16x8xf32>
    %3 = vector.shape_cast %2 : vector<1x16x16x8xf32> to vector<16x16x8xf32>
    %c0_4 = arith.constant 0 : index
    %c0_5 = arith.constant 0 : index
    %c0_6 = arith.constant 0 : index
    %4 = vector.load %arg9[%c0_4, %c0_5, %c0_6] : memref<18x18x128xbf16, #tpu.memory_space<vmem>>, vector<1x18x128xbf16>
    tpu.vector_store %arg9[%c0_4, %c0_5, %c0_6], %0 {strides = array<i32>} : memref<18x18x128xbf16, #tpu.memory_space<vmem>>, vector<1x18x128xbf16>,
    %c17 = arith.constant 17 : index
    %c0_7 = arith.constant 0 : index
    %c0_8 = arith.constant 0 : index
    %5 = vector.load %arg9[%c17, %c0_7, %c0_8] : memref<18x18x128xbf16, #tpu.memory_space<vmem>>, vector<1x18x128xbf16>
    tpu.vector_store %arg9[%c17, %c0_7, %c0_8], %0 {strides = array<i32>} : memref<18x18x128xbf16, #tpu.memory_space<vmem>>, vector<1x18x128xbf16>,
    %c0_9 = arith.constant 0 : index
    %c0_10 = arith.constant 0 : index
    %c0_11 = arith.constant 0 : index
    %6 = vector.load %arg9[%c0_9, %c0_10, %c0_11] : memref<18x18x128xbf16, #tpu.memory_space<vmem>>, vector<18x1x128xbf16>
    tpu.vector_store %arg9[%c0_9, %c0_10, %c0_11], %1 {strides = array<i32>} : memref<18x18x128xbf16, #tpu.memory_space<vmem>>, vector<18x1x128xbf16>,
    %c0_12 = arith.constant 0 : index
    %c17_13 = arith.constant 17 : index
    %c0_14 = arith.constant 0 : index
    %7 = vector.load %arg9[%c0_12, %c17_13, %c0_14] : memref<18x18x128xbf16, #tpu.memory_space<vmem>>, vector<18x1x128xbf16>
    tpu.vector_store %arg9[%c0_12, %c17_13, %c0_14], %1 {strides = array<i32>} : memref<18x18x128xbf16, #tpu.memory_space<vmem>>, vector<18x1x128xbf16>,
    %8 = arith.truncf %3 : vector<16x16x8xf32> to vector<16x16x8xbf16>
    %cst_15 = arith.constant 0.000000e+00 : bf16
    %9 = vector.broadcast %cst_15 : bf16 to vector<16x16x120xbf16>
    %10 = tpu.concatenate %8, %9 in 2 : vector<16x16x8xbf16>, vector<16x16x120xbf16> -> vector<16x16x128xbf16>
    %c1 = arith.constant 1 : index
    %c1_16 = arith.constant 1 : index
    %c0_17 = arith.constant 0 : index
    %11 = vector.load %arg9[%c1, %c1_16, %c0_17] : memref<18x18x128xbf16, #tpu.memory_space<vmem>>, vector<16x16x128xbf16>
    tpu.vector_store %arg9[%c1, %c1_16, %c0_17], %10 {strides = array<i32>} : memref<18x18x128xbf16, #tpu.memory_space<vmem>>, vector<16x16x128xbf16>,
    %c0_18 = arith.constant 0 : index
    %c0_19 = arith.constant 0 : index
    %c0_20 = arith.constant 0 : index
    %12 = vector.load %arg9[%c0_18, %c0_19, %c0_20] : memref<18x18x128xbf16, #tpu.memory_space<vmem>>, vector<16x16x128xbf16>
    %13 = vector.shape_cast %12 : vector<16x16x128xbf16> to vector<256x128xbf16>
    %c0_21 = arith.constant 0 : index
    %c1_22 = arith.constant 1 : index
    %c0_23 = arith.constant 0 : index
    %14 = vector.load %arg9[%c0_21, %c1_22, %c0_23] : memref<18x18x128xbf16, #tpu.memory_space<vmem>>, vector<16x16x128xbf16>
    %15 = vector.shape_cast %14 : vector<16x16x128xbf16> to vector<256x128xbf16>
    %c0_24 = arith.constant 0 : index
    %c2 = arith.constant 2 : index
    %c0_25 = arith.constant 0 : index
    %16 = vector.load %arg9[%c0_24, %c2, %c0_25] : memref<18x18x128xbf16, #tpu.memory_space<vmem>>, vector<16x16x128xbf16>
    %17 = vector.shape_cast %16 : vector<16x16x128xbf16> to vector<256x128xbf16>
    %18 = tpu.concatenate %13, %15, %17 in 1 : vector<256x128xbf16>, vector<256x128xbf16>, vector<256x128xbf16> -> vector<256x384xbf16>
    %c0_26 = arith.constant 0 : index
    %c0_27 = arith.constant 0 : index
    %c0_28 = arith.constant 0 : index
    %19 = vector.load %arg2[%c0_26, %c0_27, %c0_28] : memref<3x384x128xbf16, #tpu.memory_space<vmem>>, vector<1x384x128xbf16>
    %20 = vector.shape_cast %19 : vector<1x384x128xbf16> to vector<384x128xbf16>
    %cst_29 = arith.constant dense<0.000000e+00> : vector<256x128xf32>
    %21 = tpu.matmul %18, %20, %cst_29 {dimension_numbers = #tpu.dot_dimension_numbers<[1], [0], [0], [1], [0, 0, 1, 1], [], []>} : vector<256x384xbf16>, vector<384x128xbf16>, vector<256x128xf32> -> vector<256x128xf32>
    %c1_30 = arith.constant 1 : index
    %c0_31 = arith.constant 0 : index
    %c0_32 = arith.constant 0 : index
    %22 = vector.load %arg9[%c1_30, %c0_31, %c0_32] : memref<18x18x128xbf16, #tpu.memory_space<vmem>>, vector<16x16x128xbf16>
    %23 = vector.shape_cast %22 : vector<16x16x128xbf16> to vector<256x128xbf16>
    %c1_33 = arith.constant 1 : index
    %c1_34 = arith.constant 1 : index
    %c0_35 = arith.constant 0 : index
    %24 = vector.load %arg9[%c1_33, %c1_34, %c0_35] : memref<18x18x128xbf16, #tpu.memory_space<vmem>>, vector<16x16x128xbf16>
    %25 = vector.shape_cast %24 : vector<16x16x128xbf16> to vector<256x128xbf16>
    %c1_36 = arith.constant 1 : index
    %c2_37 = arith.constant 2 : index
    %c0_38 = arith.constant 0 : index
    %26 = vector.load %arg9[%c1_36, %c2_37, %c0_38] : memref<18x18x128xbf16, #tpu.memory_space<vmem>>, vector<16x16x128xbf16>
    %27 = vector.shape_cast %26 : vector<16x16x128xbf16> to vector<256x128xbf16>
    %28 = tpu.concatenate %23, %25, %27 in 1 : vector<256x128xbf16>, vector<256x128xbf16>, vector<256x128xbf16> -> vector<256x384xbf16>
    %c1_39 = arith.constant 1 : index
    %c0_40 = arith.constant 0 : index
    %c0_41 = arith.constant 0 : index
    %29 = vector.load %arg2[%c1_39, %c0_40, %c0_41] : memref<3x384x128xbf16, #tpu.memory_space<vmem>>, vector<1x384x128xbf16>
    %30 = vector.shape_cast %29 : vector<1x384x128xbf16> to vector<384x128xbf16>
    %cst_42 = arith.constant dense<0.000000e+00> : vector<256x128xf32>
    %31 = tpu.matmul %28, %30, %cst_42 {dimension_numbers = #tpu.dot_dimension_numbers<[1], [0], [0], [1], [0, 0, 1, 1], [], []>} : vector<256x384xbf16>, vector<384x128xbf16>, vector<256x128xf32> -> vector<256x128xf32>
    %32 = arith.addf %21, %31 : vector<256x128xf32>
    %c2_43 = arith.constant 2 : index
    %c0_44 = arith.constant 0 : index
    %c0_45 = arith.constant 0 : index
    %33 = vector.load %arg9[%c2_43, %c0_44, %c0_45] : memref<18x18x128xbf16, #tpu.memory_space<vmem>>, vector<16x16x128xbf16>
    %34 = vector.shape_cast %33 : vector<16x16x128xbf16> to vector<256x128xbf16>
    %c2_46 = arith.constant 2 : index
    %c1_47 = arith.constant 1 : index
    %c0_48 = arith.constant 0 : index
    %35 = vector.load %arg9[%c2_46, %c1_47, %c0_48] : memref<18x18x128xbf16, #tpu.memory_space<vmem>>, vector<16x16x128xbf16>
    %36 = vector.shape_cast %35 : vector<16x16x128xbf16> to vector<256x128xbf16>
    %c2_49 = arith.constant 2 : index
    %c2_50 = arith.constant 2 : index
    %c0_51 = arith.constant 0 : index
    %37 = vector.load %arg9[%c2_49, %c2_50, %c0_51] : memref<18x18x128xbf16, #tpu.memory_space<vmem>>, vector<16x16x128xbf16>
    %38 = vector.shape_cast %37 : vector<16x16x128xbf16> to vector<256x128xbf16>
    %39 = tpu.concatenate %34, %36, %38 in 1 : vector<256x128xbf16>, vector<256x128xbf16>, vector<256x128xbf16> -> vector<256x384xbf16>
    %c2_52 = arith.constant 2 : index
    %c0_53 = arith.constant 0 : index
    %c0_54 = arith.constant 0 : index
    %40 = vector.load %arg2[%c2_52, %c0_53, %c0_54] : memref<3x384x128xbf16, #tpu.memory_space<vmem>>, vector<1x384x128xbf16>
    %41 = vector.shape_cast %40 : vector<1x384x128xbf16> to vector<384x128xbf16>
    %cst_55 = arith.constant dense<0.000000e+00> : vector<256x128xf32>
    %42 = tpu.matmul %39, %41, %cst_55 {dimension_numbers = #tpu.dot_dimension_numbers<[1], [0], [0], [1], [0, 0, 1, 1], [], []>} : vector<256x384xbf16>, vector<384x128xbf16>, vector<256x128xf32> -> vector<256x128xf32>
    %43 = arith.addf %32, %42 : vector<256x128xf32>
    %c0_56 = arith.constant 0 : index
    %c0_57 = arith.constant 0 : index
    %44 = vector.load %arg3[%c0_56, %c0_57] : memref<1x128xf32, #tpu.memory_space<vmem>>, vector<1x128xf32>
    %45 = vector.broadcast %44 : vector<1x128xf32> to vector<256x128xf32>
    %46 = arith.mulf %43, %45 : vector<256x128xf32>
    %c0_58 = arith.constant 0 : index
    %c0_59 = arith.constant 0 : index
    %47 = vector.load %arg4[%c0_58, %c0_59] : memref<1x128xf32, #tpu.memory_space<vmem>>, vector<1x128xf32>
    %48 = vector.broadcast %47 : vector<1x128xf32> to vector<256x128xf32>
    %49 = arith.addf %46, %48 : vector<256x128xf32>
    %cst_60 = arith.constant 0.000000e+00 : f32
    %50 = vector.broadcast %cst_60 : f32 to vector<256x128xf32>
    %51 = arith.cmpf oge, %49, %50 : vector<256x128xf32>
    %cst_61 = arith.constant 0.00999999977 : f32
    %52 = vector.broadcast %cst_61 : f32 to vector<256x128xf32>
    %53 = arith.mulf %52, %49 : vector<256x128xf32>
    %54 = arith.select %51, %49, %53 : vector<256x128xi1>, vector<256x128xf32>
    %c0_62 = arith.constant 0 : index
    %c0_63 = arith.constant 0 : index
    %c0_64 = arith.constant 0 : index
    %55 = vector.load %arg10[%c0_62, %c0_63, %c0_64] : memref<18x18x128xbf16, #tpu.memory_space<vmem>>, vector<1x18x128xbf16>
    tpu.vector_store %arg10[%c0_62, %c0_63, %c0_64], %0 {strides = array<i32>} : memref<18x18x128xbf16, #tpu.memory_space<vmem>>, vector<1x18x128xbf16>,
    %c17_65 = arith.constant 17 : index
    %c0_66 = arith.constant 0 : index
    %c0_67 = arith.constant 0 : index
    %56 = vector.load %arg10[%c17_65, %c0_66, %c0_67] : memref<18x18x128xbf16, #tpu.memory_space<vmem>>, vector<1x18x128xbf16>
    tpu.vector_store %arg10[%c17_65, %c0_66, %c0_67], %0 {strides = array<i32>} : memref<18x18x128xbf16, #tpu.memory_space<vmem>>, vector<1x18x128xbf16>,
    %c0_68 = arith.constant 0 : index
    %c0_69 = arith.constant 0 : index
    %c0_70 = arith.constant 0 : index
    %57 = vector.load %arg10[%c0_68, %c0_69, %c0_70] : memref<18x18x128xbf16, #tpu.memory_space<vmem>>, vector<18x1x128xbf16>
    tpu.vector_store %arg10[%c0_68, %c0_69, %c0_70], %1 {strides = array<i32>} : memref<18x18x128xbf16, #tpu.memory_space<vmem>>, vector<18x1x128xbf16>,
    %c0_71 = arith.constant 0 : index
    %c17_72 = arith.constant 17 : index
    %c0_73 = arith.constant 0 : index
    %58 = vector.load %arg10[%c0_71, %c17_72, %c0_73] : memref<18x18x128xbf16, #tpu.memory_space<vmem>>, vector<18x1x128xbf16>
    tpu.vector_store %arg10[%c0_71, %c17_72, %c0_73], %1 {strides = array<i32>} : memref<18x18x128xbf16, #tpu.memory_space<vmem>>, vector<18x1x128xbf16>,
    %59 = arith.truncf %54 : vector<256x128xf32> to vector<256x128xbf16>
    %60 = vector.shape_cast %59 : vector<256x128xbf16> to vector<16x16x128xbf16>
    %c1_74 = arith.constant 1 : index
    %c1_75 = arith.constant 1 : index
    %c0_76 = arith.constant 0 : index
    %61 = vector.load %arg10[%c1_74, %c1_75, %c0_76] : memref<18x18x128xbf16, #tpu.memory_space<vmem>>, vector<16x16x128xbf16>
    tpu.vector_store %arg10[%c1_74, %c1_75, %c0_76], %60 {strides = array<i32>} : memref<18x18x128xbf16, #tpu.memory_space<vmem>>, vector<16x16x128xbf16>,
    %c0_77 = arith.constant 0 : index
    %c0_78 = arith.constant 0 : index
    %c0_79 = arith.constant 0 : index
    %62 = vector.load %arg10[%c0_77, %c0_78, %c0_79] : memref<18x18x128xbf16, #tpu.memory_space<vmem>>, vector<16x16x128xbf16>
    %63 = vector.shape_cast %62 : vector<16x16x128xbf16> to vector<256x128xbf16>
    %c0_80 = arith.constant 0 : index
    %c1_81 = arith.constant 1 : index
    %c0_82 = arith.constant 0 : index
    %64 = vector.load %arg10[%c0_80, %c1_81, %c0_82] : memref<18x18x128xbf16, #tpu.memory_space<vmem>>, vector<16x16x128xbf16>
    %65 = vector.shape_cast %64 : vector<16x16x128xbf16> to vector<256x128xbf16>
    %c0_83 = arith.constant 0 : index
    %c2_84 = arith.constant 2 : index
    %c0_85 = arith.constant 0 : index
    %66 = vector.load %arg10[%c0_83, %c2_84, %c0_85] : memref<18x18x128xbf16, #tpu.memory_space<vmem>>, vector<16x16x128xbf16>
    %67 = vector.shape_cast %66 : vector<16x16x128xbf16> to vector<256x128xbf16>
    %68 = tpu.concatenate %63, %65, %67 in 1 : vector<256x128xbf16>, vector<256x128xbf16>, vector<256x128xbf16> -> vector<256x384xbf16>
    %c0_86 = arith.constant 0 : index
    %c0_87 = arith.constant 0 : index
    %c0_88 = arith.constant 0 : index
    %69 = vector.load %arg5[%c0_86, %c0_87, %c0_88] : memref<3x384x128xbf16, #tpu.memory_space<vmem>>, vector<1x384x128xbf16>
    %70 = vector.shape_cast %69 : vector<1x384x128xbf16> to vector<384x128xbf16>
    %cst_89 = arith.constant dense<0.000000e+00> : vector<256x128xf32>
    %71 = tpu.matmul %68, %70, %cst_89 {dimension_numbers = #tpu.dot_dimension_numbers<[1], [0], [0], [1], [0, 0, 1, 1], [], []>} : vector<256x384xbf16>, vector<384x128xbf16>, vector<256x128xf32> -> vector<256x128xf32>
    %c1_90 = arith.constant 1 : index
    %c0_91 = arith.constant 0 : index
    %c0_92 = arith.constant 0 : index
    %72 = vector.load %arg10[%c1_90, %c0_91, %c0_92] : memref<18x18x128xbf16, #tpu.memory_space<vmem>>, vector<16x16x128xbf16>
    %73 = vector.shape_cast %72 : vector<16x16x128xbf16> to vector<256x128xbf16>
    %c1_93 = arith.constant 1 : index
    %c1_94 = arith.constant 1 : index
    %c0_95 = arith.constant 0 : index
    %74 = vector.load %arg10[%c1_93, %c1_94, %c0_95] : memref<18x18x128xbf16, #tpu.memory_space<vmem>>, vector<16x16x128xbf16>
    %75 = vector.shape_cast %74 : vector<16x16x128xbf16> to vector<256x128xbf16>
    %c1_96 = arith.constant 1 : index
    %c2_97 = arith.constant 2 : index
    %c0_98 = arith.constant 0 : index
    %76 = vector.load %arg10[%c1_96, %c2_97, %c0_98] : memref<18x18x128xbf16, #tpu.memory_space<vmem>>, vector<16x16x128xbf16>
    %77 = vector.shape_cast %76 : vector<16x16x128xbf16> to vector<256x128xbf16>
    %78 = tpu.concatenate %73, %75, %77 in 1 : vector<256x128xbf16>, vector<256x128xbf16>, vector<256x128xbf16> -> vector<256x384xbf16>
    %c1_99 = arith.constant 1 : index
    %c0_100 = arith.constant 0 : index
    %c0_101 = arith.constant 0 : index
    %79 = vector.load %arg5[%c1_99, %c0_100, %c0_101] : memref<3x384x128xbf16, #tpu.memory_space<vmem>>, vector<1x384x128xbf16>
    %80 = vector.shape_cast %79 : vector<1x384x128xbf16> to vector<384x128xbf16>
    %cst_102 = arith.constant dense<0.000000e+00> : vector<256x128xf32>
    %81 = tpu.matmul %78, %80, %cst_102 {dimension_numbers = #tpu.dot_dimension_numbers<[1], [0], [0], [1], [0, 0, 1, 1], [], []>} : vector<256x384xbf16>, vector<384x128xbf16>, vector<256x128xf32> -> vector<256x128xf32>
    %82 = arith.addf %71, %81 : vector<256x128xf32>
    %c2_103 = arith.constant 2 : index
    %c0_104 = arith.constant 0 : index
    %c0_105 = arith.constant 0 : index
    %83 = vector.load %arg10[%c2_103, %c0_104, %c0_105] : memref<18x18x128xbf16, #tpu.memory_space<vmem>>, vector<16x16x128xbf16>
    %84 = vector.shape_cast %83 : vector<16x16x128xbf16> to vector<256x128xbf16>
    %c2_106 = arith.constant 2 : index
    %c1_107 = arith.constant 1 : index
    %c0_108 = arith.constant 0 : index
    %85 = vector.load %arg10[%c2_106, %c1_107, %c0_108] : memref<18x18x128xbf16, #tpu.memory_space<vmem>>, vector<16x16x128xbf16>
    %86 = vector.shape_cast %85 : vector<16x16x128xbf16> to vector<256x128xbf16>
    %c2_109 = arith.constant 2 : index
    %c2_110 = arith.constant 2 : index
    %c0_111 = arith.constant 0 : index
    %87 = vector.load %arg10[%c2_109, %c2_110, %c0_111] : memref<18x18x128xbf16, #tpu.memory_space<vmem>>, vector<16x16x128xbf16>
    %88 = vector.shape_cast %87 : vector<16x16x128xbf16> to vector<256x128xbf16>
    %89 = tpu.concatenate %84, %86, %88 in 1 : vector<256x128xbf16>, vector<256x128xbf16>, vector<256x128xbf16> -> vector<256x384xbf16>
    %c2_112 = arith.constant 2 : index
    %c0_113 = arith.constant 0 : index
    %c0_114 = arith.constant 0 : index
    %90 = vector.load %arg5[%c2_112, %c0_113, %c0_114] : memref<3x384x128xbf16, #tpu.memory_space<vmem>>, vector<1x384x128xbf16>
    %91 = vector.shape_cast %90 : vector<1x384x128xbf16> to vector<384x128xbf16>
    %cst_115 = arith.constant dense<0.000000e+00> : vector<256x128xf32>
    %92 = tpu.matmul %89, %91, %cst_115 {dimension_numbers = #tpu.dot_dimension_numbers<[1], [0], [0], [1], [0, 0, 1, 1], [], []>} : vector<256x384xbf16>, vector<384x128xbf16>, vector<256x128xf32> -> vector<256x128xf32>
    %93 = arith.addf %82, %92 : vector<256x128xf32>
    %c0_116 = arith.constant 0 : index
    %c0_117 = arith.constant 0 : index
    %94 = vector.load %arg6[%c0_116, %c0_117] : memref<1x128xf32, #tpu.memory_space<vmem>>, vector<1x128xf32>
    %95 = vector.broadcast %94 : vector<1x128xf32> to vector<256x128xf32>
    %96 = arith.mulf %93, %95 : vector<256x128xf32>
    %c0_118 = arith.constant 0 : index
    %c0_119 = arith.constant 0 : index
    %97 = vector.load %arg7[%c0_118, %c0_119] : memref<1x128xf32, #tpu.memory_space<vmem>>, vector<1x128xf32>
    %98 = vector.broadcast %97 : vector<1x128xf32> to vector<256x128xf32>
    %99 = arith.addf %96, %98 : vector<256x128xf32>
    %cst_120 = arith.constant 0.000000e+00 : f32
    %100 = vector.broadcast %cst_120 : f32 to vector<16x16x120xf32>
    %101 = tpu.concatenate %3, %100 in 2 : vector<16x16x8xf32>, vector<16x16x120xf32> -> vector<16x16x128xf32>
    %102 = vector.shape_cast %101 : vector<16x16x128xf32> to vector<256x128xf32>
    %103 = arith.addf %99, %102 : vector<256x128xf32>
    %cst_121 = arith.constant 0.000000e+00 : f32
    %104 = vector.broadcast %cst_121 : f32 to vector<256x128xf32>
    %105 = arith.cmpf oge, %103, %104 : vector<256x128xf32>
    %cst_122 = arith.constant 0.00999999977 : f32
    %106 = vector.broadcast %cst_122 : f32 to vector<256x128xf32>
    %107 = arith.mulf %106, %103 : vector<256x128xf32>
    %108 = arith.select %105, %103, %107 : vector<256x128xi1>, vector<256x128xf32>
    %109 = vector.shape_cast %108 : vector<256x128xf32> to vector<16x16x128xf32>
    %c0_123 = arith.constant 0 : index
    %c0_124 = arith.constant 0 : index
    %c0_125 = arith.constant 0 : index
    %c0_126 = arith.constant 0 : index
    %110 = vector.load %arg8[%c0_123, %c0_124, %c0_125, %c0_126] : memref<1x16x16x128xf32, #tpu.memory_space<vmem>>, vector<1x16x16x128xf32>
    %111 = vector.shape_cast %110 : vector<1x16x16x128xf32> to vector<16x16x128xf32>
    %112 = vector.shape_cast %109 : vector<16x16x128xf32> to vector<1x16x16x128xf32>
    tpu.vector_store %arg8[%c0_123, %c0_124, %c0_125, %c0_126], %112 {strides = array<i32>} : memref<1x16x16x128xf32, #tpu.memory_space<vmem>>, vector<1x16x16x128xf32>,
    return
  }
  func.func @transform_0(%arg0: i32) -> (i32, i32, i32, i32) {
    %c0_i32 = arith.constant 0 : i32
    %c0_i32_0 = arith.constant 0 : i32
    %c0_i32_1 = arith.constant 0 : i32
    %c0_i32_2 = arith.constant 0 : i32
    return %arg0, %c0_i32, %c0_i32_0, %c0_i32_1 : i32, i32, i32, i32
  }
  func.func @transform_1(%arg0: i32) -> (i32, i32, i32) {
    %c0_i32 = arith.constant 0 : i32
    %c0_i32_0 = arith.constant 0 : i32
    %c0_i32_1 = arith.constant 0 : i32
    %c0_i32_2 = arith.constant 0 : i32
    return %c0_i32, %c0_i32_0, %c0_i32_1 : i32, i32, i32
  }
  func.func @transform_2(%arg0: i32) -> (i32, i32) {
    %c0_i32 = arith.constant 0 : i32
    %c0_i32_0 = arith.constant 0 : i32
    %c0_i32_1 = arith.constant 0 : i32
    return %c0_i32, %c0_i32_0 : i32, i32
  }
  func.func @transform_3(%arg0: i32) -> (i32, i32) {
    %c0_i32 = arith.constant 0 : i32
    %c0_i32_0 = arith.constant 0 : i32
    %c0_i32_1 = arith.constant 0 : i32
    return %c0_i32, %c0_i32_0 : i32, i32
  }
  func.func @transform_4(%arg0: i32) -> (i32, i32, i32) {
    %c0_i32 = arith.constant 0 : i32
    %c0_i32_0 = arith.constant 0 : i32
    %c0_i32_1 = arith.constant 0 : i32
    %c0_i32_2 = arith.constant 0 : i32
    return %c0_i32, %c0_i32_0, %c0_i32_1 : i32, i32, i32
  }
  func.func @transform_5(%arg0: i32) -> (i32, i32) {
    %c0_i32 = arith.constant 0 : i32
    %c0_i32_0 = arith.constant 0 : i32
    %c0_i32_1 = arith.constant 0 : i32
    return %c0_i32, %c0_i32_0 : i32, i32
  }
  func.func @transform_6(%arg0: i32) -> (i32, i32) {
    %c0_i32 = arith.constant 0 : i32
    %c0_i32_0 = arith.constant 0 : i32
    %c0_i32_1 = arith.constant 0 : i32
    return %c0_i32, %c0_i32_0 : i32, i32
  }
  func.func @transform_7(%arg0: i32) -> (i32, i32, i32, i32) {
    %c0_i32 = arith.constant 0 : i32
    %c0_i32_0 = arith.constant 0 : i32
    %c0_i32_1 = arith.constant 0 : i32
    %c0_i32_2 = arith.constant 0 : i32
    return %arg0, %c0_i32, %c0_i32_0, %c0_i32_1 : i32, i32, i32, i32
  }
}

</mosaic_0001>

<bundles_post_ra>
// kernel: residual_block_forward.1
= control target key start
LH: loop header
LB: loop body
LE: loop exit
PB: predicated region body
PF: predicated region fallthrough
CT: control target
= control target key end

     0   :  { %12 = vsyncpa [#allocation5], 0  ;;  %s12835_s24 = smov 0   ;;  %s17647_s0 = inlined_call_operand.vmem [shape: f32[2,16,16,8], index: 0, kind: input, shape index: {}]   ;;  %s17648_s1 = inlined_call_operand.vmem [shape: bf16[3,384,128], index: 1, kind: input, shape index: {}]   ;;  %s17649_s2 = inlined_call_operand.vmem [shape: f32[1,128], index: 2, kind: input, shape index: {}]   ;;  %s17650_s3 = inlined_call_operand.vmem [shape: f32[1,128], index: 3, kind: input, shape index: {}]   ;;  %s17651_s4 = inlined_call_operand.hbm [shape: bf16[3,384,128], index: 4, kind: input, shape index: {}]   ;;  %s17652_s5 = inlined_call_operand.vmem [shape: f32[1,128], index: 5, kind: input, shape index: {}]   ;;  %s17653_s6 = inlined_call_operand.vmem [shape: f32[1,128], index: 6, kind: input, shape index: {}]   ;;  %s17654_s7 = inlined_call_operand.vmem [shape: f32[2,16,16,128], index: 7, kind: output, shape index: {}]  }
   0x1 LB: > { %s12841_s25 = sadd.s32 4294967295, %s12789_s24   ;;  %p10227_p0 = scmp.ge.s32.totalorder %s12789_s24, 1  ;;  %s12789_s24 = sphi %s12835_s24, %s18_s24  }
   0x2   : > { %p201_p1 = scmp.lt.s32.totalorder %s12789_s24, 3  ;;  %s12791_s26 = smov [#allocation4]  }
   0x3   : > { %s222_s27 = sshll.u32 %s12791_s26, 4  ;;  %p17655_p3 = scmp.eq.s32.totalorder %s12841_s25, 0  ;;  %s223_s27 = int_to_ptr.vmem [resolvable:$true] %s222_s27 }
   0x4   : > { %p12845_p2 = pnand %p10227_p0, %p201_p1  ;;  %s12751_s9 = scalar_lea.hbm %s17651_s4, 9216 }
   0x5   : > { %p12752_p6 = scmp.ne.s32.totalorder %s17651_s4, %s12751_s9  ;;  %p12758_p10 = scmp.lt.u32.totalorder %s12751_s9, %s17651_s4 }
   0x6   : > { %s17673_s28 = scalar_select %p12845_p2, 1, 0 }
   0x7   : > { %p12392_p4 = pneg %p12845_p2 }
   0x9   : > { %p12854_p5 = pnand %p17655_p3, %p12392_p4 }
   0xb   : > { %p12753_p7 = pneg %p12854_p5 }
   0xd   : > { %p12754_p8 = pnand %p12753_p7, %p12752_p6 }
   0xf   : > { %p12755_p9 = pneg %p12754_p8 }
  0x11   : > { %p12760_p11 = pnand %p12758_p10, %p12755_p9 }
  0x13   : > { %12763 = shalt.err (!%p12760_p11)
}
  0x14   : > { %s12764_s14 = scalar_lea.vmem %s223_s27, 9216  ;;  %p12772_p1 = scmp.lt.s32.totalorder %s223_s27, %s223_s27 }
  0x15   : > { %p12765_p12 = scmp.ne.s32.totalorder %s223_s27, %s12764_s14  ;;  %p12773_p4 = scmp.lt.s32.totalorder %s12764_s14, %s12764_s14 }
  0x17   : > { %p12767_p13 = pnand %p12765_p12, %p12753_p7  ;;  %p12774_p3 = por %p12773_p4, %p12772_p1 }
  0x19   : > { %p12768_p0 = pneg %p12767_p13 }
  0x1b   : > { %p12775_p2 = pnand %p12774_p3, %p12768_p0 }
  0x1d   : > { %12778 = shalt.err (!%p12775_p2)
}
  0x1e   : > { %s12792_s15 = smov 64   ;;  %s12793_s16 = smov 4  }
  0x1f   : > { %12395 = dma.hbm_to_vmem [thread:$0]  (!%p12854_p5), %s17651_s4, 9216, %s223_s27, [#allocation5], %s12792_s15, %s12792_s15, %s12793_s16  }
  0x20   : > { %p17675_p6 = scmp.ne.s32.totalorder %s17673_s28, 0 }
  0x22   : > { %252 = sbr.rel (%p17675_p6) target bundleno = 1328 (0x530), region = 48 }
  0x29   : > { %p17676_p8 = scmp.eq.s32.totalorder %s12841_s25, 0 }
  0x2b   : > { %12784 = dma.done.wait (%p17676_p8), [#allocation5], 9216   ;;  %p17677_p7 = pmov %p17676_p8 }
  0x2c   : > { %v12794_v0 = vmov 0   ;;  %v12410_v1 = vld [vmem:[%s17648_s1 + $0x100] sm:$0xff]   ;;  %v12414_v5 = vld [vmem:[%s17648_s1 + $0x108] sm:$0xff]   ;;  %v12418_v9 = vld [vmem:[%s17648_s1 + $0x110] sm:$0xff]   ;;  %vm335_vm0 = vsmask.f32 256 }
  0x2d   : > { %12786 = vsyncadd (%p17677_p7), [#allocation5], 4294958080  ;;  %327 = vst [vmem:[#allocation2] sm:$0xf] %v12794_v0  ;;  %v12411_v2 = vld [vmem:[%s17648_s1 + $0xc0] sm:$0xff]   ;;  %10964 = vmatprep.subr.bf16.mxu0 %v12410_v1  ;;  %v12415_v6 = vld [vmem:[%s17648_s1 + $0xc8] sm:$0xff]  }
  0x2e   : > { %328 = vst [vmem:[#allocation2 + $0x4] sm:$0xf] %v12794_v0  ;;  %329 = vst [vmem:[#allocation2 + $0x8] sm:$0x1] %v12794_v0  ;;  %v12412_v3 = vld [vmem:[%s17648_s1 + $0x40] sm:$0xff]   ;;  %10965 = vmatpush3.bf16.msra.mxu0 %v12411_v2  ;;  %v12416_v7 = vld [vmem:[%s17648_s1 + $0x48] sm:$0xff]  }
  0x2f   : > { %331 = vst [vmem:[#allocation2 + $0xcc] sm:$0xf] %v12794_v0  ;;  %332 = vst [vmem:[#allocation2 + $0xd0] sm:$0xf] %v12794_v0  ;;  %v12413_v4 = vld [vmem:[%s17648_s1] sm:$0xff]   ;;  %11100 = vmatprep.subr.bf16.mxu1 %v12412_v3  ;;  %10966 = vmatprep.subr.bf16.mxu0 %v12414_v5  ;;  %v12417_v8 = vld [vmem:[%s17648_s1 + $0x8] sm:$0xff]  }
  0x30   : > { %333 = vst [vmem:[#allocation2 + $0xd4] sm:$0x1] %v12794_v0  ;;  %5219 = vst [vmem:[#allocation3] sm:$0xf] %v12794_v0  ;;  %11101 = vmatpush3.bf16.msra.mxu1 %v12413_v4  ;;  %v12419_v10 = vld [vmem:[%s17648_s1 + $0xd0] sm:$0xff]   ;;  %v12422_v13 = vld [vmem:[%s17648_s1 + $0x118] sm:$0xff]  }
  0x31   : > { %5220 = vst [vmem:[#allocation3 + $0x4] sm:$0xf] %v12794_v0  ;;  %5221 = vst [vmem:[#allocation3 + $0x8] sm:$0x1] %v12794_v0  ;;  %11102 = vmatprep.subr.bf16.mxu1 %v12416_v7  ;;  %v12420_v11 = vld [vmem:[%s17648_s1 + $0x50] sm:$0xff]   ;;  %v12423_v14 = vld [vmem:[%s17648_s1 + $0xd8] sm:$0xff]  }
  0x32   : > { %5223 = vst [vmem:[#allocation3 + $0xcc] sm:$0xf] %v12794_v0  ;;  %5224 = vst [vmem:[#allocation3 + $0xd0] sm:$0xf] %v12794_v0  ;;  %10967 = vmatpush3.bf16.msra.mxu0 %v12415_v6  ;;  %v12421_v12 = vld [vmem:[%s17648_s1 + $0x10] sm:$0xff]   ;;  %v12424_v15 = vld [vmem:[%s17648_s1 + $0x58] sm:$0xff]  }
  0x33   : > { %5225 = vst [vmem:[#allocation3 + $0xd4] sm:$0x1] %v12794_v0  ;;  %10968 = vmatprep.subr.bf16.mxu0 %v12418_v9  ;;  %vm391_vm1 = vsmask.f32 7938  ;;  %v12425_v16 = vld [vmem:[%s17648_s1 + $0x18] sm:$0xff]   ;;  %v12426_v17 = vld [vmem:[%s17648_s1 + $0x120] sm:$0xff]  }
  0x34   : > { %11103 = vmatpush3.bf16.msra.mxu1 %v12417_v8  ;;  %v12427_v18 = vld [vmem:[%s17648_s1 + $0xe0] sm:$0xff]   ;;  %p284_p2 = scmp.lt.s32.totalorder %s12841_s25, 1  ;;  %vm334_vm2 = vcmask 1040384   ;;  %v12430_v21 = vld [vmem:[%s17648_s1 + $0x128] sm:$0xff]   ;;  %v17680_v26 = vmov 0  ;;  %v12434_v27 = vld [vmem:[%s17648_s1 + $0x130] sm:$0xff]  }
  0x35   : > { %11104 = vmatprep.subr.bf16.mxu1 %v12420_v11  ;;  %v12428_v19 = vld [vmem:[%s17648_s1 + $0x60] sm:$0xff]   ;;  %v12431_v22 = vld [vmem:[%s17648_s1 + $0xe8] sm:$0xff]   ;;  %vm12954_vm3 = vmand %vm334_vm2, %vm335_vm0  ;;  %vm463_vm5 = vcmask 64512   ;;  %vm577_vm6 = vsmask.f32 4368  ;;  %vm900_vm7 = vcmask 1043456  }
  0x36   : > { %10969 = vmatpush3.bf16.msra.mxu0 %v12419_v10  ;;  %v12429_v20 = vld [vmem:[%s17648_s1 + $0x20] sm:$0xff]   ;;  %v12432_v23 = vld [vmem:[%s17648_s1 + $0x68] sm:$0xff]   ;;  %s17947_s25 = smov (!%p284_p2, %s12841_s25), 1  ;;  %vm12962_vm4 = vmand %vm334_vm2, %vm391_vm1  ;;  %vm1062_vm8 = vsmask.f32 3328  ;;  %v17683_v7 = vmov 0 }
  0x37   : > { %10970 = vmatprep.subr.bf16.mxu0 %v12422_v13  ;;  %v12433_v25 = vld [vmem:[%s17648_s1 + $0x28] sm:$0xff]   ;;  %v17681_v26 = vsel %vm12962_vm4, 4294967295, %v17680_v26  ;;  %v12435_v28 = vld [vmem:[%s17648_s1 + $0xf0] sm:$0xff]   ;;  %s10930_s10 = sshll.u32 %s17947_s25, 8  ;;  %v12438_v31 = vld [vmem:[%s17648_s1 + $0x138] sm:$0xff]   ;;  %vm1513_vm13 = vcmask 1042432  }
  0x38   : > { %11105 = vmatpush3.bf16.msra.mxu1 %v12421_v12  ;;  %17682 = vst [vmem:[#allocation7_spill] sm:$0xff] %v17681_v26  ;;  %v12436_v29 = vld [vmem:[%s17648_s1 + $0x70] sm:$0xff]   ;;  %v12439_v32 = vld [vmem:[%s17648_s1 + $0xf8] sm:$0xff]   ;;  %s12990_s19 = scalar_lea.vmem %s17647_s0, %s10930_s10  ;;  %v340_v37 = vld [vmem:[#allocation2 + $0xc] sm:$0x1]  ;;  %v17686_v12 = vmov 0  ;;  %s17471_s23 = scalar_lea.vmem %s17654_s7, %s10930_s10 }
  0x39   : > { %11106 = vmatprep.subr.bf16.mxu1 %v12424_v15  ;;  %v12437_v30 = vld [vmem:[%s17648_s1 + $0x30] sm:$0xff]   ;;  %v12440_v33 = vld [vmem:[%s17648_s1 + $0x78] sm:$0xff]   ;;  %v295_v35 = vld [vmem:[%s12990_s19] sm:$0xff]  ;;  %v341_v38 = vsel %vm12954_vm3, 0, %v340_v37  ;;  %vm1063_vm11 = vsmask.f32 7440 }
  0x3a   : > { %10971 = vmatpush3.bf16.msra.mxu0 %v12423_v14  ;;  %v12441_v34 = vld [vmem:[%s17648_s1 + $0x38] sm:$0xff]   ;;  %v296_v36 = vld [vmem:[%s12990_s19 + $0x8] sm:$0xff]  ;;  %v396_v39 = vld [vmem:[#allocation2 + $0x14] sm:$0x1]  ;;  %342 = vst [vmem:[#allocation2 + $0xc] sm:$0x1] %v341_v38 }
  0x3b   : > { %10972 = vmatprep.subr.bf16.mxu0 %v12426_v17  ;;  %v447_v40 = vpack.c.bf16 %v296_v36, %v295_v35  ;;  %v13005_v41 = vld [vmem:[%s17648_s1 + $0x140] sm:$0xff]   ;;  %v397_v42 = vsel %vm12962_vm4, 0, %v396_v39  ;;  %v297_v44 = vld [vmem:[%s12990_s19 + $0x10] sm:$0xff]  ;;  %v393_v47 = vld [vmem:[#allocation2 + $0x8] sm:$0x1]  ;;  %vm1514_vm14 = vcmask 1046532  }
  0x3c   : > { %11107 = vmatpush3.bf16.msra.mxu1 %v12425_v16  ;;  %v337_v43 = vld [vmem:[#allocation2] sm:$0x1]  ;;  %398 = vst [vmem:[#allocation2 + $0x14] sm:$0x1] %v397_v42  ;;  %v13014_v48 = vld [vmem:[#allocation2 + $0x4] sm:$0xf]  ;;  %vm13032_vm9 = vmor %vm335_vm0, %vm577_vm6 }
  0x3d   : > { %11108 = vmatprep.subr.bf16.mxu1 %v12428_v19  ;;  %v466_v45 = vsel %vm463_vm5, %v447_v40, 0  ;;  %v338_v46 = vsel %vm12954_vm3, 0, %v337_v43  ;;  %v394_v51 = vsel %vm12962_vm4, 0, %v393_v47  ;;  %v1075_v52 = vshll.u32 %v13014_v48, 16  ;;  %v298_v53 = vld [vmem:[%s12990_s19 + $0x18] sm:$0xff]  ;;  %v299_v63 = vld [vmem:[%s12990_s19 + $0x20] sm:$0xff]  ;;  %vm13038_vm10 = vmand %vm900_vm7, %vm391_vm1 }
  0x3e   : > { %10973 = vmatpush3.bf16.msra.mxu0 %v12427_v18  ;;  %v10236_v49 = vcombine.low %v466_v45, %v466_v45  ;;  %v10237_v50 = vcombine.high %v466_v45, %v466_v45  ;;  %339 = vst [vmem:[#allocation2] sm:$0x1] %v338_v46  ;;  %v343_v54 = vld [vmem:[#allocation2 + $0x18] sm:$0x1]  ;;  %395 = vst [vmem:[#allocation2 + $0x8] sm:$0x1] %v394_v51  ;;  %v448_v58 = vpack.c.bf16 %v298_v53, %v297_v44 }
  0x3f   : > { %10974 = vmatprep.subr.bf16.mxu0 %v12430_v21  ;;  %v1079_v55 = vshrl.u32 %v13014_v48, 16  ;;  %v344_v56 = vsel %vm12954_vm3, 0, %v343_v54  ;;  %v399_v57 = vld [vmem:[#allocation2 + $0x20] sm:$0x1]  ;;  %v300_v0 = vld [vmem:[%s12990_s19 + $0x28] sm:$0xff]  ;;  %v13025_v2 = vrot.slane %v1075_v52, 5  ;;  %vm13062_vm12 = vmor %vm1062_vm8, %vm1063_vm11 }
  0x40   : > { %11109 = vmatpush3.bf16.msra.mxu1 %v12429_v20  ;;  %v580_v59 = vshrl.u32 %v10236_v49, 16  ;;  %v583_v60 = vshll.u32 %v10236_v49, 16  ;;  %v588_v61 = vshrl.u32 %v10237_v50, 16  ;;  %v591_v62 = vshll.u32 %v10237_v50, 16  ;;  %345 = vst [vmem:[#allocation2 + $0x18] sm:$0x1] %v344_v56  ;;  %vm13945_vm15 = vmor %vm1513_vm13, %vm1514_vm14 }
  0x41   : > { %11110 = vmatprep.subr.bf16.mxu1 %v12432_v23  ;;  %v346_v1 = vld [vmem:[#allocation2 + $0x24] sm:$0x1]  ;;  %v1081_v3 = vrot.slane %v1079_v55, 4  ;;  %v400_v4 = vsel %vm12962_vm4, 0, %v399_v57  ;;  %v468_v5 = vsel %vm463_vm5, %v448_v58, 0  ;;  %v17684_v7 = vsel %vm13032_vm9, 4294967295, %v17683_v7 }
  0x42   : > { %10975 = vmatpush3.bf16.msra.mxu0 %v12431_v22  ;;  %v402_v6 = vld [vmem:[#allocation2 + $0x2c] sm:$0x1]  ;;  %17685 = vst [vmem:[#allocation8_spill] sm:$0xff] %v17684_v7  ;;  %v582_v8 = vrot.slane %v580_v59, 7  ;;  %v590_v9 = vrot.slane %v588_v61, 7  ;;  %v10238_v10 = vcombine.low %v468_v5, %v468_v5  ;;  %v10239_v11 = vcombine.high %v468_v5, %v468_v5 }
  0x43   : > { %10976 = vmatprep.subr.bf16.mxu0 %v12434_v27  ;;  %401 = vst [vmem:[#allocation2 + $0x20] sm:$0x1] %v400_v4  ;;  %v17687_v12 = vsel %vm13038_vm10, 4294967295, %v17686_v12  ;;  %v902_v13 = vld [vmem:[#allocation2 + $0xc] sm:$0xf]  ;;  %v1082_v14 = vor.u32 %v1081_v3, %v13025_v2  ;;  %v347_v15 = vsel %vm12954_vm3, 0, %v346_v1 }
  0x44   : > { %11111 = vmatpush3.bf16.msra.mxu1 %v12433_v25  ;;  %17688 = vst [vmem:[#allocation9_spill] sm:$0xff] %v17687_v12  ;;  %v403_v16 = vsel %vm12962_vm4, 0, %v402_v6  ;;  %v585_v17 = vor.u32 %v583_v60, %v582_v8  ;;  %v586_v18 = vrot.slane %v582_v8, 4  ;;  %v593_v19 = vor.u32 %v591_v62, %v590_v9  ;;  %v906_v21 = vld [vmem:[#allocation2 + $0x14] sm:$0x1] }
  0x45   : > { %11112 = vmatprep.subr.bf16.mxu1 %v12436_v29  ;;  %v595_v20 = vrot.slane %v590_v9, 4  ;;  %348 = vst [vmem:[#allocation2 + $0x24] sm:$0x1] %v347_v15  ;;  %404 = vst [vmem:[#allocation2 + $0x2c] sm:$0x1] %v403_v16  ;;  %v597_v23 = vshrl.u32 %v10238_v10, 16 }
  0x46   : > { %10977 = vmatpush3.bf16.msra.mxu0 %v12435_v28  ;;  %v13047_v22 = vld [vmem:[#allocation2] sm:$0xf]  ;;  %v600_v25 = vshll.u32 %v10238_v10, 16  ;;  %v605_v27 = vshrl.u32 %v10239_v11, 16  ;;  %v449_v28 = vpack.c.bf16 %v300_v0, %v299_v63  ;;  %v594_v29 = vsel %vm13032_vm9, %v586_v18, %v593_v19  ;;  %v405_v38 = vld [vmem:[#allocation2 + $0x38] sm:$0x1] }
  0x47   : > { %10978 = vmatprep.subr.bf16.mxu0 %v12438_v31  ;;  %v907_v31 = vsel %vm12954_vm3, %v595_v20, %v906_v21  ;;  %905 = vst [vmem:[#allocation2 + $0x10] sm:$0xf] %v594_v29  ;;  %v1069_v35 = vshll.u32 %v13047_v22, 16  ;;  %v1083_v36 = vrot.slane %v1082_v14, 4  ;;  %v599_v40 = vrot.slane %v597_v23, 7  ;;  %v13094_v14 = vld [vmem:[%s12990_s19 + $0x30] sm:$0xff] }
  0x48   : > { %11113 = vmatpush3.bf16.msra.mxu1 %v12437_v30  ;;  %v903_v30 = vsel %vm13038_vm10, %v585_v17, %v902_v13  ;;  %908 = vst [vmem:[#allocation2 + $0x14] sm:$0x1] %v907_v31  ;;  %v607_v42 = vrot.slane %v605_v27, 7  ;;  %v608_v43 = vshll.u32 %v10239_v11, 16  ;;  %v909_v44 = vld [vmem:[#allocation2 + $0x18] sm:$0xf]  ;;  %v10284_v6 = vcombine.low %v13047_v22, %v13014_v48 }
  0x49   : > { %11114 = vmatprep.subr.bf16.mxu1 %v12440_v33  ;;  %v1066_v33 = vshrl.u32 %v13047_v22, 16  ;;  %904 = vst [vmem:[#allocation2 + $0xc] sm:$0xf] %v903_v30  ;;  %v1071_v45 = vrot.slane %v1069_v35, 5  ;;  %v470_v49 = vsel %vm463_vm5, %v449_v28, 0  ;;  %v602_v51 = vor.u32 %v600_v25, %v599_v40  ;;  %v13097_v15 = vld [vmem:[%s12990_s19 + $0x38] sm:$0xff] }
  0x4a   : > { %10979 = vmatpush3.bf16.msra.mxu0 %v12439_v32  ;;  %v1046_v32 = vld [vmem:[#allocation2 + $0x8] sm:$0x1]  ;;  %v913_v47 = vld [vmem:[#allocation2 + $0x20] sm:$0x1]  ;;  %v603_v52 = vrot.slane %v599_v40, 4  ;;  %v610_v53 = vor.u32 %v608_v43, %v607_v42  ;;  %v612_v54 = vrot.slane %v607_v42, 4  ;;  %v13066_v57 = vcombine.low %v470_v49, %v470_v49 }
  0x4b   : > { %11780 = vmatprep.subr.bf16.mxu0 %v13005_v41  ;;  %v1085_v37 = vshll.u32 %v1046_v32, 16  ;;  %v1068_v39 = vrot.slane %v1066_v33, 4  ;;  %v13068_v58 = vcombine.high %v470_v49, %v470_v49  ;;  %v910_v60 = vsel %vm13038_vm10, %v602_v51, %v909_v44  ;;  %v13100_v16 = vld [vmem:[%s12990_s19 + $0x40] sm:$0xff]  ;;  %v13110_v21 = vld [vmem:[%s12990_s19 + $0x48] sm:$0xff]  ;;  %v13113_v28 = vld [vmem:[%s12990_s19 + $0x50] sm:$0xff] }
  0x4c   : > { %11115 = vmatpush3.bf16.msra.mxu1 %v12441_v34  ;;  %v349_v34 = vld [vmem:[#allocation2 + $0x30] sm:$0x1]  ;;  %v611_v59 = vsel %vm13032_vm9, %v603_v52, %v610_v53  ;;  %v914_v61 = vsel %vm12954_vm3, %v612_v54, %v913_v47  ;;  %v406_v62 = vsel %vm12962_vm4, 0, %v405_v38  ;;  %911 = vst [vmem:[#allocation2 + $0x18] sm:$0xf] %v910_v60  ;;  %v614_v0 = vshrl.u32 %v13066_v57, 16 }
  0x4d   : > { %v1087_v46 = vrot.slane %v1085_v37, 5  ;;  %v350_v50 = vsel %vm12954_vm3, 0, %v349_v34  ;;  %v1072_v56 = vor.u32 %v1071_v45, %v1068_v39  ;;  %912 = vst [vmem:[#allocation2 + $0x1c] sm:$0xf] %v611_v59  ;;  %915 = vst [vmem:[#allocation2 + $0x20] sm:$0x1] %v914_v61  ;;  %v450_v42 = vpack.c.bf16 %v13097_v15, %v13094_v14 }
  0x4e   : > { %351 = vst [vmem:[#allocation2 + $0x30] sm:$0x1] %v350_v50  ;;  %407 = vst [vmem:[#allocation2 + $0x38] sm:$0x1] %v406_v62  ;;  %v13081_v3 = vld [vmem:[#allocation2 + $0x10] sm:$0xf]  ;;  %v451_v43 = vpack.c.bf16 %v13110_v21, %v13100_v16 }
  0x4f   : > { %v1073_v63 = vrot.slane %v1072_v56, 4  ;;  %v1916_v4 = vld [vmem:[#allocation2 + $0x14] sm:$0x1]  ;;  %v1088_v5 = vsel %vm13062_vm12, %v1083_v36, %v1087_v46  ;;  %v1942_v10 = vshll.u32 %v13081_v3, 16  ;;  %v1946_v11 = vshrl.u32 %v13081_v3, 16  ;;  %v13116_v29 = vld [vmem:[%s12990_s19 + $0x58] sm:$0xff] }
  0x50   : > { %v13079_v1 = vld [vmem:[#allocation2 + $0xc] sm:$0xf]  ;;  %v1952_v17 = vshll.u32 %v1916_v4, 16  ;;  %v13105_v18 = vld [vmem:[#allocation2 + $0x10] sm:$0xf]  ;;  %v617_v19 = vshll.u32 %v13066_v57, 16  ;;  %v452_v44 = vpack.c.bf16 %v13116_v29, %v13113_v28 }
  0x51   : > { %v1933_v8 = vshrl.u32 %v13079_v1, 16  ;;  %v1936_v9 = vshll.u32 %v13079_v1, 16  ;;  %v13091_v13 = vld [vmem:[#allocation2 + $0xc] sm:$0xf]  ;;  %v1078_v48 = vsel %vm13062_vm12, %v1073_v63, %v13025_v2  ;;  %v622_v20 = vshrl.u32 %v13068_v58, 16  ;;  %v13141_v54 = vld [vmem:[%s12990_s19 + $0x60] sm:$0xff] }
  0x52   : > { %v1944_v25 = vrot.slane %v1942_v10, 5  ;;  %v1948_v27 = vrot.slane %v1946_v11, 4  ;;  %v1954_v30 = vrot.slane %v1952_v17, 5  ;;  %v10300_v31 = vcombine.low %v1078_v48, %v1088_v5  ;;  %v13144_v56 = vld [vmem:[%s12990_s19 + $0x68] sm:$0xff]  ;;  %v1047_v63 = vld [vmem:[#allocation2 + $0x14] sm:$0x1] }
  0x53   : > { %v1935_v22 = vrot.slane %v1933_v8, 4  ;;  %v1938_v23 = vrot.slane %v1936_v9, 5  ;;  %v1090_v2 = vshrl.u32 %v13091_v13, 16  ;;  %v1093_v32 = vshll.u32 %v13091_v13, 16  ;;  %v13124_v38 = vld [vmem:[#allocation2 + $0x18] sm:$0xf] }
  0x54   : > { %v1949_v34 = vor.u32 %v1948_v27, %v1944_v25  ;;  %v1099_v35 = vshll.u32 %v13105_v18, 16  ;;  %v1103_v36 = vshrl.u32 %v13105_v18, 16  ;;  %v10348_v37 = vcombine.low %v13079_v1, %v13081_v3  ;;  %3391 = vmatprep.mubr.bf16.mxu1 %v10300_v31  ;;  %v13126_v39 = vld [vmem:[#allocation2 + $0x1c] sm:$0xf]  ;;  %v1917_v40 = vld [vmem:[#allocation2 + $0x20] sm:$0x1] }
  0x55   : > { %v1939_v33 = vor.u32 %v1938_v23, %v1935_v22  ;;  %3392 = vmatmul.mubr.bf16.vlgmr.msra.gmra.mrb[0].mxu1 %v10284_v6  ;;  %v1957_v47 = vshrl.u32 %v13124_v38, 16  ;;  %v1960_v49 = vshll.u32 %v13124_v38, 16  ;;  %v1966_v50 = vshll.u32 %v13126_v39, 16  ;;  %v12448_v6 = vld [vmem:[%s17648_s1 + $0x148] sm:$0xff]  }
  0x56   : > { %v1950_v46 = vrot.slane %v1949_v34, 4  ;;  %v1970_v51 = vshrl.u32 %v13126_v39, 16  ;;  %v1976_v52 = vshll.u32 %v1917_v40, 16  ;;  %v10285_v53 = vcombine.low %v13091_v13, %v13105_v18 }
  0x57   : > { %v1940_v45 = vrot.slane %v1939_v33, 4  ;;  %v1959_v61 = vrot.slane %v1957_v47, 4  ;;  %v1962_v62 = vrot.slane %v1960_v49, 5  ;;  %v1968_v3 = vrot.slane %v1966_v50, 5 }
  0x58   : > { %v1955_v60 = vsel %vm13062_vm12, %v1950_v46, %v1954_v30  ;;  %v1972_v4 = vrot.slane %v1970_v51, 4  ;;  %v1978_v5 = vrot.slane %v1976_v52, 5  ;;  %v1092_v9 = vrot.slane %v1090_v2, 4  ;;  %v920_v2 = vld [vmem:[#allocation2 + $0x2c] sm:$0x1] }
  0x59   : > { %v1945_v59 = vsel %vm13062_vm12, %v1940_v45, %v1944_v25  ;;  %v1963_v8 = vor.u32 %v1962_v62, %v1959_v61  ;;  %v1095_v10 = vrot.slane %v1093_v32, 5  ;;  %v453_v11 = vpack.c.bf16 %v13144_v56, %v13141_v54  ;;  %v916_v25 = vld [vmem:[#allocation2 + $0x24] sm:$0xf]  ;;  %v13159_v32 = vld [vmem:[#allocation2 + $0x18] sm:$0xf] }
  0x5a   : > { %v10364_v1 = vcombine.low %v1945_v59, %v1955_v60  ;;  %v1973_v17 = vor.u32 %v1972_v4, %v1968_v3  ;;  %v1101_v48 = vrot.slane %v1099_v35, 5  ;;  %v1105_v22 = vrot.slane %v1103_v36, 4  ;;  %v1048_v46 = vld [vmem:[#allocation2 + $0x20] sm:$0x1] }
  0x5b   : > { %v1109_v23 = vshll.u32 %v1047_v63, 16  ;;  %v1964_v27 = vrot.slane %v1963_v8, 4  ;;  %v10349_v30 = vcombine.low %v13124_v38, %v13126_v39  ;;  %v1096_v31 = vor.u32 %v1095_v10, %v1092_v9  ;;  %v12453_v38 = vld [vmem:[%s17648_s1 + $0x150] sm:$0xff]   ;;  %v352_v63 = vld [vmem:[#allocation2 + $0x3c] sm:$0x1] }
  0x5c   : > { %2925 = vmatprep.mubr.bf16.mxu0 %v10364_v1  ;;  %v616_v33 = vrot.slane %v614_v0, 7  ;;  %v1974_v34 = vrot.slane %v1973_v17, 4  ;;  %v1106_v40 = vor.u32 %v1105_v22, %v1101_v48  ;;  %v624_v36 = vrot.slane %v622_v20, 7  ;;  %v12458_v8 = vld [vmem:[%s17648_s1 + $0x158] sm:$0xff]   ;;  %v355_v22 = vld [vmem:[#allocation2 + $0x48] sm:$0x1] }
  0x5d   : > { %2926 = vmatmul.mubr.bf16.vlgmr.msra.gmra.mrb[0].mxu0 %v10348_v37  ;;  %v1111_v35 = vrot.slane %v1109_v23, 5  ;;  %v13164_v37 = vld [vmem:[#allocation2 + $0x1c] sm:$0xf]  ;;  %v1969_v0 = vsel %vm13062_vm12, %v1964_v27, %v1968_v3  ;;  %v1097_v39 = vrot.slane %v1096_v31, 4  ;;  %v625_v49 = vshll.u32 %v13068_v58, 16 }
  0x5e   : > { %11781 = vmatpush3.bf16.msra.mxu0 %v13005_v41  ;;  %v619_v45 = vor.u32 %v617_v19, %v616_v33  ;;  %v620_v41 = vrot.slane %v616_v33, 4  ;;  %v1979_v47 = vsel %vm13062_vm12, %v1974_v34, %v1978_v5  ;;  %v1107_v20 = vrot.slane %v1106_v40, 4  ;;  %v12465_v19 = vld [vmem:[%s17648_s1 + $0x80] sm:$0xff]   ;;  %v12471_v40 = vld [vmem:[%s17648_s1 + $0x88] sm:$0xff]  }
  0x5f   : > { %11782 = vmatprep.subr.bf16.mxu0 %v12448_v6  ;;  %v629_v50 = vrot.slane %v624_v36, 4  ;;  %v10365_v51 = vcombine.low %v1969_v0, %v1979_v47  ;;  %v1102_v52 = vsel %vm13062_vm12, %v1097_v39, %v1101_v48  ;;  %v1114_v57 = vshrl.u32 %v13159_v32, 16  ;;  %v408_v48 = vld [vmem:[#allocation2 + $0x44] sm:$0x1]  ;;  %11828 = vmatprep.subr.bf16.mxu1 %v12465_v19 }
  0x60   : > { %v917_v59 = vsel %vm13038_vm10, %v619_v45, %v916_v25  ;;  %v1112_v60 = vsel %vm13062_vm12, %v1107_v20, %v1111_v35  ;;  %v627_v61 = vor.u32 %v625_v49, %v624_v36  ;;  %v1117_v62 = vshll.u32 %v13159_v32, 16  ;;  %11829 = vmatpush3.bf16.msra.mxu1 %v12465_v19 }
  0x61   : > { %918 = vst [vmem:[#allocation2 + $0x24] sm:$0xf] %v917_v59  ;;  %v921_v58 = vsel %vm12954_vm3, %v629_v50, %v920_v2  ;;  %2933 = vmatprep.mubr.bf16.mxu0 %v10365_v51  ;;  %v10301_v1 = vcombine.low %v1102_v52, %v1112_v60  ;;  %v1116_v3 = vrot.slane %v1114_v57, 4  ;;  %v1123_v4 = vshll.u32 %v13164_v37, 16  ;;  %11830 = vmatprep.subr.bf16.mxu1 %v12471_v40  ;;  %v12469_v57 = vld [vmem:[%s17648_s1 + $0x168] sm:$0xff]  }
  0x62   : > { %11783 = vmatpush3.bf16.msra.mxu0 %v12448_v6  ;;  %922 = vst [vmem:[#allocation2 + $0x2c] sm:$0x1] %v921_v58  ;;  %v1127_v5 = vshrl.u32 %v13164_v37, 16  ;;  %v628_v9 = vsel %vm13032_vm9, %v620_v41, %v627_v61  ;;  %v1119_v10 = vrot.slane %v1117_v62, 5  ;;  %v1133_v17 = vshll.u32 %v1048_v46, 16 }
  0x63   : > { %11784 = vmatprep.subr.bf16.mxu0 %v12453_v38  ;;  %v10286_v6 = vcombine.low %v13159_v32, %v13164_v37  ;;  %3399 = vmatprep.mubr.bf16.mxu1 %v10301_v1  ;;  %919 = vst [vmem:[#allocation2 + $0x28] sm:$0xf] %v628_v9  ;;  %v1125_v23 = vrot.slane %v1123_v4, 5  ;;  %v472_v27 = vsel %vm463_vm5, %v450_v42, 0  ;;  %v353_v31 = vsel %vm12954_vm3, 0, %v352_v63  ;;  %v12463_v42 = vld [vmem:[%s17648_s1 + $0x160] sm:$0xff]  }
  0x64   : > { %v1129_v25 = vrot.slane %v1127_v5, 4  ;;  %3400 = vmatmul.mubr.bf16.gmra.mrb[4].mxu1 %v10285_v53  ;;  %v1120_v33 = vor.u32 %v1119_v10, %v1116_v3  ;;  %v1135_v2 = vrot.slane %v1133_v17, 5  ;;  %v10242_v34 = vcombine.low %v472_v27, %v472_v27  ;;  %354 = vst [vmem:[#allocation2 + $0x3c] sm:$0x1] %v353_v31  ;;  %v923_v63 = vld [vmem:[#allocation2 + $0x30] sm:$0xf] }
  0x65   : > { %2934 = vmatmul.mubr.bf16.gmra.mrb[4].mxu0 %v10349_v30  ;;  %v10243_v30 = vcombine.high %v472_v27, %v472_v27  ;;  %v409_v15 = vsel %vm12962_vm4, 0, %v408_v48  ;;  %v474_v13 = vsel %vm463_vm5, %v451_v43, 0  ;;  %v356_v18 = vsel %vm12954_vm3, 0, %v355_v22  ;;  %11831 = vmatpush3.bf16.msra.mxu1 %v12471_v40 }
  0x66   : > { %11785 = vmatpush3.bf16.msra.mxu0 %v12453_v38  ;;  %v1130_v14 = vor.u32 %v1129_v25, %v1125_v23  ;;  %v1121_v53 = vrot.slane %v1120_v33, 4  ;;  %v631_v35 = vshrl.u32 %v10242_v34, 16  ;;  %v634_v36 = vshll.u32 %v10242_v34, 16  ;;  %410 = vst [vmem:[#allocation2 + $0x44] sm:$0x1] %v409_v15 }
  0x67   : > { %11786 = vmatprep.subr.bf16.mxu0 %v12458_v8  ;;  %v639_v38 = vshrl.u32 %v10243_v30, 16  ;;  %357 = vst [vmem:[#allocation2 + $0x48] sm:$0x1] %v356_v18  ;;  %v642_v21 = vshll.u32 %v10243_v30, 16  ;;  %v13225_v39 = vcombine.low %v474_v13, %v474_v13  ;;  %v13227_v45 = vcombine.high %v474_v13, %v474_v13  ;;  %v411_v15 = vld [vmem:[#allocation2 + $0x50] sm:$0x1] }
  0x68   : > { %v13221_v0 = vld [vmem:[#allocation2 + $0x24] sm:$0xf]  ;;  %v1131_v16 = vrot.slane %v1130_v14, 4  ;;  %v1126_v20 = vsel %vm13062_vm12, %v1121_v53, %v1125_v23  ;;  %v633_v49 = vrot.slane %v631_v35, 7  ;;  %v13265_v35 = vld [vmem:[%s12990_s19 + $0x70] sm:$0xff] }
  0x69   : > { %v13223_v43 = vld [vmem:[#allocation2 + $0x24] sm:$0xf]  ;;  %v1918_v41 = vld [vmem:[#allocation2 + $0x2c] sm:$0x1]  ;;  %v1981_v46 = vshrl.u32 %v13221_v0, 16  ;;  %v1984_v47 = vshll.u32 %v13221_v0, 16 }
  0x6a   : > { %11787 = vmatpush3.bf16.msra.mxu0 %v12458_v8  ;;  %v2000_v50 = vshll.u32 %v1918_v41, 16  ;;  %v1136_v51 = vsel %vm13062_vm12, %v1131_v16, %v1135_v2  ;;  %v641_v52 = vrot.slane %v639_v38, 7  ;;  %v1138_v59 = vshrl.u32 %v13223_v43, 16  ;;  %v13239_v19 = vld [vmem:[#allocation2 + $0x28] sm:$0xf]  ;;  %v13271_v38 = vld [vmem:[%s12990_s19 + $0x80] sm:$0xff] }
  0x6b   : > { %11788 = vmatprep.subr.bf16.mxu0 %v12463_v42  ;;  %v1983_v60 = vrot.slane %v1981_v46, 4  ;;  %v1986_v61 = vrot.slane %v1984_v47, 5  ;;  %v10302_v58 = vcombine.low %v1126_v20, %v1136_v51  ;;  %v636_v62 = vor.u32 %v634_v36, %v633_v49  ;;  %v927_v8 = vld [vmem:[#allocation2 + $0x38] sm:$0x1]  ;;  %v13245_v22 = vld [vmem:[#allocation2 + $0x28] sm:$0xf] }
  0x6c   : > { %v1990_v1 = vshll.u32 %v13239_v19, 16  ;;  %v1994_v3 = vshrl.u32 %v13239_v19, 16  ;;  %v2002_v4 = vrot.slane %v2000_v50, 5  ;;  %v10350_v5 = vcombine.low %v13221_v0, %v13239_v19  ;;  %v1049_v23 = vld [vmem:[#allocation2 + $0x2c] sm:$0x1]  ;;  %v13268_v36 = vld [vmem:[%s12990_s19 + $0x78] sm:$0xff] }
  0x6d   : > { %v1987_v9 = vor.u32 %v1986_v61, %v1983_v60  ;;  %3407 = vmatprep.mubr.bf16.mxu1 %v10302_v58  ;;  %v637_v10 = vrot.slane %v633_v49, 4  ;;  %v644_v17 = vor.u32 %v642_v21, %v641_v52  ;;  %v646_v48 = vrot.slane %v641_v52, 4  ;;  %v13276_v51 = vld [vmem:[%s12990_s19 + $0x88] sm:$0xff]  ;;  %v930_v61 = vld [vmem:[#allocation2 + $0x3c] sm:$0xf] }
  0x6e   : > { %11789 = vmatpush3.bf16.msra.mxu0 %v12463_v42  ;;  %v1992_v25 = vrot.slane %v1990_v1, 5  ;;  %v1996_v27 = vrot.slane %v1994_v3, 4  ;;  %3408 = vmatmul.mubr.bf16.gmra.mrb[8].mxu1 %v10286_v6  ;;  %v924_v31 = vsel %vm13038_vm10, %v636_v62, %v923_v63  ;;  %v1140_v33 = vrot.slane %v1138_v59, 4 }
  0x6f   : > { %11790 = vmatprep.subr.bf16.mxu0 %v12469_v57  ;;  %v1988_v2 = vrot.slane %v1987_v9, 4  ;;  %v645_v34 = vsel %vm13032_vm9, %v637_v10, %v644_v17  ;;  %925 = vst [vmem:[#allocation2 + $0x30] sm:$0xf] %v924_v31  ;;  %v928_v30 = vsel %vm12954_vm3, %v646_v48, %v927_v8  ;;  %v1141_v40 = vshll.u32 %v13223_v43, 16 }
  0x70   : > { %v1997_v32 = vor.u32 %v1996_v27, %v1992_v25  ;;  %926 = vst [vmem:[#allocation2 + $0x34] sm:$0xf] %v645_v34  ;;  %929 = vst [vmem:[#allocation2 + $0x38] sm:$0x1] %v928_v30  ;;  %v1147_v37 = vshll.u32 %v13245_v22, 16  ;;  %v1151_v6 = vshrl.u32 %v13245_v22, 16  ;;  %v10287_v42 = vcombine.low %v13223_v43, %v13245_v22 }
  0x71   : > { %v1157_v14 = vshll.u32 %v1049_v23, 16  ;;  %v1993_v13 = vsel %vm13062_vm12, %v1988_v2, %v1992_v25  ;;  %v1143_v18 = vrot.slane %v1141_v40, 5  ;;  %v648_v53 = vshrl.u32 %v13225_v39, 16 }
  0x72   : > { %11791 = vmatpush3.bf16.msra.mxu0 %v12469_v57  ;;  %v1998_v16 = vrot.slane %v1997_v32, 4  ;;  %v1149_v21 = vrot.slane %v1147_v37, 5  ;;  %v1153_v41 = vrot.slane %v1151_v6, 4  ;;  %v651_v49 = vshll.u32 %v13225_v39, 16  ;;  %v934_v6 = vld [vmem:[#allocation2 + $0x44] sm:$0x1] }
  0x73   : > { %v1159_v46 = vrot.slane %v1157_v14, 5  ;;  %v1144_v47 = vor.u32 %v1143_v18, %v1140_v33  ;;  %v650_v20 = vrot.slane %v648_v53, 7  ;;  %v656_v50 = vshrl.u32 %v13227_v45, 16 }
  0x74   : > { %v2003_v52 = vsel %vm13062_vm12, %v1998_v16, %v2002_v4  ;;  %v1154_v59 = vor.u32 %v1153_v41, %v1149_v21  ;;  %v659_v60 = vshll.u32 %v13227_v45, 16  ;;  %v412_v57 = vsel %vm12962_vm4, 0, %v411_v15 }
  0x75   : > { %v10366_v58 = vcombine.low %v1993_v13, %v2003_v52  ;;  %v1145_v62 = vrot.slane %v1144_v47, 4  ;;  %v653_v63 = vor.u32 %v651_v49, %v650_v20  ;;  %v654_v1 = vrot.slane %v650_v20, 4  ;;  %413 = vst [vmem:[#allocation2 + $0x50] sm:$0x1] %v412_v57 }
  0x76   : > { %v13283_v39 = vld [vmem:[#allocation2 + $0x30] sm:$0xf]  ;;  %v1155_v3 = vrot.slane %v1154_v59, 4  ;;  %v658_v8 = vrot.slane %v656_v50, 7  ;;  %v454_v9 = vpack.c.bf16 %v13268_v36, %v13265_v35  ;;  %v455_v4 = vpack.c.bf16 %v13276_v51, %v13271_v38 }
  0x77   : > { %2941 = vmatprep.mubr.bf16.mxu0 %v10366_v58  ;;  %v13289_v45 = vld [vmem:[#allocation2 + $0x34] sm:$0xf]  ;;  %v1919_v10 = vld [vmem:[#allocation2 + $0x38] sm:$0x1]  ;;  %v2005_v17 = vshrl.u32 %v13283_v39, 16  ;;  %v2008_v48 = vshll.u32 %v13283_v39, 16  ;;  %v1150_v23 = vsel %vm13062_vm12, %v1145_v62, %v1149_v21  ;;  %v931_v25 = vsel %vm13038_vm10, %v653_v63, %v930_v61 }
  0x78   : > { %2942 = vmatmul.mubr.bf16.gmra.mrb[8].mxu0 %v10350_v5  ;;  %v2014_v27 = vshll.u32 %v13289_v45, 16  ;;  %v2018_v31 = vshrl.u32 %v13289_v45, 16  ;;  %v2024_v33 = vshll.u32 %v1919_v10, 16  ;;  %v10351_v2 = vcombine.low %v13283_v39, %v13289_v45  ;;  %932 = vst [vmem:[#allocation2 + $0x3c] sm:$0xf] %v931_v25  ;;  %v12477_v61 = vld [vmem:[%s17648_s1 + $0x90] sm:$0xff]  }
  0x79   : > { %v13304_v34 = vld [vmem:[#allocation2 + $0x30] sm:$0xf]  ;;  %v2007_v30 = vrot.slane %v2005_v17, 4  ;;  %v2010_v40 = vrot.slane %v2008_v48, 5  ;;  %v1160_v32 = vsel %vm13062_vm12, %v1155_v3, %v1159_v46  ;;  %v661_v37 = vor.u32 %v659_v60, %v658_v8  ;;  %v13308_v0 = vld [vmem:[#allocation2 + $0x34] sm:$0xf]  ;;  %11832 = vmatprep.subr.bf16.mxu1 %v12477_v61 }
  0x7a   : > { %v2016_v19 = vrot.slane %v2014_v27, 5  ;;  %v2020_v5 = vrot.slane %v2018_v31, 4  ;;  %v2026_v14 = vrot.slane %v2024_v33, 5  ;;  %v10303_v15 = vcombine.low %v1150_v23, %v1160_v32  ;;  %v1050_v13 = vld [vmem:[#allocation2 + $0x38] sm:$0x1]  ;;  %v12475_v60 = vld [vmem:[%s17648_s1 + $0x170] sm:$0xff]   ;;  %11833 = vmatpush3.bf16.msra.mxu1 %v12477_v61 }
  0x7b   : > { %v2011_v18 = vor.u32 %v2010_v40, %v2007_v30  ;;  %v662_v53 = vsel %vm13032_vm9, %v654_v1, %v661_v37  ;;  %v663_v16 = vrot.slane %v658_v8, 4  ;;  %v1162_v21 = vshrl.u32 %v13304_v34, 16  ;;  %11792 = vmatprep.subr.bf16.mxu0 %v12475_v60 }
  0x7c   : > { %v2021_v41 = vor.u32 %v2020_v5, %v2016_v19  ;;  %3415 = vmatprep.mubr.bf16.mxu1 %v10303_v15  ;;  %933 = vst [vmem:[#allocation2 + $0x40] sm:$0xf] %v662_v53  ;;  %v1165_v46 = vshll.u32 %v13304_v34, 16  ;;  %v1171_v47 = vshll.u32 %v13308_v0, 16  ;;  %v1175_v20 = vshrl.u32 %v13308_v0, 16  ;;  %11793 = vmatpush3.bf16.msra.mxu0 %v12475_v60 }
  0x7d   : > { %v2012_v49 = vrot.slane %v2011_v18, 4  ;;  %3416 = vmatmul.mubr.bf16.gmra.mrb[12].mxu1 %v10287_v42  ;;  %v935_v50 = vsel %vm12954_vm3, %v663_v16, %v934_v6  ;;  %v1164_v52 = vrot.slane %v1162_v21, 4  ;;  %v1181_v59 = vshll.u32 %v1050_v13, 16  ;;  %v937_v15 = vld [vmem:[#allocation2 + $0x48] sm:$0xf] }
  0x7e   : > { %v2022_v57 = vrot.slane %v2021_v41, 4  ;;  %936 = vst [vmem:[#allocation2 + $0x44] sm:$0x1] %v935_v50  ;;  %v1167_v58 = vrot.slane %v1165_v46, 5  ;;  %v1173_v62 = vrot.slane %v1171_v47, 5  ;;  %v1177_v63 = vrot.slane %v1175_v20, 4 }
  0x7f   : > { %v2017_v43 = vsel %vm13062_vm12, %v2012_v49, %v2016_v19  ;;  %v13329_v22 = vld [vmem:[#allocation2 + $0x3c] sm:$0xf]  ;;  %v1183_v42 = vrot.slane %v1181_v59, 5  ;;  %v10288_v1 = vcombine.low %v13304_v34, %v13308_v0  ;;  %v476_v3 = vsel %vm463_vm5, %v452_v44, 0  ;;  %v941_v39 = vld [vmem:[#allocation2 + $0x50] sm:$0x1] }
  0x80   : > { %v13337_v8 = vld [vmem:[#allocation2 + $0x3c] sm:$0xf]  ;;  %v2027_v10 = vsel %vm13062_vm12, %v2022_v57, %v2026_v14  ;;  %v2029_v17 = vshrl.u32 %v13329_v22, 16  ;;  %v2032_v48 = vshll.u32 %v13329_v22, 16  ;;  %v1168_v23 = vor.u32 %v1167_v58, %v1164_v52  ;;  %v358_v60 = vld [vmem:[#allocation2 + $0x54] sm:$0x1] }
  0x81   : > { %v10367_v25 = vcombine.low %v2017_v43, %v2027_v10  ;;  %v1178_v27 = vor.u32 %v1177_v63, %v1173_v62  ;;  %v10246_v31 = vcombine.low %v476_v3, %v476_v3  ;;  %v10247_v28 = vcombine.high %v476_v3, %v476_v3  ;;  %v414_v63 = vld [vmem:[#allocation2 + $0x5c] sm:$0x1] }
  0x82   : > { %v2031_v29 = vrot.slane %v2029_v17, 4  ;;  %v2034_v44 = vrot.slane %v2032_v48, 5  ;;  %v1169_v33 = vrot.slane %v1168_v23, 4  ;;  %v1186_v34 = vshrl.u32 %v13337_v8, 16  ;;  %v361_v17 = vld [vmem:[#allocation2 + $0x60] sm:$0x1] }
  0x83   : > { %2949 = vmatprep.mubr.bf16.mxu0 %v10367_v25  ;;  %v13344_v30 = vld [vmem:[#allocation2 + $0x40] sm:$0xf]  ;;  %v1179_v40 = vrot.slane %v1178_v27, 4  ;;  %v665_v32 = vshrl.u32 %v10246_v31, 16  ;;  %v668_v37 = vshll.u32 %v10246_v31, 16  ;;  %v673_v6 = vshrl.u32 %v10247_v28, 16 }
  0x84   : > { %2950 = vmatmul.mubr.bf16.gmra.mrb[12].mxu0 %v10351_v2  ;;  %v2035_v0 = vor.u32 %v2034_v44, %v2031_v29  ;;  %v2038_v19 = vshll.u32 %v13344_v30, 16  ;;  %v2042_v5 = vshrl.u32 %v13344_v30, 16  ;;  %v10352_v14 = vcombine.low %v13329_v22, %v13344_v30  ;;  %v13357_v47 = vld [vmem:[#allocation2 + $0x40] sm:$0xf]  ;;  %v417_v48 = vld [vmem:[#allocation2 + $0x68] sm:$0x1] }
  0x85   : > { %v1920_v13 = vld [vmem:[#allocation2 + $0x44] sm:$0x1]  ;;  %v1174_v18 = vsel %vm13062_vm12, %v1169_v33, %v1173_v62  ;;  %v1184_v53 = vsel %vm13062_vm12, %v1179_v40, %v1183_v42  ;;  %v667_v16 = vrot.slane %v665_v32, 7  ;;  %v675_v21 = vrot.slane %v673_v6, 7 }
  0x86   : > { %v2036_v45 = vrot.slane %v2035_v0, 4  ;;  %v2040_v2 = vrot.slane %v2038_v19, 5  ;;  %v2044_v41 = vrot.slane %v2042_v5, 4  ;;  %v2048_v46 = vshll.u32 %v1920_v13, 16  ;;  %v1051_v59 = vld [vmem:[#allocation2 + $0x44] sm:$0x1] }
  0x87   : > { %v10304_v20 = vcombine.low %v1174_v18, %v1184_v53  ;;  %v670_v49 = vor.u32 %v668_v37, %v667_v16  ;;  %v671_v50 = vrot.slane %v667_v16, 4  ;;  %v676_v52 = vshll.u32 %v10247_v28, 16 }
  0x88   : > { %v2041_v61 = vsel %vm13062_vm12, %v2036_v45, %v2040_v2  ;;  %v2045_v57 = vor.u32 %v2044_v41, %v2040_v2  ;;  %v2050_v58 = vrot.slane %v2048_v46, 5  ;;  %v680_v62 = vrot.slane %v675_v21, 4 }
  0x89   : > { %3423 = vmatprep.mubr.bf16.mxu1 %v10304_v20  ;;  %v678_v43 = vor.u32 %v676_v52, %v675_v21  ;;  %v938_v42 = vsel %vm13038_vm10, %v670_v49, %v937_v15  ;;  %v1188_v3 = vrot.slane %v1186_v34, 4  ;;  %v1189_v10 = vshll.u32 %v13337_v8, 16  ;;  %v364_v34 = vld [vmem:[#allocation2 + $0x6c] sm:$0x1] }
  0x8a   : > { %v2046_v23 = vrot.slane %v2045_v57, 4  ;;  %3424 = vmatmul.mubr.bf16.gmra.mrb[16].mxu1 %v10288_v1  ;;  %939 = vst [vmem:[#allocation2 + $0x48] sm:$0xf] %v938_v42  ;;  %v942_v25 = vsel %vm12954_vm3, %v680_v62, %v941_v39  ;;  %v1195_v27 = vshll.u32 %v13357_v47, 16  ;;  %v1199_v31 = vshrl.u32 %v13357_v47, 16 }
  0x8b   : > { %v679_v28 = vsel %vm13032_vm9, %v671_v50, %v678_v43  ;;  %943 = vst [vmem:[#allocation2 + $0x50] sm:$0x1] %v942_v25  ;;  %v1191_v29 = vrot.slane %v1189_v10, 5  ;;  %v1205_v44 = vshll.u32 %v1051_v59, 16  ;;  %v10289_v33 = vcombine.low %v13337_v8, %v13357_v47  ;;  %v12480_v8 = vld [vmem:[%s17648_s1 + $0x98] sm:$0xff]  }
  0x8c   : > { %v2051_v1 = vsel %vm13062_vm12, %v2046_v23, %v2050_v58  ;;  %940 = vst [vmem:[#allocation2 + $0x4c] sm:$0xf] %v679_v28  ;;  %v1197_v40 = vrot.slane %v1195_v27, 5  ;;  %v1201_v32 = vrot.slane %v1199_v31, 4  ;;  %v359_v37 = vsel %vm12954_vm3, 0, %v358_v60  ;;  %11834 = vmatprep.subr.bf16.mxu1 %v12480_v8 }
  0x8d   : > { %v10368_v6 = vcombine.low %v2041_v61, %v2051_v1  ;;  %v1192_v0 = vor.u32 %v1191_v29, %v1188_v3  ;;  %v1207_v19 = vrot.slane %v1205_v44, 5  ;;  %360 = vst [vmem:[#allocation2 + $0x54] sm:$0x1] %v359_v37  ;;  %v415_v5 = vsel %vm12962_vm4, 0, %v414_v63  ;;  %11835 = vmatpush3.bf16.msra.mxu1 %v12480_v8 }
  0x8e   : > { %v1202_v15 = vor.u32 %v1201_v32, %v1197_v40  ;;  %416 = vst [vmem:[#allocation2 + $0x5c] sm:$0x1] %v415_v5  ;;  %v478_v13 = vsel %vm463_vm5, %v453_v11, 0  ;;  %v362_v18 = vsel %vm12954_vm3, 0, %v361_v17  ;;  %v418_v53 = vsel %vm12962_vm4, 0, %v417_v48 }
  0x8f   : > { %2957 = vmatprep.mubr.bf16.mxu0 %v10368_v6  ;;  %v1193_v16 = vrot.slane %v1192_v0, 4  ;;  %v10248_v21 = vcombine.low %v478_v13, %v478_v13  ;;  %v10249_v39 = vcombine.high %v478_v13, %v478_v13  ;;  %363 = vst [vmem:[#allocation2 + $0x60] sm:$0x1] %v362_v18  ;;  %419 = vst [vmem:[#allocation2 + $0x68] sm:$0x1] %v418_v53  ;;  %v480_v45 = vsel %vm463_vm5, %v454_v9, 0 }
  0x90   : > { %2958 = vmatmul.mubr.bf16.gmra.mrb[16].mxu0 %v10352_v14  ;;  %v1203_v54 = vrot.slane %v1202_v15, 4  ;;  %v13396_v56 = vcombine.low %v480_v45, %v480_v45  ;;  %v13398_v11 = vcombine.high %v480_v45, %v480_v45  ;;  %v365_v2 = vsel %vm12954_vm3, 0, %v364_v34  ;;  %v420_v15 = vld [vmem:[#allocation2 + $0x74] sm:$0x1] }
  0x91   : > { %v13402_v41 = vld [vmem:[#allocation2 + $0x48] sm:$0xf]  ;;  %v1198_v35 = vsel %vm13062_vm12, %v1193_v16, %v1197_v40  ;;  %v682_v36 = vshrl.u32 %v10248_v21, 16  ;;  %v685_v9 = vshll.u32 %v10248_v21, 16  ;;  %v690_v46 = vshrl.u32 %v10249_v39, 16 }
  0x92   : > { %366 = vst [vmem:[#allocation2 + $0x6c] sm:$0x1] %v365_v2  ;;  %v1921_v22 = vld [vmem:[#allocation2 + $0x50] sm:$0x1]  ;;  %v2053_v30 = vshrl.u32 %v13402_v41, 16  ;;  %v2056_v14 = vshll.u32 %v13402_v41, 16  ;;  %v1208_v47 = vsel %vm13062_vm12, %v1203_v54, %v1207_v19 }
  0x93   : > { %v693_v20 = vshll.u32 %v10249_v39, 16  ;;  %v13410_v49 = vld [vmem:[#allocation2 + $0x4c] sm:$0xf]  ;;  %v2072_v50 = vshll.u32 %v1921_v22, 16  ;;  %v10305_v52 = vcombine.low %v1198_v35, %v1208_v47  ;;  %v684_v59 = vrot.slane %v682_v36, 7 }
  0x94   : > { %v692_v60 = vrot.slane %v690_v46, 7  ;;  %v2055_v61 = vrot.slane %v2053_v30, 4  ;;  %v2058_v57 = vrot.slane %v2056_v14, 5  ;;  %v2062_v58 = vshll.u32 %v13410_v49, 16  ;;  %v944_v63 = vld [vmem:[#allocation2 + $0x54] sm:$0xf] }
  0x95   : > { %v2066_v62 = vshrl.u32 %v13410_v49, 16  ;;  %v2074_v43 = vrot.slane %v2072_v50, 5  ;;  %v10353_v42 = vcombine.low %v13402_v41, %v13410_v49  ;;  %3431 = vmatprep.mubr.bf16.mxu1 %v10305_v52  ;;  %v687_v3 = vor.u32 %v685_v9, %v684_v59  ;;  %v13416_v17 = vld [vmem:[#allocation2 + $0x48] sm:$0xf]  ;;  %v948_v31 = vld [vmem:[#allocation2 + $0x5c] sm:$0x1] }
  0x96   : > { %v688_v10 = vrot.slane %v684_v59, 4  ;;  %v2059_v48 = vor.u32 %v2058_v57, %v2055_v61  ;;  %v2064_v23 = vrot.slane %v2062_v58, 5  ;;  %3432 = vmatmul.mubr.bf16.gmra.mrb[20].mxu1 %v10289_v33  ;;  %v695_v27 = vor.u32 %v693_v20, %v692_v60  ;;  %v13418_v28 = vld [vmem:[#allocation2 + $0x4c] sm:$0xf]  ;;  %v1052_v34 = vld [vmem:[#allocation2 + $0x50] sm:$0x1] }
  0x97   : > { %v2068_v25 = vrot.slane %v2066_v62, 4  ;;  %v697_v29 = vrot.slane %v692_v60, 4  ;;  %v945_v44 = vsel %vm13038_vm10, %v687_v3, %v944_v63  ;;  %v1210_v1 = vshrl.u32 %v13416_v17, 16  ;;  %v12484_v46 = vld [vmem:[%s17648_s1 + $0xa0] sm:$0xff]   ;;  %v12482_v60 = vld [vmem:[%s17648_s1 + $0x178] sm:$0xff]   ;;  %v12485_v61 = vld [vmem:[%s17648_s1 + $0xa8] sm:$0xff]  }
  0x98   : > { %v1213_v40 = vshll.u32 %v13416_v17, 16  ;;  %v2060_v32 = vrot.slane %v2059_v48, 4  ;;  %v696_v6 = vsel %vm13032_vm9, %v688_v10, %v695_v27  ;;  %946 = vst [vmem:[#allocation2 + $0x54] sm:$0xf] %v945_v44  ;;  %v1219_v33 = vshll.u32 %v13418_v28, 16  ;;  %11836 = vmatprep.subr.bf16.mxu1 %v12484_v46  ;;  %11794 = vmatprep.subr.bf16.mxu0 %v12482_v60 }
  0x99   : > { %v2069_v37 = vor.u32 %v2068_v25, %v2064_v23  ;;  %947 = vst [vmem:[#allocation2 + $0x58] sm:$0xf] %v696_v6  ;;  %v949_v0 = vsel %vm12954_vm3, %v697_v29, %v948_v31  ;;  %v1212_v19 = vrot.slane %v1210_v1, 4  ;;  %v1223_v8 = vshrl.u32 %v13418_v28, 16  ;;  %v951_v52 = vld [vmem:[#allocation2 + $0x60] sm:$0xf]  ;;  %11837 = vmatpush3.bf16.msra.mxu1 %v12484_v46  ;;  %11795 = vmatpush3.bf16.msra.mxu0 %v12482_v60 }
  0x9a   : > { %v1215_v5 = vrot.slane %v1213_v40, 5  ;;  %v2065_v13 = vsel %vm13062_vm12, %v2060_v32, %v2064_v23  ;;  %950 = vst [vmem:[#allocation2 + $0x5c] sm:$0x1] %v949_v0  ;;  %v1221_v53 = vrot.slane %v1219_v33, 5  ;;  %v1229_v16 = vshll.u32 %v1052_v34, 16  ;;  %11838 = vmatprep.subr.bf16.mxu1 %v12485_v61 }
  0x9b   : > { %v2070_v18 = vrot.slane %v2069_v37, 4  ;;  %v1225_v39 = vrot.slane %v1223_v8, 4  ;;  %v10290_v45 = vcombine.low %v13416_v17, %v13418_v28  ;;  %v699_v54 = vshrl.u32 %v13396_v56, 16 }
  0x9c   : > { %v1216_v21 = vor.u32 %v1215_v5, %v1212_v19  ;;  %v1231_v35 = vrot.slane %v1229_v16, 5  ;;  %v702_v36 = vshll.u32 %v13396_v56, 16  ;;  %v707_v9 = vshrl.u32 %v13398_v11, 16 }
  0x9d   : > { %v2075_v2 = vsel %vm13062_vm12, %v2070_v18, %v2074_v43  ;;  %v1226_v14 = vor.u32 %v1225_v39, %v1221_v53  ;;  %v701_v47 = vrot.slane %v699_v54, 7  ;;  %v710_v50 = vshll.u32 %v13398_v11, 16  ;;  %11839 = vmatpush3.bf16.msra.mxu1 %v12485_v61  ;;  %v13494_v39 = vld [vmem:[%s12990_s19 + $0x98] sm:$0xff] }
  0x9e   : > { %v10369_v22 = vcombine.low %v2065_v13, %v2075_v2  ;;  %v1217_v30 = vrot.slane %v1216_v21, 4  ;;  %v709_v20 = vrot.slane %v707_v9, 7  ;;  %v421_v59 = vsel %vm12962_vm4, 0, %v420_v15  ;;  %v13491_v21 = vld [vmem:[%s12990_s19 + $0x90] sm:$0xff]  ;;  %v367_v54 = vld [vmem:[#allocation2 + $0x78] sm:$0x1] }
  0x9f   : > { %v13449_v56 = vsel %vm463_vm5, %v455_v4, 0  ;;  %v13457_v11 = vld [vmem:[#allocation2 + $0x54] sm:$0xf]  ;;  %v1227_v58 = vrot.slane %v1226_v14, 4  ;;  %v704_v38 = vor.u32 %v702_v36, %v701_v47  ;;  %v705_v51 = vrot.slane %v701_v47, 4  ;;  %v13506_v47 = vld [vmem:[%s12990_s19 + $0xa8] sm:$0xff] }
  0xa0   : > { %2965 = vmatprep.mubr.bf16.mxu0 %v10369_v22  ;;  %v1222_v57 = vsel %vm13062_vm12, %v1217_v30, %v1221_v53  ;;  %v955_v4 = vld [vmem:[#allocation2 + $0x68] sm:$0x1]  ;;  %v13461_v62 = vld [vmem:[#allocation2 + $0x54] sm:$0xf]  ;;  %422 = vst [vmem:[#allocation2 + $0x74] sm:$0x1] %v421_v59  ;;  %v712_v10 = vor.u32 %v710_v50, %v709_v20  ;;  %v10252_v30 = vcombine.low %v13449_v56, %v13449_v56 }
  0xa1   : > { %2966 = vmatmul.mubr.bf16.gmra.mrb[20].mxu0 %v10353_v42  ;;  %v13466_v63 = vld [vmem:[#allocation2 + $0x58] sm:$0xf]  ;;  %v2077_v43 = vshrl.u32 %v13457_v11, 16  ;;  %v2080_v3 = vshll.u32 %v13457_v11, 16  ;;  %v714_v17 = vrot.slane %v709_v20, 4  ;;  %v1232_v41 = vsel %vm13062_vm12, %v1227_v58, %v1231_v35 }
  0xa2   : > { %v1922_v48 = vld [vmem:[#allocation2 + $0x5c] sm:$0x1]  ;;  %v2086_v23 = vshll.u32 %v13466_v63, 16  ;;  %v2090_v25 = vshrl.u32 %v13466_v63, 16  ;;  %v10354_v27 = vcombine.low %v13457_v11, %v13466_v63  ;;  %v13476_v49 = vld [vmem:[#allocation2 + $0x58] sm:$0xf]  ;;  %v10306_v29 = vcombine.low %v1222_v57, %v1232_v41 }
  0xa3   : > { %v2079_v42 = vrot.slane %v2077_v43, 4  ;;  %v2082_v31 = vrot.slane %v2080_v3, 5  ;;  %v2096_v28 = vshll.u32 %v1922_v48, 16  ;;  %v1053_v44 = vld [vmem:[#allocation2 + $0x5c] sm:$0x1]  ;;  %v713_v40 = vsel %vm13032_vm9, %v705_v51, %v712_v10 }
  0xa4   : > { %v2088_v34 = vrot.slane %v2086_v23, 5  ;;  %v2092_v1 = vrot.slane %v2090_v25, 4  ;;  %v952_v32 = vsel %vm13038_vm10, %v704_v38, %v951_v52  ;;  %3439 = vmatprep.mubr.bf16.mxu1 %v10306_v29  ;;  %954 = vst [vmem:[#allocation2 + $0x64] sm:$0xf] %v713_v40  ;;  %v956_v33 = vsel %vm12954_vm3, %v714_v17, %v955_v4  ;;  %v12488_v38 = vld [vmem:[%s17648_s1 + $0xb0] sm:$0xff]  }
  0xa5   : > { %v2083_v37 = vor.u32 %v2082_v31, %v2079_v42  ;;  %v2098_v6 = vrot.slane %v2096_v28, 5  ;;  %953 = vst [vmem:[#allocation2 + $0x60] sm:$0xf] %v952_v32  ;;  %v1234_v0 = vshrl.u32 %v13461_v62, 16  ;;  %3440 = vmatmul.mubr.bf16.gmra.mrb[24].mxu1 %v10290_v45  ;;  %957 = vst [vmem:[#allocation2 + $0x68] sm:$0x1] %v956_v33  ;;  %v10291_v16 = vcombine.low %v13461_v62, %v13476_v49 }
  0xa6   : > { %v2093_v19 = vor.u32 %v2092_v1, %v2088_v34  ;;  %v1237_v5 = vshll.u32 %v13461_v62, 16  ;;  %v1243_v8 = vshll.u32 %v13476_v49, 16  ;;  %v1247_v15 = vshrl.u32 %v13476_v49, 16  ;;  %v13497_v45 = vld [vmem:[%s12990_s19 + $0xa0] sm:$0xff]  ;;  %11840 = vmatprep.subr.bf16.mxu1 %v12488_v38  ;;  %v958_v33 = vld [vmem:[#allocation2 + $0x6c] sm:$0xf] }
  0xa7   : > { %v2084_v13 = vrot.slane %v2083_v37, 4  ;;  %v1236_v18 = vrot.slane %v1234_v0, 4  ;;  %v1253_v53 = vshll.u32 %v1053_v44, 16  ;;  %v10253_v14 = vcombine.high %v13449_v56, %v13449_v56  ;;  %11841 = vmatpush3.bf16.msra.mxu1 %v12488_v38 }
  0xa8   : > { %v2094_v2 = vrot.slane %v2093_v19, 4  ;;  %v1239_v35 = vrot.slane %v1237_v5, 5  ;;  %v1245_v36 = vrot.slane %v1243_v8, 5  ;;  %v1249_v9 = vrot.slane %v1247_v15, 4  ;;  %v962_v8 = vld [vmem:[#allocation2 + $0x74] sm:$0x1] }
  0xa9   : > { %v2089_v46 = vsel %vm13062_vm12, %v2084_v13, %v2088_v34  ;;  %v1255_v22 = vrot.slane %v1253_v53, 5  ;;  %v368_v59 = vsel %vm12954_vm3, 0, %v367_v54  ;;  %v716_v61 = vshrl.u32 %v10252_v30, 16  ;;  %v12489_v34 = vld [vmem:[%s17648_s1 + $0xb8] sm:$0xff]  }
  0xaa   : > { %v2099_v20 = vsel %vm13062_vm12, %v2094_v2, %v2098_v6  ;;  %v1240_v50 = vor.u32 %v1239_v35, %v1236_v18  ;;  %v1250_v52 = vor.u32 %v1249_v9, %v1245_v36  ;;  %v719_v57 = vshll.u32 %v10252_v30, 16  ;;  %369 = vst [vmem:[#allocation2 + $0x78] sm:$0x1] %v368_v59  ;;  %11842 = vmatprep.subr.bf16.mxu1 %v12489_v34  ;;  %v423_v35 = vld [vmem:[#allocation2 + $0x80] sm:$0x1] }
  0xab   : > { %v10370_v60 = vcombine.low %v2089_v46, %v2099_v20  ;;  %v724_v58 = vshrl.u32 %v10253_v14, 16  ;;  %v13517_v51 = vld [vmem:[#allocation2 + $0x64] sm:$0xf]  ;;  %v456_v3 = vpack.c.bf16 %v13494_v39, %v13491_v21  ;;  %v457_v10 = vpack.c.bf16 %v13506_v47, %v13497_v45  ;;  %11843 = vmatpush3.bf16.msra.mxu1 %v12489_v34  ;;  %v13573_v34 = vld [vmem:[%s12990_s19 + $0xb8] sm:$0xff] }
  0xac   : > { %v13515_v56 = vld [vmem:[#allocation2 + $0x60] sm:$0xf]  ;;  %v1241_v4 = vrot.slane %v1240_v50, 4  ;;  %v1251_v43 = vrot.slane %v1250_v52, 4  ;;  %v1923_v17 = vld [vmem:[#allocation2 + $0x68] sm:$0x1] }
  0xad   : > { %2973 = vmatprep.mubr.bf16.mxu0 %v10370_v60  ;;  %v2101_v48 = vshrl.u32 %v13515_v56, 16  ;;  %v2104_v23 = vshll.u32 %v13515_v56, 16  ;;  %v2110_v25 = vshll.u32 %v13517_v51, 16  ;;  %v2114_v41 = vshrl.u32 %v13517_v51, 16  ;;  %v13536_v44 = vld [vmem:[#allocation2 + $0x60] sm:$0xf] }
  0xae   : > { %2974 = vmatmul.mubr.bf16.gmra.mrb[24].mxu0 %v10354_v27  ;;  %v2120_v42 = vshll.u32 %v1923_v17, 16  ;;  %v10355_v31 = vcombine.low %v13515_v56, %v13517_v51  ;;  %v1246_v28 = vsel %vm13062_vm12, %v1241_v4, %v1245_v36  ;;  %v1256_v29 = vsel %vm13062_vm12, %v1251_v43, %v1255_v22  ;;  %v13541_v15 = vld [vmem:[#allocation2 + $0x64] sm:$0xf]  ;;  %v1054_v22 = vld [vmem:[#allocation2 + $0x68] sm:$0x1] }
  0xaf   : > { %v2103_v1 = vrot.slane %v2101_v48, 4  ;;  %v2106_v11 = vrot.slane %v2104_v23, 5  ;;  %v2112_v63 = vrot.slane %v2110_v25, 5  ;;  %v2116_v27 = vrot.slane %v2114_v41, 4  ;;  %v370_v4 = vld [vmem:[#allocation2 + $0x84] sm:$0x1] }
  0xb0   : > { %v2122_v40 = vrot.slane %v2120_v42, 5  ;;  %v10307_v32 = vcombine.low %v1246_v28, %v1256_v29  ;;  %v718_v37 = vrot.slane %v716_v61, 7  ;;  %v726_v6 = vrot.slane %v724_v58, 7  ;;  %v426_v43 = vld [vmem:[#allocation2 + $0x8c] sm:$0x1]  ;;  %v13570_v29 = vld [vmem:[%s12990_s19 + $0xb0] sm:$0xff] }
  0xb1   : > { %v2107_v0 = vor.u32 %v2106_v11, %v2103_v1  ;;  %v2117_v19 = vor.u32 %v2116_v27, %v2112_v63  ;;  %v727_v5 = vshll.u32 %v10253_v14, 16  ;;  %v1258_v13 = vshrl.u32 %v13536_v44, 16  ;;  %v13587_v11 = vld [vmem:[%s12990_s19 + $0xc0] sm:$0xff] }
  0xb2   : > { %3447 = vmatprep.mubr.bf16.mxu1 %v10307_v32  ;;  %v721_v18 = vor.u32 %v719_v57, %v718_v37  ;;  %v722_v53 = vrot.slane %v718_v37, 4  ;;  %v731_v54 = vrot.slane %v726_v6, 4  ;;  %v1261_v2 = vshll.u32 %v13536_v44, 16 }
  0xb3   : > { %v2108_v36 = vrot.slane %v2107_v0, 4  ;;  %v2118_v9 = vrot.slane %v2117_v19, 4  ;;  %3448 = vmatmul.mubr.bf16.gmra.mrb[28].mxu1 %v10291_v16  ;;  %v729_v46 = vor.u32 %v727_v5, %v726_v6  ;;  %v1260_v30 = vrot.slane %v1258_v13, 4  ;;  %v12490_v16 = vld [vmem:[%s17648_s1 + $0x1c0] sm:$0xff]  }
  0xb4   : > { %v959_v14 = vsel %vm13038_vm10, %v721_v18, %v958_v33  ;;  %v963_v20 = vsel %vm12954_vm3, %v731_v54, %v962_v8  ;;  %v1263_v50 = vrot.slane %v1261_v2, 5  ;;  %v1267_v52 = vshll.u32 %v13541_v15, 16  ;;  %11236 = vmatprep.subr.bf16.mxu0 %v12490_v16  ;;  %v965_v2 = vld [vmem:[#allocation2 + $0x78] sm:$0xf] }
  0xb5   : > { %v2113_v59 = vsel %vm13062_vm12, %v2108_v36, %v2112_v63  ;;  %v2123_v60 = vsel %vm13062_vm12, %v2118_v9, %v2122_v40  ;;  %v730_v62 = vsel %vm13032_vm9, %v722_v53, %v729_v46  ;;  %960 = vst [vmem:[#allocation2 + $0x6c] sm:$0xf] %v959_v14  ;;  %964 = vst [vmem:[#allocation2 + $0x74] sm:$0x1] %v963_v20  ;;  %v1271_v49 = vshrl.u32 %v13541_v15, 16 }
  0xb6   : > { %v10371_v61 = vcombine.low %v2113_v59, %v2123_v60  ;;  %961 = vst [vmem:[#allocation2 + $0x70] sm:$0xf] %v730_v62  ;;  %v1264_v57 = vor.u32 %v1263_v50, %v1260_v30  ;;  %v1269_v58 = vrot.slane %v1267_v52, 5  ;;  %v1277_v38 = vshll.u32 %v1054_v22, 16 }
  0xb7   : > { %v1273_v17 = vrot.slane %v1271_v49, 4  ;;  %v424_v48 = vsel %vm12962_vm4, 0, %v423_v35  ;;  %v484_v23 = vsel %vm463_vm5, %v456_v3, 0  ;;  %v371_v39 = vsel %vm12954_vm3, 0, %v370_v4 }
  0xb8   : > { %2981 = vmatprep.mubr.bf16.mxu0 %v10371_v61  ;;  %v1265_v25 = vrot.slane %v1264_v57, 4  ;;  %v1279_v41 = vrot.slane %v1277_v38, 5  ;;  %425 = vst [vmem:[#allocation2 + $0x80] sm:$0x1] %v424_v48  ;;  %v10254_v42 = vcombine.low %v484_v23, %v484_v23  ;;  %v10255_v28 = vcombine.high %v484_v23, %v484_v23  ;;  %372 = vst [vmem:[#allocation2 + $0x84] sm:$0x1] %v371_v39 }
  0xb9   : > { %2982 = vmatmul.mubr.bf16.gmra.mrb[28].mxu0 %v10355_v31  ;;  %v1274_v21 = vor.u32 %v1273_v17, %v1269_v58  ;;  %v427_v3 = vsel %vm12962_vm4, 0, %v426_v43  ;;  %v486_v1 = vsel %vm463_vm5, %v457_v10, 0  ;;  %v10292_v63 = vcombine.low %v13536_v44, %v13541_v15  ;;  %v13592_v31 = vld [vmem:[%s12990_s19 + $0xc8] sm:$0xff] }
  0xba   : > { %v733_v27 = vshrl.u32 %v10254_v42, 16  ;;  %v736_v56 = vshll.u32 %v10254_v42, 16  ;;  %v741_v51 = vshrl.u32 %v10255_v28, 16  ;;  %428 = vst [vmem:[#allocation2 + $0x8c] sm:$0x1] %v427_v3  ;;  %v1270_v40 = vsel %vm13062_vm12, %v1265_v25, %v1269_v58 }
  0xbb   : > { %v1275_v32 = vrot.slane %v1274_v21, 4  ;;  %v744_v37 = vshll.u32 %v10255_v28, 16  ;;  %v13596_v45 = vcombine.low %v486_v1, %v486_v1  ;;  %v13600_v44 = vcombine.high %v486_v1, %v486_v1 }
  0xbc   : > { %v13598_v47 = vld [vmem:[#allocation2 + $0x6c] sm:$0xf]  ;;  %v1924_v10 = vld [vmem:[#allocation2 + $0x74] sm:$0x1]  ;;  %v735_v6 = vrot.slane %v733_v27, 7  ;;  %v743_v33 = vrot.slane %v741_v51, 7  ;;  %v458_v0 = vpack.c.bf16 %v13573_v34, %v13570_v29  ;;  %v459_v36 = vpack.c.bf16 %v13592_v31, %v13587_v11 }
  0xbd   : > { %v13604_v19 = vld [vmem:[#allocation2 + $0x70] sm:$0xf]  ;;  %v2125_v5 = vshrl.u32 %v13598_v47, 16  ;;  %v2128_v8 = vshll.u32 %v13598_v47, 16  ;;  %v2144_v15 = vshll.u32 %v1924_v10, 16  ;;  %v1280_v13 = vsel %vm13062_vm12, %v1275_v32, %v1279_v41 }
  0xbe   : > { %v2134_v18 = vshll.u32 %v13604_v19, 16  ;;  %v2138_v53 = vshrl.u32 %v13604_v19, 16  ;;  %v10308_v54 = vcombine.low %v1270_v40, %v1280_v13  ;;  %v13612_v35 = vld [vmem:[#allocation2 + $0x6c] sm:$0xf]  ;;  %v738_v30 = vor.u32 %v736_v56, %v735_v6  ;;  %v13616_v14 = vld [vmem:[#allocation2 + $0x70] sm:$0xf] }
  0xbf   : > { %v2127_v9 = vrot.slane %v2125_v5, 4  ;;  %v2130_v46 = vrot.slane %v2128_v8, 5  ;;  %v2146_v22 = vrot.slane %v2144_v15, 5  ;;  %v739_v52 = vrot.slane %v735_v6, 4  ;;  %v969_v60 = vld [vmem:[#allocation2 + $0x80] sm:$0x1] }
  0xc0   : > { %v2136_v20 = vrot.slane %v2134_v18, 5  ;;  %v2140_v50 = vrot.slane %v2138_v53, 4  ;;  %3455 = vmatprep.mubr.bf16.mxu1 %v10308_v54  ;;  %v746_v59 = vor.u32 %v744_v37, %v743_v33  ;;  %v748_v49 = vrot.slane %v743_v33, 4  ;;  %v1055_v61 = vld [vmem:[#allocation2 + $0x74] sm:$0x1]  ;;  %v13647_v18 = vld [vmem:[%s12990_s19 + $0xd8] sm:$0xff] }
  0xc1   : > { %v2131_v62 = vor.u32 %v2130_v46, %v2127_v9  ;;  %3456 = vmatmul.mubr.bf16.gmra.mrb[32].mxu1 %v10292_v63  ;;  %v966_v16 = vsel %vm13038_vm10, %v738_v30, %v965_v2  ;;  %v1282_v57 = vshrl.u32 %v13612_v35, 16  ;;  %v1285_v4 = vshll.u32 %v13612_v35, 16  ;;  %v373_v27 = vld [vmem:[#allocation2 + $0x90] sm:$0x1]  ;;  %v429_v56 = vld [vmem:[#allocation2 + $0x98] sm:$0x1] }
  0xc2   : > { %v2141_v58 = vor.u32 %v2140_v50, %v2136_v20  ;;  %v747_v38 = vsel %vm13032_vm9, %v739_v52, %v746_v59  ;;  %967 = vst [vmem:[#allocation2 + $0x78] sm:$0xf] %v966_v16  ;;  %v1291_v43 = vshll.u32 %v13616_v14, 16  ;;  %v970_v48 = vsel %vm12954_vm3, %v748_v49, %v969_v60  ;;  %v13638_v8 = vld [vmem:[%s12990_s19 + $0xd0] sm:$0xff]  ;;  %v972_v46 = vld [vmem:[#allocation2 + $0x84] sm:$0xf] }
  0xc3   : > { %v2132_v17 = vrot.slane %v2131_v62, 4  ;;  %968 = vst [vmem:[#allocation2 + $0x7c] sm:$0xf] %v747_v38  ;;  %v1284_v23 = vrot.slane %v1282_v57, 4  ;;  %v1295_v25 = vshrl.u32 %v13616_v14, 16  ;;  %v1287_v42 = vrot.slane %v1285_v4, 5 }
  0xc4   : > { %v2142_v41 = vrot.slane %v2141_v58, 4  ;;  %971 = vst [vmem:[#allocation2 + $0x80] sm:$0x1] %v970_v48  ;;  %v1293_v28 = vrot.slane %v1291_v43, 5  ;;  %v1301_v21 = vshll.u32 %v1055_v61, 16  ;;  %v10356_v3 = vcombine.low %v13598_v47, %v13604_v19 }
  0xc5   : > { %v2137_v39 = vsel %vm13062_vm12, %v2132_v17, %v2136_v20  ;;  %v1297_v1 = vrot.slane %v1295_v25, 4  ;;  %v750_v63 = vshrl.u32 %v13596_v45, 16  ;;  %v1288_v40 = vor.u32 %v1287_v42, %v1284_v23  ;;  %v976_v58 = vld [vmem:[#allocation2 + $0x8c] sm:$0x1] }
  0xc6   : > { %v2147_v51 = vsel %vm13062_vm12, %v2142_v41, %v2146_v22  ;;  %v1303_v32 = vrot.slane %v1301_v21, 5  ;;  %v753_v37 = vshll.u32 %v13596_v45, 16  ;;  %v758_v5 = vshrl.u32 %v13600_v44, 16 }
  0xc7   : > { %v10372_v10 = vcombine.low %v2137_v39, %v2147_v51  ;;  %v1298_v6 = vor.u32 %v1297_v1, %v1293_v28  ;;  %v752_v33 = vrot.slane %v750_v63, 7  ;;  %v1289_v47 = vrot.slane %v1288_v40, 4  ;;  %v376_v40 = vld [vmem:[#allocation2 + $0x9c] sm:$0x1] }
  0xc8   : > { %v10293_v19 = vcombine.low %v13612_v35, %v13616_v14  ;;  %v374_v15 = vsel %vm12954_vm3, 0, %v373_v27  ;;  %v430_v13 = vsel %vm12962_vm4, 0, %v429_v56  ;;  %v760_v2 = vrot.slane %v758_v5, 7 }
  0xc9   : > { %2989 = vmatprep.mubr.bf16.mxu0 %v10372_v10  ;;  %v13649_v45 = vld [vmem:[#allocation2 + $0x78] sm:$0xf]  ;;  %v1299_v53 = vrot.slane %v1298_v6, 4  ;;  %v755_v54 = vor.u32 %v753_v37, %v752_v33  ;;  %v761_v9 = vshll.u32 %v13600_v44, 16  ;;  %375 = vst [vmem:[#allocation2 + $0x90] sm:$0x1] %v374_v15  ;;  %v1294_v14 = vsel %vm13062_vm12, %v1289_v47, %v1293_v28 }
  0xca   : > { %431 = vst [vmem:[#allocation2 + $0x98] sm:$0x1] %v430_v13  ;;  %2990 = vmatmul.mubr.bf16.gmra.mrb[32].mxu0 %v10356_v3  ;;  %v13652_v35 = vld [vmem:[#allocation2 + $0x7c] sm:$0xf]  ;;  %v2149_v22 = vshrl.u32 %v13649_v45, 16  ;;  %v2152_v30 = vshll.u32 %v13649_v45, 16  ;;  %v460_v62 = vpack.c.bf16 %v13647_v18, %v13638_v8 }
  0xcb   : > { %v756_v20 = vrot.slane %v752_v33, 4  ;;  %v1925_v50 = vld [vmem:[#allocation2 + $0x80] sm:$0x1]  ;;  %v2158_v52 = vshll.u32 %v13652_v35, 16  ;;  %v2162_v59 = vshrl.u32 %v13652_v35, 16  ;;  %v1304_v44 = vsel %vm13062_vm12, %v1299_v53, %v1303_v32 }
  0xcc   : > { %v13662_v60 = vld [vmem:[#allocation2 + $0x78] sm:$0xf]  ;;  %v2151_v49 = vrot.slane %v2149_v22, 4  ;;  %v2154_v16 = vrot.slane %v2152_v30, 5  ;;  %v2168_v61 = vshll.u32 %v1925_v50, 16  ;;  %v10309_v57 = vcombine.low %v1294_v14, %v1304_v44 }
  0xcd   : > { %v2160_v38 = vrot.slane %v2158_v52, 5  ;;  %v2164_v4 = vrot.slane %v2162_v59, 4  ;;  %v763_v43 = vor.u32 %v761_v9, %v760_v2  ;;  %v765_v17 = vrot.slane %v760_v2, 4  ;;  %v13666_v48 = vld [vmem:[#allocation2 + $0x7c] sm:$0xf] }
  0xce   : > { %v2155_v23 = vor.u32 %v2154_v16, %v2151_v49  ;;  %v2170_v25 = vrot.slane %v2168_v61, 5  ;;  %3463 = vmatprep.mubr.bf16.mxu1 %v10309_v57  ;;  %v973_v41 = vsel %vm13038_vm10, %v755_v54, %v972_v46  ;;  %v1056_v42 = vld [vmem:[#allocation2 + $0x80] sm:$0x1]  ;;  %v1306_v28 = vshrl.u32 %v13662_v60, 16  ;;  %v432_v33 = vld [vmem:[#allocation2 + $0xa4] sm:$0x1] }
  0xcf   : > { %v2165_v21 = vor.u32 %v2164_v4, %v2160_v38  ;;  %3464 = vmatmul.mubr.bf16.gmra.mrb[36].mxu1 %v10293_v19  ;;  %v764_v39 = vsel %vm13032_vm9, %v756_v20, %v763_v43  ;;  %974 = vst [vmem:[#allocation2 + $0x84] sm:$0xf] %v973_v41  ;;  %v977_v3 = vsel %vm12954_vm3, %v765_v17, %v976_v58  ;;  %v1309_v1 = vshll.u32 %v13662_v60, 16 }
  0xd0   : > { %v2156_v63 = vrot.slane %v2155_v23, 4  ;;  %975 = vst [vmem:[#allocation2 + $0x88] sm:$0xf] %v764_v39  ;;  %978 = vst [vmem:[#allocation2 + $0x8c] sm:$0x1] %v977_v3  ;;  %v1308_v27 = vrot.slane %v1306_v28, 4  ;;  %v10357_v37 = vcombine.low %v13649_v45, %v13652_v35  ;;  %v10294_v58 = vcombine.low %v13662_v60, %v13666_v48 }
  0xd1   : > { %v1315_v56 = vshll.u32 %v13666_v48, 16  ;;  %v1319_v51 = vshrl.u32 %v13666_v48, 16  ;;  %v2166_v32 = vrot.slane %v2165_v21, 4  ;;  %v1311_v10 = vrot.slane %v1309_v1, 5  ;;  %v13691_v45 = vld [vmem:[%s17648_s1 + $0x200] sm:$0xff]  }
  0xd2   : > { %v1325_v6 = vshll.u32 %v1056_v42, 16  ;;  %v2161_v5 = vsel %vm13062_vm12, %v2156_v63, %v2160_v38  ;;  %v488_v15 = vsel %vm463_vm5, %v458_v0, 0  ;;  %v377_v22 = vsel %vm12954_vm3, 0, %v376_v40  ;;  %11876 = vmatprep.subr.bf16.mxu1 %v13691_v45  ;;  %v979_v21 = vld [vmem:[#allocation2 + $0x90] sm:$0xf] }
  0xd3   : > { %v1317_v47 = vrot.slane %v1315_v56, 5  ;;  %v1321_v19 = vrot.slane %v1319_v51, 4  ;;  %v2171_v13 = vsel %vm13062_vm12, %v2166_v32, %v2170_v25  ;;  %v1312_v53 = vor.u32 %v1311_v10, %v1308_v27  ;;  %378 = vst [vmem:[#allocation2 + $0x9c] sm:$0x1] %v377_v22  ;;  %v983_v56 = vld [vmem:[#allocation2 + $0x98] sm:$0x1] }
  0xd4   : > { %v1327_v54 = vrot.slane %v1325_v6, 5  ;;  %v10258_v2 = vcombine.low %v488_v15, %v488_v15  ;;  %v10373_v9 = vcombine.low %v2161_v5, %v2171_v13  ;;  %v10259_v35 = vcombine.high %v488_v15, %v488_v15  ;;  %v382_v22 = vld [vmem:[#allocation2 + $0xb4] sm:$0x1] }
  0xd5   : > { %v1322_v46 = vor.u32 %v1321_v19, %v1317_v47  ;;  %v1313_v29 = vrot.slane %v1312_v53, 4  ;;  %v433_v30 = vsel %vm12962_vm4, 0, %v432_v33  ;;  %v490_v59 = vsel %vm463_vm5, %v459_v36, 0  ;;  %v379_v53 = vld [vmem:[#allocation2 + $0xa8] sm:$0x1] }
  0xd6   : > { %v767_v34 = vshrl.u32 %v10258_v2, 16  ;;  %v770_v0 = vshll.u32 %v10258_v2, 16  ;;  %2997 = vmatprep.mubr.bf16.mxu0 %v10373_v9  ;;  %v13698_v14 = vld [vmem:[#allocation2 + $0x84] sm:$0xf]  ;;  %v775_v50 = vshrl.u32 %v10259_v35, 16  ;;  %v778_v52 = vshll.u32 %v10259_v35, 16 }
  0xd7   : > { %v1323_v20 = vrot.slane %v1322_v46, 4  ;;  %434 = vst [vmem:[#allocation2 + $0xa4] sm:$0x1] %v433_v30  ;;  %2998 = vmatmul.mubr.bf16.gmra.mrb[36].mxu0 %v10357_v37  ;;  %v13704_v44 = vld [vmem:[#allocation2 + $0x88] sm:$0xf]  ;;  %v2173_v16 = vshrl.u32 %v13698_v14, 16  ;;  %v1318_v57 = vsel %vm13062_vm12, %v1313_v29, %v1317_v47  ;;  %v13716_v4 = vcombine.low %v490_v59, %v490_v59 }
  0xd8   : > { %v1926_v49 = vld [vmem:[#allocation2 + $0x8c] sm:$0x1]  ;;  %v2176_v61 = vshll.u32 %v13698_v14, 16  ;;  %v2182_v38 = vshll.u32 %v13704_v44, 16  ;;  %v2186_v11 = vshrl.u32 %v13704_v44, 16  ;;  %v769_v25 = vrot.slane %v767_v34, 7 }
  0xd9   : > { %v2192_v31 = vshll.u32 %v1926_v49, 16  ;;  %v13714_v36 = vld [vmem:[#allocation2 + $0x84] sm:$0xf]  ;;  %v2175_v43 = vrot.slane %v2173_v16, 4  ;;  %v1328_v23 = vsel %vm13062_vm12, %v1323_v20, %v1327_v54  ;;  %v13720_v41 = vld [vmem:[#allocation2 + $0x88] sm:$0xf]  ;;  %v10358_v34 = vcombine.low %v13698_v14, %v13704_v44 }
  0xda   : > { %v2178_v17 = vrot.slane %v2176_v61, 5  ;;  %v2184_v42 = vrot.slane %v2182_v38, 5  ;;  %v2188_v28 = vrot.slane %v2186_v11, 4  ;;  %v10310_v48 = vcombine.low %v1318_v57, %v1328_v23  ;;  %v1057_v5 = vld [vmem:[#allocation2 + $0x8c] sm:$0x1] }
  0xdb   : > { %v2194_v60 = vrot.slane %v2192_v31, 5  ;;  %v772_v3 = vor.u32 %v770_v0, %v769_v25  ;;  %v773_v1 = vrot.slane %v769_v25, 4  ;;  %v777_v63 = vrot.slane %v775_v50, 7  ;;  %v435_v35 = vld [vmem:[#allocation2 + $0xb0] sm:$0x1] }
  0xdc   : > { %v2179_v39 = vor.u32 %v2178_v17, %v2175_v43  ;;  %v2189_v27 = vor.u32 %v2188_v28, %v2184_v42  ;;  %3471 = vmatprep.mubr.bf16.mxu1 %v10310_v48  ;;  %v1330_v51 = vshrl.u32 %v13714_v36, 16  ;;  %v1333_v40 = vshll.u32 %v13714_v36, 16 }
  0xdd   : > { %v1339_v32 = vshll.u32 %v13720_v41, 16  ;;  %3472 = vmatmul.mubr.bf16.gmra.mrb[40].mxu1 %v10294_v58  ;;  %v780_v10 = vor.u32 %v778_v52, %v777_v63  ;;  %v782_v6 = vrot.slane %v777_v63, 4  ;;  %v980_v33 = vsel %vm13038_vm10, %v772_v3, %v979_v21  ;;  %v986_v58 = vld [vmem:[#allocation2 + $0x9c] sm:$0xf] }
  0xde   : > { %v2180_v37 = vrot.slane %v2179_v39, 4  ;;  %v2190_v47 = vrot.slane %v2189_v27, 4  ;;  %981 = vst [vmem:[#allocation2 + $0x90] sm:$0xf] %v980_v33  ;;  %v1332_v19 = vrot.slane %v1330_v51, 4  ;;  %v1335_v15 = vrot.slane %v1333_v40, 5 }
  0xdf   : > { %v1341_v13 = vrot.slane %v1339_v32, 5  ;;  %v781_v2 = vsel %vm13032_vm9, %v773_v1, %v780_v10  ;;  %v984_v9 = vsel %vm12954_vm3, %v782_v6, %v983_v56  ;;  %v1343_v46 = vshrl.u32 %v13720_v41, 16  ;;  %v990_v18 = vld [vmem:[#allocation2 + $0xa4] sm:$0x1] }
  0xe0   : > { %v2185_v54 = vsel %vm13062_vm12, %v2180_v37, %v2184_v42  ;;  %v2195_v29 = vsel %vm13062_vm12, %v2190_v47, %v2194_v60  ;;  %982 = vst [vmem:[#allocation2 + $0x94] sm:$0xf] %v781_v2  ;;  %985 = vst [vmem:[#allocation2 + $0x98] sm:$0x1] %v984_v9  ;;  %v1336_v0 = vor.u32 %v1335_v15, %v1332_v19  ;;  %v1349_v30 = vshll.u32 %v1057_v5, 16 }
  0xe1   : > { %v10374_v20 = vcombine.low %v2185_v54, %v2195_v29  ;;  %v1345_v50 = vrot.slane %v1343_v46, 4  ;;  %v10261_v52 = vcombine.high %v490_v59, %v490_v59  ;;  %v784_v49 = vshrl.u32 %v13716_v4, 16 }
  0xe2   : > { %v1337_v16 = vrot.slane %v1336_v0, 4  ;;  %v1351_v61 = vrot.slane %v1349_v30, 5  ;;  %v787_v57 = vshll.u32 %v13716_v4, 16  ;;  %v380_v38 = vsel %vm12954_vm3, 0, %v379_v53 }
  0xe3   : > { %3005 = vmatprep.mubr.bf16.mxu0 %v10374_v20  ;;  %v1346_v11 = vor.u32 %v1345_v50, %v1341_v13  ;;  %v786_v14 = vrot.slane %v784_v49, 7  ;;  %v792_v44 = vshrl.u32 %v10261_v52, 16  ;;  %v795_v31 = vshll.u32 %v10261_v52, 16  ;;  %381 = vst [vmem:[#allocation2 + $0xa8] sm:$0x1] %v380_v38 }
  0xe4   : > { %3006 = vmatmul.mubr.bf16.gmra.mrb[40].mxu0 %v10358_v34  ;;  %v10295_v59 = vcombine.low %v13714_v36, %v13720_v41  ;;  %v436_v43 = vsel %vm12962_vm4, 0, %v435_v35  ;;  %v492_v4 = vsel %vm463_vm5, %v460_v62, 0  ;;  %v383_v17 = vsel %vm12954_vm3, 0, %v382_v22 }
  0xe5   : > { %v13752_v23 = vld [vmem:[#allocation2 + $0x90] sm:$0xf]  ;;  %v1347_v25 = vrot.slane %v1346_v11, 4  ;;  %v789_v42 = vor.u32 %v787_v57, %v786_v14  ;;  %v790_v28 = vrot.slane %v786_v14, 4  ;;  %v794_v60 = vrot.slane %v792_v44, 7 }
  0xe6   : > { %437 = vst [vmem:[#allocation2 + $0xb0] sm:$0x1] %v436_v43  ;;  %384 = vst [vmem:[#allocation2 + $0xb4] sm:$0x1] %v383_v17  ;;  %v2197_v36 = vshrl.u32 %v13752_v23, 16  ;;  %v2200_v41 = vshll.u32 %v13752_v23, 16  ;;  %v1342_v8 = vsel %vm13062_vm12, %v1337_v16, %v1341_v13  ;;  %v13760_v48 = vcombine.low %v492_v4, %v492_v4 }
  0xe7   : > { %v13758_v62 = vld [vmem:[#allocation2 + $0x90] sm:$0xf]  ;;  %v13762_v21 = vld [vmem:[#allocation2 + $0x94] sm:$0xf]  ;;  %v1927_v39 = vld [vmem:[#allocation2 + $0x98] sm:$0x1]  ;;  %v1352_v3 = vsel %vm13062_vm12, %v1347_v25, %v1351_v61  ;;  %v797_v1 = vor.u32 %v795_v31, %v794_v60  ;;  %v987_v27 = vsel %vm13038_vm10, %v789_v42, %v986_v58  ;;  %v13774_v5 = vcombine.high %v492_v4, %v492_v4 }
  0xe8   : > { %v799_v63 = vrot.slane %v794_v60, 4  ;;  %v2199_v56 = vrot.slane %v2197_v36, 4  ;;  %v2202_v51 = vrot.slane %v2200_v41, 5  ;;  %v2206_v40 = vshll.u32 %v13762_v21, 16  ;;  %988 = vst [vmem:[#allocation2 + $0x9c] sm:$0xf] %v987_v27 }
  0xe9   : > { %v2210_v32 = vshrl.u32 %v13762_v21, 16  ;;  %v13770_v37 = vld [vmem:[#allocation2 + $0x94] sm:$0xf]  ;;  %v2216_v10 = vshll.u32 %v1927_v39, 16  ;;  %v10311_v6 = vcombine.low %v1342_v8, %v1352_v3  ;;  %v798_v33 = vsel %vm13032_vm9, %v790_v28, %v797_v1  ;;  %v1058_v53 = vld [vmem:[#allocation2 + $0x98] sm:$0x1] }
  0xea   : > { %v2203_v47 = vor.u32 %v2202_v51, %v2199_v56  ;;  %v2208_v19 = vrot.slane %v2206_v40, 5  ;;  %989 = vst [vmem:[#allocation2 + $0xa0] sm:$0xf] %v798_v33  ;;  %v991_v13 = vsel %vm12954_vm3, %v799_v63, %v990_v18  ;;  %v10359_v54 = vcombine.low %v13752_v23, %v13762_v21  ;;  %v993_v39 = vld [vmem:[#allocation2 + $0xa8] sm:$0xf] }
  0xeb   : > { %v2212_v15 = vrot.slane %v2210_v32, 4  ;;  %3479 = vmatprep.mubr.bf16.mxu1 %v10311_v6  ;;  %992 = vst [vmem:[#allocation2 + $0xa4] sm:$0x1] %v991_v13  ;;  %v1354_v2 = vshrl.u32 %v13758_v62, 16  ;;  %v1357_v9 = vshll.u32 %v13758_v62, 16  ;;  %v1363_v46 = vshll.u32 %v13770_v37, 16 }
  0xec   : > { %v2204_v35 = vrot.slane %v2203_v47, 4  ;;  %v2218_v29 = vrot.slane %v2216_v10, 5  ;;  %3480 = vmatmul.mubr.bf16.gmra.mrb[44].mxu1 %v10295_v59  ;;  %v1367_v34 = vshrl.u32 %v13770_v37, 16  ;;  %v1373_v50 = vshll.u32 %v1058_v53, 16 }
  0xed   : > { %v2213_v22 = vor.u32 %v2212_v15, %v2208_v19  ;;  %v1356_v0 = vrot.slane %v1354_v2, 4  ;;  %v1359_v30 = vrot.slane %v1357_v9, 5  ;;  %v1365_v20 = vrot.slane %v1363_v46, 5  ;;  %v997_v56 = vld [vmem:[#allocation2 + $0xb0] sm:$0x1]  ;;  %v323_v46 = vld [vmem:[%s12990_s19 + $0xe0] sm:$0xff] }
  0xee   : > { %v2209_v52 = vsel %vm13062_vm12, %v2204_v35, %v2208_v19  ;;  %v1369_v16 = vrot.slane %v1367_v34, 4  ;;  %v10296_v61 = vcombine.low %v13758_v62, %v13770_v37  ;;  %v801_v38 = vshrl.u32 %v13760_v48, 16  ;;  %v438_v34 = vld [vmem:[#allocation2 + $0xbc] sm:$0x1] }
  0xef   : > { %v2214_v49 = vrot.slane %v2213_v22, 4  ;;  %v13788_v57 = vld [vmem:[#allocation2 + $0x9c] sm:$0xf]  ;;  %v1360_v58 = vor.u32 %v1359_v30, %v1356_v0  ;;  %v804_v11 = vshll.u32 %v13760_v48, 16  ;;  %v809_v14 = vshrl.u32 %v13774_v5, 16 }
  0xf0   : > { %v2221_v31 = vshrl.u32 %v13788_v57, 16  ;;  %v2224_v59 = vshll.u32 %v13788_v57, 16  ;;  %v1370_v43 = vor.u32 %v1369_v16, %v1365_v20  ;;  %v1375_v25 = vrot.slane %v1373_v50, 5  ;;  %v13803_v51 = vld [vmem:[#allocation2 + $0x9c] sm:$0xf] }
  0xf1   : > { %v2219_v44 = vsel %vm13062_vm12, %v2214_v49, %v2218_v29  ;;  %v13797_v17 = vld [vmem:[#allocation2 + $0xa0] sm:$0xf]  ;;  %v1361_v23 = vrot.slane %v1360_v58, 4  ;;  %v803_v42 = vrot.slane %v801_v38, 7  ;;  %v811_v21 = vrot.slane %v809_v14, 7  ;;  %v324_v49 = vld [vmem:[%s12990_s19 + $0xe8] sm:$0xff] }
  0xf2   : > { %v10375_v4 = vcombine.low %v2209_v52, %v2219_v44  ;;  %v1928_v28 = vld [vmem:[#allocation2 + $0xa4] sm:$0x1]  ;;  %v2223_v60 = vrot.slane %v2221_v31, 4  ;;  %v2226_v36 = vrot.slane %v2224_v59, 5  ;;  %v2230_v41 = vshll.u32 %v13797_v17, 16 }
  0xf3   : > { %v2234_v8 = vshrl.u32 %v13797_v17, 16  ;;  %v2240_v18 = vshll.u32 %v1928_v28, 16  ;;  %v1366_v62 = vsel %vm13062_vm12, %v1361_v23, %v1365_v20  ;;  %v1371_v48 = vrot.slane %v1370_v43, 4  ;;  %v13808_v6 = vld [vmem:[#allocation2 + $0xa0] sm:$0xf] }
  0xf4   : > { %3013 = vmatprep.mubr.bf16.mxu0 %v10375_v4  ;;  %v2227_v3 = vor.u32 %v2226_v36, %v2223_v60  ;;  %v2232_v1 = vrot.slane %v2230_v41, 5  ;;  %v806_v27 = vor.u32 %v804_v11, %v803_v42  ;;  %v807_v37 = vrot.slane %v803_v42, 4  ;;  %v385_v0 = vld [vmem:[#allocation2 + $0xc0] sm:$0x1]  ;;  %v441_v16 = vld [vmem:[#allocation2 + $0xc8] sm:$0x1] }
  0xf5   : > { %3014 = vmatmul.mubr.bf16.gmra.mrb[44].mxu0 %v10359_v54  ;;  %v2236_v63 = vrot.slane %v2234_v8, 4  ;;  %v2242_v40 = vrot.slane %v2240_v18, 5  ;;  %v1376_v32 = vsel %vm13062_vm12, %v1371_v48, %v1375_v25  ;;  %v812_v10 = vshll.u32 %v13774_v5, 16  ;;  %v1059_v54 = vld [vmem:[#allocation2 + $0xa4] sm:$0x1] }
  0xf6   : > { %v2228_v33 = vrot.slane %v2227_v3, 4  ;;  %v10312_v19 = vcombine.low %v1366_v62, %v1376_v32  ;;  %v816_v15 = vrot.slane %v811_v21, 4  ;;  %v994_v53 = vsel %vm13038_vm10, %v806_v27, %v993_v39  ;;  %v13835_v28 = vld [vmem:[#allocation2 + $0x8] sm:$0x1] }
  0xf7   : > { %v2237_v47 = vor.u32 %v2236_v63, %v2232_v1  ;;  %v814_v13 = vor.u32 %v812_v10, %v811_v21  ;;  %v1378_v2 = vshrl.u32 %v13803_v51, 16  ;;  %v1381_v9 = vshll.u32 %v13803_v51, 16  ;;  %995 = vst [vmem:[#allocation2 + $0xa8] sm:$0xf] %v994_v53  ;;  %v13850_v63 = vld [vmem:[%s12990_s19 + $0xf8] sm:$0xff] }
  0xf8   : > { %v2233_v5 = vsel %vm13062_vm12, %v2228_v33, %v2232_v1  ;;  %3487 = vmatprep.mubr.bf16.mxu1 %v10312_v19  ;;  %v998_v22 = vsel %vm12954_vm3, %v816_v15, %v997_v56  ;;  %v1387_v29 = vshll.u32 %v13808_v6, 16  ;;  %v1391_v52 = vshrl.u32 %v13808_v6, 16  ;;  %v13847_v1 = vld [vmem:[%s12990_s19 + $0xf0] sm:$0xff] }
  0xf9   : > { %v2238_v35 = vrot.slane %v2237_v47, 4  ;;  %3488 = vmatmul.mubr.bf16.gmra.mrb[48].mxu1 %v10296_v61  ;;  %v815_v30 = vsel %vm13032_vm9, %v807_v37, %v814_v13  ;;  %999 = vst [vmem:[#allocation2 + $0xb0] sm:$0x1] %v998_v22  ;;  %v1380_v20 = vrot.slane %v1378_v2, 4  ;;  %v1383_v50 = vrot.slane %v1381_v9, 5 }
  0xfa   : > { %v10360_v38 = vcombine.low %v13788_v57, %v13797_v17  ;;  %996 = vst [vmem:[#allocation2 + $0xac] sm:$0xf] %v815_v30  ;;  %v1389_v11 = vrot.slane %v1387_v29, 5  ;;  %v1397_v14 = vshll.u32 %v1059_v54, 16  ;;  %v1393_v31 = vrot.slane %v1391_v52, 4 }
  0xfb   : > { %v2243_v58 = vsel %vm13062_vm12, %v2238_v35, %v2242_v40  ;;  %v1384_v44 = vor.u32 %v1383_v50, %v1380_v20  ;;  %v439_v59 = vsel %vm12962_vm4, 0, %v438_v34  ;;  %v461_v43 = vpack.c.bf16 %v324_v49, %v323_v46  ;;  %v1000_v53 = vld [vmem:[#allocation2 + $0xb4] sm:$0xf] }
  0xfc   : > { %v10376_v61 = vcombine.low %v2233_v5, %v2243_v58  ;;  %440 = vst [vmem:[#allocation2 + $0xbc] sm:$0x1] %v439_v59  ;;  %v386_v4 = vsel %vm12954_vm3, 0, %v385_v0  ;;  %v442_v23 = vsel %vm12962_vm4, 0, %v441_v16  ;;  %v1394_v57 = vor.u32 %v1393_v31, %v1389_v11 }
  0xfd   : > { %v1385_v25 = vrot.slane %v1384_v44, 4  ;;  %v1399_v17 = vrot.slane %v1397_v14, 5  ;;  %387 = vst [vmem:[#allocation2 + $0xc0] sm:$0x1] %v386_v4  ;;  %443 = vst [vmem:[#allocation2 + $0xc8] sm:$0x1] %v442_v23  ;;  %v10297_v8 = vcombine.low %v13803_v51, %v13808_v6  ;;  %v462_v54 = vpack.c.bf16 %v13850_v63, %v13847_v1 }
  0xfe   : > { %3021 = vmatprep.mubr.bf16.mxu0 %v10376_v61  ;;  %v494_v42 = vsel %vm463_vm5, %v461_v43, 0  ;;  %v1521_v60 = vrot.slane %v13835_v28, 5  ;;  %v13838_v36 = vld [vmem:[#allocation2 + $0xa8] sm:$0xf]  ;;  %v1395_v41 = vrot.slane %v1394_v57, 4 }
  0xff   : > { %3022 = vmatmul.mubr.bf16.gmra.mrb[48].mxu0 %v10360_v38  ;;  %v10264_v18 = vcombine.low %v494_v42, %v494_v42  ;;  %v2245_v48 = vshrl.u32 %v13838_v36, 16  ;;  %v2248_v21 = vshll.u32 %v13838_v36, 16  ;;  %v1390_v39 = vsel %vm13062_vm12, %v1385_v25, %v1389_v11  ;;  %v13858_v47 = vld [vmem:[#allocation2 + $0xa8] sm:$0xf]  ;;  %v13888_v1 = vld [vmem:[#allocation2 + $0x20] sm:$0x1] }
 0x100   : > { %v1929_v62 = vld [vmem:[#allocation2 + $0xb0] sm:$0x1]  ;;  %v10265_v3 = vcombine.high %v494_v42, %v494_v42  ;;  %v1400_v51 = vsel %vm13062_vm12, %v1395_v41, %v1399_v17  ;;  %v1402_v0 = vshrl.u32 %v13858_v47, 16  ;;  %v1405_v49 = vshll.u32 %v13858_v47, 16  ;;  %v13891_v63 = vld [vmem:[#allocation2 + $0x14] sm:$0x1] }
 0x101   : > { %v13852_v27 = vld [vmem:[#allocation2 + $0xac] sm:$0xf]  ;;  %v2264_v56 = vshll.u32 %v1929_v62, 16  ;;  %v818_v40 = vshrl.u32 %v10264_v18, 16  ;;  %v821_v32 = vshll.u32 %v10264_v18, 16  ;;  %v2247_v37 = vrot.slane %v2245_v48, 4 }
 0x102   : > { %v2250_v10 = vrot.slane %v2248_v21, 5  ;;  %v2254_v6 = vshll.u32 %v13852_v27, 16  ;;  %v2258_v33 = vshrl.u32 %v13852_v27, 16  ;;  %v10313_v15 = vcombine.low %v1390_v39, %v1400_v51  ;;  %v13862_v35 = vld [vmem:[#allocation2 + $0xac] sm:$0xf] }
 0x103   : > { %v2266_v19 = vrot.slane %v2264_v56, 5  ;;  %v820_v13 = vrot.slane %v818_v40, 7  ;;  %v826_v5 = vshrl.u32 %v10265_v3, 16  ;;  %v829_v34 = vshll.u32 %v10265_v3, 16  ;;  %v13865_v52 = vld [vmem:[#allocation2 + $0xb0] sm:$0x1] }
 0x104   : > { %v2251_v2 = vor.u32 %v2250_v10, %v2247_v37  ;;  %v2256_v9 = vrot.slane %v2254_v6, 5  ;;  %v2260_v46 = vrot.slane %v2258_v33, 4  ;;  %3495 = vmatprep.mubr.bf16.mxu1 %v10313_v15  ;;  %v1004_v58 = vld [vmem:[#allocation2 + $0xbc] sm:$0x1]  ;;  %v1404_v38 = vrot.slane %v1402_v0, 4 }
 0x105   : > { %v823_v22 = vor.u32 %v821_v32, %v820_v13  ;;  %v824_v29 = vrot.slane %v820_v13, 4  ;;  %3496 = vmatmul.mubr.bf16.gmra.mrb[52].mxu1 %v10297_v8  ;;  %v828_v50 = vrot.slane %v826_v5, 7  ;;  %v1411_v11 = vshll.u32 %v13862_v35, 16  ;;  %v13883_v21 = vld [vmem:[#allocation2 + $0xc] sm:$0xe] }
 0x106   : > { %v2252_v30 = vrot.slane %v2251_v2, 4  ;;  %v2261_v20 = vor.u32 %v2260_v46, %v2256_v9  ;;  %v1415_v14 = vshrl.u32 %v13862_v35, 16  ;;  %v1407_v43 = vrot.slane %v1405_v49, 5  ;;  %v13885_v39 = vld [vmem:[#allocation2 + $0x14] sm:$0x1] }
 0x107   : > { %v1001_v16 = vsel %vm13038_vm10, %v823_v22, %v1000_v53  ;;  %v831_v31 = vor.u32 %v829_v34, %v828_v50  ;;  %v833_v59 = vrot.slane %v828_v50, 4  ;;  %v1413_v4 = vrot.slane %v1411_v11, 5  ;;  %v13898_v33 = vld [vmem:[#allocation2 + $0x10] sm:$0xf]  ;;  %v13901_v15 = vld [vmem:[#allocation2 + $0x1c] sm:$0xf] }
 0x108   : > { %v2257_v61 = vsel %vm13062_vm12, %v2252_v30, %v2256_v9  ;;  %v2262_v44 = vrot.slane %v2261_v20, 4  ;;  %1002 = vst [vmem:[#allocation2 + $0xb4] sm:$0xf] %v1001_v16  ;;  %v1417_v23 = vrot.slane %v1415_v14, 4  ;;  %v1421_v25 = vshll.u32 %v13865_v52, 16 }
 0x109   : > { %v10361_v17 = vcombine.low %v13838_v36, %v13852_v27  ;;  %v832_v42 = vsel %vm13032_vm9, %v824_v29, %v831_v31  ;;  %v1005_v41 = vsel %vm12954_vm3, %v833_v59, %v1004_v58  ;;  %v1408_v18 = vor.u32 %v1407_v43, %v1404_v38  ;;  %v13904_v53 = vld [vmem:[#allocation2] sm:$0xe] }
 0x10a   : > { %v2267_v57 = vsel %vm13062_vm12, %v2262_v44, %v2266_v19  ;;  %1003 = vst [vmem:[#allocation2 + $0xb8] sm:$0xf] %v832_v42  ;;  %1006 = vst [vmem:[#allocation2 + $0xbc] sm:$0x1] %v1005_v41  ;;  %v1418_v62 = vor.u32 %v1417_v23, %v1413_v4  ;;  %v1423_v48 = vrot.slane %v1421_v25, 5  ;;  %v2385_v3 = vrot.slane %v13885_v39, 5 }
 0x10b   : > { %v10377_v8 = vcombine.low %v2257_v61, %v2267_v57  ;;  %v2392_v36 = vrot.slane %v13888_v1, 5  ;;  %v1528_v27 = vrot.slane %v13891_v63, 5  ;;  %v496_v56 = vsel %vm463_vm5, %v462_v54, 0  ;;  %v1007_v31 = vld [vmem:[#allocation2 + $0xc0] sm:$0xf] }
 0x10c   : > { %v1409_v51 = vrot.slane %v1408_v18, 4  ;;  %v1419_v40 = vrot.slane %v1418_v62, 4  ;;  %v10266_v32 = vcombine.low %v496_v56, %v496_v56  ;;  %v10267_v37 = vcombine.high %v496_v56, %v496_v56  ;;  %v1011_v57 = vld [vmem:[#allocation2 + $0xc8] sm:$0x1] }
 0x10d   : > { %3029 = vmatprep.mubr.bf16.mxu0 %v10377_v8  ;;  %v10298_v10 = vcombine.low %v13858_v47, %v13862_v35  ;;  %v10332_v6 = vrot.slane %v13883_v21, 9  ;;  %v2382_v19 = vrot.slane %v13898_v33, 5  ;;  %v2389_v13 = vrot.slane %v13901_v15, 5 }
 0x10e   : > { %3030 = vmatmul.mubr.bf16.gmra.mrb[52].mxu0 %v10361_v17  ;;  %v1414_v2 = vsel %vm13062_vm12, %v1409_v51, %v1413_v4  ;;  %v1424_v47 = vsel %vm13062_vm12, %v1419_v40, %v1423_v48  ;;  %v835_v9 = vshrl.u32 %v10266_v32, 16  ;;  %v838_v46 = vshll.u32 %v10266_v32, 16 }
 0x10f   : > { %v13906_v54 = vld [vmem:[#allocation2 + $0xb4] sm:$0xf]  ;;  %v10314_v34 = vcombine.low %v1414_v2, %v1424_v47  ;;  %v843_v0 = vshrl.u32 %v10267_v37, 16  ;;  %v846_v20 = vshll.u32 %v10267_v37, 16  ;;  %v10268_v49 = vrot.slane %v13904_v53, 9 }
 0x110   : > { %v13912_v5 = vld [vmem:[#allocation2 + $0xb4] sm:$0xf]  ;;  %v2269_v22 = vshrl.u32 %v13906_v54, 16  ;;  %v2272_v29 = vshll.u32 %v13906_v54, 16  ;;  %v837_v30 = vrot.slane %v835_v9, 7 }
 0x111   : > { %v1426_v50 = vshrl.u32 %v13912_v5, 16  ;;  %v13918_v16 = vld [vmem:[#allocation2 + $0xb8] sm:$0xf]  ;;  %v13920_v58 = vld [vmem:[#allocation2 + $0xbc] sm:$0x1]  ;;  %3503 = vmatprep.mubr.bf16.mxu1 %v10314_v34  ;;  %v1429_v59 = vshll.u32 %v13912_v5, 16 }
 0x112   : > { %v2271_v38 = vrot.slane %v2269_v22, 4  ;;  %v2274_v11 = vrot.slane %v2272_v29, 5  ;;  %v2278_v14 = vshll.u32 %v13918_v16, 16  ;;  %v2282_v61 = vshrl.u32 %v13918_v16, 16  ;;  %3504 = vmatmul.mubr.bf16.gmra.mrb[56].mxu1 %v10298_v10  ;;  %v13926_v17 = vld [vmem:[#allocation2 + $0xb8] sm:$0xf] }
 0x113   : > { %v2288_v44 = vshll.u32 %v13920_v58, 16  ;;  %v840_v4 = vor.u32 %v838_v46, %v837_v30  ;;  %v841_v23 = vrot.slane %v837_v30, 4  ;;  %v845_v25 = vrot.slane %v843_v0, 7  ;;  %v13928_v18 = vld [vmem:[#allocation2 + $0xbc] sm:$0x1] }
 0x114   : > { %v2275_v43 = vor.u32 %v2274_v11, %v2271_v38  ;;  %v2280_v42 = vrot.slane %v2278_v14, 5  ;;  %v2284_v41 = vrot.slane %v2282_v61, 4  ;;  %v1428_v62 = vrot.slane %v1426_v50, 4  ;;  %v2317_v47 = vld [vmem:[#allocation2 + $0x18] sm:$0xe] }
 0x115   : > { %v2290_v8 = vrot.slane %v2288_v44, 5  ;;  %v848_v56 = vor.u32 %v846_v20, %v845_v25  ;;  %v850_v51 = vrot.slane %v845_v25, 4  ;;  %v1008_v40 = vsel %vm13038_vm10, %v840_v4, %v1007_v31  ;;  %v12656_v61 = vld [vmem:[#allocation2 + $0x4] sm:$0xf] }
 0x116   : > { %v2276_v48 = vrot.slane %v2275_v43, 4  ;;  %v2285_v32 = vor.u32 %v2284_v41, %v2280_v42  ;;  %1009 = vst [vmem:[#allocation2 + $0xc0] sm:$0xf] %v1008_v40  ;;  %v1431_v37 = vrot.slane %v1429_v59, 5  ;;  %v1435_v10 = vshll.u32 %v13926_v17, 16 }
 0x117   : > { %v1439_v2 = vshrl.u32 %v13926_v17, 16  ;;  %v849_v46 = vsel %vm13032_vm9, %v841_v23, %v848_v56  ;;  %v1012_v22 = vsel %vm12954_vm3, %v850_v51, %v1011_v57  ;;  %v1445_v29 = vshll.u32 %v13928_v18, 16  ;;  %v1450_v23 = vld [vmem:[#allocation2 + $0xc] sm:$0xe] }
 0x118   : > { %v2281_v9 = vsel %vm13062_vm12, %v2276_v48, %v2280_v42  ;;  %v2286_v34 = vrot.slane %v2285_v32, 4  ;;  %1010 = vst [vmem:[#allocation2 + $0xc4] sm:$0xf] %v849_v46  ;;  %1013 = vst [vmem:[#allocation2 + $0xc8] sm:$0x1] %v1012_v22  ;;  %v1432_v0 = vor.u32 %v1431_v37, %v1428_v62  ;;  %v1437_v30 = vrot.slane %v1435_v10, 5 }
 0x119   : > { %v1441_v20 = vrot.slane %v1439_v2, 4  ;;  %v10362_v50 = vcombine.low %v13906_v54, %v13918_v16  ;;  %v17691_v38 = vmov 0  ;;  %v2384_v11 = vrot.slane %v2382_v19, 4  ;;  %v12657_v42 = vld [vmem:[#allocation2 + $0x10] sm:$0xf] }
 0x11a   : > { %v17692_v38 = vsel %vm13945_vm15, 4294967295, %v17691_v38  ;;  %v10333_v14 = vrot.slane %v2317_v47, 9  ;;  %v1518_v44 = vrot.slane %v12656_v61, 5  ;;  %v2291_v31 = vsel %vm13062_vm12, %v2286_v34, %v2290_v8  ;;  %v2318_v46 = vld [vmem:[#allocation2 + $0x24] sm:$0xe] }
 0x11b   : > { %17693 = vst [vmem:[#allocation10_spill] sm:$0xff] %v17692_v38  ;;  %v1433_v59 = vrot.slane %v1432_v0, 4  ;;  %v1442_v43 = vor.u32 %v1441_v20, %v1437_v30  ;;  %v1447_v4 = vrot.slane %v1445_v29, 5  ;;  %v10378_v54 = vcombine.low %v2281_v9, %v2291_v31  ;;  %v1451_v22 = vld [vmem:[#allocation2 + $0x18] sm:$0xe] }
 0x11c   : > { %v2391_v25 = vrot.slane %v2389_v13, 4  ;;  %v1520_v57 = vrot.slane %v1518_v44, 4  ;;  %v1525_v41 = vrot.slane %v12657_v42, 5  ;;  %v13963_v8 = vsel %vm13945_vm15, %v10332_v6, %v2382_v19 }
 0x11d   : > { %v1438_v62 = vsel %vm13062_vm12, %v1433_v59, %v1437_v30  ;;  %v1443_v48 = vrot.slane %v1442_v43, 4  ;;  %v1519_v56 = vsel %vm13945_vm15, %v10268_v49, %v1518_v44  ;;  %3037 = vmatprep.mubr.bf16.mxu0 %v10378_v54  ;;  %v13969_v51 = vld [vmem:[#allocation2 + $0xc0] sm:$0xf]  ;;  %v10299_v40 = vcombine.low %v13912_v5, %v13926_v17  ;;  %v1452_v30 = vld [vmem:[#allocation2 + $0x24] sm:$0xe] }
 0x11e   : > { %v13977_v21 = vsel %vm13945_vm15, %v2384_v11, %v2385_v3  ;;  %v1522_v6 = vsel %vm13945_vm15, %v1520_v57, %v1521_v60  ;;  %v10269_v33 = vrot.slane %v1450_v23, 9  ;;  %3038 = vmatmul.mubr.bf16.gmra.mrb[56].mxu0 %v10362_v50  ;;  %v2293_v19 = vshrl.u32 %v13969_v51, 16  ;;  %v12659_v43 = vld [vmem:[#allocation2 + $0x1c] sm:$0xf]  ;;  %v14016_v54 = vld [vmem:[#allocation2 + $0x34] sm:$0xf] }
 0x11f   : > { %v2296_v53 = vshll.u32 %v13969_v51, 16  ;;  %v1448_v5 = vsel %vm13062_vm12, %v1443_v48, %v1447_v4  ;;  %v1527_v49 = vrot.slane %v1525_v41, 4  ;;  %v13987_v39 = vld [vmem:[#allocation2 + $0xc4] sm:$0xf]  ;;  %v13989_v32 = vld [vmem:[#allocation2 + $0xc8] sm:$0x1]  ;;  %v13995_v28 = vsel %vm13945_vm15, %v10333_v14, %v2389_v13 }
 0x120   : > { %v10315_v3 = vcombine.low %v1438_v62, %v1448_v5  ;;  %v14001_v60 = vsel %vm13945_vm15, %v2391_v25, %v2392_v36  ;;  %v10316_v37 = vcombine.low %v1519_v56, %v1522_v6  ;;  %v2295_v10 = vrot.slane %v2293_v19, 4  ;;  %v12658_v14 = vld [vmem:[#allocation2 + $0x28] sm:$0xf]  ;;  %v14021_v62 = vld [vmem:[#allocation2 + $0x30] sm:$0xe] }
 0x121   : > { %v2298_v2 = vrot.slane %v2296_v53, 5  ;;  %v2302_v47 = vshll.u32 %v13987_v39, 16  ;;  %v2306_v9 = vshrl.u32 %v13987_v39, 16  ;;  %v2312_v15 = vshll.u32 %v13989_v32, 16  ;;  %v12663_v53 = vld [vmem:[#allocation2 + $0x28] sm:$0xf] }
 0x122   : > { %3511 = vmatprep.mubr.bf16.mxu1 %v10315_v3  ;;  %v10380_v13 = vcombine.low %v13963_v8, %v13977_v21  ;;  %v1526_v1 = vsel %vm13945_vm15, %v10269_v33, %v1525_v41  ;;  %v1529_v0 = vsel %vm13945_vm15, %v1527_v49, %v1528_v27  ;;  %v10381_v50 = vcombine.low %v13995_v28, %v14001_v60  ;;  %v12661_v27 = vld [vmem:[#allocation2 + $0x20] sm:$0x1]  ;;  %v12662_v33 = vld [vmem:[#allocation2 + $0x2c] sm:$0x1]  ;;  %v1456_v28 = vld [vmem:[#allocation2 + $0x54] sm:$0xe] }
 0x123   : > { %v2299_v36 = vor.u32 %v2298_v2, %v2295_v10  ;;  %v2304_v29 = vrot.slane %v2302_v47, 5  ;;  %v2308_v34 = vrot.slane %v2306_v9, 4  ;;  %3512 = vmatmul.mubr.bf16.gmra.mrb[60].mxu1 %v10299_v40  ;;  %v2314_v20 = vrot.slane %v2312_v15, 5  ;;  %v14025_v40 = vld [vmem:[#allocation2 + $0x3c] sm:$0xe]  ;;  %v12491_v21 = vld [vmem:[%s17648_s1 + $0x180] sm:$0xff]  }
 0x124   : > { %11844 = vmatprep.mubr.bf16.mxu1 %v10316_v37  ;;  %v10334_v11 = vrot.slane %v2318_v46, 9  ;;  %v2396_v61 = vrot.slane %v12658_v14, 5  ;;  %v10270_v59 = vrot.slane %v1451_v22, 9  ;;  %v1532_v4 = vrot.slane %v12659_v43, 5  ;;  %v12664_v49 = vld [vmem:[#allocation2 + $0x2c] sm:$0x1] }
 0x125   : > { %v2300_v44 = vrot.slane %v2299_v36, 4  ;;  %v2309_v31 = vor.u32 %v2308_v34, %v2304_v29  ;;  %v10317_v23 = vcombine.low %v1526_v1, %v1529_v0  ;;  %v2403_v63 = vrot.slane %v14016_v54, 5  ;;  %v1453_v37 = vld [vmem:[#allocation2 + $0x30] sm:$0xe]  ;;  %v14037_v9 = vld [vmem:[#allocation2 + $0x40] sm:$0xf] }
 0x126   : > { %v1535_v25 = vrot.slane %v12661_v27, 5  ;;  %v10271_v57 = vrot.slane %v1452_v30, 9  ;;  %v1533_v48 = vsel %vm13945_vm15, %v10270_v59, %v1532_v4  ;;  %v1534_v56 = vrot.slane %v1532_v4, 4  ;;  %v14040_v15 = vld [vmem:[#allocation2 + $0x48] sm:$0xe] }
 0x127   : > { %v2305_v42 = vsel %vm13062_vm12, %v2300_v44, %v2304_v29  ;;  %v2310_v41 = vrot.slane %v2309_v31, 4  ;;  %v14029_v6 = vsel %vm13945_vm15, %v10334_v11, %v2396_v61  ;;  %v2399_v19 = vrot.slane %v12662_v33, 5  ;;  %v12501_v1 = vld [vmem:[%s17648_s1 + $0x208] sm:$0xff]   ;;  %v12666_v30 = vld [vmem:[#allocation2 + $0x38] sm:$0x1] }
 0x128   : > { %v1539_v5 = vrot.slane %v12663_v53, 5  ;;  %v1542_v3 = vrot.slane %v12664_v49, 5  ;;  %v10363_v2 = vcombine.low %v13969_v51, %v13987_v39  ;;  %v1536_v47 = vsel %vm13945_vm15, %v1534_v56, %v1535_v25  ;;  %v14050_v14 = vld [vmem:[#allocation2 + $0x3c] sm:$0xe]  ;;  %v14052_v44 = vld [vmem:[#allocation2 + $0x54] sm:$0xe] }
 0x129   : > { %v2315_v10 = vsel %vm13062_vm12, %v2310_v41, %v2314_v20  ;;  %v2410_v46 = vrot.slane %v14037_v9, 5  ;;  %v2398_v36 = vrot.slane %v2396_v61, 4  ;;  %v10318_v29 = vcombine.low %v1533_v48, %v1536_v47  ;;  %v14057_v59 = vld [vmem:[#allocation2 + $0x4c] sm:$0xf]  ;;  %v12668_v25 = vld [vmem:[#allocation2 + $0x44] sm:$0x1] }
 0x12a   : > { %v10379_v22 = vcombine.low %v2305_v42, %v2315_v10  ;;  %v1541_v34 = vrot.slane %v1539_v5, 4  ;;  %v10335_v51 = vrot.slane %v14021_v62, 9  ;;  %v2405_v0 = vrot.slane %v2403_v63, 4  ;;  %v12669_v42 = vld [vmem:[#allocation2 + $0x34] sm:$0xf]  ;;  %v12492_v54 = vld [vmem:[%s17648_s1 + $0x1c8] sm:$0xff]  }
 0x12b   : > { %11845 = vmatmul.mubr.bf16.vlgmr.msra.gmra.mrb[64].mxu1 %v10317_v23  ;;  %v2406_v20 = vrot.slane %v12666_v30, 5  ;;  %v1540_v11 = vsel %vm13945_vm15, %v10271_v57, %v1539_v5  ;;  %v10336_v31 = vrot.slane %v14025_v40, 9  ;;  %v2417_v43 = vrot.slane %v14057_v59, 5  ;;  %v14063_v23 = vld [vmem:[%s17648_s1 + $0x210] sm:$0xff]   ;;  %v12670_v62 = vld [vmem:[#allocation2 + $0x38] sm:$0x1] }
 0x12c   : > { %3045 = vmatprep.mubr.bf16.mxu0 %v10379_v22  ;;  %11848 = vmatprep.mubr.bf16.mxu1 %v10318_v29  ;;  %v1543_v61 = vsel %vm13945_vm15, %v1541_v34, %v1542_v3  ;;  %v10272_v4 = vrot.slane %v1453_v37, 9  ;;  %v2412_v27 = vrot.slane %v2410_v46, 4  ;;  %v2413_v57 = vrot.slane %v12668_v25, 5  ;;  %v12671_v53 = vld [vmem:[#allocation2 + $0x50] sm:$0x1] }
 0x12d   : > { %3046 = vmatmul.mubr.bf16.gmra.mrb[60].mxu0 %v10363_v2  ;;  %v1546_v41 = vrot.slane %v12669_v42, 5  ;;  %v1549_v48 = vrot.slane %v12670_v62, 5  ;;  %11877 = vmatpush3.bf16.msra.mxu1 %v13691_v45  ;;  %v2400_v56 = vsel %vm13945_vm15, %v2398_v36, %v2399_v19  ;;  %v10319_v40 = vcombine.low %v1540_v11, %v1543_v61  ;;  %v1455_v49 = vld [vmem:[#allocation2 + $0x48] sm:$0xe]  ;;  %v12672_v10 = vld [vmem:[#allocation2 + $0x40] sm:$0xf] }
 0x12e   : > { %11796 = vmatprep.mubr.bf16.mxu0 %v10380_v13  ;;  %v10337_v33 = vrot.slane %v14040_v15, 9  ;;  %v2420_v5 = vrot.slane %v12671_v53, 5  ;;  %11878 = vmatprep.subr.bf16.mxu1 %v12501_v1  ;;  %v2419_v3 = vrot.slane %v2417_v43, 4  ;;  %v1553_v8 = vrot.slane %v12672_v10, 5  ;;  %v12673_v19 = vld [vmem:[#allocation2 + $0x44] sm:$0x1] }
 0x12f   : > { %v1547_v45 = vsel %vm13945_vm15, %v10272_v4, %v1546_v41  ;;  %v1548_v37 = vrot.slane %v1546_v41, 4  ;;  %v10273_v13 = vrot.slane %v14050_v14, 9  ;;  %v1556_v2 = vrot.slane %v12673_v19, 5  ;;  %v12674_v15 = vld [vmem:[#allocation2 + $0x58] sm:$0xf]  ;;  %v12493_v41 = vld [vmem:[%s17648_s1 + $0x188] sm:$0xff]  }
 0x130   : > { %v10338_v47 = vrot.slane %v14052_v44, 9  ;;  %v2424_v22 = vrot.slane %v12674_v15, 5  ;;  %v14083_v36 = vpop.f32.mrb[0].mxu0  ;;  %v10382_v29 = vcombine.low %v14029_v6, %v2400_v56  ;;  %v14090_v34 = vsel %vm13945_vm15, %v10335_v51, %v2403_v63  ;;  %v14094_v14 = vld [vmem:[#allocation2 + $0x60] sm:$0xe] }
 0x131   : > { %17694 = vst [vmem:[#allocation11_spill] sm:$0xff] %v14083_v36  ;;  %v1550_v30 = vsel %vm13945_vm15, %v1548_v37, %v1549_v48  ;;  %v1555_v11 = vrot.slane %v1553_v8, 4  ;;  %11879 = vmatpush3.bf16.msra.mxu1 %v12501_v1  ;;  %v14096_v44 = vpop.f32.mrb[1].mxu0  ;;  %v14100_v61 = vsel %vm13945_vm15, %v2405_v0, %v2406_v20  ;;  %v14109_v63 = vsel %vm13945_vm15, %v10336_v31, %v2410_v46  ;;  %v12675_v51 = vld [vmem:[#allocation2 + $0x5c] sm:$0x1] }
 0x132   : > { %17695 = vst [vmem:[#allocation12_spill] sm:$0xff] %v14096_v44  ;;  %v10320_v6 = vcombine.low %v1547_v45, %v1550_v30  ;;  %v2427_v4 = vrot.slane %v12675_v51, 5  ;;  %11880 = vmatprep.subr.bf16.mxu1 %v14063_v23  ;;  %v12505_v1 = vld [vmem:[%s17648_s1 + $0x218] sm:$0xff]   ;;  %v14115_v0 = vpop.f32.mrb[2].mxu0  ;;  %v14119_v20 = vsel %vm13945_vm15, %v2412_v27, %v2413_v57  ;;  %v2426_v9 = vrot.slane %v2424_v22, 4  ;;  %v12494_v45 = vld [vmem:[%s17648_s1 + $0x1d0] sm:$0xff]  }
 0x133   : > { %17696 = vst [vmem:[#allocation13_spill] sm:$0xff] %v14115_v0  ;;  %11849 = vmatmul.mubr.bf16.gmra.mrb[68].mxu1 %v10319_v40  ;;  %v14121_v25 = vld [vmem:[#allocation2 + $0x64] sm:$0xf]  ;;  %v10274_v31 = vrot.slane %v1455_v49, 9  ;;  %v14124_v42 = vpop.f32.mrb[3].mxu0  ;;  %v1554_v62 = vsel %vm13945_vm15, %v10273_v13, %v1553_v8  ;;  %v1557_v27 = vsel %vm13945_vm15, %v1555_v11, %v1556_v2  ;;  %v14140_v53 = vsel %vm13945_vm15, %v10337_v33, %v2417_v43  ;;  %v12495_v2 = vld [vmem:[%s17648_s1 + $0x190] sm:$0xff]  }
 0x134   : > { %v2431_v46 = vrot.slane %v14121_v25, 5  ;;  %17697 = vst [vmem:[#allocation14_spill] sm:$0xff] %v14124_v42  ;;  %11852 = vmatprep.mubr.bf16.mxu1 %v10320_v6  ;;  %v12677_v57 = vld [vmem:[#allocation2 + $0x4c] sm:$0xf]  ;;  %v12678_v56 = vld [vmem:[#allocation2 + $0x50] sm:$0x1]  ;;  %v14144_v49 = vsel %vm13945_vm15, %v2419_v3, %v2420_v5  ;;  %v14151_v37 = vsel %vm13945_vm15, %v10338_v47, %v2424_v22  ;;  %v10321_v3 = vcombine.low %v1554_v62, %v1557_v27 }
 0x135   : > { %v1560_v48 = vrot.slane %v12677_v57, 5  ;;  %v1563_v40 = vrot.slane %v12678_v56, 5  ;;  %11797 = vmatmul.mubr.bf16.vlgmr.msra.gmra.mrb[64].mxu0 %v10381_v50  ;;  %11881 = vmatpush3.bf16.msra.mxu1 %v14063_v23  ;;  %v10339_v60 = vrot.slane %v14094_v14, 9  ;;  %v12679_v43 = vld [vmem:[#allocation2 + $0x58] sm:$0xf]  ;;  %v12508_v5 = vld [vmem:[%s17648_s1 + $0x220] sm:$0xff]   ;;  %v14162_v10 = vsel %vm13945_vm15, %v2426_v9, %v2427_v4 }
 0x136   : > { %11237 = vmatpush3.bf16.msra.mxu0 %v12491_v21  ;;  %11800 = vmatprep.mubr.bf16.mxu0 %v10382_v29  ;;  %v1567_v33 = vrot.slane %v12679_v43, 5  ;;  %v2433_v23 = vrot.slane %v2431_v46, 4  ;;  %v12680_v8 = vld [vmem:[#allocation2 + $0x68] sm:$0x1]  ;;  %v14164_v13 = vld [vmem:[#allocation2 + $0x6c] sm:$0xe]  ;;  %v10383_v14 = vcombine.low %v14090_v34, %v14100_v61 }
 0x137   : > { %v1561_v50 = vsel %vm13945_vm15, %v10274_v31, %v1560_v48  ;;  %v1562_v59 = vrot.slane %v1560_v48, 4  ;;  %11238 = vmatprep.subr.bf16.mxu0 %v12492_v54  ;;  %v2434_v21 = vrot.slane %v12680_v8, 5  ;;  %v1457_v19 = vld [vmem:[#allocation2 + $0x60] sm:$0xe]  ;;  %11882 = vmatprep.subr.bf16.mxu1 %v12505_v1  ;;  %v10275_v15 = vrot.slane %v1456_v28, 9  ;;  %v12496_v51 = vld [vmem:[%s17648_s1 + $0x1d8] sm:$0xff]  }
 0x138   : > { %v1569_v22 = vrot.slane %v1567_v33, 4  ;;  %v12681_v29 = vld [vmem:[#allocation2 + $0x5c] sm:$0x1]  ;;  %v14171_v11 = vpop.f32.mrb[4].mxu0  ;;  %v10384_v54 = vcombine.low %v14109_v63, %v14119_v20  ;;  %v14180_v4 = vld [vmem:[#allocation2 + $0x78] sm:$0xe] }
 0x139   : > { %v1564_v47 = vsel %vm13945_vm15, %v1562_v59, %v1563_v40  ;;  %v1570_v30 = vrot.slane %v12681_v29, 5  ;;  %17698 = vst [vmem:[#allocation15_spill] sm:$0xff] %v14171_v11  ;;  %11883 = vmatpush3.bf16.msra.mxu1 %v12505_v1  ;;  %v14182_v9 = vpop.f32.mrb[5].mxu0  ;;  %v14188_v61 = vld [vmem:[#allocation2 + $0x70] sm:$0xf]  ;;  %v10276_v20 = vrot.slane %v1457_v19, 9 }
 0x13a   : > { %v10322_v6 = vcombine.low %v1561_v50, %v1564_v47  ;;  %17699 = vst [vmem:[#allocation16_spill] sm:$0xff] %v14182_v9  ;;  %11239 = vmatpush3.bf16.msra.mxu0 %v12493_v41  ;;  %v2438_v63 = vrot.slane %v14188_v61, 5  ;;  %v14191_v31 = vld [vmem:[#allocation2 + $0x6c] sm:$0xe]  ;;  %11884 = vmatprep.subr.bf16.mxu1 %v12508_v5  ;;  %v14196_v62 = vpop.f32.mrb[6].mxu0  ;;  %v14200_v41 = vsel %vm13945_vm15, %v10339_v60, %v2431_v46  ;;  %v12497_v43 = vld [vmem:[%s17648_s1 + $0x198] sm:$0xff]  }
 0x13b   : > { %v12509_v1 = vld [vmem:[%s17648_s1 + $0x228] sm:$0xff]   ;;  %17700 = vst [vmem:[#allocation17_spill] sm:$0xff] %v14196_v62  ;;  %11240 = vmatprep.subr.bf16.mxu0 %v12494_v45  ;;  %11853 = vmatmul.mubr.bf16.gmra.mrb[72].mxu1 %v10321_v3  ;;  %v14202_v27 = vld [vmem:[#allocation2 + $0x7c] sm:$0xf]  ;;  %v12684_v48 = vld [vmem:[#allocation2 + $0x64] sm:$0xf]  ;;  %v14211_v45 = vsel %vm13945_vm15, %v2433_v23, %v2434_v21  ;;  %v1568_v46 = vsel %vm13945_vm15, %v10275_v15, %v1567_v33 }
 0x13c   : > { %v17657_v57 = vrot.slane %v14202_v27, 5  ;;  %v1574_v56 = vrot.slane %v12684_v48, 5  ;;  %v12685_v40 = vld [vmem:[#allocation2 + $0x68] sm:$0x1]  ;;  %v14205_v50 = vld [vmem:[#allocation2 + $0x84] sm:$0xe]  ;;  %11856 = vmatprep.mubr.bf16.mxu1 %v10322_v6  ;;  %v1571_v60 = vsel %vm13945_vm15, %v1569_v22, %v1570_v30 }
 0x13d   : > { %v1577_v28 = vrot.slane %v12685_v40, 5  ;;  %v14207_v59 = vpop.f32.mrb[7].mxu0  ;;  %v10340_v3 = vrot.slane %v14164_v13, 9  ;;  %v14221_v8 = vld [vmem:[#allocation2 + $0x78] sm:$0xe]  ;;  %11801 = vmatmul.mubr.bf16.gmra.mrb[68].mxu0 %v10383_v14  ;;  %v12498_v33 = vld [vmem:[%s17648_s1 + $0x1e0] sm:$0xff]   ;;  %11885 = vmatpush3.bf16.msra.mxu1 %v12508_v5 }
 0x13e   : > { %17701 = vst [vmem:[#allocation18_spill] sm:$0xff] %v14207_v59  ;;  %v12686_v19 = vld [vmem:[#allocation2 + $0x74] sm:$0x1]  ;;  %v1575_v23 = vsel %vm13945_vm15, %v10276_v20, %v1574_v56  ;;  %v1576_v21 = vrot.slane %v1574_v56, 4  ;;  %v12687_v15 = vld [vmem:[#allocation2 + $0x70] sm:$0xf]  ;;  %11804 = vmatprep.mubr.bf16.mxu0 %v10384_v54  ;;  %11241 = vmatpush3.bf16.msra.mxu0 %v12495_v2  ;;  %v10323_v56 = vcombine.low %v1568_v46, %v1571_v60 }
 0x13f   : > { %v2441_v47 = vrot.slane %v12686_v19, 5  ;;  %v1581_v22 = vrot.slane %v12687_v15, 5  ;;  %v12512_v13 = vld [vmem:[%s17648_s1 + $0x230] sm:$0xff]   ;;  %v2440_v29 = vrot.slane %v2438_v63, 4  ;;  %v10341_v30 = vrot.slane %v14180_v4, 9  ;;  %11242 = vmatprep.subr.bf16.mxu0 %v12496_v51  ;;  %11886 = vmatprep.subr.bf16.mxu1 %v12509_v1  ;;  %v12499_v4 = vld [vmem:[%s17648_s1 + $0x1a0] sm:$0xff]  }
 0x140   : > { %v12688_v14 = vld [vmem:[#allocation2 + $0x80] sm:$0x1]  ;;  %v12689_v20 = vld [vmem:[#allocation2 + $0x88] sm:$0xf]  ;;  %v2447_v5 = vrot.slane %v17657_v57, 4  ;;  %v1578_v40 = vsel %vm13945_vm15, %v1576_v21, %v1577_v28  ;;  %v10277_v54 = vrot.slane %v14191_v31, 9 }
 0x141   : > { %v2448_v6 = vrot.slane %v12688_v14, 5  ;;  %v2452_v48 = vrot.slane %v12689_v20, 5  ;;  %v10324_v2 = vcombine.low %v1575_v23, %v1578_v40  ;;  %v1583_v19 = vrot.slane %v1581_v22, 4  ;;  %v12690_v15 = vld [vmem:[#allocation2 + $0x74] sm:$0x1]  ;;  %v12502_v23 = vld [vmem:[%s17648_s1 + $0x1e8] sm:$0xff]   ;;  %11887 = vmatpush3.bf16.msra.mxu1 %v12509_v1 }
 0x142   : > { %v1584_v34 = vrot.slane %v12690_v15, 5  ;;  %v10342_v51 = vrot.slane %v14205_v50, 9  ;;  %v14243_v46 = vld [vmem:[#allocation2 + $0x90] sm:$0xe]  ;;  %v12691_v14 = vld [vmem:[#allocation2 + $0x8c] sm:$0x1]  ;;  %v10387_v50 = vcombine.low %v14200_v41, %v14211_v45  ;;  %11243 = vmatpush3.bf16.msra.mxu0 %v12497_v43  ;;  %v14260_v40 = vsel %vm13945_vm15, %v10340_v3, %v2438_v63  ;;  %11888 = vmatprep.subr.bf16.mxu1 %v12512_v13 }
 0x143   : > { %v2454_v60 = vrot.slane %v2452_v48, 4  ;;  %v2455_v20 = vrot.slane %v12691_v14, 5  ;;  %v14245_v25 = vld [vmem:[#allocation2 + $0x94] sm:$0xf]  ;;  %v10278_v28 = vrot.slane %v14221_v8, 9  ;;  %11857 = vmatmul.mubr.bf16.gmra.mrb[76].mxu1 %v10323_v56  ;;  %v14264_v57 = vsel %vm13945_vm15, %v2440_v29, %v2441_v47  ;;  %11244 = vmatprep.subr.bf16.mxu0 %v12498_v33  ;;  %v12513_v3 = vld [vmem:[%s17648_s1 + $0x238] sm:$0xff]  }
 0x144   : > { %v14252_v21 = vld [vmem:[#allocation2 + $0x84] sm:$0xe]  ;;  %v12693_v15 = vld [vmem:[#allocation2 + $0x7c] sm:$0xf]  ;;  %v12694_v8 = vld [vmem:[#allocation2 + $0x80] sm:$0x1]  ;;  %v14274_v61 = vsel %vm13945_vm15, %v2447_v5, %v2448_v6  ;;  %11860 = vmatprep.mubr.bf16.mxu1 %v10324_v2  ;;  %v1582_v47 = vsel %vm13945_vm15, %v10277_v54, %v1581_v22  ;;  %v17703_v5 = vcombine.low %v14140_v53, %v14144_v49  ;;  %v17705_v53 = vcombine.low %v14151_v37, %v14162_v10 }
 0x145   : > { %v1588_v14 = vrot.slane %v12693_v15, 5  ;;  %v1591_v31 = vrot.slane %v12694_v8, 5  ;;  %v17702_v1 = vrot.slane %v14202_v27, 5  ;;  %v14276_v63 = vld [vmem:[#allocation2 + $0x90] sm:$0xe]  ;;  %v1585_v27 = vsel %vm13945_vm15, %v1583_v19, %v1584_v34  ;;  %v12503_v33 = vld [vmem:[%s17648_s1 + $0x1a8] sm:$0xff]   ;;  %11889 = vmatpush3.bf16.msra.mxu1 %v12512_v13 }
 0x146   : > { %v14288_v6 = vld [vmem:[#allocation2 + $0x9c] sm:$0xe]  ;;  %11805 = vmatmul.mubr.bf16.gmra.mrb[72].mxu0 %v17703_v5  ;;  %v10343_v2 = vrot.slane %v14243_v46, 9  ;;  %v17704_v22 = vrot.slane %v14245_v25, 5  ;;  %v12696_v15 = vld [vmem:[#allocation2 + $0x98] sm:$0x1]  ;;  %v14308_v49 = vsel %vm13945_vm15, %v10342_v51, %v2452_v48  ;;  %v14312_v46 = vsel %vm13945_vm15, %v2454_v60, %v2455_v20  ;;  %11890 = vmatprep.subr.bf16.mxu1 %v12513_v3 }
 0x147   : > { %v14270_v43 = vsel %vm13945_vm15, %v10341_v30, %v17702_v1  ;;  %v1590_v29 = vrot.slane %v1588_v14, 4  ;;  %v12695_v30 = vld [vmem:[#allocation2 + $0x88] sm:$0xf]  ;;  %v2462_v34 = vrot.slane %v12696_v15, 5  ;;  %v1589_v19 = vsel %vm13945_vm15, %v10278_v28, %v1588_v14  ;;  %v12506_v8 = vld [vmem:[%s17648_s1 + $0x1f0] sm:$0xff]   ;;  %v14301_v1 = vpop.f32.mrb[0].mxu1  ;;  %11808 = vmatprep.mubr.bf16.mxu0 %v17705_v53  ;;  %11245 = vmatpush3.bf16.msra.mxu0 %v12499_v4 }
 0x148   : > { %v1595_v56 = vrot.slane %v12695_v30, 5  ;;  %v2461_v54 = vrot.slane %v17704_v22, 4  ;;  %v10279_v13 = vrot.slane %v14252_v21, 9  ;;  %v14317_v14 = vpop.f32.mrb[1].mxu1  ;;  %v10325_v30 = vcombine.low %v1582_v47, %v1585_v27  ;;  %11246 = vmatprep.subr.bf16.mxu0 %v12502_v23  ;;  %v12697_v10 = vld [vmem:[#allocation2 + $0x8c] sm:$0x1] }
 0x149   : > { %v1592_v28 = vsel %vm13945_vm15, %v1590_v29, %v1591_v31  ;;  %v1598_v4 = vrot.slane %v12697_v10, 5  ;;  %v12698_v5 = vld [vmem:[#allocation2 + $0xa0] sm:$0xf]  ;;  %v14319_v48 = vpop.f32.mrb[2].mxu1  ;;  %v10388_v51 = vcombine.low %v14260_v40, %v14264_v57  ;;  %v10344_v20 = vrot.slane %v14288_v6, 9  ;;  %11891 = vmatpush3.bf16.msra.mxu1 %v12513_v3 }
 0x14a   : > { %v1597_v37 = vrot.slane %v1595_v56, 4  ;;  %v2466_v22 = vrot.slane %v12698_v5, 5  ;;  %v10326_v60 = vcombine.low %v1589_v19, %v1592_v28  ;;  %v10280_v31 = vrot.slane %v14276_v63, 9  ;;  %v14325_v21 = vld [vmem:[#allocation2 + $0x9c] sm:$0xe]  ;;  %v14327_v23 = vpop.f32.mrb[3].mxu1 }
 0x14b   : > { %v2330_v47 = vld [vmem:[#allocation2 + $0xb4] sm:$0xe]  ;;  %v12700_v10 = vld [vmem:[#allocation2 + $0x98] sm:$0x1]  ;;  %v2331_v40 = vld [vmem:[#allocation2 + $0xc0] sm:$0xe]  ;;  %v14341_v19 = vsel %vm13945_vm15, %v2461_v54, %v2462_v34  ;;  %v1596_v28 = vsel %vm13945_vm15, %v10279_v13, %v1595_v56  ;;  %11247 = vmatpush3.bf16.msra.mxu0 %v12503_v33  ;;  %11861 = vmatmul.mubr.bf16.gmra.mrb[80].mxu1 %v10325_v30 }
 0x14c   : > { %v12699_v15 = vld [vmem:[#allocation2 + $0x94] sm:$0xf]  ;;  %v1605_v57 = vrot.slane %v12700_v10, 5  ;;  %v17706_v6 = vrot.slane %v14245_v25, 5  ;;  %v14345_v5 = vld [vmem:[#allocation2 + $0xa4] sm:$0x1]  ;;  %v1599_v3 = vsel %vm13945_vm15, %v1597_v37, %v1598_v4  ;;  %11248 = vmatprep.subr.bf16.mxu0 %v12506_v8  ;;  %11864 = vmatprep.mubr.bf16.mxu1 %v10326_v60  ;;  %v14374_v60 = vsel %vm13945_vm15, %v10344_v20, %v2466_v22 }
 0x14d   : > { %v1602_v53 = vrot.slane %v12699_v15, 5  ;;  %v12507_v25 = vld [vmem:[%s17648_s1 + $0x1b0] sm:$0xff]   ;;  %v12702_v34 = vld [vmem:[#allocation2 + $0xa0] sm:$0xf]  ;;  %v14355_v56 = vld [vmem:[#allocation2 + $0xa8] sm:$0xe]  ;;  %v10327_v15 = vcombine.low %v1596_v28, %v1599_v3 }
 0x14e   : > { %v14337_v63 = vsel %vm13945_vm15, %v10343_v2, %v17706_v6  ;;  %v14353_v2 = vrot.slane %v2466_v22, 4  ;;  %v1609_v10 = vrot.slane %v12702_v34, 5  ;;  %v12510_v33 = vld [vmem:[%s17648_s1 + $0x1f8] sm:$0xff]   ;;  %v10346_v30 = vrot.slane %v2330_v47, 9  ;;  %v1464_v4 = vld [vmem:[#allocation2 + $0xb4] sm:$0xe]  ;;  %11809 = vmatmul.mubr.bf16.gmra.mrb[76].mxu0 %v10387_v50 }
 0x14f   : > { %v1604_v54 = vrot.slane %v1602_v53, 4  ;;  %v1603_v13 = vsel %vm13945_vm15, %v10280_v31, %v1602_v53  ;;  %v2480_v6 = vrot.slane %v13918_v16, 5  ;;  %v2483_v37 = vrot.slane %v13920_v58, 5  ;;  %v12511_v8 = vld [vmem:[%s17648_s1 + $0x1b8] sm:$0xff]   ;;  %v14367_v34 = vpop.f32.mrb[8].mxu0  ;;  %v14381_v29 = vpop.f32.mrb[4].mxu1  ;;  %11812 = vmatprep.mubr.bf16.mxu0 %v10388_v51  ;;  %11249 = vmatpush3.bf16.msra.mxu0 %v12507_v25 }
 0x150   : > { %17707 = vst [vmem:[#allocation19_spill] sm:$0xff] %v14367_v34  ;;  %v10281_v58 = vrot.slane %v14325_v21, 9  ;;  %v12703_v31 = vld [vmem:[#allocation2 + $0xa4] sm:$0x1]  ;;  %v14379_v53 = vpop.f32.mrb[9].mxu0  ;;  %v10347_v50 = vrot.slane %v2331_v40, 9  ;;  %11250 = vmatprep.subr.bf16.mxu0 %v12510_v33 }
 0x151   : > { %v1606_v16 = vsel %vm13945_vm15, %v1604_v54, %v1605_v57  ;;  %v1612_v47 = vrot.slane %v12703_v31, 5  ;;  %17708 = vst [vmem:[#allocation20_spill] sm:$0xff] %v14379_v53  ;;  %v14385_v41 = vsel %vm13945_vm15, %v10346_v30, %v2480_v6  ;;  %v2482_v45 = vrot.slane %v2480_v6, 4  ;;  %v14387_v22 = vld [vmem:[#allocation2 + $0x18] sm:$0xf]  ;;  %v14389_v20 = vpop.f32.mrb[10].mxu0 }
 0x152   : > { %17709 = vst [vmem:[#allocation21_spill] sm:$0xff] %v14389_v20  ;;  %v14391_v21 = vpop.f32.mrb[5].mxu1  ;;  %v10328_v57 = vcombine.low %v1603_v13, %v1606_v16  ;;  %v1611_v54 = vrot.slane %v1609_v10, 4  ;;  %v2487_v31 = vrot.slane %v13987_v39, 5  ;;  %v2490_v51 = vrot.slane %v13989_v32, 5  ;;  %v14395_v28 = vpop.f32.mrb[11].mxu0 }
 0x153   : > { %17710 = vst [vmem:[#allocation22_spill] sm:$0xff] %v14395_v28  ;;  %v14397_v25 = vpop.f32.mrb[6].mxu1  ;;  %v14401_v40 = vsel %vm13945_vm15, %v2482_v45, %v2483_v37  ;;  %v10282_v3 = vrot.slane %v14355_v56, 9  ;;  %v1616_v30 = vrot.slane %v13862_v35, 5  ;;  %v1619_v13 = vrot.slane %v13865_v52, 5  ;;  %11251 = vmatpush3.bf16.msra.mxu0 %v12511_v8  ;;  %11865 = vmatmul.mubr.bf16.gmra.mrb[84].mxu1 %v10327_v15 }
 0x154   : > { %v14406_v6 = vld [vmem:[#allocation2 + $0x1c] sm:$0xf]  ;;  %v14408_v39 = vpop.f32.mrb[7].mxu1  ;;  %v14414_v33 = vsel %vm13945_vm15, %v10347_v50, %v2487_v31  ;;  %v2489_v16 = vrot.slane %v2487_v31, 4  ;;  %v10283_v37 = vrot.slane %v1464_v4, 9  ;;  %v1623_v52 = vrot.slane %v13926_v17, 5  ;;  %11868 = vmatprep.mubr.bf16.mxu1 %v10328_v57 }
 0x155   : > { %v14416_v45 = vld [vmem:[#allocation2 + $0xac] sm:$0xf]  ;;  %v1618_v35 = vrot.slane %v1616_v30, 4  ;;  %v1626_v27 = vrot.slane %v13928_v18, 5  ;;  %v1610_v32 = vsel %vm13945_vm15, %v10281_v58, %v1609_v10  ;;  %v3731_v4 = vshrl.u32 %v14387_v22, 16 }
 0x156   : > { %v14425_v50 = vsel %vm13945_vm15, %v2489_v16, %v2490_v51  ;;  %v3734_v31 = vshll.u32 %v14387_v22, 16  ;;  %v1613_v56 = vsel %vm13945_vm15, %v1611_v54, %v1612_v47  ;;  %v14435_v18 = vsel %vm13945_vm15, %v10283_v37, %v1623_v52  ;;  %v4114_v10 = vld [vmem:[#allocation2 + $0x18] sm:$0xe]  ;;  %v2329_v47 = vld [vmem:[#allocation2 + $0xa8] sm:$0xe] }
 0x157   : > { %v1625_v15 = vrot.slane %v1623_v52, 4  ;;  %v17711_v8 = vcombine.low %v14270_v43, %v14274_v61  ;;  %v17712_v58 = vrot.slane %v14345_v5, 5  ;;  %v1617_v54 = vsel %vm13945_vm15, %v10282_v3, %v1616_v30  ;;  %v14450_v37 = vld [vmem:[#allocation2 + $0x28] sm:$0xf]  ;;  %v14452_v52 = vpop.f32.mrb[8].mxu1  ;;  %v14477_v12 = vpop.f32.mrb[12].mxu0 }
 0x158   : > { %v1620_v51 = vsel %vm13945_vm15, %v1618_v35, %v1619_v13  ;;  %v3740_v16 = vshll.u32 %v14406_v6, 16  ;;  %17713 = vst [vmem:[#allocation23_spill] sm:$0xff] %v14452_v52  ;;  %v17714_v43 = vcombine.low %v14308_v49, %v14312_v46  ;;  %v14461_v5 = vld [vmem:[#allocation2 + $0x20] sm:$0x1]  ;;  %v3736_v3 = vrot.slane %v3734_v31, 5  ;;  %v14464_v13 = vpop.f32.mrb[9].mxu1 }
 0x159   : > { %11813 = vmatmul.mubr.bf16.gmra.mrb[80].mxu0 %v17711_v8  ;;  %v2470_v57 = vsel %vm13945_vm15, %v14353_v2, %v17712_v58  ;;  %v14459_v61 = vsel %vm13945_vm15, %v1625_v15, %v1626_v27  ;;  %v3733_v2 = vrot.slane %v3731_v4, 4  ;;  %v3744_v30 = vshrl.u32 %v14406_v6, 16  ;;  %17715 = vst [vmem:[#allocation24_spill] sm:$0xff] %v14464_v13  ;;  %v14471_v58 = vld [vmem:[#allocation2 + $0x24] sm:$0xf]  ;;  %v14473_v27 = vpop.f32.mrb[10].mxu1 }
 0x15a   : > { %11816 = vmatprep.mubr.bf16.mxu0 %v17714_v43  ;;  %v10391_v35 = vcombine.low %v14337_v63, %v14341_v19  ;;  %v10329_v8 = vcombine.low %v1610_v32, %v1613_v56  ;;  %v4180_v46 = vrot.slane %v14406_v6, 5  ;;  %17716 = vst [vmem:[#allocation25_spill] sm:$0xff] %v14473_v27  ;;  %v10345_v15 = vrot.slane %v2329_v47, 9  ;;  %v12705_v43 = vld [vmem:[#allocation2 + $0xb0] sm:$0x1]  ;;  %17718 = vst [vmem:[#allocation26_spill] sm:$0xff] %v14477_v12 }
 0x15b   : > { %v17717_v4 = vrot.slane %v14416_v45, 5  ;;  %v2476_v17 = vrot.slane %v12705_v43, 5  ;;  %v10330_v7 = vcombine.low %v1617_v54, %v1620_v51  ;;  %v14479_v63 = vpop.f32.mrb[11].mxu1  ;;  %v10392_v19 = vcombine.low %v14374_v60, %v2470_v57  ;;  %v14483_v28 = vld [vmem:[#allocation2 + $0x2c] sm:$0x1]  ;;  %v14485_v47 = vpop.f32.mrb[13].mxu0 }
 0x15c   : > { %17719 = vst [vmem:[#allocation27_spill] sm:$0xff] %v14479_v63  ;;  %v10492_v32 = vrot.slane %v4114_v10, 9  ;;  %v4182_v56 = vrot.slane %v4180_v46, 4  ;;  %v4183_v49 = vrot.slane %v14461_v5, 5  ;;  %v4115_v20 = vld [vmem:[#allocation2 + $0x24] sm:$0xe]  ;;  %v3737_v53 = vor.u32 %v3736_v3, %v3733_v2  ;;  %11869 = vmatmul.mubr.bf16.gmra.mrb[88].mxu1 %v10329_v8 }
 0x15d   : > { %v2475_v31 = vrot.slane %v17717_v4, 4  ;;  %17720 = vst [vmem:[#allocation28_spill] sm:$0xff] %v14485_v47  ;;  %v14487_v4 = vrot.slane %v3740_v16, 5  ;;  %v3746_v43 = vrot.slane %v3744_v30, 4  ;;  %v4187_v54 = vrot.slane %v14450_v37, 5  ;;  %v14492_v34 = vpop.f32.mrb[14].mxu0  ;;  %11872 = vmatprep.mubr.bf16.mxu1 %v10330_v7 }
 0x15e   : > { %v14490_v51 = vld [vmem:[#allocation2 + $0x34] sm:$0xf]  ;;  %17721 = vst [vmem:[#allocation29_spill] sm:$0xff] %v14492_v34  ;;  %v3755_v60 = vshrl.u32 %v14471_v58, 16  ;;  %v3758_v10 = vshll.u32 %v14471_v58, 16  ;;  %v14496_v12 = vpop.f32.mrb[15].mxu0  ;;  %v4181_v34 = vsel %vm13945_vm15, %v10492_v32, %v4180_v46 }
 0x15f   : > { %v4116_v57 = vld [vmem:[#allocation2 + $0x30] sm:$0xe]  ;;  %17722 = vst [vmem:[#allocation30_spill] sm:$0xff] %v14496_v12  ;;  %v17723_v47 = vrot.slane %v14416_v45, 5  ;;  %v2477_v2 = vsel %vm13945_vm15, %v2475_v31, %v2476_v17  ;;  %v3750_v3 = vshll.u32 %v14461_v5, 16  ;;  %v3764_v30 = vshll.u32 %v14450_v37, 16 }
 0x160   : > { %v14506_v8 = vld [vmem:[#allocation2 + $0x38] sm:$0x1]  ;;  %v4184_v45 = vsel %vm13945_vm15, %v4182_v56, %v4183_v49  ;;  %v10493_v12 = vrot.slane %v4115_v20, 9  ;;  %v14515_v17 = vpop.f32.mrb[12].mxu1  ;;  %v14517_v7 = vrot.slane %v3737_v53, 4  ;;  %v3747_v5 = vor.u32 %v3746_v43, %v14487_v4 }
 0x161   : > { %v2474_v16 = vsel %vm13945_vm15, %v10345_v15, %v17723_v47  ;;  %11817 = vmatmul.mubr.bf16.gmra.mrb[84].mxu0 %v10391_v35  ;;  %v3768_v15 = vshrl.u32 %v14450_v37, 16  ;;  %v14513_v47 = vld [vmem:[#allocation2 + $0x30] sm:$0xf]  ;;  %17724 = vst [vmem:[#allocation31_spill] sm:$0xff] %v14515_v17  ;;  %v4189_v31 = vrot.slane %v4187_v54, 4  ;;  %v4190_v35 = vrot.slane %v14483_v28, 5 }
 0x162   : > { %11820 = vmatprep.mubr.bf16.mxu0 %v10392_v19  ;;  %v14521_v42 = vld [vmem:[#allocation2 + $0x40] sm:$0xf]  ;;  %v14523_v46 = vpop.f32.mrb[13].mxu1  ;;  %v3757_v49 = vrot.slane %v3755_v60, 4  ;;  %v3760_v20 = vrot.slane %v3758_v10, 5  ;;  %v4194_v32 = vrot.slane %v14490_v51, 5  ;;  %v10540_v0 = vcombine.low %v4181_v34, %v4184_v45 }
 0x163   : > { %17725 = vst [vmem:[#allocation32_spill] sm:$0xff] %v14523_v46  ;;  %v14526_v56 = vpop.f32.mrb[14].mxu1  ;;  %v14528_v59 = vrot.slane %v3764_v30, 5  ;;  %v3770_v53 = vrot.slane %v3768_v15, 4  ;;  %v10494_v19 = vrot.slane %v4116_v57, 9  ;;  %v10393_v44 = vcombine.low %v2474_v16, %v2477_v2 }
 0x164   : > { %17726 = vst [vmem:[#allocation33_spill] sm:$0xff] %v14526_v56  ;;  %v4117_v62 = vld [vmem:[#allocation2 + $0x3c] sm:$0xe]  ;;  %v14530_v43 = vpop.f32.mrb[15].mxu1  ;;  %v4196_v9 = vrot.slane %v4194_v32, 4  ;;  %v4197_v60 = vrot.slane %v14506_v8, 5  ;;  %v4188_v56 = vsel %vm13945_vm15, %v10493_v12, %v4187_v54  ;;  %v17728_v16 = vcombine.low %v14435_v18, %v14459_v61 }
 0x165   : > { %17727 = vst [vmem:[#allocation34_spill] sm:$0xff] %v14530_v43  ;;  %v3748_v10 = vrot.slane %v3747_v5, 4  ;;  %v3752_v11 = vrot.slane %v3750_v3, 5  ;;  %v14537_v34 = vld [vmem:[#allocation2 + $0x44] sm:$0x1]  ;;  %v3779_v30 = vshrl.u32 %v14513_v47, 16  ;;  %v4191_v2 = vsel %vm13945_vm15, %v4189_v31, %v4190_v35 }
 0x166   : > { %v14540_v57 = vld [vmem:[#allocation2 + $0x4c] sm:$0xf]  ;;  %11873 = vmatmul.mubr.bf16.gmra.mrb[92].mxu1 %v17728_v16  ;;  %v3761_v45 = vor.u32 %v3760_v20, %v3757_v49  ;;  %v4201_v15 = vrot.slane %v14521_v42, 5  ;;  %v3782_v3 = vshll.u32 %v14513_v47, 16  ;;  %v4118_v5 = vld [vmem:[#allocation2 + $0x48] sm:$0xe]  ;;  %v3743_v12 = vsel %vm13062_vm12, %v14517_v7, %v14487_v4 }
 0x167   : > { %11892 = vmatprep.mubr.bf16.mxu1 %v10540_v0  ;;  %v3771_v54 = vor.u32 %v3770_v53, %v14528_v59  ;;  %v3774_v18 = vshll.u32 %v14483_v28, 16  ;;  %v10495_v61 = vrot.slane %v4117_v62, 9  ;;  %v14555_v16 = vld [vmem:[#allocation2 + $0x50] sm:$0x1]  ;;  %v14557_v31 = vpop.f32.mrb[16].mxu0  ;;  %v4195_v35 = vsel %vm13945_vm15, %v10494_v19, %v4194_v32  ;;  %v14568_v28 = vpop.f32.mrb[16].mxu1 }
 0x168   : > { %17729 = vst [vmem:[#allocation35_spill] sm:$0xff] %v14557_v31  ;;  %v4198_v49 = vsel %vm13945_vm15, %v4196_v9, %v4197_v60  ;;  %v3781_v20 = vrot.slane %v3779_v30, 4  ;;  %v3788_v4 = vshll.u32 %v14490_v51, 16  ;;  %v14564_v0 = vld [vmem:[#allocation2 + $0x3c] sm:$0xf]  ;;  %v14566_v7 = vpop.f32.mrb[17].mxu0  ;;  %v17732_v62 = vcombine.low %v14385_v41, %v14401_v40 }
 0x169   : > { %11821 = vmatmul.mubr.bf16.gmra.mrb[88].mxu0 %v10393_v44  ;;  %17730 = vst [vmem:[#allocation36_spill] sm:$0xff] %v14566_v7  ;;  %17731 = vst [vmem:[#allocation37_spill] sm:$0xff] %v14568_v28  ;;  %v3753_v44 = vsel %vm13062_vm12, %v3748_v10, %v3752_v11  ;;  %v10541_v32 = vcombine.low %v4188_v56, %v4191_v2  ;;  %v3784_v53 = vrot.slane %v3782_v3, 5  ;;  %v3792_v9 = vshrl.u32 %v14490_v51, 16  ;;  %v14576_v19 = vpop.f32.mrb[18].mxu0  ;;  %v14578_v60 = vpop.f32.mrb[17].mxu1 }
 0x16a   : > { %11824 = vmatprep.mubr.bf16.mxu0 %v17732_v62  ;;  %17733 = vst [vmem:[#allocation38_spill] sm:$0xff] %v14576_v19  ;;  %17734 = vst [vmem:[#allocation39_spill] sm:$0xff] %v14578_v60  ;;  %v3762_v30 = vrot.slane %v3761_v45, 4  ;;  %v4203_v36 = vrot.slane %v4201_v15, 4  ;;  %v4204_v7 = vrot.slane %v14537_v34, 5  ;;  %v4208_v31 = vrot.slane %v14540_v57, 5 }
 0x16b   : > { %v14582_v28 = vpop.f32.mrb[19].mxu0  ;;  %v14584_v41 = vpop.f32.mrb[18].mxu1  ;;  %v3772_v40 = vrot.slane %v3771_v54, 4  ;;  %v3776_v11 = vrot.slane %v3774_v18, 5  ;;  %v10542_v56 = vcombine.low %v4195_v35, %v4198_v49  ;;  %v10496_v10 = vrot.slane %v4118_v5, 9 }
 0x16c   : > { %17735 = vst [vmem:[#allocation40_spill] sm:$0xff] %v14582_v28  ;;  %17736 = vst [vmem:[#allocation41_spill] sm:$0xff] %v14584_v41  ;;  %v14586_v2 = vld [vmem:[#allocation2 + $0x58] sm:$0xf]  ;;  %v14588_v3 = vpop.f32.mrb[19].mxu1  ;;  %v10524_v62 = vcombine.low %v3743_v12, %v3753_v44  ;;  %v4202_v45 = vsel %vm13945_vm15, %v10495_v61, %v4201_v15  ;;  %v4210_v19 = vrot.slane %v4208_v31, 4  ;;  %v3785_v46 = vor.u32 %v3784_v53, %v3781_v20 }
 0x16d   : > { %17737 = vst [vmem:[#allocation42_spill] sm:$0xff] %v14588_v3  ;;  %v4211_v60 = vrot.slane %v14555_v16, 5  ;;  %v4119_v43 = vld [vmem:[#allocation2 + $0x54] sm:$0xe]  ;;  %v14593_v28 = vrot.slane %v3788_v4, 5  ;;  %v3794_v41 = vrot.slane %v3792_v9, 4  ;;  %v3767_v5 = vsel %vm13062_vm12, %v3762_v30, %v14528_v59 }
 0x16e   : > { %v3803_v54 = vshrl.u32 %v14564_v0, 16  ;;  %v14596_v18 = vld [vmem:[#allocation2 + $0x64] sm:$0xf]  ;;  %11893 = vmatmul.mubr.bf16.vlgmr.msra.gmra.mrb[64].mxu1 %v10541_v32  ;;  %v4205_v15 = vsel %vm13945_vm15, %v4203_v36, %v4204_v7  ;;  %v14603_v12 = vld [vmem:[#allocation2 + $0x5c] sm:$0x1]  ;;  %v4215_v61 = vrot.slane %v14586_v2, 5  ;;  %v3777_v20 = vsel %vm13062_vm12, %v3772_v40, %v3776_v11 }
 0x16f   : > { %v3806_v35 = vshll.u32 %v14564_v0, 16  ;;  %v4120_v49 = vld [vmem:[#allocation2 + $0x60] sm:$0xe]  ;;  %11896 = vmatprep.mubr.bf16.mxu1 %v10542_v56  ;;  %v3798_v4 = vshll.u32 %v14506_v8, 16  ;;  %v4209_v44 = vsel %vm13945_vm15, %v10496_v10, %v4208_v31  ;;  %v3812_v59 = vshll.u32 %v14521_v42, 16  ;;  %v14623_v8 = vpop.f32.mrb[20].mxu1 }
 0x170   : > { %v14613_v32 = vld [vmem:[#allocation2 + $0x68] sm:$0x1]  ;;  %v17738_v36 = vcombine.low %v14414_v33, %v14425_v50  ;;  %v4212_v7 = vsel %vm13945_vm15, %v4210_v19, %v4211_v60  ;;  %v3805_v53 = vrot.slane %v3803_v54, 4  ;;  %v3816_v30 = vshrl.u32 %v14521_v42, 16  ;;  %v14621_v40 = vld [vmem:[#allocation2 + $0x70] sm:$0xf] }
 0x171   : > { %v3808_v9 = vrot.slane %v3806_v35, 5  ;;  %17739 = vst [vmem:[#allocation43_spill] sm:$0xff] %v14623_v8  ;;  %v14625_v31 = vrot.slane %v3785_v46, 4  ;;  %v3795_v11 = vor.u32 %v3794_v41, %v14593_v28  ;;  %v10497_v56 = vrot.slane %v4119_v43, 9  ;;  %v14630_v33 = vpop.f32.mrb[21].mxu1 }
 0x172   : > { %11825 = vmatmul.mubr.bf16.gmra.mrb[92].mxu0 %v17738_v36  ;;  %v14628_v10 = vrot.slane %v3812_v59, 5  ;;  %17740 = vst [vmem:[#allocation44_spill] sm:$0xff] %v14630_v33  ;;  %v10543_v50 = vcombine.low %v4202_v45, %v4205_v15  ;;  %v4217_v19 = vrot.slane %v4215_v61, 4  ;;  %v3818_v60 = vrot.slane %v3816_v30, 4  ;;  %v14633_v35 = vld [vmem:[#allocation2 + $0x6c] sm:$0xe] }
 0x173   : > { %4723 = vmatprep.mubr.bf16.mxu0 %v10524_v62  ;;  %v4222_v54 = vrot.slane %v14596_v18, 5  ;;  %v14635_v36 = vpop.f32.mrb[22].mxu1  ;;  %v10544_v8 = vcombine.low %v4209_v44, %v4212_v7  ;;  %v4218_v46 = vrot.slane %v14603_v12, 5  ;;  %v3822_v62 = vshll.u32 %v14537_v34, 16  ;;  %v14639_v43 = vld [vmem:[#allocation2 + $0x48] sm:$0xf] }
 0x174   : > { %17741 = vst [vmem:[#allocation45_spill] sm:$0xff] %v14635_v36  ;;  %v10498_v41 = vrot.slane %v4120_v49, 9  ;;  %v14641_v59 = vpop.f32.mrb[23].mxu1  ;;  %v10525_v33 = vcombine.low %v3767_v5, %v3777_v20  ;;  %v3809_v45 = vor.u32 %v3808_v9, %v3805_v53  ;;  %v4225_v30 = vrot.slane %v14613_v32, 5  ;;  %v14644_v3 = vld [vmem:[#allocation2 + $0x74] sm:$0x1] }
 0x175   : > { %17742 = vst [vmem:[#allocation46_spill] sm:$0xff] %v14641_v59  ;;  %v4224_v15 = vrot.slane %v4222_v54, 4  ;;  %v3796_v17 = vrot.slane %v3795_v11, 4  ;;  %v3800_v63 = vrot.slane %v3798_v4, 5  ;;  %v3819_v44 = vor.u32 %v3818_v60, %v14628_v10  ;;  %v14648_v36 = vld [vmem:[#allocation2 + $0x7c] sm:$0xf] }
 0x176   : > { %v4229_v7 = vrot.slane %v14621_v40, 5  ;;  %11897 = vmatmul.mubr.bf16.gmra.mrb[68].mxu1 %v10543_v50  ;;  %v3791_v34 = vsel %vm13062_vm12, %v14625_v31, %v14593_v28  ;;  %v4216_v5 = vsel %vm13945_vm15, %v10497_v56, %v4215_v61  ;;  %v3827_v49 = vshrl.u32 %v14639_v43, 16  ;;  %v14664_v50 = vld [vmem:[#allocation2 + $0x80] sm:$0x1]  ;;  %v4122_v28 = vld [vmem:[#allocation2 + $0x78] sm:$0xe] }
 0x177   : > { %v3830_v20 = vshll.u32 %v14639_v43, 16  ;;  %11900 = vmatprep.mubr.bf16.mxu1 %v10544_v8  ;;  %v4219_v4 = vsel %vm13945_vm15, %v4217_v19, %v4218_v46  ;;  %v14660_v53 = vrot.slane %v3822_v62, 5  ;;  %v10499_v9 = vrot.slane %v14633_v35, 9  ;;  %v14666_v31 = vpop.f32.mrb[20].mxu0  ;;  %v14676_v35 = vld [vmem:[#allocation2 + $0x54] sm:$0xf] }
 0x178   : > { %v3836_v11 = vshll.u32 %v14540_v57, 16  ;;  %17743 = vst [vmem:[#allocation47_spill] sm:$0xff] %v14666_v31  ;;  %v17744_v61 = vcombine.low %v14387_v22, %v14406_v6  ;;  %v3810_v56 = vrot.slane %v3809_v45, 4  ;;  %v4223_v8 = vsel %vm13945_vm15, %v10498_v41, %v4222_v54  ;;  %v14678_v46 = vpop.f32.mrb[21].mxu0  ;;  %v14683_v45 = vld [vmem:[#allocation2 + $0x88] sm:$0xf] }
 0x179   : > { %v4226_v19 = vsel %vm13945_vm15, %v4224_v15, %v4225_v30  ;;  %v3840_v60 = vshrl.u32 %v14540_v57, 16  ;;  %17745 = vst [vmem:[#allocation48_spill] sm:$0xff] %v14678_v46  ;;  %v3801_v62 = vsel %vm13062_vm12, %v3796_v17, %v3800_v63  ;;  %v3820_v31 = vrot.slane %v3819_v44, 4  ;;  %v14685_v54 = vpop.f32.mrb[22].mxu0  ;;  %v4123_v44 = vld [vmem:[#allocation2 + $0x84] sm:$0xe] }
 0x17a   : > { %4724 = vmatmul.mubr.bf16.vlgmr.msra.gmra.mrb[96].mxu0 %v17744_v61  ;;  %v4231_v22 = vrot.slane %v4229_v7, 4  ;;  %v4232_v6 = vrot.slane %v14644_v3, 5  ;;  %17746 = vst [vmem:[#allocation49_spill] sm:$0xff] %v14685_v54  ;;  %v10545_v41 = vcombine.low %v4216_v5, %v4219_v4  ;;  %v3829_v15 = vrot.slane %v3827_v49, 4  ;;  %v14688_v59 = vpop.f32.mrb[23].mxu0  ;;  %v14695_v5 = vpop.f32.mrb[24].mxu1 }
 0x17b   : > { %4731 = vmatprep.mubr.bf16.mxu0 %v10525_v33  ;;  %v3832_v30 = vrot.slane %v3830_v20, 5  ;;  %v4236_v61 = vrot.slane %v14648_v36, 5  ;;  %17747 = vst [vmem:[#allocation50_spill] sm:$0xff] %v14688_v59  ;;  %v10509_v33 = vcombine.low %v14471_v58, %v14450_v37  ;;  %v10546_v46 = vcombine.low %v4223_v8, %v4226_v19  ;;  %17748 = vst [vmem:[#allocation51_spill] sm:$0xff] %v14695_v5  ;;  %v14704_v58 = vld [vmem:[#allocation2 + $0x8c] sm:$0x1] }
 0x17c   : > { %v14692_v63 = vrot.slane %v3836_v11, 5  ;;  %v3842_v17 = vrot.slane %v3840_v60, 4  ;;  %v10526_v27 = vcombine.low %v3791_v34, %v3801_v62  ;;  %v10500_v13 = vrot.slane %v4122_v28, 9  ;;  %v14707_v4 = vld [vmem:[#allocation2 + $0x94] sm:$0xf]  ;;  %v14709_v11 = vpop.f32.mrb[25].mxu1 }
 0x17d   : > { %v4238_v52 = vrot.slane %v4236_v61, 4  ;;  %v4239_v54 = vrot.slane %v14664_v50, 5  ;;  %v3815_v49 = vsel %vm13062_vm12, %v3810_v56, %v14628_v10  ;;  %v4230_v20 = vsel %vm13945_vm15, %v10499_v9, %v4229_v7  ;;  %17749 = vst [vmem:[#allocation52_spill] sm:$0xff] %v14709_v11  ;;  %v14716_v9 = vpop.f32.mrb[26].mxu1 }
 0x17e   : > { %v4233_v37 = vsel %vm13945_vm15, %v4231_v22, %v4232_v6  ;;  %v3851_v34 = vshrl.u32 %v14676_v35, 16  ;;  %11901 = vmatmul.mubr.bf16.gmra.mrb[72].mxu1 %v10545_v41  ;;  %v3825_v28 = vsel %vm13062_vm12, %v3820_v31, %v14660_v53  ;;  %v3833_v10 = vor.u32 %v3832_v30, %v3829_v15  ;;  %17750 = vst [vmem:[#allocation53_spill] sm:$0xff] %v14716_v9  ;;  %v14723_v22 = vld [vmem:[#allocation2 + $0x98] sm:$0x1]  ;;  %v4124_v53 = vld [vmem:[#allocation2 + $0x90] sm:$0xe] }
 0x17f   : > { %v4243_v56 = vrot.slane %v14683_v45, 5  ;;  %v3854_v7 = vshll.u32 %v14676_v35, 16  ;;  %v10510_v8 = vcombine.low %v14513_v47, %v14490_v51  ;;  %11904 = vmatprep.mubr.bf16.mxu1 %v10546_v46  ;;  %v3843_v19 = vor.u32 %v3842_v17, %v14692_v63  ;;  %17751 = vst [vmem:[#allocation54_spill] sm:$0xff] %v14723_v22  ;;  %v14725_v31 = vpop.f32.mrb[27].mxu1  ;;  %v14731_v46 = vld [vmem:[#allocation2 + $0xa0] sm:$0xf] }
 0x180   : > { %v3846_v60 = vshll.u32 %v14555_v16, 16  ;;  %v3860_v62 = vshll.u32 %v14586_v2, 16  ;;  %17752 = vst [vmem:[#allocation55_spill] sm:$0xff] %v14725_v31  ;;  %v4237_v6 = vsel %vm13945_vm15, %v10500_v13, %v4236_v61  ;;  %v4240_v41 = vsel %vm13945_vm15, %v4238_v52, %v4239_v54  ;;  %v14733_v15 = vld [vmem:[#allocation2 + $0x60] sm:$0xf] }
 0x181   : > { %v10501_v51 = vrot.slane %v4123_v44, 9  ;;  %v3853_v47 = vrot.slane %v3851_v34, 4  ;;  %v10527_v16 = vcombine.low %v3815_v49, %v3825_v28  ;;  %v10547_v30 = vcombine.low %v4230_v20, %v4233_v37  ;;  %v14740_v52 = vld [vmem:[#allocation2 + $0x9c] sm:$0xe]  ;;  %v14747_v28 = vld [vmem:[#allocation2 + $0xa4] sm:$0x1] }
 0x182   : > { %4732 = vmatmul.mubr.bf16.gmra.mrb[100].mxu0 %v10509_v33  ;;  %v3856_v17 = vrot.slane %v3854_v7, 5  ;;  %v3864_v59 = vshrl.u32 %v14586_v2, 16  ;;  %v14736_v31 = vrot.slane %v3833_v10, 4  ;;  %v4245_v33 = vrot.slane %v4243_v56, 4  ;;  %17753 = vst [vmem:[#allocation56_spill] sm:$0xff] %v14747_v28  ;;  %v14749_v10 = vpop.f32.mrb[24].mxu0 }
 0x183   : > { %4739 = vmatprep.mubr.bf16.mxu0 %v10526_v27  ;;  %v4246_v13 = vrot.slane %v14704_v58, 5  ;;  %v4250_v61 = vrot.slane %v14707_v4, 5  ;;  %v3844_v54 = vrot.slane %v3843_v19, 4  ;;  %v3848_v44 = vrot.slane %v3846_v60, 5  ;;  %17754 = vst [vmem:[#allocation57_spill] sm:$0xff] %v14749_v10 }
 0x184   : > { %v10548_v34 = vcombine.low %v4237_v6, %v4240_v41  ;;  %v14742_v9 = vrot.slane %v3860_v62, 5  ;;  %v4244_v27 = vsel %vm13945_vm15, %v10501_v51, %v4243_v56  ;;  %v10502_v49 = vrot.slane %v4124_v53, 9  ;;  %v14753_v60 = vld [vmem:[#allocation2 + $0xac] sm:$0xf]  ;;  %v14755_v62 = vpop.f32.mrb[25].mxu0 }
 0x185   : > { %v4252_v20 = vrot.slane %v4250_v61, 4  ;;  %v4253_v37 = vrot.slane %v14723_v22, 5  ;;  %v3857_v7 = vor.u32 %v3856_v17, %v3853_v47  ;;  %v3866_v11 = vrot.slane %v3864_v59, 4  ;;  %17755 = vst [vmem:[#allocation58_spill] sm:$0xff] %v14755_v62  ;;  %v4126_v41 = vld [vmem:[#allocation2 + $0xa8] sm:$0xe] }
 0x186   : > { %v4257_v5 = vrot.slane %v14731_v46, 5  ;;  %v3875_v19 = vshrl.u32 %v14733_v15, 16  ;;  %11905 = vmatmul.mubr.bf16.gmra.mrb[76].mxu1 %v10547_v30  ;;  %v3839_v56 = vsel %vm13062_vm12, %v14736_v31, %v14692_v63  ;;  %v4247_v53 = vsel %vm13945_vm15, %v4245_v33, %v4246_v13  ;;  %v14765_v51 = vpop.f32.mrb[26].mxu0  ;;  %v14771_v63 = vld [vmem:[#allocation2 + $0xb0] sm:$0x1]  ;;  %v14786_v10 = vpop.f32.mrb[28].mxu1 }
 0x187   : > { %v3870_v6 = vshll.u32 %v14603_v12, 16  ;;  %v3878_v59 = vshll.u32 %v14733_v15, 16  ;;  %17756 = vst [vmem:[#allocation59_spill] sm:$0xff] %v14765_v51  ;;  %v3849_v47 = vsel %vm13062_vm12, %v3844_v54, %v3848_v44  ;;  %11908 = vmatprep.mubr.bf16.mxu1 %v10548_v34  ;;  %v10503_v30 = vrot.slane %v14740_v52, 9  ;;  %v14773_v31 = vld [vmem:[#allocation2 + $0xb8] sm:$0xf] }
 0x188   : > { %v3877_v17 = vrot.slane %v3875_v19, 4  ;;  %v3884_v62 = vshll.u32 %v14596_v18, 16  ;;  %17757 = vst [vmem:[#allocation60_spill] sm:$0xff] %v14773_v31  ;;  %v14775_v33 = vpop.f32.mrb[27].mxu0  ;;  %v4251_v12 = vsel %vm13945_vm15, %v10502_v49, %v4250_v61  ;;  %v4254_v13 = vsel %vm13945_vm15, %v4252_v20, %v4253_v37  ;;  %17759 = vst [vmem:[#allocation62_spill] sm:$0xff] %v14786_v10  ;;  %v14793_v37 = vpop.f32.mrb[29].mxu1 }
 0x189   : > { %17758 = vst [vmem:[#allocation61_spill] sm:$0xff] %v14775_v33  ;;  %v3880_v54 = vrot.slane %v3878_v59, 5  ;;  %v3888_v44 = vshrl.u32 %v14596_v18, 16  ;;  %v14782_v52 = vrot.slane %v3857_v7, 4  ;;  %v3867_v34 = vor.u32 %v3866_v11, %v14742_v9  ;;  %v14791_v20 = vld [vmem:[#allocation2 + $0xb4] sm:$0xe] }
 0x18a   : > { %4740 = vmatmul.mubr.bf16.gmra.mrb[104].mxu0 %v10510_v8  ;;  %v4259_v19 = vrot.slane %v4257_v5, 4  ;;  %v4260_v51 = vrot.slane %v14747_v28, 5  ;;  %v10549_v8 = vcombine.low %v4244_v27, %v4247_v53  ;;  %v14788_v33 = vrot.slane %v3884_v62, 5  ;;  %17760 = vst [vmem:[#allocation63_spill] sm:$0xff] %v14793_v37  ;;  %v14796_v22 = vld [vmem:[#allocation2 + $0x6c] sm:$0xf] }
 0x18b   : > { %4747 = vmatprep.mubr.bf16.mxu0 %v10527_v16  ;;  %v3890_v61 = vrot.slane %v3888_v44, 4  ;;  %v4264_v49 = vrot.slane %v14753_v60, 5  ;;  %v10550_v16 = vcombine.low %v4251_v12, %v4254_v13  ;;  %v3881_v7 = vor.u32 %v3880_v54, %v3877_v17  ;;  %v14798_v28 = vpop.f32.mrb[30].mxu1  ;;  %v14806_v13 = vld [vmem:[#allocation2 + $0xbc] sm:$0x1] }
 0x18c   : > { %v3894_v59 = vshll.u32 %v14613_v32, 16  ;;  %v10504_v11 = vrot.slane %v4126_v41, 9  ;;  %17761 = vst [vmem:[#allocation64_spill] sm:$0xff] %v14798_v28  ;;  %v10511_v27 = vcombine.low %v14564_v0, %v14521_v42  ;;  %v4267_v53 = vrot.slane %v14771_v63, 5  ;;  %v14804_v10 = vpop.f32.mrb[31].mxu1  ;;  %17763 = vst [vmem:[#allocation66_spill] sm:$0xff] %v14806_v13 }
 0x18d   : > { %v4266_v62 = vrot.slane %v4264_v49, 4  ;;  %v4271_v44 = vrot.slane %v14773_v31, 5  ;;  %17762 = vst [vmem:[#allocation65_spill] sm:$0xff] %v14804_v10  ;;  %v10528_v37 = vcombine.low %v3839_v56, %v3849_v47  ;;  %v3868_v12 = vrot.slane %v3867_v34, 4  ;;  %v14808_v32 = vld [vmem:[#allocation2 + $0xc4] sm:$0xf] }
 0x18e   : > { %v3872_v17 = vrot.slane %v3870_v6, 5  ;;  %17764 = vst [vmem:[#allocation67_spill] sm:$0xff] %v14808_v32  ;;  %11909 = vmatmul.mubr.bf16.gmra.mrb[80].mxu1 %v10549_v8  ;;  %v3863_v42 = vsel %vm13062_vm12, %v14782_v52, %v14742_v9  ;;  %v4258_v0 = vsel %vm13945_vm15, %v10503_v30, %v4257_v5  ;;  %v3891_v41 = vor.u32 %v3890_v61, %v14788_v33  ;;  %v4128_v54 = vld [vmem:[#allocation2 + $0xc0] sm:$0xe]  ;;  %v388_v10 = vld [vmem:[#allocation2 + $0xcc] sm:$0x1] }
 0x18f   : > { %v444_v56 = vld [vmem:[#allocation2 + $0xd4] sm:$0x1]  ;;  %11912 = vmatprep.mubr.bf16.mxu1 %v10550_v16  ;;  %v4261_v6 = vsel %vm13945_vm15, %v4259_v19, %v4260_v51  ;;  %v14819_v47 = vrot.slane %v3881_v7, 4  ;;  %v14821_v34 = vrot.slane %v3894_v59, 5  ;;  %v10505_v8 = vrot.slane %v14791_v20, 9  ;;  %v14826_v9 = vpop.f32.mrb[28].mxu0 }
 0x190   : > { %v14824_v28 = vld [vmem:[#allocation2 + $0xc8] sm:$0x1]  ;;  %17765 = vst [vmem:[#allocation68_spill] sm:$0xff] %v14826_v9  ;;  %v4265_v5 = vsel %vm13945_vm15, %v10504_v11, %v4264_v49  ;;  %v4268_v30 = vsel %vm13945_vm15, %v4266_v62, %v4267_v53  ;;  %v4273_v52 = vrot.slane %v4271_v44, 4  ;;  %v3899_v51 = vshrl.u32 %v14796_v22, 16  ;;  %v14833_v19 = vpop.f32.mrb[29].mxu0 }
 0x191   : > { %17766 = vst [vmem:[#allocation69_spill] sm:$0xff] %v14833_v19  ;;  %v3873_v61 = vsel %vm13062_vm12, %v3868_v12, %v3872_v17  ;;  %v3902_v20 = vshll.u32 %v14796_v22, 16  ;;  %v3908_v16 = vshll.u32 %v14621_v40, 16  ;;  %v3912_v7 = vshrl.u32 %v14621_v40, 16  ;;  %v14840_v59 = vld [vmem:[#allocation2 + $0x78] sm:$0xf] }
 0x192   : > { %4748 = vmatmul.mubr.bf16.gmra.mrb[108].mxu0 %v10511_v27  ;;  %v14842_v49 = vpop.f32.mrb[30].mxu0  ;;  %v10551_v11 = vcombine.low %v4258_v0, %v4261_v6  ;;  %v3892_v27 = vrot.slane %v3891_v41, 4  ;;  %v4274_v62 = vrot.slane %v14806_v13, 5  ;;  %v4278_v53 = vrot.slane %v14808_v32, 5 }
 0x193   : > { %4755 = vmatprep.mubr.bf16.mxu0 %v10528_v37  ;;  %17767 = vst [vmem:[#allocation70_spill] sm:$0xff] %v14842_v49  ;;  %v14846_v37 = vld [vmem:[#allocation2 + $0xd0] sm:$0xf]  ;;  %v14848_v19 = vpop.f32.mrb[31].mxu0  ;;  %v10552_v12 = vcombine.low %v4265_v5, %v4268_v30  ;;  %v10506_v17 = vrot.slane %v4128_v54, 9  ;;  %v389_v9 = vsel %vm12954_vm3, 0, %v388_v10  ;;  %v10512_v0 = vcombine.low %v14639_v43, %v14540_v57 }
 0x194   : > { %17768 = vst [vmem:[#allocation71_spill] sm:$0xff] %v14848_v19  ;;  %v445_v31 = vsel %vm12962_vm4, 0, %v444_v56  ;;  %v10529_v41 = vcombine.low %v3863_v42, %v3873_v61  ;;  %v4280_v6 = vrot.slane %v4278_v53, 4  ;;  %v4281_v13 = vrot.slane %v14824_v28, 5  ;;  %390 = vst [vmem:[#allocation2 + $0xcc] sm:$0x1] %v389_v9 }
 0x195   : > { %446 = vst [vmem:[#allocation2 + $0xd4] sm:$0x1] %v445_v31  ;;  %v3901_v32 = vrot.slane %v3899_v51, 4  ;;  %v3904_v49 = vrot.slane %v3902_v20, 5  ;;  %v14857_v19 = vrot.slane %v3908_v16, 5  ;;  %v3914_v54 = vrot.slane %v3912_v7, 4 }
 0x196   : > { %11913 = vmatmul.mubr.bf16.gmra.mrb[84].mxu1 %v10551_v11  ;;  %v3923_v10 = vshrl.u32 %v14840_v59, 16  ;;  %v3926_v5 = vshll.u32 %v14840_v59, 16  ;;  %v4272_v57 = vsel %vm13945_vm15, %v10505_v8, %v4271_v44  ;;  %v4275_v43 = vsel %vm13945_vm15, %v4273_v52, %v4274_v62  ;;  %v4129_v42 = vld [vmem:[#allocation2 + $0xcc] sm:$0xe]  ;;  %v14866_v56 = vpop.f32.mrb[32].mxu1 }
 0x197   : > { %11916 = vmatprep.mubr.bf16.mxu1 %v10552_v12  ;;  %v4285_v31 = vrot.slane %v14846_v37, 5  ;;  %v4279_v9 = vsel %vm13945_vm15, %v10506_v17, %v4278_v53  ;;  %v4282_v30 = vsel %vm13945_vm15, %v4280_v6, %v4281_v13  ;;  %v3932_v51 = vshll.u32 %v14648_v36, 16  ;;  %v14874_v44 = vpop.f32.mrb[33].mxu1 }
 0x198   : > { %v3936_v61 = vshrl.u32 %v14648_v36, 16  ;;  %v3887_v8 = vsel %vm13062_vm12, %v14819_v47, %v14788_v33  ;;  %v3905_v52 = vor.u32 %v3904_v49, %v3901_v32  ;;  %v3915_v20 = vor.u32 %v3914_v54, %v14857_v19  ;;  %v14882_v7 = vpop.f32.mrb[34].mxu1  ;;  %v14891_v47 = vld [vmem:[#allocation2 + $0x84] sm:$0xf] }
 0x199   : > { %v3918_v16 = vshll.u32 %v14644_v3, 16  ;;  %v3897_v13 = vsel %vm13062_vm12, %v3892_v27, %v14821_v34  ;;  %v10553_v11 = vcombine.low %v4272_v57, %v4275_v43  ;;  %v3925_v62 = vrot.slane %v3923_v10, 4  ;;  %v14887_v12 = vpop.f32.mrb[35].mxu1 }
 0x19a   : > { %4756 = vmatmul.mubr.bf16.gmra.mrb[112].mxu0 %v10512_v0  ;;  %v3928_v53 = vrot.slane %v3926_v5, 5  ;;  %v10554_v17 = vcombine.low %v4279_v9, %v4282_v30  ;;  %v10507_v33 = vrot.slane %v4129_v42, 9  ;;  %v4287_v32 = vrot.slane %v4285_v31, 4 }
 0x19b   : > { %4763 = vmatprep.mubr.bf16.mxu0 %v10529_v41  ;;  %v10513_v3 = vcombine.low %v14676_v35, %v14586_v2  ;;  %v14896_v41 = vrot.slane %v3932_v51, 5  ;;  %v3938_v34 = vrot.slane %v3936_v61, 4  ;;  %v10530_v27 = vcombine.low %v3887_v8, %v3897_v13 }
 0x19c   : > { %v14889_v0 = vld [vmem:[#allocation2 + $0xd4] sm:$0x1]  ;;  %v3906_v6 = vrot.slane %v3905_v52, 4  ;;  %v3916_v54 = vrot.slane %v3915_v20, 4  ;;  %v3920_v10 = vrot.slane %v3918_v16, 5  ;;  %v3929_v5 = vor.u32 %v3928_v53, %v3925_v62 }
 0x19d   : > { %v4288_v49 = vrot.slane %v14889_v0, 5  ;;  %v3947_v57 = vshrl.u32 %v14891_v47, 16  ;;  %v3950_v43 = vshll.u32 %v14891_v47, 16  ;;  %v4286_v42 = vsel %vm13945_vm15, %v10507_v33, %v4285_v31  ;;  %v11028_v61 = vpop.f32.mrb[32].mxu0 }
 0x19e   : > { %11917 = vmatmul.mubr.bf16.gmra.mrb[88].mxu1 %v10553_v11  ;;  %v3956_v35 = vshll.u32 %v14683_v45, 16  ;;  %v3960_v9 = vshrl.u32 %v14683_v45, 16  ;;  %v3939_v30 = vor.u32 %v3938_v34, %v14896_v41  ;;  %v3942_v51 = vshll.u32 %v14664_v50, 16  ;;  %v11029_v52 = vpop.f32.mrb[33].mxu0 }
 0x19f   : > { %11920 = vmatprep.mubr.bf16.mxu1 %v10554_v17  ;;  %v4289_v2 = vsel %vm13945_vm15, %v4287_v32, %v4288_v49  ;;  %v3911_v8 = vsel %vm13062_vm12, %v3906_v6, %v14857_v19  ;;  %v3921_v31 = vsel %vm13062_vm12, %v3916_v54, %v3920_v10  ;;  %v3930_v16 = vrot.slane %v3929_v5, 4  ;;  %v11031_v11 = vpop.f32.mrb[34].mxu0  ;;  %v14933_v5 = vld [vmem:[#allocation2 + $0x9c] sm:$0xf] }
 0x1a0   : > { %v10555_v20 = vcombine.low %v4286_v42, %v4289_v2  ;;  %v3949_v13 = vrot.slane %v3947_v57, 4  ;;  %v3952_v62 = vrot.slane %v3950_v43, 5  ;;  %v14913_v53 = vrot.slane %v3956_v35, 5  ;;  %v11032_v50 = vpop.f32.mrb[35].mxu0 }
 0x1a1   : > { %v3962_v17 = vrot.slane %v3960_v9, 4  ;;  %v14915_v33 = vadd.f32 %v11029_v52, %v11028_v61  ;;  %v10514_v32 = vcombine.low %v14733_v15, %v14596_v18  ;;  %v3944_v19 = vrot.slane %v3942_v51, 5 }
 0x1a2   : > { %4764 = vmatmul.mubr.bf16.gmra.mrb[116].mxu0 %v10513_v3  ;;  %v3940_v3 = vrot.slane %v3939_v30, 4  ;;  %v14921_v49 = vadd.f32 %v14317_v14, %v14301_v1  ;;  %v10531_v34 = vcombine.low %v3911_v8, %v3921_v31  ;;  %v14925_v6 = vadd.f32 %v11032_v50, %v11031_v11  ;;  %v14931_v10 = vpop.f32.mrb[36].mxu1  ;;  %v17772_v50 = vld [vmem:[#allocation24_spill] sm:$0xff] }
 0x1a3   : > { %4771 = vmatprep.mubr.bf16.mxu0 %v10530_v27  ;;  %17769 = vst [vmem:[#allocation72_spill] sm:$0xff] %v14915_v33  ;;  %v14923_v27 = vld [vmem:[#allocation2 + $0x90] sm:$0xf]  ;;  %v14929_v54 = vadd.f32 %v14327_v23, %v14319_v48  ;;  %v14935_v18 = vpop.f32.mrb[37].mxu1  ;;  %v3935_v1 = vsel %vm13062_vm12, %v3930_v16, %v14896_v41  ;;  %v3953_v14 = vor.u32 %v3952_v62, %v3949_v13  ;;  %v3966_v57 = vshll.u32 %v14704_v58, 16 }
 0x1a4   : > { %17770 = vst [vmem:[#allocation73_spill] sm:$0xff] %v14925_v6  ;;  %v3963_v15 = vor.u32 %v3962_v17, %v14913_v53  ;;  %v14942_v43 = vpop.f32.mrb[38].mxu1  ;;  %v3945_v48 = vsel %vm13062_vm12, %v3940_v3, %v3944_v19  ;;  %v3971_v23 = vshrl.u32 %v14923_v27, 16  ;;  %v3974_v42 = vshll.u32 %v14923_v27, 16  ;;  %v14970_v6 = vld [vmem:[#allocation2 + $0xa8] sm:$0xf] }
 0x1a5   : > { %v3980_v2 = vshll.u32 %v14707_v4, 16  ;;  %v14949_v35 = vpop.f32.mrb[39].mxu1  ;;  %v3984_v41 = vshrl.u32 %v14707_v4, 16  ;;  %v3995_v9 = vshrl.u32 %v14933_v5, 16  ;;  %v14955_v58 = vadd.f32 %v14391_v21, %v14381_v29 }
 0x1a6   : > { %11921 = vmatmul.mubr.bf16.gmra.mrb[92].mxu1 %v10555_v20  ;;  %v14959_v30 = vadd.f32 %v14408_v39, %v14397_v25  ;;  %v3998_v51 = vshll.u32 %v14933_v5, 16  ;;  %v4004_v61 = vshll.u32 %v14731_v46, 16  ;;  %v4008_v8 = vshrl.u32 %v14731_v46, 16  ;;  %v17771_v39 = vld [vmem:[#allocation23_spill] sm:$0xff] }
 0x1a7   : > { %v10515_v52 = vcombine.low %v14796_v22, %v14621_v40  ;;  %v3954_v31 = vrot.slane %v3953_v14, 4  ;;  %v3968_v20 = vrot.slane %v3966_v57, 5  ;;  %v10532_v16 = vcombine.low %v3935_v1, %v3945_v48  ;;  %v17773_v40 = vld [vmem:[#allocation25_spill] sm:$0xff]  ;;  %v17774_v22 = vld [vmem:[#allocation27_spill] sm:$0xff] }
 0x1a8   : > { %v3964_v13 = vrot.slane %v3963_v15, 4  ;;  %v3973_v11 = vrot.slane %v3971_v23, 4  ;;  %v3976_v29 = vrot.slane %v3974_v42, 5  ;;  %v3982_v21 = vrot.slane %v3980_v2, 5  ;;  %v17776_v42 = vld [vmem:[#allocation54_spill] sm:$0xff] }
 0x1a9   : > { %v3986_v62 = vrot.slane %v3984_v41, 4  ;;  %v3997_v17 = vrot.slane %v3995_v9, 4  ;;  %v4000_v3 = vrot.slane %v3998_v51, 5  ;;  %v4006_v19 = vrot.slane %v4004_v61, 5 }
 0x1aa   : > { %4772 = vmatmul.mubr.bf16.gmra.mrb[120].mxu0 %v10514_v32  ;;  %v11034_v25 = vpop.f32.mrb[36].mxu0  ;;  %v14968_v32 = vadd.f32 %v17772_v50, %v17771_v39  ;;  %v14974_v1 = vadd.f32 %v17774_v22, %v17773_v40  ;;  %v3959_v57 = vsel %vm13062_vm12, %v3954_v31, %v14913_v53  ;;  %v3969_v48 = vsel %vm13062_vm12, %v3964_v13, %v3968_v20  ;;  %v17779_v20 = vld [vmem:[#allocation31_spill] sm:$0xff]  ;;  %v17780_v13 = vld [vmem:[#allocation32_spill] sm:$0xff]  ;;  %v17781_v40 = vld [vmem:[#allocation33_spill] sm:$0xff] }
 0x1ab   : > { %4779 = vmatprep.mubr.bf16.mxu0 %v10531_v34  ;;  %v4010_v34 = vrot.slane %v4008_v8, 4  ;;  %v11035_v38 = vpop.f32.mrb[37].mxu0  ;;  %v3977_v23 = vor.u32 %v3976_v29, %v3973_v11  ;;  %v3990_v2 = vshll.u32 %v17776_v42, 16  ;;  %v3987_v9 = vor.u32 %v3986_v62, %v3982_v21 }
 0x1ac   : > { %v14976_v14 = vadd.f32 %v11035_v38, %v11034_v25  ;;  %v11037_v15 = vpop.f32.mrb[38].mxu0  ;;  %v4019_v38 = vshrl.u32 %v14970_v6, 16  ;;  %v4022_v61 = vshll.u32 %v14970_v6, 16  ;;  %v4001_v8 = vor.u32 %v4000_v3, %v3997_v17  ;;  %v17778_v25 = vld [vmem:[#allocation56_spill] sm:$0xff]  ;;  %v17782_v17 = vld [vmem:[#allocation34_spill] sm:$0xff] }
 0x1ad   : > { %v11038_v41 = vpop.f32.mrb[39].mxu0  ;;  %v4014_v39 = vshll.u32 %v17778_v25, 16  ;;  %v10516_v53 = vcombine.low %v14840_v59, %v14648_v36  ;;  %v10533_v31 = vcombine.low %v3959_v57, %v3969_v48  ;;  %v14993_v11 = vadd.f32 %v17780_v13, %v17779_v20 }
 0x1ae   : > { %17775 = vst [vmem:[#allocation23_spill] sm:$0xff] %v14976_v14  ;;  %v14984_v51 = vadd.f32 %v11038_v41, %v11037_v15  ;;  %v3978_v29 = vrot.slane %v3977_v23, 4  ;;  %v4028_v62 = vshll.u32 %v14753_v60, 16  ;;  %v4032_v50 = vshrl.u32 %v14753_v60, 16 }
 0x1af   : > { %v15001_v3 = vadd.f32 %v17782_v17, %v17781_v40  ;;  %v3988_v22 = vrot.slane %v3987_v9, 4  ;;  %v3992_v36 = vrot.slane %v3990_v2, 5  ;;  %v4021_v59 = vrot.slane %v4019_v38, 4  ;;  %v17783_v40 = vld [vmem:[#allocation37_spill] sm:$0xff]  ;;  %v17784_v17 = vld [vmem:[#allocation39_spill] sm:$0xff] }
 0x1b0   : > { %17777 = vst [vmem:[#allocation24_spill] sm:$0xff] %v14984_v51  ;;  %v4024_v15 = vrot.slane %v4022_v61, 5  ;;  %v4002_v48 = vrot.slane %v4001_v8, 4  ;;  %v4016_v41 = vrot.slane %v4014_v39, 5  ;;  %v3983_v25 = vsel %vm13062_vm12, %v3978_v29, %v3982_v21  ;;  %v17785_v8 = vld [vmem:[#allocation41_spill] sm:$0xff] }
 0x1b1   : > { %v15011_v20 = vrot.slane %v4028_v62, 5  ;;  %v4034_v13 = vrot.slane %v4032_v50, 4  ;;  %v15015_v9 = vadd.f32 %v17784_v17, %v17783_v40  ;;  %v3993_v2 = vsel %vm13062_vm12, %v3988_v22, %v3992_v36  ;;  %v15028_v62 = vld [vmem:[#allocation2 + $0xb4] sm:$0xf]  ;;  %v17806_v51 = vld [vmem:[#allocation65_spill] sm:$0xff] }
 0x1b2   : > { %4780 = vmatmul.mubr.bf16.gmra.mrb[124].mxu0 %v10515_v52  ;;  %v4011_v52 = vor.u32 %v4010_v34, %v4006_v19  ;;  %v4025_v38 = vor.u32 %v4024_v15, %v4021_v59  ;;  %v4038_v61 = vshll.u32 %v14771_v63, 16  ;;  %v4007_v21 = vsel %vm13062_vm12, %v4002_v48, %v4006_v19 }
 0x1b3   : > { %4787 = vmatprep.mubr.bf16.mxu0 %v10532_v16  ;;  %v14995_v16 = vpop.f32.mrb[40].mxu1  ;;  %v10534_v22 = vcombine.low %v3983_v25, %v3993_v2  ;;  %v10518_v63 = vcombine.low %v14923_v27, %v14707_v4  ;;  %v4035_v36 = vor.u32 %v4034_v13, %v15011_v20  ;;  %v4043_v40 = vshrl.u32 %v15028_v62, 16  ;;  %v17791_v4 = vld [vmem:[#allocation43_spill] sm:$0xff]  ;;  %v17792_v27 = vld [vmem:[#allocation44_spill] sm:$0xff] }
 0x1b4   : > { %v15003_v34 = vpop.f32.mrb[41].mxu1  ;;  %v4012_v42 = vrot.slane %v4011_v52, 4  ;;  %v17786_v52 = vld [vmem:[#allocation42_spill] sm:$0xff]  ;;  %v15037_v48 = vrot.slane %v4025_v38, 4  ;;  %v15048_v13 = vadd.f32 %v17792_v27, %v17791_v4  ;;  %v17805_v27 = vld [vmem:[#allocation64_spill] sm:$0xff] }
 0x1b5   : > { %v15005_v57 = vpop.f32.mrb[42].mxu1  ;;  %v15022_v39 = vadd.f32 %v17786_v52, %v17785_v8  ;;  %v17793_v8 = vld [vmem:[#allocation45_spill] sm:$0xff]  ;;  %v17794_v38 = vld [vmem:[#allocation46_spill] sm:$0xff]  ;;  %v15069_v33 = vadd.f32 %v17806_v51, %v17805_v27 }
 0x1b6   : > { %v15007_v23 = vpop.f32.mrb[43].mxu1  ;;  %v15053_v52 = vadd.f32 %v17794_v38, %v17793_v8  ;;  %v17808_v8 = vld [vmem:[#allocation15_spill] sm:$0xff]  ;;  %v17809_v38 = vld [vmem:[#allocation16_spill] sm:$0xff]  ;;  %v17816_v27 = vld [vmem:[#allocation14_spill] sm:$0xff] }
 0x1b7   : > { %17787 = vst [vmem:[#allocation25_spill] sm:$0xff] %v15022_v39  ;;  %v11040_v29 = vpop.f32.mrb[40].mxu0  ;;  %17807 = vst [vmem:[#allocation34_spill] sm:$0xff] %v15069_v33  ;;  %v15073_v14 = vadd.f32 %v17809_v38, %v17808_v8  ;;  %v17831_v33 = vld [vmem:[#allocation36_spill] sm:$0xff] }
 0x1b8   : > { %v11041_v50 = vpop.f32.mrb[41].mxu0  ;;  %17795 = vst [vmem:[#allocation56_spill] sm:$0xff] %v15053_v52  ;;  %v17848_v52 = vld [vmem:[#allocation61_spill] sm:$0xff] }
 0x1b9   : > { %v15035_v59 = vadd.f32 %v11041_v50, %v11040_v29  ;;  %v11043_v15 = vpop.f32.mrb[42].mxu0  ;;  %v17799_v29 = vld [vmem:[#allocation53_spill] sm:$0xff]  ;;  %v17800_v50 = vld [vmem:[#allocation55_spill] sm:$0xff] }
 0x1ba   : > { %4788 = vmatmul.mubr.bf16.gmra.mrb[128].mxu0 %v10516_v53  ;;  %v4017_v53 = vsel %vm13062_vm12, %v4012_v42, %v4016_v41  ;;  %v15039_v42 = vrot.slane %v4038_v61, 5  ;;  %v11044_v41 = vpop.f32.mrb[43].mxu0  ;;  %v17796_v61 = vld [vmem:[#allocation51_spill] sm:$0xff] }
 0x1bb   : > { %4795 = vmatprep.mubr.bf16.mxu0 %v10533_v31  ;;  %v10517_v31 = vcombine.low %v14891_v47, %v14683_v45  ;;  %17788 = vst [vmem:[#allocation27_spill] sm:$0xff] %v15035_v59  ;;  %v10535_v19 = vcombine.low %v4007_v21, %v4017_v53  ;;  %v15042_v17 = vadd.f32 %v11044_v41, %v11043_v15  ;;  %v4046_v45 = vshll.u32 %v15028_v62, 16  ;;  %v17790_v47 = vld [vmem:[#allocation60_spill] sm:$0xff]  ;;  %v17803_v59 = vld [vmem:[#allocation63_spill] sm:$0xff] }
 0x1bc   : > { %v4052_v25 = vshll.u32 %v17790_v47, 16  ;;  %v4056_v2 = vshrl.u32 %v17790_v47, 16  ;;  %v17797_v21 = vld [vmem:[#allocation52_spill] sm:$0xff]  ;;  %v15061_v15 = vadd.f32 %v17800_v50, %v17799_v29  ;;  %v4036_v41 = vrot.slane %v4035_v36, 4  ;;  %v17813_v36 = vld [vmem:[#allocation18_spill] sm:$0xff] }
 0x1bd   : > { %17789 = vst [vmem:[#allocation54_spill] sm:$0xff] %v15042_v17  ;;  %v15057_v53 = vadd.f32 %v17797_v21, %v17796_v61  ;;  %v17802_v17 = vld [vmem:[#allocation62_spill] sm:$0xff]  ;;  %v4045_v61 = vrot.slane %v4043_v40, 4  ;;  %v17810_v21 = vld [vmem:[#allocation11_spill] sm:$0xff]  ;;  %v4048_v51 = vrot.slane %v4046_v45, 5 }
 0x1be   : > { %17801 = vst [vmem:[#allocation32_spill] sm:$0xff] %v15061_v15  ;;  %v15065_v4 = vadd.f32 %v17803_v59, %v17802_v17  ;;  %v15085_v59 = vadd.f32 %v14874_v44, %v14866_v56  ;;  %v17815_v17 = vld [vmem:[#allocation13_spill] sm:$0xff]  ;;  %v17818_v40 = vld [vmem:[#allocation26_spill] sm:$0xff] }
 0x1bf   : > { %17798 = vst [vmem:[#allocation31_spill] sm:$0xff] %v15057_v53  ;;  %v17811_v53 = vld [vmem:[#allocation12_spill] sm:$0xff]  ;;  %v15089_v15 = vadd.f32 %v17816_v27, %v17815_v17  ;;  %v11182_v38 = vpop.f32.mrb[44].mxu1  ;;  %v17822_v44 = vld [vmem:[#allocation29_spill] sm:$0xff]  ;;  %v17823_v45 = vld [vmem:[#allocation30_spill] sm:$0xff]  ;;  %v15111_v17 = vadd.f32 %v14935_v18, %v14931_v10 }
 0x1c0   : > { %17804 = vst [vmem:[#allocation33_spill] sm:$0xff] %v15065_v4  ;;  %v15077_v29 = vadd.f32 %v17811_v53, %v17810_v21  ;;  %17814 = vst [vmem:[#allocation37_spill] sm:$0xff] %v15085_v59  ;;  %v17819_v53 = vld [vmem:[#allocation28_spill] sm:$0xff]  ;;  %v15099_v21 = vrot.slane %v4052_v25, 5  ;;  %v15107_v59 = vadd.f32 %v17823_v45, %v17822_v44  ;;  %v17825_v27 = vld [vmem:[#allocation21_spill] sm:$0xff]  ;;  %v15119_v25 = vadd.f32 %v14949_v35, %v14942_v43 }
 0x1c1   : > { %v15097_v8 = vadd.f32 %v17819_v53, %v17818_v40  ;;  %17824 = vst [vmem:[#allocation41_spill] sm:$0xff] %v15111_v17  ;;  %v17826_v40 = vld [vmem:[#allocation22_spill] sm:$0xff]  ;;  %v17830_v45 = vld [vmem:[#allocation35_spill] sm:$0xff]  ;;  %v17832_v10 = vld [vmem:[#allocation49_spill] sm:$0xff] }
 0x1c2   : > { %4796 = vmatmul.mubr.bf16.gmra.mrb[132].mxu0 %v10517_v31  ;;  %v17812_v31 = vld [vmem:[#allocation17_spill] sm:$0xff]  ;;  %v15115_v53 = vadd.f32 %v17826_v40, %v17825_v27  ;;  %17827 = vst [vmem:[#allocation42_spill] sm:$0xff] %v15119_v25  ;;  %v15127_v4 = vadd.f32 %v17831_v33, %v17830_v45  ;;  %v17833_v18 = vld [vmem:[#allocation50_spill] sm:$0xff]  ;;  %v15135_v27 = vadd.f32 %v15003_v34, %v14995_v16  ;;  %v17836_v43 = vld [vmem:[#allocation40_spill] sm:$0xff] }
 0x1c3   : > { %4803 = vmatprep.mubr.bf16.mxu0 %v10534_v22  ;;  %v15081_v50 = vadd.f32 %v17813_v36, %v17812_v31  ;;  %v15093_v22 = vadd.f32 %v14887_v12, %v14882_v7  ;;  %v17820_v31 = vld [vmem:[#allocation19_spill] sm:$0xff]  ;;  %v17821_v36 = vld [vmem:[#allocation20_spill] sm:$0xff]  ;;  %v11183_v7 = vpop.f32.mrb[45].mxu1  ;;  %v4058_v12 = vrot.slane %v4056_v2, 4  ;;  %v15131_v2 = vadd.f32 %v17833_v18, %v17832_v10  ;;  %v17835_v40 = vld [vmem:[#allocation38_spill] sm:$0xff] }
 0x1c4   : > { %v15103_v56 = vadd.f32 %v17821_v36, %v17820_v31  ;;  %v17828_v31 = vld [vmem:[#allocation47_spill] sm:$0xff]  ;;  %v17829_v36 = vld [vmem:[#allocation48_spill] sm:$0xff]  ;;  %v11185_v44 = vpop.f32.mrb[46].mxu1  ;;  %17834 = vst [vmem:[#allocation60_spill] sm:$0xff] %v15135_v27  ;;  %v15139_v35 = vadd.f32 %v17836_v43, %v17835_v40  ;;  %v17840_v45 = vld [vmem:[#allocation69_spill] sm:$0xff]  ;;  %v15159_v40 = vadd.f32 %v11183_v7, %v11182_v38 }
 0x1c5   : > { %17817 = vst [vmem:[#allocation39_spill] sm:$0xff] %v15093_v22  ;;  %v15123_v22 = vadd.f32 %v17829_v36, %v17828_v31  ;;  %v11186_v25 = vpop.f32.mrb[47].mxu1  ;;  %v15141_v31 = vld [vmem:[#allocation2 + $0xc0] sm:$0xf]  ;;  %v15145_v36 = vadd.f32 %v15007_v23, %v15005_v57  ;;  %v17839_v33 = vld [vmem:[#allocation68_spill] sm:$0xff]  ;;  %v17842_v18 = vld [vmem:[#allocation58_spill] sm:$0xff]  ;;  %v4031_v23 = vsel %vm13062_vm12, %v15037_v48, %v15011_v20  ;;  %v10519_v48 = vcombine.low %v14933_v5, %v14731_v46 }
 0x1c6   : > { %17837 = vst [vmem:[#allocation43_spill] sm:$0xff] %v15139_v35  ;;  %v15149_v17 = vadd.f32 %v17840_v45, %v17839_v33  ;;  %v17841_v10 = vld [vmem:[#allocation57_spill] sm:$0xff]  ;;  %v17843_v16 = vld [vmem:[#allocation70_spill] sm:$0xff]  ;;  %v17844_v34 = vld [vmem:[#allocation71_spill] sm:$0xff]  ;;  %v15165_v57 = vadd.f32 %v11186_v25, %v11185_v44  ;;  %v4041_v33 = vsel %vm13062_vm12, %v4036_v41, %v15039_v42  ;;  %v4049_v45 = vor.u32 %v4048_v51, %v4045_v61 }
 0x1c7   : > { %17838 = vst [vmem:[#allocation44_spill] sm:$0xff] %v15145_v36  ;;  %v15153_v39 = vadd.f32 %v17842_v18, %v17841_v10  ;;  %v15157_v27 = vadd.f32 %v17844_v34, %v17843_v16  ;;  %17846 = vst [vmem:[#allocation46_spill] sm:$0xff] %v15159_v40  ;;  %v17847_v43 = vld [vmem:[#allocation59_spill] sm:$0xff]  ;;  %v4067_v38 = vshrl.u32 %v15141_v31, 16  ;;  %v4070_v7 = vshll.u32 %v15141_v31, 16  ;;  %v17852_v44 = vld [vmem:[#allocation66_spill] sm:$0xff] }
 0x1c8   : > { %v15163_v35 = vadd.f32 %v17848_v52, %v17847_v43  ;;  %17850 = vst [vmem:[#allocation52_spill] sm:$0xff] %v15165_v57  ;;  %v17851_v52 = vld [vmem:[#allocation67_spill] sm:$0xff]  ;;  %v4062_v18 = vshll.u32 %v17852_v44, 16  ;;  %v11046_v16 = vpop.f32.mrb[44].mxu0  ;;  %v10536_v42 = vcombine.low %v4031_v23, %v4041_v33  ;;  %v4050_v41 = vrot.slane %v4049_v45, 4 }
 0x1c9   : > { %17845 = vst [vmem:[#allocation45_spill] sm:$0xff] %v15157_v27  ;;  %v4076_v10 = vshll.u32 %v17851_v52, 16  ;;  %v4080_v25 = vshrl.u32 %v17851_v52, 16  ;;  %v11047_v20 = vpop.f32.mrb[45].mxu0  ;;  %v4069_v34 = vrot.slane %v4067_v38, 4  ;;  %v4072_v43 = vrot.slane %v4070_v7, 5 }
 0x1ca   : > { %17849 = vst [vmem:[#allocation51_spill] sm:$0xff] %v15163_v35  ;;  %4804 = vmatmul.mubr.bf16.gmra.mrb[136].mxu0 %v10518_v63  ;;  %v4059_v63 = vor.u32 %v4058_v12, %v15099_v21  ;;  %v11049_v61 = vpop.f32.mrb[46].mxu0  ;;  %v4064_v35 = vrot.slane %v4062_v18, 5  ;;  %v15186_v44 = vld [vmem:[#allocation2 + $0xcc] sm:$0xf]  ;;  %v4055_v46 = vsel %vm13062_vm12, %v4050_v41, %v15099_v21  ;;  %v4086_v5 = vshll.u32 %v14824_v28, 16 }
 0x1cb   : > { %4811 = vmatprep.mubr.bf16.mxu0 %v10535_v19  ;;  %v15182_v19 = vadd.f32 %v11047_v20, %v11046_v16  ;;  %v11050_v51 = vpop.f32.mrb[47].mxu0  ;;  %v4078_v36 = vrot.slane %v4076_v10, 5  ;;  %v4082_v57 = vrot.slane %v4080_v25, 4  ;;  %v4073_v33 = vor.u32 %v4072_v43, %v4069_v34 }
 0x1cc   : > { %v4060_v40 = vrot.slane %v4059_v63, 4  ;;  %v15184_v12 = vadd.f32 %v11050_v51, %v11049_v61  ;;  %v11188_v27 = vpop.f32.mrb[48].mxu1  ;;  %v4091_v38 = vshrl.u32 %v15186_v44, 16  ;;  %v4094_v63 = vshll.u32 %v15186_v44, 16 }
 0x1cd   : > { %v11189_v23 = vpop.f32.mrb[49].mxu1  ;;  %v4083_v45 = vor.u32 %v4082_v57, %v4078_v36  ;;  %v4100_v18 = vshll.u32 %v14846_v37, 16  ;;  %v4104_v21 = vshrl.u32 %v14846_v37, 16  ;;  %v10520_v57 = vcombine.low %v14970_v6, %v14753_v60 }
 0x1ce   : > { %v15193_v7 = vadd.f32 %v11189_v23, %v11188_v27  ;;  %v11191_v10 = vpop.f32.mrb[50].mxu1  ;;  %v4065_v25 = vsel %vm13062_vm12, %v4060_v40, %v4064_v35  ;;  %v4088_v20 = vrot.slane %v4086_v5, 5  ;;  %v4093_v51 = vrot.slane %v4091_v38, 4 }
 0x1cf   : > { %v11192_v16 = vpop.f32.mrb[51].mxu1  ;;  %v10537_v27 = vcombine.low %v4055_v46, %v4065_v25  ;;  %v4084_v41 = vrot.slane %v4083_v45, 4  ;;  %v4096_v34 = vrot.slane %v4094_v63, 5  ;;  %v4102_v43 = vrot.slane %v4100_v18, 5  ;;  %v5229_v46 = vld [vmem:[#allocation3 + $0xc] sm:$0x1] }
 0x1d0   : > { %17853 = vst [vmem:[#allocation53_spill] sm:$0xff] %v15193_v7  ;;  %v15200_v28 = vadd.f32 %v11192_v16, %v11191_v10  ;;  %v4106_v23 = vrot.slane %v4104_v21, 4  ;;  %v4110_v6 = vshll.u32 %v14889_v0, 16  ;;  %v5230_v38 = vsel %vm12954_vm3, 0, %v5229_v46 }
 0x1d1   : > { %v4089_v5 = vsel %vm13062_vm12, %v4084_v41, %v4088_v20  ;;  %5231 = vst [vmem:[#allocation3 + $0xc] sm:$0x1] %v5230_v38  ;;  %v10523_v38 = vcombine.low %v15186_v44, %v14846_v37  ;;  %v5289_v37 = vld [vmem:[#allocation3 + $0x2c] sm:$0x1] }
 0x1d2   : > { %4812 = vmatmul.mubr.bf16.gmra.mrb[140].mxu0 %v10519_v48  ;;  %v11052_v48 = vpop.f32.mrb[48].mxu0  ;;  %v4107_v45 = vor.u32 %v4106_v23, %v4102_v43  ;;  %v4112_v16 = vrot.slane %v4110_v6, 5  ;;  %v5290_v44 = vsel %vm12962_vm4, 0, %v5289_v37 }
 0x1d3   : > { %4819 = vmatprep.mubr.bf16.mxu0 %v10536_v42  ;;  %v4074_v42 = vrot.slane %v4073_v33, 4  ;;  %v11053_v61 = vpop.f32.mrb[49].mxu0  ;;  %v4097_v33 = vor.u32 %v4096_v34, %v4093_v51  ;;  %v5232_v34 = vld [vmem:[#allocation3 + $0x18] sm:$0x1]  ;;  %5291 = vst [vmem:[#allocation3 + $0x2c] sm:$0x1] %v5290_v44 }
 0x1d4   : > { %v15204_v35 = vadd.f32 %v11053_v61, %v11052_v48  ;;  %v11055_v40 = vpop.f32.mrb[50].mxu0  ;;  %v5241_v44 = vld [vmem:[#allocation3 + $0x3c] sm:$0x1] }
 0x1d5   : > { %v11056_v7 = vpop.f32.mrb[51].mxu0  ;;  %v4079_v60 = vsel %vm13062_vm12, %v4074_v42, %v4078_v36  ;;  %v4098_v21 = vrot.slane %v4097_v33, 4  ;;  %v4108_v36 = vrot.slane %v4107_v45, 4  ;;  %v10522_v42 = vcombine.low %v15141_v31, %v17851_v52  ;;  %v5286_v45 = vld [vmem:[#allocation3 + $0x20] sm:$0x1] }
 0x1d6   : > { %v15206_v10 = vadd.f32 %v11056_v7, %v11055_v40  ;;  %v10521_v7 = vcombine.low %v15028_v62, %v17790_v47  ;;  %v10538_v63 = vcombine.low %v4079_v60, %v4089_v5  ;;  %v5283_v47 = vld [vmem:[#allocation3 + $0x14] sm:$0x1] }
 0x1d7   : > { %v4113_v62 = vsel %vm13062_vm12, %v4108_v36, %v4112_v16  ;;  %v5284_v61 = vsel %vm12962_vm4, 0, %v5283_v47  ;;  %v5235_v36 = vld [vmem:[#allocation3 + $0x24] sm:$0x1] }
 0x1d8   : > { %v11194_v25 = vpop.f32.mrb[52].mxu1  ;;  %5285 = vst [vmem:[#allocation3 + $0x14] sm:$0x1] %v5284_v61  ;;  %v5236_v16 = vsel %vm12954_vm3, 0, %v5235_v36  ;;  %v12534_v47 = vld [vmem:[#allocation4 + $0xc8] sm:$0xff]  }
 0x1d9   : > { %v11195_v18 = vpop.f32.mrb[53].mxu1  ;;  %5237 = vst [vmem:[#allocation3 + $0x24] sm:$0x1] %v5236_v16  ;;  %v12540_v16 = vld [vmem:[#allocation4 + $0xd8] sm:$0xff]  }
 0x1da   : > { %4820 = vmatmul.mubr.bf16.gmra.mrb[144].mxu0 %v10520_v57  ;;  %v15217_v0 = vadd.f32 %v11195_v18, %v11194_v25  ;;  %v11197_v57 = vpop.f32.mrb[54].mxu1  ;;  %v5287_v25 = vsel %vm12962_vm4, 0, %v5286_v45  ;;  %v12530_v18 = vld [vmem:[#allocation4 + $0x100] sm:$0xff]  }
 0x1db   : > { %4827 = vmatprep.mubr.bf16.mxu0 %v10537_v27  ;;  %v11198_v48 = vpop.f32.mrb[55].mxu1  ;;  %v4103_v27 = vsel %vm13062_vm12, %v4098_v21, %v4102_v43  ;;  %v5233_v43 = vsel %vm12954_vm3, 0, %v5232_v34  ;;  %5288 = vst [vmem:[#allocation3 + $0x20] sm:$0x1] %v5287_v25  ;;  %v12531_v21 = vld [vmem:[#allocation4 + $0xc0] sm:$0xff]   ;;  %11372 = vmatprep.subr.bf16.mxu0 %v12530_v18 }
 0x1dc   : > { %v15219_v20 = vadd.f32 %v11198_v48, %v11197_v57  ;;  %v10539_v51 = vcombine.low %v4103_v27, %v4113_v62  ;;  %5234 = vst [vmem:[#allocation3 + $0x18] sm:$0x1] %v5233_v43  ;;  %11373 = vmatpush3.bf16.msra.mxu0 %v12531_v21  ;;  %v12532_v57 = vld [vmem:[#allocation4 + $0x140] sm:$0xff]   ;;  %v12533_v48 = vld [vmem:[#allocation4 + $0x108] sm:$0xff]  }
 0x1dd   : > { %11924 = vmatprep.subr.bf16.mxu1 %v12532_v57  ;;  %11374 = vmatprep.subr.bf16.mxu0 %v12533_v48  ;;  %v5292_v25 = vld [vmem:[#allocation3 + $0x38] sm:$0x1] }
 0x1de   : > { %11925 = vmatpush3.bf16.msra.mxu1 %v12532_v57  ;;  %v5293_v21 = vsel %vm12962_vm4, 0, %v5292_v25  ;;  %v12541_v57 = vld [vmem:[#allocation4 + $0x158] sm:$0xff]   ;;  %v12542_v48 = vld [vmem:[#allocation4 + $0x120] sm:$0xff]  }
 0x1df   : > { %5294 = vst [vmem:[#allocation3 + $0x38] sm:$0x1] %v5293_v21 }
 0x1e0   : > { %11375 = vmatpush3.bf16.msra.mxu0 %v12534_v47  ;;  %v5242_v47 = vsel %vm12954_vm3, 0, %v5241_v44 }
 0x1e1   : > { %v11058_v41 = vpop.f32.mrb[52].mxu0  ;;  %5243 = vst [vmem:[#allocation3 + $0x3c] sm:$0x1] %v5242_v47 }
 0x1e2   : > { %4828 = vmatmul.mubr.bf16.gmra.mrb[148].mxu0 %v10521_v7  ;;  %v11059_v40 = vpop.f32.mrb[53].mxu0 }
 0x1e3   : > { %4835 = vmatprep.mubr.bf16.mxu0 %v10538_v63  ;;  %v15229_v23 = vadd.f32 %v11059_v40, %v11058_v41  ;;  %v11061_v60 = vpop.f32.mrb[54].mxu0  ;;  %v12536_v41 = vld [vmem:[#allocation4 + $0x110] sm:$0xff]   ;;  %v5238_v40 = vld [vmem:[#allocation3 + $0x30] sm:$0x1] }
 0x1e4   : > { %v11062_v6 = vpop.f32.mrb[55].mxu0  ;;  %v5239_v43 = vsel %vm12954_vm3, 0, %v5238_v40  ;;  %11376 = vmatprep.subr.bf16.mxu0 %v12536_v41  ;;  %v12545_v40 = vld [vmem:[#allocation4 + $0x128] sm:$0xff]  }
 0x1e5   : > { %v15233_v46 = vadd.f32 %v11062_v6, %v11061_v60  ;;  %v11200_v31 = vpop.f32.mrb[56].mxu1  ;;  %v12537_v60 = vld [vmem:[#allocation4 + $0xd0] sm:$0xff]   ;;  %5240 = vst [vmem:[#allocation3 + $0x30] sm:$0x1] %v5239_v43 }
 0x1e6   : > { %v11201_v52 = vpop.f32.mrb[57].mxu1  ;;  %11377 = vmatpush3.bf16.msra.mxu0 %v12537_v60 }
 0x1e7   : > { %v15235_v5 = vadd.f32 %v11201_v52, %v11200_v31  ;;  %v11203_v33 = vpop.f32.mrb[58].mxu1 }
 0x1e8   : > { %v11204_v7 = vpop.f32.mrb[59].mxu1 }
 0x1e9   : > { %v15241_v63 = vadd.f32 %v11204_v7, %v11203_v33  ;;  %v12539_v7 = vld [vmem:[#allocation4 + $0x118] sm:$0xff]  }
 0x1ea   : > { %4836 = vmatmul.mubr.bf16.gmra.mrb[152].mxu0 %v10522_v42  ;;  %v12535_v42 = vld [vmem:[#allocation4 + $0x148] sm:$0xff]   ;;  %11378 = vmatprep.subr.bf16.mxu0 %v12539_v7  ;;  %v5244_v7 = vld [vmem:[#allocation3 + $0x48] sm:$0x1] }
 0x1eb   : > { %4843 = vmatprep.mubr.bf16.mxu0 %v10539_v51  ;;  %11926 = vmatprep.subr.bf16.mxu1 %v12535_v42  ;;  %v5245_v25 = vsel %vm12954_vm3, 0, %v5244_v7 }
 0x1ec   : > { %11927 = vmatpush3.bf16.msra.mxu1 %v12535_v42  ;;  %11379 = vmatpush3.bf16.msra.mxu0 %v12540_v16  ;;  %5246 = vst [vmem:[#allocation3 + $0x48] sm:$0x1] %v5245_v25 }
 0x1ed   : > { %11380 = vmatprep.subr.bf16.mxu0 %v12542_v48  ;;  %v12550_v48 = vld [vmem:[#allocation4 + $0x170] sm:$0xff]  }
 0x1f1   : > { %v11064_v27 = vpop.f32.mrb[56].mxu0 }
 0x1f2   : > { %4844 = vmatmul.mubr.bf16.gmra.mrb[156].mxu0 %v10523_v38  ;;  %v11065_v62 = vpop.f32.mrb[57].mxu0  ;;  %v12538_v38 = vld [vmem:[#allocation4 + $0x150] sm:$0xff]  }
 0x1f3   : > { %v15247_v61 = vadd.f32 %v11065_v62, %v11064_v27  ;;  %v11067_v51 = vpop.f32.mrb[58].mxu0  ;;  %11928 = vmatprep.subr.bf16.mxu1 %v12538_v38  ;;  %v12543_v62 = vld [vmem:[#allocation4 + $0xe0] sm:$0xff]  }
 0x1f4   : > { %v11068_v34 = vpop.f32.mrb[59].mxu0  ;;  %11929 = vmatpush3.bf16.msra.mxu1 %v12538_v38  ;;  %11381 = vmatpush3.bf16.msra.mxu0 %v12543_v62  ;;  %v12548_v38 = vld [vmem:[#allocation4 + $0x130] sm:$0xff]   ;;  %v5298_v62 = vld [vmem:[#allocation3 + $0x50] sm:$0x1] }
 0x1f5   : > { %v15251_v6 = vadd.f32 %v11068_v34, %v11067_v51  ;;  %11930 = vmatprep.subr.bf16.mxu1 %v12541_v57  ;;  %v12544_v51 = vld [vmem:[#allocation4 + $0x160] sm:$0xff]   ;;  %v5295_v34 = vld [vmem:[#allocation3 + $0x44] sm:$0x1]  ;;  %11382 = vmatprep.subr.bf16.mxu0 %v12545_v40 }
 0x1f6   : > { %v11206_v31 = vpop.f32.mrb[60].mxu1  ;;  %v5296_v43 = vsel %vm12962_vm4, 0, %v5295_v34 }
 0x1f7   : > { %v11207_v52 = vpop.f32.mrb[61].mxu1  ;;  %5297 = vst [vmem:[#allocation3 + $0x44] sm:$0x1] %v5296_v43 }
 0x1f8   : > { %v15253_v33 = vadd.f32 %v11207_v52, %v11206_v31  ;;  %v11209_v45 = vpop.f32.mrb[62].mxu1  ;;  %11931 = vmatpush3.bf16.msra.mxu1 %v12541_v57  ;;  %v12546_v52 = vld [vmem:[#allocation4 + $0xe8] sm:$0xff]   ;;  %v12549_v57 = vld [vmem:[#allocation4 + $0xf0] sm:$0xff]  }
 0x1f9   : > { %v11210_v18 = vpop.f32.mrb[63].mxu1  ;;  %11932 = vmatprep.subr.bf16.mxu1 %v12544_v51  ;;  %11383 = vmatpush3.bf16.msra.mxu0 %v12546_v52 }
 0x1fa   : > { %v15257_v36 = vadd.f32 %v11210_v18, %v11209_v45  ;;  %v12547_v45 = vld [vmem:[#allocation4 + $0x168] sm:$0xff]   ;;  %11384 = vmatprep.subr.bf16.mxu0 %v12548_v38 }
 0x1fc   : > { %11933 = vmatpush3.bf16.msra.mxu1 %v12544_v51 }
 0x1fd   : > { %11934 = vmatprep.subr.bf16.mxu1 %v12547_v45  ;;  %11385 = vmatpush3.bf16.msra.mxu0 %v12549_v57 }
 0x200   : > { %v11070_v37 = vpop.f32.mrb[60].mxu0  ;;  %11935 = vmatpush3.bf16.msra.mxu1 %v12547_v45 }
 0x201   : > { %v11071_v27 = vpop.f32.mrb[61].mxu0  ;;  %11936 = vmatprep.subr.bf16.mxu1 %v12550_v48 }
 0x202   : > { %v15261_v42 = vadd.f32 %v11071_v27, %v11070_v37  ;;  %v11073_v41 = vpop.f32.mrb[62].mxu0  ;;  %v12551_v27 = vld [vmem:[#allocation4 + $0x138] sm:$0xff]  }
 0x203   : > { %v11074_v60 = vpop.f32.mrb[63].mxu0  ;;  %11386 = vmatprep.subr.bf16.mxu0 %v12551_v27 }
 0x204   : > { %v15265_v31 = vadd.f32 %v11074_v60, %v11073_v41  ;;  %v12552_v60 = vld [vmem:[#allocation4 + $0xf8] sm:$0xff]   ;;  %11937 = vmatpush3.bf16.msra.mxu1 %v12550_v48 }
 0x205   : > { %11387 = vmatpush3.bf16.msra.mxu0 %v12552_v60 }
 0x208   : > { %v11798_v18 = vpop.f32.mrb[64].mxu0 }
 0x209   : > { %v3097_v21 = vadd.f32 %v11798_v18, %v15073_v14  ;;  %v3088_v16 = vpop.f32.mrb[65].mxu0  ;;  %v5299_v14 = vsel %vm12962_vm4, 0, %v5298_v62 }
 0x20a   : > { %v3089_v37 = vadd.f32 %v15077_v29, %v3088_v16  ;;  %v11799_v44 = vpop.f32.mrb[66].mxu0  ;;  %5300 = vst [vmem:[#allocation3 + $0x50] sm:$0x1] %v5299_v14 }
 0x20b   : > { %v15272_v47 = vadd.f32 %v14955_v58, %v3097_v21  ;;  %v3100_v41 = vadd.f32 %v11799_v44, %v15081_v50  ;;  %v3091_v51 = vpop.f32.mrb[67].mxu0  ;;  %v12553_v58 = vld [vmem:[#allocation4 + $0x178] sm:$0xff]   ;;  %v17854_v44 = vld [vmem:[#allocation43_spill] sm:$0xff] }
 0x20c   : > { %v15278_v40 = vadd.f32 %v14921_v49, %v3089_v37  ;;  %v3092_v29 = vadd.f32 %v15089_v15, %v3091_v51  ;;  %11938 = vmatprep.subr.bf16.mxu1 %v12553_v58 }
 0x20d   : > { %v15282_v34 = vadd.f32 %v14959_v30, %v3100_v41  ;;  %11939 = vmatpush3.bf16.msra.mxu1 %v12553_v58  ;;  %v5301_v41 = vld [vmem:[#allocation3 + $0x5c] sm:$0x1] }
 0x20e   : > { %v15285_v43 = vadd.f32 %v14929_v54, %v3092_v29  ;;  %v5247_v54 = vld [vmem:[#allocation3 + $0x54] sm:$0x1] }
 0x210   : > { %v11802_v50 = vpop.f32.mrb[68].mxu0 }
 0x211   : > { %v3113_v52 = vadd.f32 %v11802_v50, %v15097_v8  ;;  %v3104_v49 = vpop.f32.mrb[69].mxu0  ;;  %v5248_v8 = vsel %vm12954_vm3, 0, %v5247_v54  ;;  %v17857_v50 = vld [vmem:[#allocation33_spill] sm:$0xff]  ;;  %v17860_v54 = vld [vmem:[#allocation51_spill] sm:$0xff] }
 0x212   : > { %v3105_v15 = vadd.f32 %v15103_v56, %v3104_v49  ;;  %v11803_v45 = vpop.f32.mrb[70].mxu0  ;;  %5249 = vst [vmem:[#allocation3 + $0x54] sm:$0x1] %v5248_v8  ;;  %v17858_v49 = vld [vmem:[#allocation45_spill] sm:$0xff]  ;;  %v17861_v8 = vld [vmem:[#allocation34_spill] sm:$0xff] }
 0x213   : > { %v15290_v30 = vadd.f32 %v14993_v11, %v3113_v52  ;;  %v3116_v38 = vadd.f32 %v11803_v45, %v15107_v59  ;;  %v3107_v7 = vpop.f32.mrb[71].mxu0 }
 0x214   : > { %v15294_v25 = vadd.f32 %v14968_v32, %v3105_v15  ;;  %v3108_v18 = vadd.f32 %v15115_v53, %v3107_v7 }
 0x215   : > { %v15300_v21 = vadd.f32 %v15001_v3, %v3116_v38  ;;  %v17859_v38 = vld [vmem:[#allocation31_spill] sm:$0xff] }
 0x216   : > { %v15303_v56 = vadd.f32 %v14974_v1, %v3108_v18  ;;  %v17855_v1 = vld [vmem:[#allocation56_spill] sm:$0xff] }
 0x219   : > { %v11806_v11 = vpop.f32.mrb[72].mxu0 }
 0x21a   : > { %v3129_v59 = vadd.f32 %v11806_v11, %v15123_v22  ;;  %v3120_v16 = vpop.f32.mrb[73].mxu0  ;;  %v17856_v22 = vld [vmem:[#allocation25_spill] sm:$0xff] }
 0x21b   : > { %v3121_v57 = vadd.f32 %v15127_v4, %v3120_v16  ;;  %v11807_v32 = vpop.f32.mrb[74].mxu0  ;;  %v5302_v4 = vsel %vm12962_vm4, 0, %v5301_v41  ;;  %v17865_v41 = vld [vmem:[#allocation41_spill] sm:$0xff] }
 0x21c   : > { %v15308_v48 = vadd.f32 %v15048_v13, %v3129_v59  ;;  %v3132_v53 = vadd.f32 %v11807_v32, %v15131_v2  ;;  %v3123_v37 = vpop.f32.mrb[75].mxu0  ;;  %v5250_v13 = vld [vmem:[#allocation3 + $0x60] sm:$0x1]  ;;  %5303 = vst [vmem:[#allocation3 + $0x5c] sm:$0x1] %v5302_v4  ;;  %v17863_v32 = vld [vmem:[#allocation23_spill] sm:$0xff] }
 0x21d   : > { %v15312_v3 = vadd.f32 %v15015_v9, %v3121_v57  ;;  %v3124_v27 = vadd.f32 %v17854_v44, %v3123_v37  ;;  %v5251_v2 = vsel %vm12954_vm3, 0, %v5250_v13  ;;  %v5304_v59 = vld [vmem:[#allocation3 + $0x68] sm:$0x1]  ;;  %v17864_v44 = vld [vmem:[#allocation72_spill] sm:$0xff] }
 0x21e   : > { %v15316_v62 = vadd.f32 %v17855_v1, %v3132_v53  ;;  %5252 = vst [vmem:[#allocation3 + $0x60] sm:$0x1] %v5251_v2  ;;  %v17866_v4 = vld [vmem:[#allocation24_spill] sm:$0xff] }
 0x21f   : > { %v15319_v51 = vadd.f32 %v17856_v22, %v3124_v27 }
 0x221   : > { %v11810_v14 = vpop.f32.mrb[76].mxu0 }
 0x222   : > { %v3145_v9 = vadd.f32 %v11810_v14, %v15149_v17  ;;  %v3136_v29 = vpop.f32.mrb[77].mxu0  ;;  %v17862_v17 = vld [vmem:[#allocation32_spill] sm:$0xff]  ;;  %v17867_v14 = vld [vmem:[#allocation37_spill] sm:$0xff] }
 0x223   : > { %v3137_v60 = vadd.f32 %v15153_v39, %v3136_v29  ;;  %v11811_v58 = vpop.f32.mrb[78].mxu0  ;;  %v5305_v39 = vsel %vm12962_vm4, 0, %v5304_v59  ;;  %v17868_v29 = vld [vmem:[#allocation73_spill] sm:$0xff]  ;;  %v17871_v59 = vld [vmem:[#allocation27_spill] sm:$0xff] }
 0x224   : > { %v15328_v52 = vadd.f32 %v17857_v50, %v3145_v9  ;;  %v3148_v15 = vadd.f32 %v11811_v58, %v17858_v49  ;;  %v3139_v45 = vpop.f32.mrb[79].mxu0  ;;  %5306 = vst [vmem:[#allocation3 + $0x68] sm:$0x1] %v5305_v39  ;;  %v5253_v58 = vld [vmem:[#allocation3 + $0x6c] sm:$0x1]  ;;  %v17869_v50 = vld [vmem:[#allocation42_spill] sm:$0xff] }
 0x225   : > { %v15332_v7 = vadd.f32 %v17859_v38, %v3137_v60  ;;  %v3140_v18 = vadd.f32 %v17860_v54, %v3139_v45  ;;  %v17870_v45 = vld [vmem:[#allocation39_spill] sm:$0xff] }
 0x226   : > { %v15336_v11 = vadd.f32 %v17861_v8, %v3148_v15  ;;  %v5254_v15 = vsel %vm12954_vm3, 0, %v5253_v58 }
 0x227   : > { %v15339_v16 = vadd.f32 %v17862_v17, %v3140_v18  ;;  %5255 = vst [vmem:[#allocation3 + $0x6c] sm:$0x1] %v5254_v15 }
 0x22c   : > { %v11814_v57 = vpop.f32.mrb[80].mxu0 }
 0x22d   : > { %v3161_v53 = vadd.f32 %v11814_v57, %v17863_v32  ;;  %v3152_v37 = vpop.f32.mrb[81].mxu0  ;;  %v17872_v57 = vld [vmem:[#allocation46_spill] sm:$0xff] }
 0x22e   : > { %v3153_v27 = vadd.f32 %v17864_v44, %v3152_v37  ;;  %v11815_v1 = vpop.f32.mrb[82].mxu0  ;;  %v17873_v44 = vld [vmem:[#allocation60_spill] sm:$0xff] }
 0x22f   : > { %v15346_v22 = vadd.f32 %v17865_v41, %v3161_v53  ;;  %v3164_v13 = vadd.f32 %v11815_v1, %v17866_v4  ;;  %v3155_v2 = vpop.f32.mrb[83].mxu0  ;;  %v17874_v1 = vld [vmem:[#allocation54_spill] sm:$0xff]  ;;  %v17875_v4 = vld [vmem:[#allocation52_spill] sm:$0xff] }
 0x230   : > { %v15350_v9 = vadd.f32 %v17867_v14, %v3153_v27  ;;  %v3156_v60 = vadd.f32 %v17868_v29, %v3155_v2  ;;  %v5307_v2 = vld [vmem:[#allocation3 + $0x74] sm:$0x1] }
 0x231   : > { %v15354_v49 = vadd.f32 %v17869_v50, %v3164_v13  ;;  %v5308_v29 = vsel %vm12962_vm4, 0, %v5307_v2 }
 0x232   : > { %v15359_v38 = vadd.f32 %v17870_v45, %v3156_v60  ;;  %5309 = vst [vmem:[#allocation3 + $0x74] sm:$0x1] %v5308_v29  ;;  %v5256_v45 = vld [vmem:[#allocation3 + $0x78] sm:$0x1] }
 0x234   : > { %v11818_v54 = vpop.f32.mrb[84].mxu0 }
 0x235   : > { %v3177_v18 = vadd.f32 %v11818_v54, %v15182_v19  ;;  %v3168_v8 = vpop.f32.mrb[85].mxu0  ;;  %v17877_v19 = vld [vmem:[#allocation44_spill] sm:$0xff] }
 0x236   : > { %v3169_v17 = vadd.f32 %v17871_v59, %v3168_v8  ;;  %v11819_v39 = vpop.f32.mrb[86].mxu0  ;;  %v5257_v59 = vsel %vm12954_vm3, 0, %v5256_v45 }
 0x237   : > { %v15364_v32 = vadd.f32 %v17872_v57, %v3177_v18  ;;  %v3180_v53 = vadd.f32 %v11819_v39, %v15184_v12  ;;  %v3171_v37 = vpop.f32.mrb[87].mxu0  ;;  %5258 = vst [vmem:[#allocation3 + $0x78] sm:$0x1] %v5257_v59 }
 0x238   : > { %v15368_v27 = vadd.f32 %v17873_v44, %v3169_v17  ;;  %v3172_v41 = vadd.f32 %v17874_v1, %v3171_v37  ;;  %v17879_v17 = vld [vmem:[#allocation53_spill] sm:$0xff] }
 0x239   : > { %v15372_v13 = vadd.f32 %v17875_v4, %v3180_v53 }
 0x23a   : > { %v15375_v14 = vadd.f32 %v17877_v19, %v3172_v41 }
 0x23b   : > { %17876 = vst [vmem:[#allocation55_spill] sm:$0xff] %v15372_v13 }
 0x23c   : > { %v11822_v60 = vpop.f32.mrb[88].mxu0 }
 0x23d   : > { %v3193_v12 = vadd.f32 %v11822_v60, %v15229_v23  ;;  %v3184_v58 = vpop.f32.mrb[89].mxu0 }
 0x23e   : > { %v3185_v50 = vadd.f32 %v15204_v35, %v3184_v58  ;;  %v11823_v15 = vpop.f32.mrb[90].mxu0 }
 0x23f   : > { %v15382_v54 = vadd.f32 %v15217_v0, %v3193_v12  ;;  %v3196_v18 = vadd.f32 %v11823_v15, %v15233_v46  ;;  %v3187_v8 = vpop.f32.mrb[91].mxu0 }
 0x240   : > { %v15388_v39 = vadd.f32 %v17879_v17, %v3185_v50  ;;  %v3188_v57 = vadd.f32 %v15206_v10, %v3187_v8  ;;  %v15431_v17 = vld [vmem:[%s17649_s2] ss:$0 sm:$0xff] }
 0x241   : > { %17878 = vst [vmem:[#allocation62_spill] sm:$0xff] %v15382_v54  ;;  %v15392_v23 = vadd.f32 %v15219_v20, %v3196_v18  ;;  %v11894_v0 = vpop.f32.mrb[64].mxu1  ;;  %v5259_v18 = vld [vmem:[#allocation3 + $0x84] sm:$0x1] }
 0x242   : > { %17880 = vst [vmem:[#allocation63_spill] sm:$0xff] %v15388_v39  ;;  %v15395_v35 = vadd.f32 %v15200_v28, %v3188_v57  ;;  %v4886_v53 = vpop.f32.mrb[65].mxu1  ;;  %v5310_v28 = vld [vmem:[#allocation3 + $0x80] sm:$0x1] }
 0x243   : > { %17881 = vst [vmem:[#allocation64_spill] sm:$0xff] %v15392_v23  ;;  %v15397_v46 = vpop.f32.mrb[66].mxu1 }
 0x244   : > { %17882 = vst [vmem:[#allocation65_spill] sm:$0xff] %v15395_v35  ;;  %v4889_v41 = vpop.f32.mrb[67].mxu1 }
 0x245   : > { %v11826_v37 = vpop.f32.mrb[92].mxu0 }
 0x246   : > { %v3209_v44 = vadd.f32 %v11826_v37, %v15261_v42  ;;  %v3200_v1 = vpop.f32.mrb[93].mxu0  ;;  %v5311_v42 = vsel %vm12962_vm4, 0, %v5310_v28 }
 0x247   : > { %v3201_v4 = vadd.f32 %v15247_v61, %v3200_v1  ;;  %v11827_v2 = vpop.f32.mrb[94].mxu0  ;;  %5312 = vst [vmem:[#allocation3 + $0x80] sm:$0x1] %v5311_v42  ;;  %v15439_v1 = vld [vmem:[%s17650_s3] ss:$0 sm:$0xff] }
 0x248   : > { %v15402_v10 = vadd.f32 %v15253_v33, %v3209_v44  ;;  %v3212_v20 = vadd.f32 %v11827_v2, %v15265_v31  ;;  %v3203_v19 = vpop.f32.mrb[95].mxu0 }
 0x249   : > { %v15406_v29 = vadd.f32 %v15235_v5, %v3201_v4  ;;  %v3204_v60 = vadd.f32 %v15251_v6, %v3203_v19  ;;  %v15417_v33 = vpop.f32.mrb[68].mxu1 }
 0x24a   : > { %17883 = vst [vmem:[#allocation15_spill] sm:$0xff] %v15402_v10  ;;  %v15412_v12 = vadd.f32 %v15257_v36, %v3212_v20  ;;  %v15419_v31 = vpop.f32.mrb[69].mxu1  ;;  %v5260_v36 = vsel %vm12954_vm3, 0, %v5259_v18  ;;  %v5751_v10 = vld [vmem:[#allocation3 + $0xc] sm:$0xf] }
 0x24b   : > { %17884 = vst [vmem:[#allocation16_spill] sm:$0xff] %v15406_v29  ;;  %v15415_v61 = vadd.f32 %v15241_v63, %v3204_v60  ;;  %v15421_v50 = vpop.f32.mrb[70].mxu1  ;;  %5261 = vst [vmem:[#allocation3 + $0x84] sm:$0x1] %v5260_v36 }
 0x24c   : > { %17885 = vst [vmem:[#allocation11_spill] sm:$0xff] %v15412_v12  ;;  %v15423_v15 = vpop.f32.mrb[71].mxu1 }
 0x24d   : > { %17886 = vst [vmem:[#allocation12_spill] sm:$0xff] %v15415_v61  ;;  %v11252_v58 = vpop.f32.mrb[96].mxu0 }
 0x24e   : > { %v11253_v5 = vpop.f32.mrb[97].mxu0 }
 0x24f   : > { %v11254_v6 = vadd.f32 %v11253_v5, %v11252_v58  ;;  %v11255_v45 = vpop.f32.mrb[98].mxu0 }
 0x250   : > { %v11256_v8 = vpop.f32.mrb[99].mxu0 }
 0x251   : > { %v12074_v63 = vadd.f32 %v11254_v6, %v15278_v40  ;;  %v11257_v59 = vadd.f32 %v11256_v8, %v11255_v45  ;;  %v15434_v44 = vpop.f32.mrb[72].mxu1 }
 0x252   : > { %v15441_v4 = vpop.f32.mrb[73].mxu1 }
 0x253   : > { %v12075_v57 = vadd.f32 %v12074_v63, %v4886_v53  ;;  %v12082_v37 = vadd.f32 %v11257_v59, %v15285_v43  ;;  %v15444_v19 = vpop.f32.mrb[74].mxu1  ;;  %v5313_v53 = vld [vmem:[#allocation3 + $0x8c] sm:$0x1] }
 0x254   : > { %v15446_v60 = vpop.f32.mrb[75].mxu1  ;;  %v5314_v6 = vsel %vm12962_vm4, 0, %v5313_v53 }
 0x255   : > { %v5052_v40 = vmul.f32 %v12075_v57, %v15431_v17  ;;  %v12083_v2 = vadd.f32 %v12082_v37, %v4889_v41  ;;  %v11258_v20 = vpop.f32.mrb[100].mxu0  ;;  %5315 = vst [vmem:[#allocation3 + $0x8c] sm:$0x1] %v5314_v6 }
 0x256   : > { %v11259_v28 = vpop.f32.mrb[101].mxu0 }
 0x257   : > { %v5091_v43 = vadd.f32 %v15439_v1, %v5052_v40  ;;  %v5053_v42 = vmul.f32 %v12083_v2, %v15431_v17  ;;  %v11260_v58 = vadd.f32 %v11259_v28, %v11258_v20  ;;  %v11261_v5 = vpop.f32.mrb[102].mxu0  ;;  %v5262_v28 = vld [vmem:[#allocation3 + $0x90] sm:$0x1] }
 0x258   : > { %v11262_v45 = vpop.f32.mrb[103].mxu0 }
 0x259   : > { %vm5123_vm0 = vcmp.ge.f32.partialorder %v5091_v43, 0.0  ;;  %v5155_v41 = vmul.f32 0.01, %v5091_v43  ;;  %v5092_v18 = vadd.f32 %v15439_v1, %v5053_v42  ;;  %v12070_v8 = vadd.f32 %v11260_v58, %v15272_v47  ;;  %v15454_v37 = vpop.f32.mrb[76].mxu1 }
 0x25a   : > { %v11263_v36 = vadd.f32 %v11262_v45, %v11261_v5  ;;  %v15457_v20 = vpop.f32.mrb[77].mxu1  ;;  %v5263_v47 = vsel %vm12954_vm3, 0, %v5262_v28 }
 0x25b   : > { %v5187_v63 = vsel %vm5123_vm0, %v5091_v43, %v5155_v41  ;;  %vm5124_vm1 = vcmp.ge.f32.partialorder %v5092_v18, 0.0  ;;  %v5156_v59 = vmul.f32 0.01, %v5092_v18  ;;  %v12071_v57 = vadd.f32 %v12070_v8, %v11894_v0  ;;  %v15460_v42 = vpop.f32.mrb[78].mxu1  ;;  %5264 = vst [vmem:[#allocation3 + $0x90] sm:$0x1] %v5263_v47 }
 0x25c   : > { %v10932_v40 = vpack.c.bf16 %v5187_v63, %v5187_v63  ;;  %v12078_v2 = vadd.f32 %v11263_v36, %v15282_v34  ;;  %v15465_v45 = vpop.f32.mrb[79].mxu1 }
 0x25d   : > { %v5188_v53 = vsel %vm5124_vm1, %v5092_v18, %v5156_v59  ;;  %v5054_v6 = vmul.f32 %v12071_v57, %v15431_v17  ;;  %v11264_v12 = vpop.f32.mrb[104].mxu0 }
 0x25e   : > { %v5431_v43 = vshrl.u32 %v10932_v40, 16  ;;  %v10933_v58 = vpack.c.bf16 %v5188_v53, %v5188_v53  ;;  %v12079_v0 = vadd.f32 %v12078_v2, %v15397_v46  ;;  %v11265_v5 = vpop.f32.mrb[105].mxu0  ;;  %v5434_v36 = vshll.u32 %v10932_v40, 16 }
 0x25f   : > { %v5093_v34 = vadd.f32 %v15439_v1, %v5054_v6  ;;  %v11266_v41 = vadd.f32 %v11265_v5, %v11264_v12  ;;  %v11267_v18 = vpop.f32.mrb[106].mxu0  ;;  %v5755_v12 = vld [vmem:[#allocation3 + $0x14] sm:$0x1] }
 0x260   : > { %v5433_v8 = vrot.slane %v5431_v43, 7  ;;  %v5439_v63 = vshrl.u32 %v10933_v58, 16  ;;  %v5055_v59 = vmul.f32 %v12079_v0, %v15431_v17  ;;  %v11268_v57 = vpop.f32.mrb[107].mxu0  ;;  %v5442_v29 = vshll.u32 %v10933_v58, 16 }
 0x261   : > { %vm5125_vm2 = vcmp.ge.f32.partialorder %v5093_v34, 0.0  ;;  %v5157_v28 = vmul.f32 0.01, %v5093_v34  ;;  %v12090_v53 = vadd.f32 %v11266_v41, %v15294_v25  ;;  %v11269_v46 = vadd.f32 %v11268_v57, %v11267_v18  ;;  %v15473_v0 = vpop.f32.mrb[80].mxu1 }
 0x262   : > { %v5436_v2 = vor.u32 %v5434_v36, %v5433_v8  ;;  %v5441_v61 = vrot.slane %v5439_v63, 7  ;;  %v5094_v47 = vadd.f32 %v15439_v1, %v5055_v59  ;;  %v5437_v6 = vrot.slane %v5433_v8, 4  ;;  %v15477_v18 = vpop.f32.mrb[81].mxu1 }
 0x263   : > { %v5189_v5 = vsel %vm5125_vm2, %v5093_v34, %v5157_v28  ;;  %v12091_v40 = vadd.f32 %v12090_v53, %v15419_v31  ;;  %v12098_v43 = vadd.f32 %v11269_v46, %v15303_v56  ;;  %v15481_v36 = vpop.f32.mrb[82].mxu1  ;;  %v5316_v46 = vld [vmem:[#allocation3 + $0x98] sm:$0x1] }
 0x264   : > { %v5752_v54 = vsel %vm13038_vm10, %v5436_v2, %v5751_v10  ;;  %v5444_v35 = vor.u32 %v5442_v29, %v5441_v61  ;;  %v5446_v25 = vrot.slane %v5441_v61, 4  ;;  %v10934_v41 = vpack.c.bf16 %v5189_v5, %v5189_v5  ;;  %v15487_v59 = vpop.f32.mrb[83].mxu1 }
 0x265   : > { %5753 = vst [vmem:[#allocation3 + $0xc] sm:$0xf] %v5752_v54  ;;  %vm5126_vm6 = vcmp.ge.f32.partialorder %v5094_v47, 0.0  ;;  %v5158_v58 = vmul.f32 0.01, %v5094_v47  ;;  %v5056_v8 = vmul.f32 %v12091_v40, %v15431_v17  ;;  %v12099_v34 = vadd.f32 %v12098_v43, %v15423_v15  ;;  %v11270_v31 = vpop.f32.mrb[108].mxu0 }
 0x266   : > { %v5445_v63 = vsel %vm13032_vm9, %v5437_v6, %v5444_v35  ;;  %v5756_v10 = vsel %vm12954_vm3, %v5446_v25, %v5755_v12  ;;  %v5448_v29 = vshrl.u32 %v10934_v41, 16  ;;  %v11271_v61 = vpop.f32.mrb[109].mxu0  ;;  %v5451_v5 = vshll.u32 %v10934_v41, 16  ;;  %v5758_v40 = vld [vmem:[#allocation3 + $0x18] sm:$0xf] }
 0x267   : > { %5754 = vst [vmem:[#allocation3 + $0x10] sm:$0xf] %v5445_v63  ;;  %5757 = vst [vmem:[#allocation3 + $0x14] sm:$0x1] %v5756_v10  ;;  %v5190_v54 = vsel %vm5126_vm6, %v5094_v47, %v5158_v58  ;;  %v5095_v57 = vadd.f32 %v15439_v1, %v5056_v8  ;;  %v5057_v15 = vmul.f32 %v12099_v34, %v15431_v17  ;;  %v11273_v53 = vpop.f32.mrb[110].mxu0  ;;  %v5317_v12 = vsel %vm12962_vm4, 0, %v5316_v46 }
 0x268   : > { %v11272_v28 = vadd.f32 %v11271_v61, %v11270_v31  ;;  %v5450_v2 = vrot.slane %v5448_v29, 7  ;;  %v10935_v35 = vpack.c.bf16 %v5190_v54, %v5190_v54  ;;  %v11274_v6 = vpop.f32.mrb[111].mxu0  ;;  %5318 = vst [vmem:[#allocation3 + $0x98] sm:$0x1] %v5317_v12 }
 0x269   : > { %vm5127_vm7 = vcmp.ge.f32.partialorder %v5095_v57, 0.0  ;;  %v5159_v43 = vmul.f32 0.01, %v5095_v57  ;;  %v5096_v25 = vadd.f32 %v15439_v1, %v5057_v15  ;;  %v15496_v29 = vpop.f32.mrb[84].mxu1  ;;  %v11275_v15 = vadd.f32 %v11274_v6, %v11273_v53 }
 0x26a   : > { %v12086_v47 = vadd.f32 %v11272_v28, %v15290_v30  ;;  %v5453_v58 = vor.u32 %v5451_v5, %v5450_v2  ;;  %v5454_v8 = vrot.slane %v5450_v2, 4  ;;  %v5456_v34 = vshrl.u32 %v10935_v35, 16  ;;  %17889 = vst [vmem:[#allocation17_spill] sm:$0xff] %v15496_v29  ;;  %v15500_v30 = vpop.f32.mrb[85].mxu1  ;;  %v5762_v2 = vld [vmem:[#allocation3 + $0x20] sm:$0x1] }
 0x26b   : > { %v5459_v31 = vshll.u32 %v10935_v35, 16  ;;  %v5191_v63 = vsel %vm5127_vm7, %v5095_v57, %v5159_v43  ;;  %vm5128_vm8 = vcmp.ge.f32.partialorder %v5096_v25, 0.0  ;;  %v5160_v41 = vmul.f32 0.01, %v5096_v25  ;;  %v15505_v12 = vpop.f32.mrb[86].mxu1 }
 0x26c   : > { %v12087_v10 = vadd.f32 %v12086_v47, %v15417_v33  ;;  %v5759_v61 = vsel %vm13038_vm10, %v5453_v58, %v5758_v40  ;;  %v5458_v54 = vrot.slane %v5456_v34, 7  ;;  %v10936_v46 = vpack.c.bf16 %v5191_v63, %v5191_v63  ;;  %v7159_v26 = vld [vmem:[#allocation3 + $0xc] sm:$0xe]  ;;  %17890 = vst [vmem:[#allocation18_spill] sm:$0xff] %v15505_v12  ;;  %v15512_v39 = vpop.f32.mrb[87].mxu1 }
 0x26d   : > { %v15502_v28 = vld [vmem:[#allocation3 + $0xc] sm:$0xf]  ;;  %5760 = vst [vmem:[#allocation3 + $0x18] sm:$0xf] %v5759_v61  ;;  %v5192_v57 = vsel %vm5128_vm8, %v5096_v25, %v5160_v41  ;;  %v11276_v35 = vpop.f32.mrb[112].mxu0  ;;  %v10726_v33 = vrot.slane %v7159_v26, 9  ;;  %v12094_v25 = vadd.f32 %v11275_v15, %v15300_v21 }
 0x26e   : > { %v5058_v5 = vmul.f32 %v12087_v10, %v15431_v17  ;;  %v5461_v40 = vor.u32 %v5459_v31, %v5458_v54  ;;  %v5463_v47 = vrot.slane %v5458_v54, 4  ;;  %v5465_v58 = vshrl.u32 %v10936_v46, 16  ;;  %v11277_v6 = vpop.f32.mrb[113].mxu0  ;;  %v15508_v34 = vld [vmem:[#allocation3 + $0x10] sm:$0xf] }
 0x26f   : > { %v5468_v53 = vshll.u32 %v10936_v46, 16  ;;  %v10937_v63 = vpack.c.bf16 %v5192_v57, %v5192_v57  ;;  %v11278_v41 = vadd.f32 %v11277_v6, %v11276_v35  ;;  %v11279_v10 = vpop.f32.mrb[114].mxu0  ;;  %v5765_v46 = vld [vmem:[#allocation3 + $0x24] sm:$0xf]  ;;  %v7225_v12 = vrot.slane %v15508_v34, 5 }
 0x270   : > { %v5097_v61 = vadd.f32 %v15439_v1, %v5058_v5  ;;  %v5462_v26 = vsel %vm13032_vm9, %v5454_v8, %v5461_v40  ;;  %v5763_v31 = vsel %vm12954_vm3, %v5463_v47, %v5762_v2  ;;  %v5467_v54 = vrot.slane %v5465_v58, 7  ;;  %v11280_v43 = vpop.f32.mrb[115].mxu0 }
 0x271   : > { %5761 = vst [vmem:[#allocation3 + $0x1c] sm:$0xf] %v5462_v26  ;;  %5764 = vst [vmem:[#allocation3 + $0x20] sm:$0x1] %v5763_v31  ;;  %v5473_v57 = vshrl.u32 %v10937_v63, 16  ;;  %v5476_v5 = vshll.u32 %v10937_v63, 16  ;;  %v12095_v6 = vadd.f32 %v12094_v25, %v15421_v50  ;;  %v12106_v8 = vadd.f32 %v11278_v41, %v15312_v3 }
 0x272   : > { %vm5129_vm11 = vcmp.ge.f32.partialorder %v5097_v61, 0.0  ;;  %v5161_v21 = vmul.f32 0.01, %v5097_v61  ;;  %v5470_v15 = vor.u32 %v5468_v53, %v5467_v54  ;;  %v5471_v35 = vrot.slane %v5467_v54, 4  ;;  %v15525_v29 = vpop.f32.mrb[88].mxu1 }
 0x273   : > { %v5475_v40 = vrot.slane %v5473_v57, 7  ;;  %v11281_v2 = vadd.f32 %v11280_v43, %v11279_v10  ;;  %v15523_v58 = vsel %vm13945_vm15, %v10726_v33, %v7225_v12  ;;  %17892 = vst [vmem:[#allocation13_spill] sm:$0xff] %v15525_v29  ;;  %v5769_v26 = vld [vmem:[#allocation3 + $0x2c] sm:$0x1]  ;;  %v5059_v53 = vmul.f32 %v12095_v6, %v15431_v17  ;;  %v15531_v25 = vpop.f32.mrb[89].mxu1 }
 0x274   : > { %v5193_v13 = vsel %vm5129_vm11, %v5097_v61, %v5161_v21  ;;  %v5766_v63 = vsel %vm13038_vm10, %v5470_v15, %v5765_v46  ;;  %v12107_v50 = vadd.f32 %v12106_v8, %v15441_v4  ;;  %v7227_v41 = vrot.slane %v7225_v12, 4  ;;  %v15534_v10 = vpop.f32.mrb[90].mxu1  ;;  %v15538_v15 = vld [vmem:[#allocation3 + $0x14] sm:$0x1] }
 0x275   : > { %v10938_v31 = vpack.c.bf16 %v5193_v13, %v5193_v13  ;;  %5767 = vst [vmem:[#allocation3 + $0x24] sm:$0xf] %v5766_v63  ;;  %v5478_v3 = vor.u32 %v5476_v5, %v5475_v40  ;;  %v5480_v43 = vrot.slane %v5475_v40, 4  ;;  %v12114_v61 = vadd.f32 %v11281_v2, %v15319_v51  ;;  %v11282_v33 = vpop.f32.mrb[116].mxu0  ;;  %17893 = vst [vmem:[#allocation14_spill] sm:$0xff] %v15534_v10  ;;  %v15540_v4 = vpop.f32.mrb[91].mxu1 }
 0x276   : > { %v5098_v46 = vadd.f32 %v15439_v1, %v5059_v53  ;;  %v5060_v13 = vmul.f32 %v12107_v50, %v15431_v17  ;;  %v11283_v21 = vpop.f32.mrb[117].mxu0  ;;  %v5772_v53 = vld [vmem:[#allocation3 + $0x30] sm:$0xf] }
 0x277   : > { %v5482_v54 = vshrl.u32 %v10938_v31, 16  ;;  %v5485_v57 = vshll.u32 %v10938_v31, 16  ;;  %v5479_v5 = vsel %vm13032_vm9, %v5471_v35, %v5478_v3  ;;  %v5770_v51 = vsel %vm12954_vm3, %v5480_v43, %v5769_v26  ;;  %v11285_v8 = vpop.f32.mrb[118].mxu0 }
 0x278   : > { %v12115_v12 = vadd.f32 %v12114_v61, %v15446_v60  ;;  %v11284_v6 = vadd.f32 %v11283_v21, %v11282_v33  ;;  %5768 = vst [vmem:[#allocation3 + $0x28] sm:$0xf] %v5479_v5  ;;  %5771 = vst [vmem:[#allocation3 + $0x2c] sm:$0x1] %v5770_v51  ;;  %vm5130_vm13 = vcmp.ge.f32.partialorder %v5098_v46, 0.0  ;;  %v5099_v63 = vadd.f32 %v15439_v1, %v5060_v13  ;;  %v11286_v31 = vpop.f32.mrb[119].mxu0 }
 0x279   : > { %v5484_v40 = vrot.slane %v5482_v54, 7  ;;  %v5162_v2 = vmul.f32 0.01, %v5098_v46  ;;  %v7228_v3 = vrot.slane %v15538_v15, 5  ;;  %v11287_v26 = vadd.f32 %v11286_v31, %v11285_v8  ;;  %v15553_v13 = vpop.f32.mrb[92].mxu1 }
 0x27a   : > { %v5061_v50 = vmul.f32 %v12115_v12, %v15431_v17  ;;  %v12102_v35 = vadd.f32 %v11284_v6, %v15308_v48  ;;  %vm5131_vm14 = vcmp.ge.f32.partialorder %v5099_v63, 0.0  ;;  %v5163_v21 = vmul.f32 0.01, %v5099_v63  ;;  %17894 = vst [vmem:[#allocation26_spill] sm:$0xff] %v15553_v13  ;;  %v15564_v6 = vpop.f32.mrb[93].mxu1 }
 0x27b   : > { %v5487_v43 = vor.u32 %v5485_v57, %v5484_v40  ;;  %v5488_v60 = vrot.slane %v5484_v40, 4  ;;  %v5194_v61 = vsel %vm5130_vm13, %v5098_v46, %v5162_v2  ;;  %v7229_v48 = vsel %vm13945_vm15, %v7227_v41, %v7228_v3  ;;  %17896 = vst [vmem:[#allocation28_spill] sm:$0xff] %v15564_v6  ;;  %v15568_v31 = vpop.f32.mrb[94].mxu1  ;;  %v15586_v6 = vld [vmem:[#allocation4 + $0x80] sm:$0xff]  }
 0x27c   : > { %v10939_v33 = vpack.c.bf16 %v5194_v61, %v5194_v61  ;;  %v5100_v54 = vadd.f32 %v15439_v1, %v5061_v50  ;;  %v12103_v5 = vadd.f32 %v12102_v35, %v15434_v44  ;;  %v12110_v12 = vadd.f32 %v11287_v26, %v15316_v62  ;;  %17897 = vst [vmem:[#allocation19_spill] sm:$0xff] %v15568_v31  ;;  %v15574_v3 = vpop.f32.mrb[95].mxu1 }
 0x27d   : > { %v5773_v51 = vsel %vm13038_vm10, %v5487_v43, %v5772_v53  ;;  %v17895_v57 = vshrl.u32 %v15502_v28, 16  ;;  %v5195_v44 = vsel %vm5131_vm14, %v5099_v63, %v5163_v21  ;;  %v15566_v2 = vpop.f32.mrb[120].mxu0  ;;  %v10774_v62 = vcombine.low %v15523_v58, %v7229_v48  ;;  %17898 = vst [vmem:[#allocation20_spill] sm:$0xff] %v15574_v3  ;;  %v5776_v21 = vld [vmem:[#allocation3 + $0x38] sm:$0x1]  ;;  %11972 = vmatprep.subr.bf16.mxu1 %v15586_v6 }
 0x27e   : > { %5774 = vst [vmem:[#allocation3 + $0x30] sm:$0xf] %v5773_v51  ;;  %v5490_v8 = vshrl.u32 %v10939_v33, 16  ;;  %v5493_v40 = vshll.u32 %v10939_v33, 16  ;;  %vm5132_vm0 = vcmp.ge.f32.partialorder %v5100_v54, 0.0  ;;  %v10940_v53 = vpack.c.bf16 %v5195_v44, %v5195_v44  ;;  %v15572_v35 = vpop.f32.mrb[121].mxu0 }
 0x27f   : > { %v15562_v46 = vrot.slane %v17895_v57, 4  ;;  %v5164_v50 = vmul.f32 0.01, %v5100_v54  ;;  %v5062_v41 = vmul.f32 %v12103_v5, %v15431_v17  ;;  %v12111_v43 = vadd.f32 %v12110_v12, %v15444_v19  ;;  %v15579_v33 = vpop.f32.mrb[122].mxu0  ;;  %11940 = vmatprep.mubr.bf16.mxu1 %v10774_v62 }
 0x280   : > { %v5492_v26 = vrot.slane %v5490_v8, 7  ;;  %v6779_v63 = vshll.u32 %v15502_v28, 16  ;;  %v6785_v61 = vshll.u32 %v15508_v34, 16  ;;  %v5499_v51 = vshrl.u32 %v10940_v53, 16  ;;  %v15583_v48 = vpop.f32.mrb[123].mxu0 }
 0x281   : > { %v5502_v57 = vshll.u32 %v10940_v53, 16  ;;  %v5196_v5 = vsel %vm5132_vm0, %v5100_v54, %v5164_v50  ;;  %v5101_v58 = vadd.f32 %v15439_v1, %v5062_v41  ;;  %v5063_v19 = vmul.f32 %v12111_v43, %v15431_v17  ;;  %v5779_v50 = vld [vmem:[#allocation3 + $0x3c] sm:$0xf] }
 0x282   : > { %v5495_v44 = vor.u32 %v5493_v40, %v5492_v26  ;;  %v5497_v8 = vrot.slane %v5492_v26, 4  ;;  %v10941_v31 = vpack.c.bf16 %v5196_v5, %v5196_v5  ;;  %v5501_v12 = vrot.slane %v5499_v51, 7  ;;  %v5783_v5 = vld [vmem:[#allocation3 + $0x44] sm:$0x1] }
 0x283   : > { %vm5133_vm1 = vcmp.ge.f32.partialorder %v5101_v58, 0.0  ;;  %v5165_v13 = vmul.f32 0.01, %v5101_v58  ;;  %v6781_v3 = vrot.slane %v6779_v63, 5  ;;  %v5102_v51 = vadd.f32 %v15439_v1, %v5063_v19 }
 0x284   : > { %v5496_v53 = vsel %vm13032_vm9, %v5488_v60, %v5495_v44  ;;  %v5777_v54 = vsel %vm12954_vm3, %v5497_v8, %v5776_v21  ;;  %v5507_v41 = vshrl.u32 %v10941_v31, 16  ;;  %v5510_v62 = vshll.u32 %v10941_v31, 16 }
 0x285   : > { %5775 = vst [vmem:[#allocation3 + $0x34] sm:$0xf] %v5496_v53  ;;  %5778 = vst [vmem:[#allocation3 + $0x38] sm:$0x1] %v5777_v54  ;;  %v5504_v40 = vor.u32 %v5502_v57, %v5501_v12  ;;  %v5505_v26 = vrot.slane %v5501_v12, 4  ;;  %v5197_v43 = vsel %vm5133_vm1, %v5101_v58, %v5165_v13  ;;  %v6782_v60 = vor.u32 %v6781_v3, %v15562_v46  ;;  %v15595_v29 = vpop.f32.mrb[124].mxu0 }
 0x286   : > { %v5509_v63 = vrot.slane %v5507_v41, 7  ;;  %v10942_v10 = vpack.c.bf16 %v5197_v43, %v5197_v43  ;;  %v6787_v44 = vrot.slane %v6785_v61, 5  ;;  %vm5134_vm2 = vcmp.ge.f32.partialorder %v5102_v51, 0.0  ;;  %v15600_v13 = vpop.f32.mrb[125].mxu0 }
 0x287   : > { %v5780_v31 = vsel %vm13038_vm10, %v5504_v40, %v5779_v50  ;;  %v5166_v21 = vmul.f32 0.01, %v5102_v51  ;;  %v6789_v57 = vshrl.u32 %v15508_v34, 16  ;;  %v15602_v53 = vpop.f32.mrb[126].mxu0  ;;  %v6783_v3 = vrot.slane %v6782_v60, 4 }
 0x288   : > { %5781 = vst [vmem:[#allocation3 + $0x3c] sm:$0xf] %v5780_v31  ;;  %v5512_v58 = vor.u32 %v5510_v62, %v5509_v63  ;;  %v5514_v8 = vrot.slane %v5509_v63, 4  ;;  %v5516_v19 = vshrl.u32 %v10942_v10, 16  ;;  %v5519_v12 = vshll.u32 %v10942_v10, 16  ;;  %v15605_v41 = vpop.f32.mrb[127].mxu0 }
 0x289   : > { %v5198_v46 = vsel %vm5134_vm2, %v5102_v51, %v5166_v21  ;;  %v6791_v61 = vrot.slane %v6789_v57, 4  ;;  %v6795_v54 = vshll.u32 %v15538_v15, 16  ;;  %v15611_v63 = vld [vmem:[#allocation3 + $0x1c] sm:$0xf]  ;;  %v7160_v10 = vld [vmem:[#allocation3 + $0x18] sm:$0xe]  ;;  %v6788_v60 = vsel %vm13062_vm12, %v6783_v3, %v6787_v44 }
 0x28a   : > { %v5513_v50 = vsel %vm13032_vm9, %v5505_v26, %v5512_v58  ;;  %v5784_v40 = vsel %vm12954_vm3, %v5514_v8, %v5783_v5  ;;  %v5518_v43 = vrot.slane %v5516_v19, 7  ;;  %v10943_v62 = vpack.c.bf16 %v5198_v46, %v5198_v46  ;;  %v5786_v51 = vld [vmem:[#allocation3 + $0x48] sm:$0xf]  ;;  %v6760_v26 = vld [vmem:[#allocation3 + $0x20] sm:$0x1] }
 0x28b   : > { %5782 = vst [vmem:[#allocation3 + $0x40] sm:$0xf] %v5513_v50  ;;  %5785 = vst [vmem:[#allocation3 + $0x44] sm:$0x1] %v5784_v40  ;;  %v6792_v15 = vor.u32 %v6791_v61, %v6787_v44  ;;  %v6797_v31 = vrot.slane %v6795_v54, 5  ;;  %v10742_v21 = vcombine.low %v15502_v28, %v15508_v34  ;;  %v11290_v46 = vadd.f32 %v15572_v35, %v15566_v2 }
 0x28c   : > { %v5521_v57 = vor.u32 %v5519_v12, %v5518_v43  ;;  %v5522_v58 = vrot.slane %v5518_v43, 4  ;;  %v5524_v5 = vshrl.u32 %v10943_v62, 16  ;;  %v5527_v8 = vshll.u32 %v10943_v62, 16  ;;  %v15624_v34 = vld [vmem:[#allocation3 + $0x18] sm:$0xf] }
 0x28d   : > { %v6793_v19 = vrot.slane %v6792_v15, 4  ;;  %v10727_v50 = vrot.slane %v7160_v10, 9  ;;  %v7232_v40 = vrot.slane %v15611_v63, 5  ;;  %v7235_v61 = vrot.slane %v6760_v26, 5  ;;  %v15626_v12 = vpop.f32.mrb[128].mxu0 }
 0x28e   : > { %v5787_v3 = vsel %vm13038_vm10, %v5521_v57, %v5786_v51  ;;  %v5526_v44 = vrot.slane %v5524_v5, 7  ;;  %v11293_v28 = vadd.f32 %v15583_v48, %v15579_v33  ;;  %v5790_v54 = vld [vmem:[#allocation3 + $0x50] sm:$0x1]  ;;  %v12122_v35 = vadd.f32 %v11290_v46, %v15332_v7  ;;  %v15633_v10 = vpop.f32.mrb[129].mxu0 }
 0x28f   : > { %5788 = vst [vmem:[#allocation3 + $0x48] sm:$0xf] %v5787_v3  ;;  %v6798_v2 = vsel %vm13062_vm12, %v6793_v19, %v6797_v31  ;;  %v7233_v43 = vsel %vm13945_vm15, %v10727_v50, %v7232_v40  ;;  %v7234_v62 = vrot.slane %v7232_v40, 4  ;;  %v15636_v57 = vpop.f32.mrb[130].mxu0  ;;  %v6800_v7 = vshrl.u32 %v15624_v34, 16 }
 0x290   : > { %v5529_v51 = vor.u32 %v5527_v8, %v5526_v44  ;;  %v5531_v15 = vrot.slane %v5526_v44, 4  ;;  %v10758_v33 = vcombine.low %v6788_v60, %v6798_v2  ;;  %v12130_v48 = vadd.f32 %v11293_v28, %v15339_v16  ;;  %v15643_v46 = vpop.f32.mrb[131].mxu0  ;;  %v7161_v28 = vld [vmem:[#allocation3 + $0x24] sm:$0xe] }
 0x291   : > { %v12123_v5 = vadd.f32 %v12122_v35, %v15457_v20  ;;  %v7236_v31 = vsel %vm13945_vm15, %v7234_v62, %v7235_v61  ;;  %v6803_v19 = vshll.u32 %v15624_v34, 16  ;;  %v12564_v20 = vld [vmem:[#allocation4 + $0x88] sm:$0xff]   ;;  %v6802_v3 = vrot.slane %v6800_v7, 4 }
 0x292   : > { %v5530_v8 = vsel %vm13032_vm9, %v5522_v58, %v5529_v51  ;;  %v5791_v60 = vsel %vm12954_vm3, %v5531_v15, %v5790_v54  ;;  %7768 = vmatprep.mubr.bf16.mxu0 %v10758_v33  ;;  %v10775_v16 = vcombine.low %v7233_v43, %v7236_v31  ;;  %v12131_v50 = vadd.f32 %v12130_v48, %v15465_v45  ;;  %v15659_v51 = vld [vmem:[#allocation3 + $0x28] sm:$0xf] }
 0x293   : > { %5789 = vst [vmem:[#allocation3 + $0x4c] sm:$0xf] %v5530_v8  ;;  %5792 = vst [vmem:[#allocation3 + $0x50] sm:$0x1] %v5791_v60  ;;  %7769 = vmatmul.mubr.bf16.vlgmr.msra.gmra.mrb[160].mxu0 %v10742_v21  ;;  %v5064_v40 = vmul.f32 %v12123_v5, %v15431_v17  ;;  %v6805_v44 = vrot.slane %v6803_v19, 5  ;;  %v6809_v61 = vshll.u32 %v15611_v63, 16  ;;  %v10743_v45 = vcombine.low %v15624_v34, %v15611_v63 }
 0x294   : > { %11941 = vmatmul.mubr.bf16.vlgmr.msra.gmra.mrb[96].mxu1 %v10775_v16  ;;  %v5065_v58 = vmul.f32 %v12131_v50, %v15431_v17  ;;  %v6813_v54 = vshrl.u32 %v15611_v63, 16  ;;  %v6819_v2 = vshll.u32 %v6760_v26, 16  ;;  %v11296_v62 = vadd.f32 %v15600_v13, %v15595_v29  ;;  %v15663_v5 = vld [vmem:[#allocation3 + $0x2c] sm:$0x1] }
 0x295   : > { %v5103_v35 = vadd.f32 %v15439_v1, %v5064_v40  ;;  %v6806_v43 = vor.u32 %v6805_v44, %v6802_v3  ;;  %v6811_v21 = vrot.slane %v6809_v61, 5  ;;  %11973 = vmatpush3.bf16.msra.mxu1 %v15586_v6  ;;  %v10728_v26 = vrot.slane %v7161_v28, 9  ;;  %v15665_v31 = vpop.f32.mrb[132].mxu0  ;;  %v15677_v3 = vld [vmem:[#allocation3 + $0x24] sm:$0xf] }
 0x296   : > { %v5104_v15 = vadd.f32 %v15439_v1, %v5065_v58  ;;  %v6815_v33 = vrot.slane %v6813_v54, 4  ;;  %v6821_v48 = vrot.slane %v6819_v2, 5  ;;  %11974 = vmatprep.subr.bf16.mxu1 %v12564_v20  ;;  %v12118_v7 = vadd.f32 %v11296_v62, %v15328_v52  ;;  %v15668_v29 = vpop.f32.mrb[133].mxu0 }
 0x297   : > { %vm5135_vm6 = vcmp.ge.f32.partialorder %v5103_v35, 0.0  ;;  %v5167_v63 = vmul.f32 0.01, %v5103_v35  ;;  %v6807_v34 = vrot.slane %v6806_v43, 4  ;;  %v7239_v19 = vrot.slane %v15659_v51, 5  ;;  %v15671_v8 = vpop.f32.mrb[134].mxu0 }
 0x298   : > { %vm5136_vm7 = vcmp.ge.f32.partialorder %v5104_v15, 0.0  ;;  %v5168_v13 = vmul.f32 0.01, %v5104_v15  ;;  %v6816_v6 = vor.u32 %v6815_v33, %v6811_v21  ;;  %v12119_v50 = vadd.f32 %v12118_v7, %v15454_v37  ;;  %v15679_v52 = vpop.f32.mrb[135].mxu0  ;;  %v5793_v7 = vld [vmem:[#allocation3 + $0x54] sm:$0xf] }
 0x299   : > { %v5199_v60 = vsel %vm5135_vm6, %v5103_v35, %v5167_v63  ;;  %v6812_v16 = vsel %vm13062_vm12, %v6807_v34, %v6811_v21  ;;  %v7242_v40 = vrot.slane %v15663_v5, 5  ;;  %11975 = vmatpush3.bf16.msra.mxu1 %v12564_v20  ;;  %v7240_v58 = vsel %vm13945_vm15, %v10728_v26, %v7239_v19 }
 0x29a   : > { %v10944_v44 = vpack.c.bf16 %v5199_v60, %v5199_v60  ;;  %v5200_v61 = vsel %vm5136_vm7, %v5104_v15, %v5168_v13  ;;  %v6817_v28 = vrot.slane %v6816_v6, 4  ;;  %v5066_v2 = vmul.f32 %v12119_v50, %v15431_v17 }
 0x29b   : > { %v10945_v54 = vpack.c.bf16 %v5200_v61, %v5200_v61  ;;  %v7241_v35 = vrot.slane %v7239_v19, 4  ;;  %v11299_v37 = vadd.f32 %v15605_v41, %v15602_v53  ;;  %v6824_v20 = vshrl.u32 %v15677_v3, 16  ;;  %v5797_v61 = vld [vmem:[#allocation3 + $0x5c] sm:$0x1] }
 0x29c   : > { %v5533_v43 = vshrl.u32 %v10944_v44, 16  ;;  %v5536_v21 = vshll.u32 %v10944_v44, 16  ;;  %v6822_v62 = vsel %vm13062_vm12, %v6817_v28, %v6821_v48  ;;  %v5105_v34 = vadd.f32 %v15439_v1, %v5066_v2 }
 0x29d   : > { %v5541_v33 = vshrl.u32 %v10945_v54, 16  ;;  %v5544_v15 = vshll.u32 %v10945_v54, 16  ;;  %v10759_v63 = vcombine.low %v6812_v16, %v6822_v62  ;;  %v7243_v13 = vsel %vm13945_vm15, %v7241_v35, %v7242_v40  ;;  %v15693_v41 = vpop.f32.mrb[136].mxu0 }
 0x29e   : > { %v5535_v26 = vrot.slane %v5533_v43, 7  ;;  %v12126_v6 = vadd.f32 %v11299_v37, %v15336_v11  ;;  %v6826_v53 = vrot.slane %v6824_v20, 4  ;;  %vm5137_vm8 = vcmp.ge.f32.partialorder %v5105_v34, 0.0  ;;  %v15695_v50 = vpop.f32.mrb[137].mxu0 }
 0x29f   : > { %v5543_v19 = vrot.slane %v5541_v33, 7  ;;  %7776 = vmatprep.mubr.bf16.mxu0 %v10759_v63  ;;  %v5169_v48 = vmul.f32 0.01, %v5105_v34  ;;  %v10776_v60 = vcombine.low %v7240_v58, %v7243_v13  ;;  %v6827_v40 = vshll.u32 %v15677_v3, 16  ;;  %v15699_v54 = vpop.f32.mrb[138].mxu0  ;;  %v12566_v58 = vld [vmem:[#allocation4 + $0x90] sm:$0xff]  }
 0x2a0   : > { %v5538_v16 = vor.u32 %v5536_v21, %v5535_v26  ;;  %v5539_v44 = vrot.slane %v5535_v26, 4  ;;  %7777 = vmatmul.mubr.bf16.gmra.mrb[164].mxu0 %v10743_v45  ;;  %v12127_v28 = vadd.f32 %v12126_v6, %v15460_v42  ;;  %v6833_v37 = vshll.u32 %v15659_v51, 16  ;;  %v15702_v43 = vpop.f32.mrb[139].mxu0  ;;  %11976 = vmatprep.subr.bf16.mxu1 %v12566_v58  ;;  %v7162_v6 = vld [vmem:[#allocation3 + $0x30] sm:$0xe] }
 0x2a1   : > { %v5546_v11 = vor.u32 %v5544_v15, %v5543_v19  ;;  %v5548_v2 = vrot.slane %v5543_v19, 4  ;;  %v5201_v35 = vsel %vm5137_vm8, %v5105_v34, %v5169_v48  ;;  %11944 = vmatprep.mubr.bf16.mxu1 %v10776_v60  ;;  %v6829_v42 = vrot.slane %v6827_v40, 5  ;;  %11977 = vmatpush3.bf16.msra.mxu1 %v12566_v58  ;;  %v5800_v19 = vld [vmem:[#allocation3 + $0x60] sm:$0xf]  ;;  %v12568_v40 = vld [vmem:[#allocation4 + $0x98] sm:$0xff]  }
 0x2a2   : > { %v5794_v21 = vsel %vm13038_vm10, %v5538_v16, %v5793_v7  ;;  %v10946_v62 = vpack.c.bf16 %v5201_v35, %v5201_v35  ;;  %v5067_v45 = vmul.f32 %v12127_v28, %v15431_v17  ;;  %v6835_v15 = vrot.slane %v6833_v37, 5  ;;  %v15720_v28 = vld [vmem:[#allocation3 + $0x30] sm:$0xf]  ;;  %11978 = vmatprep.subr.bf16.mxu1 %v12568_v40 }
 0x2a3   : > { %5795 = vst [vmem:[#allocation3 + $0x54] sm:$0xf] %v5794_v21  ;;  %v5547_v20 = vsel %vm13032_vm9, %v5539_v44, %v5546_v11  ;;  %v5798_v33 = vsel %vm12954_vm3, %v5548_v2, %v5797_v61  ;;  %v6837_v63 = vshrl.u32 %v15659_v51, 16  ;;  %v6830_v13 = vor.u32 %v6829_v42, %v6826_v53  ;;  %v15718_v61 = vld [vmem:[#allocation3 + $0x34] sm:$0xf] }
 0x2a4   : > { %5796 = vst [vmem:[#allocation3 + $0x58] sm:$0xf] %v5547_v20  ;;  %5799 = vst [vmem:[#allocation3 + $0x5c] sm:$0x1] %v5798_v33  ;;  %v5550_v34 = vshrl.u32 %v10946_v62, 16  ;;  %v5553_v26 = vshll.u32 %v10946_v62, 16  ;;  %v5106_v7 = vadd.f32 %v15439_v1, %v5067_v45  ;;  %v10744_v16 = vcombine.low %v15677_v3, %v15659_v51 }
 0x2a5   : > { %v6839_v48 = vrot.slane %v6837_v63, 4  ;;  %v6843_v60 = vshll.u32 %v15663_v5, 16  ;;  %v11302_v44 = vadd.f32 %v15633_v10, %v15626_v12  ;;  %v6831_v2 = vrot.slane %v6830_v13, 4  ;;  %v15724_v35 = vpop.f32.mrb[140].mxu0  ;;  %v15727_v51 = vld [vmem:[#allocation3 + $0x38] sm:$0x1]  ;;  %11979 = vmatpush3.bf16.msra.mxu1 %v12568_v40 }
 0x2a6   : > { %v15722_v11 = vrot.slane %v5550_v34, 7  ;;  %vm5138_vm11 = vcmp.ge.f32.partialorder %v5106_v7, 0.0  ;;  %v5170_v53 = vmul.f32 0.01, %v5106_v7  ;;  %v10729_v3 = vrot.slane %v7162_v6, 9  ;;  %v15729_v12 = vpop.f32.mrb[141].mxu0 }
 0x2a7   : > { %v6840_v37 = vor.u32 %v6839_v48, %v6835_v15  ;;  %v6845_v5 = vrot.slane %v6843_v60, 5  ;;  %v12138_v58 = vadd.f32 %v11302_v44, %v15350_v9  ;;  %v6836_v45 = vsel %vm13062_vm12, %v6831_v2, %v6835_v15  ;;  %v15735_v42 = vpop.f32.mrb[142].mxu0 }
 0x2a8   : > { %v5555_v10 = vor.u32 %v5553_v26, %v15722_v11  ;;  %v5556_v21 = vrot.slane %v15722_v11, 4  ;;  %v5202_v62 = vsel %vm5138_vm11, %v5106_v7, %v5170_v53  ;;  %v7246_v63 = vrot.slane %v15718_v61, 5  ;;  %v15739_v34 = vpop.f32.mrb[143].mxu0  ;;  %v12570_v53 = vld [vmem:[#allocation4 + $0xa0] sm:$0xff]  }
 0x2a9   : > { %v10947_v20 = vpack.c.bf16 %v5202_v62, %v5202_v62  ;;  %v6841_v33 = vrot.slane %v6840_v37, 4  ;;  %v12139_v9 = vadd.f32 %v12138_v58, %v15477_v18  ;;  %v7249_v13 = vrot.slane %v15727_v51, 5  ;;  %v5804_v58 = vld [vmem:[#allocation3 + $0x68] sm:$0x1]  ;;  %11980 = vmatprep.subr.bf16.mxu1 %v12570_v53 }
 0x2aa   : > { %v5801_v26 = vsel %vm13038_vm10, %v5555_v10, %v5800_v19  ;;  %v11305_v7 = vadd.f32 %v15643_v46, %v15636_v57  ;;  %v6848_v15 = vshrl.u32 %v15720_v28, 16  ;;  %v7247_v40 = vsel %vm13945_vm15, %v10729_v3, %v7246_v63  ;;  %11981 = vmatpush3.bf16.msra.mxu1 %v12570_v53  ;;  %v15775_v53 = vld [vmem:[#allocation3 + $0x40] sm:$0xf] }
 0x2ab   : > { %5802 = vst [vmem:[#allocation3 + $0x60] sm:$0xf] %v5801_v26  ;;  %v5558_v6 = vshrl.u32 %v10947_v20, 16  ;;  %v5561_v48 = vshll.u32 %v10947_v20, 16  ;;  %v6846_v18 = vsel %vm13062_vm12, %v6841_v33, %v6845_v5  ;;  %v5068_v60 = vmul.f32 %v12139_v9, %v15431_v17 }
 0x2ac   : > { %v10760_v44 = vcombine.low %v6836_v45, %v6846_v18  ;;  %v7248_v19 = vrot.slane %v7246_v63, 4  ;;  %v12146_v11 = vadd.f32 %v11305_v7, %v15359_v38  ;;  %v6850_v46 = vrot.slane %v6848_v15, 4  ;;  %v7163_v7 = vld [vmem:[#allocation3 + $0x3c] sm:$0xe] }
 0x2ad   : > { %v5560_v2 = vrot.slane %v5558_v6, 7  ;;  %v5107_v57 = vadd.f32 %v15439_v1, %v5068_v60  ;;  %v6851_v37 = vshll.u32 %v15720_v28, 16  ;;  %v6857_v62 = vshll.u32 %v15718_v61, 16  ;;  %v15760_v45 = vpop.f32.mrb[144].mxu0 }
 0x2ae   : > { %7784 = vmatprep.mubr.bf16.mxu0 %v10760_v44  ;;  %v7250_v5 = vsel %vm13945_vm15, %v7248_v19, %v7249_v13  ;;  %v12147_v10 = vadd.f32 %v12146_v11, %v15487_v59  ;;  %v6861_v3 = vshrl.u32 %v15718_v61, 16  ;;  %v15762_v9 = vpop.f32.mrb[145].mxu0  ;;  %v12572_v44 = vld [vmem:[#allocation4 + $0x40] sm:$0xff]   ;;  %v6867_v11 = vshll.u32 %v15727_v51, 16 }
 0x2af   : > { %v5563_v38 = vor.u32 %v5561_v48, %v5560_v2  ;;  %v5565_v20 = vrot.slane %v5560_v2, 4  ;;  %7785 = vmatmul.mubr.bf16.gmra.mrb[168].mxu0 %v10744_v16  ;;  %vm5139_vm13 = vcmp.ge.f32.partialorder %v5107_v57, 0.0  ;;  %v5171_v33 = vmul.f32 0.01, %v5107_v57  ;;  %v15765_v15 = vpop.f32.mrb[146].mxu0  ;;  %11508 = vmatprep.subr.bf16.mxu0 %v12572_v44 }
 0x2b0   : > { %v10777_v63 = vcombine.low %v7247_v40, %v7250_v5  ;;  %v5069_v26 = vmul.f32 %v12147_v10, %v15431_v17  ;;  %v6853_v13 = vrot.slane %v6851_v37, 5  ;;  %v6859_v59 = vrot.slane %v6857_v62, 5  ;;  %v15771_v60 = vpop.f32.mrb[147].mxu0  ;;  %v12574_v10 = vld [vmem:[#allocation4 + $0xa8] sm:$0xff]  }
 0x2b1   : > { %v5564_v6 = vsel %vm13032_vm9, %v5556_v21, %v5563_v38  ;;  %v5805_v48 = vsel %vm12954_vm3, %v5565_v20, %v5804_v58  ;;  %v5203_v16 = vsel %vm5139_vm13, %v5107_v57, %v5171_v33  ;;  %v6863_v18 = vrot.slane %v6861_v3, 4  ;;  %v12573_v21 = vld [vmem:[#allocation4] sm:$0xff]   ;;  %v15781_v58 = vld [vmem:[#allocation3 + $0x44] sm:$0x1]  ;;  %11982 = vmatprep.subr.bf16.mxu1 %v12574_v10 }
 0x2b2   : > { %5803 = vst [vmem:[#allocation3 + $0x64] sm:$0xf] %v5564_v6  ;;  %5806 = vst [vmem:[#allocation3 + $0x68] sm:$0x1] %v5805_v48  ;;  %v10948_v40 = vpack.c.bf16 %v5203_v16, %v5203_v16  ;;  %11945 = vmatmul.mubr.bf16.gmra.mrb[100].mxu1 %v10777_v63  ;;  %v5108_v17 = vadd.f32 %v15439_v1, %v5069_v26  ;;  %v6854_v19 = vor.u32 %v6853_v13, %v6850_v46  ;;  %v12575_v62 = vld [vmem:[#allocation4 + $0x48] sm:$0xff]  }
 0x2b3   : > { %v6864_v2 = vor.u32 %v6863_v18, %v6859_v59  ;;  %v10745_v57 = vcombine.low %v15720_v28, %v15718_v61  ;;  %v11308_v37 = vadd.f32 %v15668_v29, %v15665_v31  ;;  %v10730_v5 = vrot.slane %v7163_v7, 9  ;;  %11509 = vmatpush3.bf16.msra.mxu0 %v12573_v21  ;;  %v12576_v3 = vld [vmem:[#allocation4 + $0x8] sm:$0xff]   ;;  %11983 = vmatpush3.bf16.msra.mxu1 %v12574_v10  ;;  %v5807_v13 = vld [vmem:[#allocation3 + $0x6c] sm:$0xf]  ;;  %v15795_v16 = vld [vmem:[#allocation3 + $0x3c] sm:$0xf] }
 0x2b4   : > { %v5567_v1 = vshrl.u32 %v10948_v40, 16  ;;  %v5570_v46 = vshll.u32 %v10948_v40, 16  ;;  %vm5140_vm14 = vcmp.ge.f32.partialorder %v5108_v17, 0.0  ;;  %v5172_v51 = vmul.f32 0.01, %v5108_v17  ;;  %11510 = vmatprep.subr.bf16.mxu0 %v12575_v62 }
 0x2b5   : > { %v6855_v38 = vrot.slane %v6854_v19, 4  ;;  %v6865_v20 = vrot.slane %v6864_v2, 4  ;;  %v6869_v33 = vrot.slane %v6867_v11, 5  ;;  %v12134_v61 = vadd.f32 %v11308_v37, %v15346_v22  ;;  %v15788_v26 = vpop.f32.mrb[148].mxu0 }
 0x2b6   : > { %v15784_v31 = vrot.slane %v5567_v1, 7  ;;  %v5204_v29 = vsel %vm5140_vm14, %v5108_v17, %v5172_v51  ;;  %v7253_v28 = vrot.slane %v15775_v53, 5  ;;  %v7256_v63 = vrot.slane %v15781_v58, 5  ;;  %v15797_v18 = vpop.f32.mrb[149].mxu0  ;;  %v12578_v51 = vld [vmem:[#allocation4 + $0x50] sm:$0xff]  }
 0x2b7   : > { %v10949_v7 = vpack.c.bf16 %v5204_v29, %v5204_v29  ;;  %v6860_v6 = vsel %vm13062_vm12, %v6855_v38, %v6859_v59  ;;  %v6870_v22 = vsel %vm13062_vm12, %v6865_v20, %v6869_v33  ;;  %v12135_v48 = vadd.f32 %v12134_v61, %v15473_v0  ;;  %v15803_v11 = vpop.f32.mrb[150].mxu0  ;;  %11511 = vmatpush3.bf16.msra.mxu0 %v12576_v3  ;;  %v15808_v0 = vld [vmem:[%s17649_s2] ss:$0 sm:$0xff]  ;;  %v5811_v29 = vld [vmem:[#allocation3 + $0x74] sm:$0x1] }
 0x2b8   : > { %v5572_v44 = vor.u32 %v5570_v46, %v15784_v31  ;;  %v5573_v40 = vrot.slane %v15784_v31, 4  ;;  %v10761_v17 = vcombine.low %v6860_v6, %v6870_v22  ;;  %v7254_v19 = vsel %vm13945_vm15, %v10730_v5, %v7253_v28  ;;  %v15811_v10 = vpop.f32.mrb[151].mxu0  ;;  %v12579_v3 = vld [vmem:[#allocation4 + $0x10] sm:$0xff]   ;;  %v12581_v31 = vld [vmem:[#allocation4 + $0x58] sm:$0xff]   ;;  %11512 = vmatprep.subr.bf16.mxu0 %v12578_v51 }
 0x2b9   : > { %v5575_v59 = vshrl.u32 %v10949_v7, 16  ;;  %v5578_v21 = vshll.u32 %v10949_v7, 16  ;;  %v5070_v2 = vmul.f32 %v15808_v0, %v12135_v48  ;;  %v7255_v37 = vrot.slane %v7253_v28, 4  ;;  %v15822_v20 = vld [vmem:[%s17650_s3] ss:$0 sm:$0xff] }
 0x2ba   : > { %v5808_v62 = vsel %vm13038_vm10, %v5572_v44, %v5807_v13  ;;  %7792 = vmatprep.mubr.bf16.mxu0 %v10761_v17  ;;  %v11311_v5 = vadd.f32 %v15679_v52, %v15671_v8  ;;  %v6872_v1 = vshrl.u32 %v15795_v16, 16  ;;  %v6875_v46 = vshll.u32 %v15795_v16, 16  ;;  %v12580_v52 = vld [vmem:[#allocation4 + $0xb0] sm:$0xff]   ;;  %v12582_v44 = vld [vmem:[#allocation4 + $0x18] sm:$0xff]  }
 0x2bb   : > { %5809 = vst [vmem:[#allocation3 + $0x6c] sm:$0xf] %v5808_v62  ;;  %v5577_v38 = vrot.slane %v5575_v59, 7  ;;  %7793 = vmatmul.mubr.bf16.gmra.mrb[172].mxu0 %v10745_v57  ;;  %v5109_v33 = vadd.f32 %v15822_v20, %v5070_v2  ;;  %v7257_v61 = vsel %vm13945_vm15, %v7255_v37, %v7256_v63  ;;  %v6881_v8 = vshll.u32 %v15775_v53, 16  ;;  %11984 = vmatprep.subr.bf16.mxu1 %v12580_v52  ;;  %v7164_v2 = vld [vmem:[#allocation3 + $0x48] sm:$0xe] }
 0x2bc   : > { %v10778_v28 = vcombine.low %v7254_v19, %v7257_v61  ;;  %v12142_v13 = vadd.f32 %v11311_v5, %v15354_v49  ;;  %v6874_v7 = vrot.slane %v6872_v1, 4  ;;  %v6877_v57 = vrot.slane %v6875_v46, 5  ;;  %11513 = vmatpush3.bf16.msra.mxu0 %v12579_v3  ;;  %v15840_v1 = vld [vmem:[#allocation3 + $0x4c] sm:$0xf]  ;;  %11985 = vmatpush3.bf16.msra.mxu1 %v12580_v52  ;;  %v15845_v61 = vld [vmem:[#allocation3 + $0x50] sm:$0x1] }
 0x2bd   : > { %v5580_v6 = vor.u32 %v5578_v21, %v5577_v38  ;;  %v5582_v22 = vrot.slane %v5577_v38, 4  ;;  %vm5141_vm0 = vcmp.ge.f32.partialorder %v5109_v33, 0.0  ;;  %v5173_v48 = vmul.f32 0.01, %v5109_v33  ;;  %v15833_v49 = vpop.f32.mrb[152].mxu0  ;;  %11514 = vmatprep.subr.bf16.mxu0 %v12581_v31 }
 0x2be   : > { %11948 = vmatprep.mubr.bf16.mxu1 %v10778_v28  ;;  %v12143_v63 = vadd.f32 %v12142_v13, %v15481_v36  ;;  %v6878_v17 = vor.u32 %v6877_v57, %v6874_v7  ;;  %v15830_v59 = vrot.slane %v6881_v8, 5  ;;  %v6885_v19 = vshrl.u32 %v15775_v53, 16  ;;  %v15842_v36 = vpop.f32.mrb[153].mxu0 }
 0x2bf   : > { %v5581_v21 = vsel %vm13032_vm9, %v5573_v40, %v5580_v6  ;;  %v5812_v37 = vsel %vm12954_vm3, %v5582_v22, %v5811_v29  ;;  %v5205_v62 = vsel %vm5141_vm0, %v5109_v33, %v5173_v48  ;;  %v6891_v5 = vshll.u32 %v15781_v58, 16  ;;  %v15847_v40 = vpop.f32.mrb[154].mxu0  ;;  %v12584_v29 = vld [vmem:[#allocation4 + $0x60] sm:$0xff]  }
 0x2c0   : > { %5810 = vst [vmem:[#allocation3 + $0x70] sm:$0xf] %v5581_v21  ;;  %5813 = vst [vmem:[#allocation3 + $0x74] sm:$0x1] %v5812_v37  ;;  %v10950_v46 = vpack.c.bf16 %v5205_v62, %v5205_v62  ;;  %v5071_v51 = vmul.f32 %v15808_v0, %v12143_v63  ;;  %v6879_v3 = vrot.slane %v6878_v17, 4  ;;  %v6887_v38 = vrot.slane %v6885_v19, 4  ;;  %11515 = vmatpush3.bf16.msra.mxu0 %v12582_v44 }
 0x2c1   : > { %v6893_v8 = vrot.slane %v6891_v5, 5  ;;  %v10746_v58 = vcombine.low %v15795_v16, %v15775_v53  ;;  %v11314_v33 = vadd.f32 %v15695_v50, %v15693_v41  ;;  %v10731_v31 = vrot.slane %v7164_v2, 9  ;;  %v15853_v52 = vpop.f32.mrb[155].mxu0  ;;  %11516 = vmatprep.subr.bf16.mxu0 %v12584_v29  ;;  %v12585_v50 = vld [vmem:[#allocation4 + $0x20] sm:$0xff]   ;;  %v12586_v44 = vld [vmem:[#allocation4 + $0xb8] sm:$0xff]   ;;  %v12587_v63 = vld [vmem:[#allocation4 + $0x68] sm:$0xff]  }
 0x2c2   : > { %v5584_v28 = vshrl.u32 %v10950_v46, 16  ;;  %v5587_v13 = vshll.u32 %v10950_v46, 16  ;;  %v5110_v7 = vadd.f32 %v15822_v20, %v5071_v51  ;;  %v6884_v57 = vsel %vm13062_vm12, %v6879_v3, %v15830_v59  ;;  %v5814_v21 = vld [vmem:[#allocation3 + $0x78] sm:$0xf]  ;;  %11986 = vmatprep.subr.bf16.mxu1 %v12586_v44  ;;  %v12588_v5 = vld [vmem:[#allocation4 + $0x28] sm:$0xff]   ;;  %v12595_v53 = vld [vmem:[#allocation4 + $0x38] sm:$0xff]  }
 0x2c3   : > { %v6888_v6 = vor.u32 %v6887_v38, %v15830_v59  ;;  %v12154_v22 = vadd.f32 %v11314_v33, %v15368_v27  ;;  %v7260_v48 = vrot.slane %v15840_v1, 5  ;;  %v7263_v41 = vrot.slane %v15845_v61, 5  ;;  %v15873_v33 = vld [vmem:[#allocation3 + $0x48] sm:$0xf]  ;;  %11987 = vmatpush3.bf16.msra.mxu1 %v12586_v44 }
 0x2c4   : > { %v15863_v17 = vrot.slane %v5584_v28, 7  ;;  %vm5142_vm1 = vcmp.ge.f32.partialorder %v5110_v7, 0.0  ;;  %v5174_v19 = vmul.f32 0.01, %v5110_v7  ;;  %v11317_v2 = vadd.f32 %v15702_v43, %v15699_v54  ;;  %11517 = vmatpush3.bf16.msra.mxu0 %v12585_v50 }
 0x2c5   : > { %v6889_v37 = vrot.slane %v6888_v6, 4  ;;  %v12155_v59 = vadd.f32 %v12154_v22, %v15500_v30  ;;  %v7261_v27 = vsel %vm13945_vm15, %v10731_v31, %v7260_v48  ;;  %v7262_v62 = vrot.slane %v7260_v48, 4  ;;  %v15875_v54 = vpop.f32.mrb[156].mxu0  ;;  %11518 = vmatprep.subr.bf16.mxu0 %v12587_v63 }
 0x2c6   : > { %v5589_v46 = vor.u32 %v5587_v13, %v15863_v17  ;;  %v5590_v51 = vrot.slane %v15863_v17, 4  ;;  %v5206_v3 = vsel %vm5142_vm1, %v5110_v7, %v5174_v19  ;;  %v12162_v38 = vadd.f32 %v11317_v2, %v15375_v14  ;;  %v15882_v28 = vpop.f32.mrb[157].mxu0  ;;  %v12591_v2 = vld [vmem:[#allocation4 + $0x30] sm:$0xff]  }
 0x2c7   : > { %v10951_v30 = vpack.c.bf16 %v5206_v3, %v5206_v3  ;;  %v6894_v43 = vsel %vm13062_vm12, %v6889_v37, %v6893_v8  ;;  %v5072_v31 = vmul.f32 %v15808_v0, %v12155_v59  ;;  %v7264_v29 = vsel %vm13945_vm15, %v7262_v62, %v7263_v41  ;;  %v15887_v22 = vpop.f32.mrb[158].mxu0  ;;  %v12590_v41 = vld [vmem:[#allocation4 + $0x70] sm:$0xff]   ;;  %v5818_v62 = vld [vmem:[#allocation3 + $0x80] sm:$0x1] }
 0x2c8   : > { %v5815_v14 = vsel %vm13038_vm10, %v5589_v46, %v5814_v21  ;;  %v10762_v13 = vcombine.low %v6884_v57, %v6894_v43  ;;  %v10779_v7 = vcombine.low %v7261_v27, %v7264_v29  ;;  %v12163_v6 = vadd.f32 %v12162_v38, %v15512_v39  ;;  %v15891_v63 = vpop.f32.mrb[159].mxu0  ;;  %11519 = vmatpush3.bf16.msra.mxu0 %v12588_v5  ;;  %v12592_v27 = vld [vmem:[#allocation4 + $0x1c0] sm:$0xff]  }
 0x2c9   : > { %5816 = vst [vmem:[#allocation3 + $0x78] sm:$0xf] %v5815_v14  ;;  %v5592_v48 = vshrl.u32 %v10951_v30, 16  ;;  %v5595_v50 = vshll.u32 %v10951_v30, 16  ;;  %v5111_v8 = vadd.f32 %v15822_v20, %v5072_v31  ;;  %v6896_v44 = vshrl.u32 %v15873_v33, 16  ;;  %11520 = vmatprep.subr.bf16.mxu0 %v12590_v41  ;;  %v12593_v30 = vld [vmem:[#allocation4 + $0x78] sm:$0xff]   ;;  %11644 = vmatprep.subr.bf16.mxu1 %v12592_v27 }
 0x2ca   : > { %7800 = vmatprep.mubr.bf16.mxu0 %v10762_v13  ;;  %11949 = vmatmul.mubr.bf16.gmra.mrb[104].mxu1 %v10779_v7  ;;  %v5073_v57 = vmul.f32 %v15808_v0, %v12163_v6  ;;  %v6899_v17 = vshll.u32 %v15873_v33, 16  ;;  %v6905_v39 = vshll.u32 %v15840_v1, 16  ;;  %v6909_v19 = vshrl.u32 %v15840_v1, 16 }
 0x2cb   : > { %v5594_v21 = vrot.slane %v5592_v48, 7  ;;  %7801 = vmatmul.mubr.bf16.gmra.mrb[176].mxu0 %v10746_v58  ;;  %vm5143_vm2 = vcmp.ge.f32.partialorder %v5111_v8, 0.0  ;;  %v5175_v37 = vmul.f32 0.01, %v5111_v8  ;;  %v6898_v59 = vrot.slane %v6896_v44, 4 }
 0x2cc   : > { %v5112_v5 = vadd.f32 %v15822_v20, %v5073_v57  ;;  %v6901_v46 = vrot.slane %v6899_v17, 5  ;;  %v6907_v3 = vrot.slane %v6905_v39, 5  ;;  %v6911_v38 = vrot.slane %v6909_v19, 4  ;;  %11521 = vmatpush3.bf16.msra.mxu0 %v12591_v2  ;;  %v15906_v44 = vld [vmem:[#allocation3 + $0x58] sm:$0xf] }
 0x2cd   : > { %v5597_v43 = vor.u32 %v5595_v50, %v5594_v21  ;;  %v5599_v31 = vrot.slane %v5594_v21, 4  ;;  %v5207_v29 = vsel %vm5143_vm2, %v5111_v8, %v5175_v37  ;;  %v6915_v14 = vshll.u32 %v15845_v61, 16  ;;  %11522 = vmatprep.subr.bf16.mxu0 %v12593_v30  ;;  %v7165_v8 = vld [vmem:[#allocation3 + $0x54] sm:$0xe] }
 0x2ce   : > { %v10952_v16 = vpack.c.bf16 %v5207_v29, %v5207_v29  ;;  %vm5144_vm6 = vcmp.ge.f32.partialorder %v5112_v5, 0.0  ;;  %v5176_v58 = vmul.f32 0.01, %v5112_v5  ;;  %v6902_v13 = vor.u32 %v6901_v46, %v6898_v59  ;;  %v6765_v59 = vld [vmem:[#allocation3 + $0x5c] sm:$0x1]  ;;  %v17899_v29 = vld [vmem:[#allocation17_spill] sm:$0xff] }
 0x2cf   : > { %v5598_v7 = vsel %vm13032_vm9, %v5590_v51, %v5597_v43  ;;  %v5819_v6 = vsel %vm12954_vm3, %v5599_v31, %v5818_v62  ;;  %v6912_v48 = vor.u32 %v6911_v38, %v6907_v3  ;;  %v6917_v50 = vrot.slane %v6915_v14, 5  ;;  %v5821_v46 = vld [vmem:[#allocation3 + $0x84] sm:$0xf] }
 0x2d0   : > { %5817 = vst [vmem:[#allocation3 + $0x7c] sm:$0xf] %v5598_v7  ;;  %5820 = vst [vmem:[#allocation3 + $0x80] sm:$0x1] %v5819_v6  ;;  %v5601_v61 = vshrl.u32 %v10952_v16, 16  ;;  %v5604_v41 = vshll.u32 %v10952_v16, 16  ;;  %v5208_v57 = vsel %vm5144_vm6, %v5112_v5, %v5176_v58  ;;  %v10747_v2 = vcombine.low %v15873_v33, %v15840_v1  ;;  %11523 = vmatpush3.bf16.msra.mxu0 %v12595_v53 }
 0x2d1   : > { %v6903_v17 = vrot.slane %v6902_v13, 4  ;;  %v10953_v39 = vpack.c.bf16 %v5208_v57, %v5208_v57  ;;  %v6913_v19 = vrot.slane %v6912_v48, 4  ;;  %v11320_v51 = vadd.f32 %v15729_v12, %v15724_v35  ;;  %v15918_v33 = vld [vmem:[#allocation3 + $0x54] sm:$0xf]  ;;  %v5825_v13 = vld [vmem:[#allocation3 + $0x8c] sm:$0x1] }
 0x2d2   : > { %v5603_v21 = vrot.slane %v5601_v61, 7  ;;  %v10732_v27 = vrot.slane %v7165_v8, 9  ;;  %v7267_v62 = vrot.slane %v15906_v44, 5  ;;  %v7270_v16 = vrot.slane %v6765_v59, 5  ;;  %v17900_v57 = vld [vmem:[#allocation55_spill] sm:$0xff] }
 0x2d3   : > { %v6908_v37 = vsel %vm13062_vm12, %v6903_v17, %v6907_v3  ;;  %v5609_v5 = vshrl.u32 %v10953_v39, 16  ;;  %v5612_v38 = vshll.u32 %v10953_v39, 16  ;;  %v6918_v30 = vsel %vm13062_vm12, %v6913_v19, %v6917_v50 }
 0x2d4   : > { %v12150_v1 = vadd.f32 %v11320_v51, %v15364_v32  ;;  %v5606_v35 = vor.u32 %v5604_v41, %v5603_v21  ;;  %v5607_v12 = vrot.slane %v5603_v21, 4  ;;  %v10763_v43 = vcombine.low %v6908_v37, %v6918_v30  ;;  %v17901_v21 = vld [vmem:[#allocation18_spill] sm:$0xff] }
 0x2d5   : > { %v7268_v3 = vsel %vm13945_vm15, %v10732_v27, %v7267_v62  ;;  %v5611_v31 = vrot.slane %v5609_v5, 7  ;;  %v7269_v53 = vrot.slane %v7267_v62, 4  ;;  %v11323_v32 = vadd.f32 %v15739_v34, %v15735_v42  ;;  %v5265_v5 = vld [vmem:[#allocation3 + $0x9c] sm:$0x1] }
 0x2d6   : > { %v12151_v14 = vadd.f32 %v12150_v1, %v17899_v29  ;;  %v5822_v58 = vsel %vm13038_vm10, %v5606_v35, %v5821_v46  ;;  %7808 = vmatprep.mubr.bf16.mxu0 %v10763_v43  ;;  %v6920_v7 = vshrl.u32 %v15918_v33, 16  ;;  %v6923_v6 = vshll.u32 %v15918_v33, 16 }
 0x2d7   : > { %5823 = vst [vmem:[#allocation3 + $0x84] sm:$0xf] %v5822_v58  ;;  %v5614_v48 = vor.u32 %v5612_v38, %v5611_v31  ;;  %v5616_v50 = vrot.slane %v5611_v31, 4  ;;  %7809 = vmatmul.mubr.bf16.gmra.mrb[180].mxu0 %v10747_v2  ;;  %v7271_v61 = vsel %vm13945_vm15, %v7269_v53, %v7270_v16  ;;  %v12158_v17 = vadd.f32 %v11323_v32, %v17900_v57  ;;  %v7166_v38 = vld [vmem:[#allocation3 + $0x60] sm:$0xe] }
 0x2d8   : > { %v5074_v8 = vmul.f32 %v15808_v0, %v12151_v14  ;;  %v10780_v41 = vcombine.low %v7268_v3, %v7271_v61  ;;  %v6922_v39 = vrot.slane %v6920_v7, 4  ;;  %v6925_v19 = vrot.slane %v6923_v6, 5  ;;  %v15946_v14 = vld [vmem:[#allocation3 + $0x68] sm:$0x1]  ;;  %v17902_v7 = vld [vmem:[#allocation63_spill] sm:$0xff] }
 0x2d9   : > { %v5615_v42 = vsel %vm13032_vm9, %v5607_v12, %v5614_v48  ;;  %v5826_v34 = vsel %vm12954_vm3, %v5616_v50, %v5825_v13  ;;  %v6929_v2 = vshll.u32 %v15906_v44, 16  ;;  %v12159_v37 = vadd.f32 %v12158_v17, %v17901_v21  ;;  %v15943_v12 = vld [vmem:[#allocation3 + $0x64] sm:$0xf] }
 0x2da   : > { %v5113_v51 = vadd.f32 %v15822_v20, %v5074_v8  ;;  %5824 = vst [vmem:[#allocation3 + $0x88] sm:$0xf] %v5615_v42  ;;  %5827 = vst [vmem:[#allocation3 + $0x8c] sm:$0x1] %v5826_v34  ;;  %11952 = vmatprep.mubr.bf16.mxu1 %v10780_v41  ;;  %v6926_v27 = vor.u32 %v6925_v19, %v6922_v39  ;;  %v6933_v62 = vshrl.u32 %v15906_v44, 16  ;;  %v6939_v46 = vshll.u32 %v6765_v59, 16 }
 0x2db   : > { %v6931_v1 = vrot.slane %v6929_v2, 5  ;;  %v10748_v35 = vcombine.low %v15918_v33, %v15906_v44  ;;  %v5075_v43 = vmul.f32 %v15808_v0, %v12159_v37  ;;  %v11326_v59 = vadd.f32 %v15762_v9, %v15760_v45  ;;  %v5319_v9 = vld [vmem:[#allocation3 + $0xa4] sm:$0x1] }
 0x2dc   : > { %vm5145_vm7 = vcmp.ge.f32.partialorder %v5113_v51, 0.0  ;;  %v5177_v30 = vmul.f32 0.01, %v5113_v51  ;;  %v6927_v3 = vrot.slane %v6926_v27, 4  ;;  %v6935_v31 = vrot.slane %v6933_v62, 4 }
 0x2dd   : > { %v6941_v29 = vrot.slane %v6939_v46, 5  ;;  %v5266_v16 = vsel %vm12954_vm3, 0, %v5265_v5  ;;  %v10733_v58 = vrot.slane %v7166_v38, 9  ;;  %v5114_v44 = vadd.f32 %v15822_v20, %v5075_v43  ;;  %v15971_v46 = vld [vmem:[#allocation3 + $0x60] sm:$0xf] }
 0x2de   : > { %v5209_v53 = vsel %vm5145_vm7, %v5113_v51, %v5177_v30  ;;  %v6932_v33 = vsel %vm13062_vm12, %v6927_v3, %v6931_v1  ;;  %v6936_v32 = vor.u32 %v6935_v31, %v6931_v1  ;;  %5267 = vst [vmem:[#allocation3 + $0x9c] sm:$0x1] %v5266_v16  ;;  %v12170_v6 = vadd.f32 %v11326_v59, %v17902_v7  ;;  %v17903_v51 = vld [vmem:[#allocation65_spill] sm:$0xff] }
 0x2df   : > { %v10954_v13 = vpack.c.bf16 %v5209_v53, %v5209_v53  ;;  %v7274_v48 = vrot.slane %v15943_v12, 5  ;;  %v7277_v50 = vrot.slane %v15946_v14, 5  ;;  %v11329_v45 = vadd.f32 %v15771_v60, %v15765_v15  ;;  %v5828_v15 = vld [vmem:[#allocation3 + $0x90] sm:$0xf] }
 0x2e0   : > { %vm5146_vm8 = vcmp.ge.f32.partialorder %v5114_v44, 0.0  ;;  %v5178_v41 = vmul.f32 0.01, %v5114_v44  ;;  %v6937_v57 = vrot.slane %v6936_v32, 4  ;;  %v12171_v17 = vadd.f32 %v12170_v6, %v15531_v25  ;;  %v5832_v32 = vld [vmem:[#allocation3 + $0x98] sm:$0x1] }
 0x2e1   : > { %v5618_v8 = vshrl.u32 %v10954_v13, 16  ;;  %v5621_v61 = vshll.u32 %v10954_v13, 16  ;;  %v7275_v39 = vsel %vm13945_vm15, %v10733_v58, %v7274_v48  ;;  %v7276_v19 = vrot.slane %v7274_v48, 4 }
 0x2e2   : > { %v5210_v34 = vsel %vm5146_vm8, %v5114_v44, %v5178_v41  ;;  %v12178_v2 = vadd.f32 %v11329_v45, %v17903_v51  ;;  %v5320_v37 = vsel %vm12962_vm4, 0, %v5319_v9  ;;  %v6942_v27 = vsel %vm13062_vm12, %v6937_v57, %v6941_v29 }
 0x2e3   : > { %v5620_v42 = vrot.slane %v5618_v8, 7  ;;  %v10955_v60 = vpack.c.bf16 %v5210_v34, %v5210_v34  ;;  %v5076_v62 = vmul.f32 %v15808_v0, %v12171_v17  ;;  %v7278_v25 = vsel %vm13945_vm15, %v7276_v19, %v7277_v50  ;;  %5321 = vst [vmem:[#allocation3 + $0xa4] sm:$0x1] %v5320_v37  ;;  %v5268_v17 = vld [vmem:[#allocation3 + $0xa8] sm:$0x1] }
 0x2e4   : > { %v10764_v30 = vcombine.low %v6932_v33, %v6942_v27  ;;  %v10781_v1 = vcombine.low %v7275_v39, %v7278_v25  ;;  %v12179_v53 = vadd.f32 %v12178_v2, %v15540_v4  ;;  %v6944_v59 = vshrl.u32 %v15971_v46, 16  ;;  %v7167_v34 = vld [vmem:[#allocation3 + $0x6c] sm:$0xe] }
 0x2e5   : > { %v5623_v5 = vor.u32 %v5621_v61, %v5620_v42  ;;  %v5624_v38 = vrot.slane %v5620_v42, 4  ;;  %v5626_v43 = vshrl.u32 %v10955_v60, 16  ;;  %v5629_v3 = vshll.u32 %v10955_v60, 16  ;;  %v15988_v60 = vld [vmem:[#allocation3 + $0x70] sm:$0xf] }
 0x2e6   : > { %v5115_v31 = vadd.f32 %v15822_v20, %v5076_v62  ;;  %7816 = vmatprep.mubr.bf16.mxu0 %v10764_v30  ;;  %11953 = vmatmul.mubr.bf16.gmra.mrb[108].mxu1 %v10781_v1  ;;  %v6947_v16 = vshll.u32 %v15971_v46, 16  ;;  %v6953_v58 = vshll.u32 %v15943_v12, 16  ;;  %v5077_v33 = vmul.f32 %v15808_v0, %v12179_v53  ;;  %v17905_v53 = vld [vmem:[#allocation62_spill] sm:$0xff] }
 0x2e7   : > { %v5829_v29 = vsel %vm13038_vm10, %v5623_v5, %v5828_v15  ;;  %v5628_v13 = vrot.slane %v5626_v43, 7  ;;  %7817 = vmatmul.mubr.bf16.gmra.mrb[184].mxu0 %v10748_v35  ;;  %v6946_v4 = vrot.slane %v6944_v59, 4  ;;  %v6957_v48 = vshrl.u32 %v15943_v12, 16  ;;  %v6767_v43 = vld [vmem:[#allocation3 + $0x74] sm:$0x1] }
 0x2e8   : > { %5830 = vst [vmem:[#allocation3 + $0x90] sm:$0xf] %v5829_v29  ;;  %vm5147_vm11 = vcmp.ge.f32.partialorder %v5115_v31, 0.0  ;;  %v5179_v44 = vmul.f32 0.01, %v5115_v31  ;;  %v6949_v7 = vrot.slane %v6947_v16, 5  ;;  %v5116_v8 = vadd.f32 %v15822_v20, %v5077_v33 }
 0x2e9   : > { %v6955_v6 = vrot.slane %v6953_v58, 5  ;;  %v5631_v50 = vor.u32 %v5629_v3, %v5628_v13  ;;  %v5633_v45 = vrot.slane %v5628_v13, 4  ;;  %v6959_v57 = vrot.slane %v6957_v48, 4  ;;  %v5322_v3 = vld [vmem:[#allocation3 + $0xb0] sm:$0x1]  ;;  %v17906_v33 = vld [vmem:[#allocation13_spill] sm:$0xff] }
 0x2ea   : > { %v5211_v9 = vsel %vm5147_vm11, %v5115_v31, %v5179_v44  ;;  %v6950_v41 = vor.u32 %v6949_v7, %v6946_v4  ;;  %v6963_v35 = vshll.u32 %v15946_v14, 16  ;;  %vm5148_vm13 = vcmp.ge.f32.partialorder %v5116_v8, 0.0  ;;  %v5835_v31 = vld [vmem:[#allocation3 + $0x9c] sm:$0xf]  ;;  %v16000_v13 = vld [vmem:[#allocation3 + $0x6c] sm:$0xf] }
 0x2eb   : > { %v10956_v61 = vpack.c.bf16 %v5211_v9, %v5211_v9  ;;  %v5632_v39 = vsel %vm13032_vm9, %v5624_v38, %v5631_v50  ;;  %v5833_v19 = vsel %vm12954_vm3, %v5633_v45, %v5832_v32  ;;  %v5180_v42 = vmul.f32 0.01, %v5116_v8  ;;  %v5839_v9 = vld [vmem:[#allocation3 + $0xa4] sm:$0x1] }
 0x2ec   : > { %5831 = vst [vmem:[#allocation3 + $0x94] sm:$0xf] %v5632_v39  ;;  %5834 = vst [vmem:[#allocation3 + $0x98] sm:$0x1] %v5833_v19  ;;  %v6951_v37 = vrot.slane %v6950_v41, 4  ;;  %v6960_v15 = vor.u32 %v6959_v57, %v6955_v6  ;;  %v6965_v14 = vrot.slane %v6963_v35, 5  ;;  %v10749_v62 = vcombine.low %v15971_v46, %v15943_v12 }
 0x2ed   : > { %v5635_v51 = vshrl.u32 %v10956_v61, 16  ;;  %v5638_v2 = vshll.u32 %v10956_v61, 16  ;;  %v5212_v27 = vsel %vm5148_vm13, %v5116_v8, %v5180_v42  ;;  %v11332_v25 = vadd.f32 %v15797_v18, %v15788_v26 }
 0x2ee   : > { %v10957_v38 = vpack.c.bf16 %v5212_v27, %v5212_v27  ;;  %v6956_v30 = vsel %vm13062_vm12, %v6951_v37, %v6955_v6  ;;  %v6961_v1 = vrot.slane %v6960_v15, 4  ;;  %v5269_v59 = vsel %vm12954_vm3, 0, %v5268_v17 }
 0x2ef   : > { %v5637_v5 = vrot.slane %v5635_v51, 7  ;;  %v12166_v29 = vadd.f32 %v11332_v25, %v17905_v53  ;;  %v10734_v16 = vrot.slane %v7167_v34, 9  ;;  %v7281_v12 = vrot.slane %v15988_v60, 5  ;;  %5270 = vst [vmem:[#allocation3 + $0xa8] sm:$0x1] %v5269_v59  ;;  %v17907_v51 = vld [vmem:[#allocation64_spill] sm:$0xff] }
 0x2f0   : > { %v5643_v26 = vshrl.u32 %v10957_v38, 16  ;;  %v5646_v18 = vshll.u32 %v10957_v38, 16  ;;  %v6966_v44 = vsel %vm13062_vm12, %v6961_v1, %v6965_v14  ;;  %v7284_v45 = vrot.slane %v6767_v43, 5  ;;  %v5271_v38 = vld [vmem:[#allocation3 + $0xb4] sm:$0x1] }
 0x2f1   : > { %v5640_v46 = vor.u32 %v5638_v2, %v5637_v5  ;;  %v5641_v58 = vrot.slane %v5637_v5, 4  ;;  %v12167_v32 = vadd.f32 %v12166_v29, %v17906_v33  ;;  %v7282_v4 = vsel %vm13945_vm15, %v10734_v16, %v7281_v12  ;;  %v7168_v53 = vld [vmem:[#allocation3 + $0x78] sm:$0xe] }
 0x2f2   : > { %v7283_v7 = vrot.slane %v7281_v12, 4  ;;  %v5645_v48 = vrot.slane %v5643_v26, 7  ;;  %v10765_v50 = vcombine.low %v6956_v30, %v6966_v44  ;;  %v11335_v61 = vadd.f32 %v15811_v10, %v15803_v11 }
 0x2f3   : > { %v5836_v6 = vsel %vm13038_vm10, %v5640_v46, %v5835_v31  ;;  %v5078_v8 = vmul.f32 %v15808_v0, %v12167_v32  ;;  %v5323_v41 = vsel %vm12962_vm4, 0, %v5322_v3  ;;  %v6968_v57 = vshrl.u32 %v16000_v13, 16  ;;  %v16032_v46 = vld [vmem:[#allocation3 + $0x7c] sm:$0xf]  ;;  %v6768_v32 = vld [vmem:[#allocation3 + $0x80] sm:$0x1] }
 0x2f4   : > { %5837 = vst [vmem:[#allocation3 + $0x9c] sm:$0xf] %v5836_v6  ;;  %v5648_v35 = vor.u32 %v5646_v18, %v5645_v48  ;;  %v5650_v17 = vrot.slane %v5645_v48, 4  ;;  %7824 = vmatprep.mubr.bf16.mxu0 %v10765_v50  ;;  %v7285_v39 = vsel %vm13945_vm15, %v7283_v7, %v7284_v45  ;;  %5324 = vst [vmem:[#allocation3 + $0xb0] sm:$0x1] %v5323_v41  ;;  %v6971_v19 = vshll.u32 %v16000_v13, 16 }
 0x2f5   : > { %7825 = vmatmul.mubr.bf16.gmra.mrb[188].mxu0 %v10749_v62  ;;  %v5117_v42 = vadd.f32 %v15822_v20, %v5078_v8  ;;  %v10782_v34 = vcombine.low %v7282_v4, %v7285_v39  ;;  %v12174_v11 = vadd.f32 %v11335_v61, %v17907_v51  ;;  %v6970_v10 = vrot.slane %v6968_v57, 4  ;;  %v17908_v62 = vld [vmem:[#allocation14_spill] sm:$0xff]  ;;  %v17910_v45 = vld [vmem:[#allocation28_spill] sm:$0xff] }
 0x2f6   : > { %v5649_v2 = vsel %vm13032_vm9, %v5641_v58, %v5648_v35  ;;  %v5840_v37 = vsel %vm12954_vm3, %v5650_v17, %v5839_v9  ;;  %v6973_v15 = vrot.slane %v6971_v19, 5  ;;  %v6977_v27 = vshll.u32 %v15988_v60, 16  ;;  %v5325_v35 = vld [vmem:[#allocation3 + $0xbc] sm:$0x1]  ;;  %v5842_v17 = vld [vmem:[#allocation3 + $0xa8] sm:$0xf] }
 0x2f7   : > { %5838 = vst [vmem:[#allocation3 + $0xa0] sm:$0xf] %v5649_v2  ;;  %5841 = vst [vmem:[#allocation3 + $0xa4] sm:$0x1] %v5840_v37  ;;  %vm5149_vm14 = vcmp.ge.f32.partialorder %v5117_v42, 0.0  ;;  %11956 = vmatprep.mubr.bf16.mxu1 %v10782_v34  ;;  %v12175_v25 = vadd.f32 %v12174_v11, %v17908_v62  ;;  %v6981_v5 = vshrl.u32 %v15988_v60, 16  ;;  %v10750_v31 = vcombine.low %v16000_v13, %v15988_v60 }
 0x2f8   : > { %v5181_v14 = vmul.f32 0.01, %v5117_v42  ;;  %v6974_v30 = vor.u32 %v6973_v15, %v6970_v10  ;;  %v6979_v1 = vrot.slane %v6977_v27, 5  ;;  %v6987_v3 = vshll.u32 %v6767_v43, 16  ;;  %v17909_v60 = vld [vmem:[#allocation16_spill] sm:$0xff] }
 0x2f9   : > { %v5079_v59 = vmul.f32 %v15808_v0, %v12175_v25  ;;  %v6983_v16 = vrot.slane %v6981_v5, 4  ;;  %v11338_v12 = vadd.f32 %v15842_v36, %v15833_v49  ;;  %v5272_v44 = vsel %vm12954_vm3, 0, %v5271_v38  ;;  %v16049_v37 = vld [vmem:[#allocation3 + $0x78] sm:$0xf] }
 0x2fa   : > { %v5213_v29 = vsel %vm5149_vm14, %v5117_v42, %v5181_v14  ;;  %v6975_v26 = vrot.slane %v6974_v30, 4  ;;  %v6989_v18 = vrot.slane %v6987_v3, 5  ;;  %5273 = vst [vmem:[#allocation3 + $0xb4] sm:$0x1] %v5272_v44  ;;  %v10735_v4 = vrot.slane %v7168_v53, 9  ;;  %v17911_v14 = vld [vmem:[#allocation12_spill] sm:$0xff] }
 0x2fb   : > { %v10958_v58 = vpack.c.bf16 %v5213_v29, %v5213_v29  ;;  %v5118_v43 = vadd.f32 %v15822_v20, %v5079_v59  ;;  %v6984_v33 = vor.u32 %v6983_v16, %v6979_v1  ;;  %v12186_v13 = vadd.f32 %v11338_v12, %v17909_v60 }
 0x2fc   : > { %v6980_v49 = vsel %vm13062_vm12, %v6975_v26, %v6979_v1  ;;  %v7288_v36 = vrot.slane %v16032_v46, 5  ;;  %v7291_v57 = vrot.slane %v6768_v32, 5  ;;  %v11341_v34 = vadd.f32 %v15853_v52, %v15847_v40  ;;  %v17912_v1 = vld [vmem:[#allocation20_spill] sm:$0xff] }
 0x2fd   : > { %v5652_v7 = vshrl.u32 %v10958_v58, 16  ;;  %v5655_v6 = vshll.u32 %v10958_v58, 16  ;;  %vm5150_vm0 = vcmp.ge.f32.partialorder %v5118_v43, 0.0  ;;  %v5182_v48 = vmul.f32 0.01, %v5118_v43 }
 0x2fe   : > { %v6985_v50 = vrot.slane %v6984_v33, 4  ;;  %v12187_v9 = vadd.f32 %v12186_v13, %v17910_v45  ;;  %v7289_v61 = vsel %vm13945_vm15, %v10735_v4, %v7288_v36  ;;  %v7290_v41 = vrot.slane %v7288_v36, 4  ;;  %v5846_v58 = vld [vmem:[#allocation3 + $0xb0] sm:$0x1]  ;;  %v5274_v36 = vld [vmem:[#allocation3 + $0xc0] sm:$0x1] }
 0x2ff   : > { %v5654_v8 = vrot.slane %v5652_v7, 7  ;;  %v5214_v39 = vsel %vm5150_vm0, %v5118_v43, %v5182_v48  ;;  %v12194_v62 = vadd.f32 %v11341_v34, %v17911_v14  ;;  %v5326_v25 = vsel %vm12962_vm4, 0, %v5325_v35 }
 0x300   : > { %v6990_v19 = vsel %vm13062_vm12, %v6985_v50, %v6989_v18  ;;  %v5080_v42 = vmul.f32 %v15808_v0, %v12187_v9  ;;  %v10959_v10 = vpack.c.bf16 %v5214_v39, %v5214_v39  ;;  %v7292_v27 = vsel %vm13945_vm15, %v7290_v41, %v7291_v57  ;;  %5327 = vst [vmem:[#allocation3 + $0xbc] sm:$0x1] %v5326_v25 }
 0x301   : > { %v5657_v51 = vor.u32 %v5655_v6, %v5654_v8  ;;  %v5658_v11 = vrot.slane %v5654_v8, 4  ;;  %v10766_v2 = vcombine.low %v6980_v49, %v6990_v19  ;;  %v10783_v38 = vcombine.low %v7289_v61, %v7292_v27  ;;  %v7169_v8 = vld [vmem:[#allocation3 + $0x84] sm:$0xe]  ;;  %v16076_v19 = vld [vmem:[#allocation3 + $0x88] sm:$0xf] }
 0x302   : > { %v5119_v15 = vadd.f32 %v15822_v20, %v5080_v42  ;;  %v5660_v40 = vshrl.u32 %v10959_v10, 16  ;;  %v5663_v52 = vshll.u32 %v10959_v10, 16  ;;  %v12195_v3 = vadd.f32 %v12194_v62, %v17912_v1  ;;  %v6769_v42 = vld [vmem:[#allocation3 + $0x8c] sm:$0x1]  ;;  %v5849_v34 = vld [vmem:[#allocation3 + $0xb4] sm:$0xf] }
 0x303   : > { %v5843_v5 = vsel %vm13038_vm10, %v5657_v51, %v5842_v17  ;;  %7832 = vmatprep.mubr.bf16.mxu0 %v10766_v2  ;;  %v6992_v53 = vshrl.u32 %v16049_v37, 16  ;;  %11957 = vmatmul.mubr.bf16.gmra.mrb[112].mxu1 %v10783_v38  ;;  %v6995_v59 = vshll.u32 %v16049_v37, 16  ;;  %v7001_v16 = vshll.u32 %v16032_v46, 16  ;;  %v17913_v62 = vld [vmem:[#allocation15_spill] sm:$0xff] }
 0x304   : > { %5844 = vst [vmem:[#allocation3 + $0xa8] sm:$0xf] %v5843_v5  ;;  %7833 = vmatmul.mubr.bf16.gmra.mrb[192].mxu0 %v10750_v31  ;;  %vm5151_vm1 = vcmp.ge.f32.partialorder %v5119_v15, 0.0  ;;  %v5183_v30 = vmul.f32 0.01, %v5119_v15  ;;  %v5662_v29 = vrot.slane %v5660_v40, 7  ;;  %v5081_v18 = vmul.f32 %v15808_v0, %v12195_v3 }
 0x305   : > { %v7005_v12 = vshrl.u32 %v16032_v46, 16  ;;  %v6994_v44 = vrot.slane %v6992_v53, 4  ;;  %v7011_v31 = vshll.u32 %v6768_v32, 16  ;;  %v6997_v13 = vrot.slane %v6995_v59, 5  ;;  %v5328_v5 = vld [vmem:[#allocation3 + $0xc8] sm:$0x1] }
 0x306   : > { %v5215_v26 = vsel %vm5151_vm1, %v5119_v15, %v5183_v30  ;;  %v5665_v43 = vor.u32 %v5663_v52, %v5662_v29  ;;  %v5667_v33 = vrot.slane %v5662_v29, 4  ;;  %v5120_v4 = vadd.f32 %v15822_v20, %v5081_v18  ;;  %v16084_v40 = vld [vmem:[#allocation3 + $0x84] sm:$0xf]  ;;  %v17914_v3 = vld [vmem:[#allocation26_spill] sm:$0xff] }
 0x307   : > { %v10960_v60 = vpack.c.bf16 %v5215_v26, %v5215_v26  ;;  %v7003_v7 = vrot.slane %v7001_v16, 5  ;;  %v7007_v6 = vrot.slane %v7005_v12, 4  ;;  %v7013_v49 = vrot.slane %v7011_v31, 5 }
 0x308   : > { %v5666_v48 = vsel %vm13032_vm9, %v5658_v11, %v5665_v43  ;;  %v5847_v50 = vsel %vm12954_vm3, %v5667_v33, %v5846_v58  ;;  %vm5152_vm2 = vcmp.ge.f32.partialorder %v5120_v4, 0.0  ;;  %v5184_v32 = vmul.f32 0.01, %v5120_v4  ;;  %v17915_v33 = vld [vmem:[#allocation11_spill] sm:$0xff] }
 0x309   : > { %v5669_v45 = vshrl.u32 %v10960_v60, 16  ;;  %v5672_v9 = vshll.u32 %v10960_v60, 16  ;;  %5845 = vst [vmem:[#allocation3 + $0xac] sm:$0xf] %v5666_v48  ;;  %5848 = vst [vmem:[#allocation3 + $0xb0] sm:$0x1] %v5847_v50  ;;  %v6998_v61 = vor.u32 %v6997_v13, %v6994_v44  ;;  %v7008_v41 = vor.u32 %v7007_v6, %v7003_v7 }
 0x30a   : > { %v10751_v35 = vcombine.low %v16049_v37, %v16032_v46  ;;  %v11344_v17 = vadd.f32 %v15882_v28, %v15875_v54  ;;  %v5275_v39 = vsel %vm12954_vm3, 0, %v5274_v36  ;;  %v5216_v51 = vsel %vm5152_vm2, %v5120_v4, %v5184_v32  ;;  %v5853_v44 = vld [vmem:[#allocation3 + $0xbc] sm:$0x1] }
 0x30b   : > { %v5671_v57 = vrot.slane %v5669_v45, 7  ;;  %v6999_v11 = vrot.slane %v6998_v61, 4  ;;  %v7009_v10 = vrot.slane %v7008_v41, 4  ;;  %5276 = vst [vmem:[#allocation3 + $0xc0] sm:$0x1] %v5275_v39  ;;  %v10736_v2 = vrot.slane %v7169_v8, 9 }
 0x30c   : > { %v10961_v14 = vpack.c.bf16 %v5216_v51, %v5216_v51  ;;  %v12182_v46 = vadd.f32 %v11344_v17, %v17913_v62  ;;  %v7295_v37 = vrot.slane %v16076_v19, 5  ;;  %v7298_v25 = vrot.slane %v6769_v42, 5  ;;  %v7170_v45 = vld [vmem:[#allocation3 + $0x90] sm:$0xe]  ;;  %v16109_v41 = vld [vmem:[#allocation3 + $0x94] sm:$0xf] }
 0x30d   : > { %v5674_v15 = vor.u32 %v5672_v9, %v5671_v57  ;;  %v5675_v27 = vrot.slane %v5671_v57, 4  ;;  %v7004_v54 = vsel %vm13062_vm12, %v6999_v11, %v7003_v7  ;;  %v7014_v28 = vsel %vm13062_vm12, %v7009_v10, %v7013_v49  ;;  %v17916_v49 = vld [vmem:[#allocation19_spill] sm:$0xff]  ;;  %v16111_v57 = vld [vmem:[#allocation3 + $0x90] sm:$0xf] }
 0x30e   : > { %v5677_v38 = vshrl.u32 %v10961_v14, 16  ;;  %v5680_v30 = vshll.u32 %v10961_v14, 16  ;;  %v10767_v1 = vcombine.low %v7004_v54, %v7014_v28  ;;  %v12183_v53 = vadd.f32 %v12182_v46, %v17914_v3 }
 0x30f   : > { %v5850_v52 = vsel %vm13038_vm10, %v5674_v15, %v5849_v34  ;;  %v7296_v29 = vsel %vm13945_vm15, %v10736_v2, %v7295_v37  ;;  %v7297_v59 = vrot.slane %v7295_v37, 4  ;;  %v11347_v16 = vadd.f32 %v15891_v63, %v15887_v22  ;;  %v6770_v34 = vld [vmem:[#allocation3 + $0x98] sm:$0x1] }
 0x310   : > { %5851 = vst [vmem:[#allocation3 + $0xb4] sm:$0xf] %v5850_v52  ;;  %v5679_v12 = vrot.slane %v5677_v38, 7  ;;  %7840 = vmatprep.mubr.bf16.mxu0 %v10767_v1  ;;  %v5329_v58 = vsel %vm12962_vm4, 0, %v5328_v5  ;;  %v7016_v26 = vshrl.u32 %v16084_v40, 16  ;;  %v7019_v18 = vshll.u32 %v16084_v40, 16 }
 0x311   : > { %7841 = vmatmul.mubr.bf16.gmra.mrb[196].mxu0 %v10751_v35  ;;  %v5082_v31 = vmul.f32 %v15808_v0, %v12183_v53  ;;  %v7299_v43 = vsel %vm13945_vm15, %v7297_v59, %v7298_v25  ;;  %v12190_v60 = vadd.f32 %v11347_v16, %v17915_v33  ;;  %5330 = vst [vmem:[#allocation3 + $0xc8] sm:$0x1] %v5329_v58  ;;  %v7025_v22 = vshll.u32 %v16076_v19, 16 }
 0x312   : > { %v5682_v63 = vor.u32 %v5680_v30, %v5679_v12  ;;  %v5684_v13 = vrot.slane %v5679_v12, 4  ;;  %v10784_v4 = vcombine.low %v7296_v29, %v7299_v43  ;;  %v7018_v7 = vrot.slane %v7016_v26, 4  ;;  %v5856_v12 = vld [vmem:[#allocation3 + $0xc0] sm:$0xf] }
 0x313   : > { %v5121_v6 = vadd.f32 %v15822_v20, %v5082_v31  ;;  %v12191_v36 = vadd.f32 %v12190_v60, %v17916_v49  ;;  %v7021_v48 = vrot.slane %v7019_v18, 5  ;;  %v7027_v50 = vrot.slane %v7025_v22, 5  ;;  %v16129_v31 = vld [vmem:[#allocation3 + $0xa0] sm:$0xf]  ;;  %v6771_v49 = vld [vmem:[#allocation3 + $0xa4] sm:$0x1] }
 0x314   : > { %v5683_v9 = vsel %vm13032_vm9, %v5675_v27, %v5682_v63  ;;  %v5854_v8 = vsel %vm12954_vm3, %v5684_v13, %v5853_v44  ;;  %11960 = vmatprep.mubr.bf16.mxu1 %v10784_v4  ;;  %v7029_v32 = vshrl.u32 %v16076_v19, 16  ;;  %v7035_v61 = vshll.u32 %v6769_v42, 16  ;;  %v7171_v63 = vld [vmem:[#allocation3 + $0x9c] sm:$0xe] }
 0x315   : > { %5852 = vst [vmem:[#allocation3 + $0xb8] sm:$0xf] %v5683_v9  ;;  %5855 = vst [vmem:[#allocation3 + $0xbc] sm:$0x1] %v5854_v8  ;;  %vm5153_vm6 = vcmp.ge.f32.partialorder %v5121_v6, 0.0  ;;  %v5083_v17 = vmul.f32 %v15808_v0, %v12191_v36  ;;  %v7022_v39 = vor.u32 %v7021_v48, %v7018_v7  ;;  %v10737_v10 = vrot.slane %v7170_v45, 9 }
 0x316   : > { %v5185_v35 = vmul.f32 0.01, %v5121_v6  ;;  %v7031_v51 = vrot.slane %v7029_v32, 4  ;;  %v7037_v11 = vrot.slane %v7035_v61, 5  ;;  %v7302_v42 = vrot.slane %v16109_v41, 5 }
 0x317   : > { %v5122_v15 = vadd.f32 %v15822_v20, %v5083_v17  ;;  %v7023_v27 = vrot.slane %v7022_v39, 4  ;;  %v7305_v46 = vrot.slane %v6770_v34, 5  ;;  %v7040_v54 = vshrl.u32 %v16111_v57, 16 }
 0x318   : > { %v5217_v2 = vsel %vm5153_vm6, %v5121_v6, %v5185_v35  ;;  %v7032_v62 = vor.u32 %v7031_v51, %v7027_v50  ;;  %v7303_v37 = vsel %vm13945_vm15, %v10737_v10, %v7302_v42  ;;  %v7304_v20 = vrot.slane %v7302_v42, 4  ;;  %v5860_v45 = vld [vmem:[#allocation3 + $0xc8] sm:$0x1]  ;;  %v7172_v42 = vld [vmem:[#allocation3 + $0xa8] sm:$0xe] }
 0x319   : > { %v10962_v14 = vpack.c.bf16 %v5217_v2, %v5217_v2  ;;  %vm5154_vm7 = vcmp.ge.f32.partialorder %v5122_v15, 0.0  ;;  %v5186_v28 = vmul.f32 0.01, %v5122_v15  ;;  %v7028_v0 = vsel %vm13062_vm12, %v7023_v27, %v7027_v50  ;;  %v16137_v50 = vld [vmem:[#allocation3 + $0x9c] sm:$0xf] }
 0x31a   : > { %v7033_v52 = vrot.slane %v7032_v62, 4  ;;  %v7042_v30 = vrot.slane %v7040_v54, 4  ;;  %v7043_v1 = vshll.u32 %v16111_v57, 16  ;;  %v7049_v3 = vshll.u32 %v16109_v41, 16  ;;  %v16150_v27 = vld [vmem:[#allocation3 + $0xac] sm:$0xf] }
 0x31b   : > { %v5686_v25 = vshrl.u32 %v10962_v14, 16  ;;  %v5689_v5 = vshll.u32 %v10962_v14, 16  ;;  %v5218_v38 = vsel %vm5154_vm7, %v5122_v15, %v5186_v28  ;;  %v7306_v16 = vsel %vm13945_vm15, %v7304_v20, %v7305_v46  ;;  %v16152_v28 = vld [vmem:[#allocation3 + $0xa8] sm:$0xf] }
 0x31c   : > { %v10963_v29 = vpack.c.bf16 %v5218_v38, %v5218_v38  ;;  %v7038_v59 = vsel %vm13062_vm12, %v7033_v52, %v7037_v11  ;;  %v10752_v26 = vcombine.low %v16084_v40, %v16076_v19  ;;  %v10785_v18 = vcombine.low %v7303_v37, %v7306_v16 }
 0x31d   : > { %v5688_v53 = vrot.slane %v5686_v25, 7  ;;  %v10768_v58 = vcombine.low %v7028_v0, %v7038_v59  ;;  %v7045_v44 = vrot.slane %v7043_v1, 5  ;;  %v7051_v22 = vrot.slane %v7049_v3, 5 }
 0x31e   : > { %v5694_v60 = vshrl.u32 %v10963_v29, 16  ;;  %v5697_v13 = vshll.u32 %v10963_v29, 16  ;;  %11961 = vmatmul.mubr.bf16.gmra.mrb[116].mxu1 %v10785_v18  ;;  %v7053_v7 = vshrl.u32 %v16109_v41, 16  ;;  %v7059_v6 = vshll.u32 %v6770_v34, 16 }
 0x31f   : > { %v5691_v43 = vor.u32 %v5689_v5, %v5688_v53  ;;  %v5692_v33 = vrot.slane %v5688_v53, 4  ;;  %7848 = vmatprep.mubr.bf16.mxu0 %v10768_v58  ;;  %v7046_v4 = vor.u32 %v7045_v44, %v7042_v30  ;;  %v10753_v36 = vcombine.low %v16111_v57, %v16109_v41  ;;  %v6772_v5 = vld [vmem:[#allocation3 + $0xb0] sm:$0x1] }
 0x320   : > { %v5696_v40 = vrot.slane %v5694_v60, 7  ;;  %7849 = vmatmul.mubr.bf16.gmra.mrb[200].mxu0 %v10752_v26  ;;  %v7309_v48 = vrot.slane %v16129_v31, 5  ;;  %v7055_v8 = vrot.slane %v7053_v7, 4  ;;  %v7061_v32 = vrot.slane %v7059_v6, 5 }
 0x321   : > { %v5857_v19 = vsel %vm13038_vm10, %v5691_v43, %v5856_v12  ;;  %v7047_v9 = vrot.slane %v7046_v4, 4  ;;  %v10738_v61 = vrot.slane %v7171_v63, 9  ;;  %v7312_v23 = vrot.slane %v6771_v49, 5  ;;  %v6773_v4 = vld [vmem:[#allocation3 + $0xbc] sm:$0x1] }
 0x322   : > { %5858 = vst [vmem:[#allocation3 + $0xc0] sm:$0xf] %v5857_v19  ;;  %v5699_v35 = vor.u32 %v5697_v13, %v5696_v40  ;;  %v5701_v17 = vrot.slane %v5696_v40, 4  ;;  %v7311_v39 = vrot.slane %v7309_v48, 4  ;;  %v7056_v34 = vor.u32 %v7055_v8, %v7051_v22  ;;  %v16170_v13 = vld [vmem:[#allocation3 + $0xb8] sm:$0xf] }
 0x323   : > { %v7310_v51 = vsel %vm13945_vm15, %v10738_v61, %v7309_v48  ;;  %v7064_v41 = vshrl.u32 %v16137_v50, 16  ;;  %v7067_v57 = vshll.u32 %v16137_v50, 16  ;;  %v7073_v15 = vshll.u32 %v16129_v31, 16  ;;  %v16172_v40 = vld [vmem:[#allocation3 + $0xb4] sm:$0xf] }
 0x324   : > { %v5700_v11 = vsel %vm13032_vm9, %v5692_v33, %v5699_v35  ;;  %v5861_v10 = vsel %vm12954_vm3, %v5701_v17, %v5860_v45  ;;  %v7313_v2 = vsel %vm13945_vm15, %v7311_v39, %v7312_v23  ;;  %v7057_v14 = vrot.slane %v7056_v34, 4 }
 0x325   : > { %5859 = vst [vmem:[#allocation3 + $0xc4] sm:$0xf] %v5700_v11  ;;  %5862 = vst [vmem:[#allocation3 + $0xc8] sm:$0x1] %v5861_v10  ;;  %v10786_v62 = vcombine.low %v7310_v51, %v7313_v2  ;;  %v7066_v46 = vrot.slane %v7064_v41, 4  ;;  %v7069_v54 = vrot.slane %v7067_v57, 5  ;;  %v7052_v56 = vsel %vm13062_vm12, %v7047_v9, %v7051_v22 }
 0x326   : > { %v7075_v0 = vrot.slane %v7073_v15, 5  ;;  %v7077_v37 = vshrl.u32 %v16129_v31, 16  ;;  %v7083_v25 = vshll.u32 %v6771_v49, 16  ;;  %v7062_v52 = vsel %vm13062_vm12, %v7057_v14, %v7061_v32 }
 0x327   : > { %11964 = vmatprep.mubr.bf16.mxu1 %v10786_v62  ;;  %v7070_v20 = vor.u32 %v7069_v54, %v7066_v46  ;;  %v10754_v38 = vcombine.low %v16137_v50, %v16129_v31  ;;  %v7316_v30 = vrot.slane %v16150_v27, 5  ;;  %v10769_v1 = vcombine.low %v7052_v56, %v7062_v52  ;;  %v7173_v31 = vld [vmem:[#allocation3 + $0xb4] sm:$0xe] }
 0x328   : > { %v7079_v3 = vrot.slane %v7077_v37, 4  ;;  %v7085_v53 = vrot.slane %v7083_v25, 5  ;;  %v10739_v29 = vrot.slane %v7172_v42, 9  ;;  %v7319_v12 = vrot.slane %v6772_v5, 5 }
 0x329   : > { %v7071_v59 = vrot.slane %v7070_v20, 4  ;;  %v7318_v16 = vrot.slane %v7316_v30, 4  ;;  %v7088_v58 = vshrl.u32 %v16152_v28, 16  ;;  %7856 = vmatprep.mubr.bf16.mxu0 %v10769_v1  ;;  %v7091_v18 = vshll.u32 %v16152_v28, 16  ;;  %v7174_v56 = vld [vmem:[#allocation3 + $0xc0] sm:$0xe] }
 0x32a   : > { %v7080_v26 = vor.u32 %v7079_v3, %v7075_v0  ;;  %v7097_v44 = vshll.u32 %v16150_v27, 16  ;;  %v7101_v43 = vshrl.u32 %v16150_v27, 16  ;;  %7857 = vmatmul.mubr.bf16.gmra.mrb[204].mxu0 %v10753_v36  ;;  %v7317_v33 = vsel %vm13945_vm15, %v10739_v29, %v7316_v30  ;;  %v16193_v52 = vld [vmem:[#allocation3 + $0xc0] sm:$0xf] }
 0x32b   : > { %v7320_v60 = vsel %vm13945_vm15, %v7318_v16, %v7319_v12  ;;  %v7090_v22 = vrot.slane %v7088_v58, 4  ;;  %v7107_v63 = vshll.u32 %v6772_v5, 16  ;;  %v7093_v49 = vrot.slane %v7091_v18, 5  ;;  %v5226_v18 = vld [vmem:[#allocation3] sm:$0x1] }
 0x32c   : > { %v7081_v7 = vrot.slane %v7080_v26, 4  ;;  %v10787_v6 = vcombine.low %v7317_v33, %v7320_v60  ;;  %v7099_v19 = vrot.slane %v7097_v44, 5  ;;  %v7076_v36 = vsel %vm13062_vm12, %v7071_v59, %v7075_v0  ;;  %v16189_v54 = vld [vmem:[#allocation3 + $0xc4] sm:$0xf]  ;;  %v6774_v3 = vld [vmem:[#allocation3 + $0xc8] sm:$0x1] }
 0x32d   : > { %v7103_v48 = vrot.slane %v7101_v43, 4  ;;  %v7109_v50 = vrot.slane %v7107_v63, 5  ;;  %v10740_v45 = vrot.slane %v7173_v31, 9  ;;  %v7094_v8 = vor.u32 %v7093_v49, %v7090_v22  ;;  %v5280_v31 = vld [vmem:[#allocation3 + $0x8] sm:$0x1] }
 0x32e   : > { %v7086_v9 = vsel %vm13062_vm12, %v7081_v7, %v7085_v53  ;;  %11965 = vmatmul.mubr.bf16.gmra.mrb[120].mxu1 %v10787_v6  ;;  %v7323_v32 = vrot.slane %v16170_v13, 5  ;;  %v7326_v61 = vrot.slane %v6773_v4, 5  ;;  %v7112_v39 = vshrl.u32 %v16172_v40, 16 }
 0x32f   : > { %v10770_v35 = vcombine.low %v7076_v36, %v7086_v9  ;;  %v7104_v17 = vor.u32 %v7103_v48, %v7099_v19  ;;  %v7115_v23 = vshll.u32 %v16172_v40, 16  ;;  %v7095_v34 = vrot.slane %v7094_v8, 4  ;;  %v16210_v36 = vld [vmem:[#allocation3 + $0x4] sm:$0xf]  ;;  %v6296_v48 = vld [vmem:[#allocation3 + $0xc] sm:$0xe] }
 0x330   : > { %v7324_v51 = vsel %vm13945_vm15, %v10740_v45, %v7323_v32  ;;  %v7325_v41 = vrot.slane %v7323_v32, 4  ;;  %v7121_v57 = vshll.u32 %v16170_v13, 16  ;;  %v7114_v10 = vrot.slane %v7112_v39, 4  ;;  %v16212_v32 = vld [vmem:[#allocation3 + $0x10] sm:$0xf] }
 0x331   : > { %7864 = vmatprep.mubr.bf16.mxu0 %v10770_v35  ;;  %v7105_v11 = vrot.slane %v7104_v17, 4  ;;  %v7117_v2 = vrot.slane %v7115_v23, 5  ;;  %v7125_v15 = vshrl.u32 %v16170_v13, 16  ;;  %v7100_v42 = vsel %vm13062_vm12, %v7095_v34, %v7099_v19  ;;  %v16216_v35 = vld [vmem:[#allocation3 + $0x1c] sm:$0xf] }
 0x332   : > { %v7327_v14 = vsel %vm13945_vm15, %v7325_v41, %v7326_v61  ;;  %v7123_v62 = vrot.slane %v7121_v57, 5  ;;  %v7131_v46 = vshll.u32 %v6773_v4, 16  ;;  %7865 = vmatmul.mubr.bf16.gmra.mrb[208].mxu0 %v10754_v38  ;;  %v10755_v30 = vcombine.low %v16152_v28, %v16150_v27  ;;  %v6295_v4 = vld [vmem:[#allocation3] sm:$0xe]  ;;  %v16214_v61 = vld [vmem:[#allocation3 + $0x14] sm:$0x1] }
 0x333   : > { %v7110_v0 = vsel %vm13062_vm12, %v7105_v11, %v7109_v50  ;;  %v10788_v37 = vcombine.low %v7324_v51, %v7327_v14  ;;  %v7118_v25 = vor.u32 %v7117_v2, %v7114_v10  ;;  %v7127_v5 = vrot.slane %v7125_v15, 4  ;;  %v6297_v51 = vld [vmem:[#allocation3 + $0x18] sm:$0xe]  ;;  %v16228_v15 = vld [vmem:[#allocation3 + $0x20] sm:$0x1] }
 0x334   : > { %v10771_v20 = vcombine.low %v7100_v42, %v7110_v0  ;;  %v7133_v1 = vrot.slane %v7131_v46, 5  ;;  %v10741_v59 = vrot.slane %v7174_v56, 9  ;;  %v7330_v38 = vrot.slane %v16189_v54, 5  ;;  %v16236_v0 = vld [vmem:[#allocation3 + $0xc] sm:$0xf] }
 0x335   : > { %11968 = vmatprep.mubr.bf16.mxu1 %v10788_v37  ;;  %v7119_v53 = vrot.slane %v7118_v25, 4  ;;  %v7128_v29 = vor.u32 %v7127_v5, %v7123_v62  ;;  %v7136_v16 = vshrl.u32 %v16193_v52, 16  ;;  %v7139_v12 = vshll.u32 %v16193_v52, 16 }
 0x336   : > { %7872 = vmatprep.mubr.bf16.mxu0 %v10771_v20  ;;  %v7145_v58 = vshll.u32 %v16189_v54, 16  ;;  %v7149_v26 = vshrl.u32 %v16189_v54, 16  ;;  %v7332_v44 = vrot.slane %v7330_v38, 4  ;;  %v7333_v43 = vrot.slane %v6774_v3, 5 }
 0x337   : > { %v7124_v27 = vsel %vm13062_vm12, %v7119_v53, %v7123_v62  ;;  %v7129_v28 = vrot.slane %v7128_v29, 4  ;;  %v7138_v33 = vrot.slane %v7136_v16, 4  ;;  %v7141_v60 = vrot.slane %v7139_v12, 5 }
 0x338   : > { %v7147_v22 = vrot.slane %v7145_v58, 5  ;;  %v7151_v63 = vrot.slane %v7149_v26, 4  ;;  %v7331_v6 = vsel %vm13945_vm15, %v10741_v59, %v7330_v38  ;;  %v7334_v49 = vsel %vm13945_vm15, %v7332_v44, %v7333_v43 }
 0x339   : > { %v7134_v7 = vsel %vm13062_vm12, %v7129_v28, %v7133_v1  ;;  %v7155_v19 = vshll.u32 %v6774_v3, 16  ;;  %v10789_v45 = vcombine.low %v7331_v6, %v7334_v49  ;;  %v7142_v9 = vor.u32 %v7141_v60, %v7138_v33 }
 0x33a   : > { %v10772_v50 = vcombine.low %v7124_v27, %v7134_v7  ;;  %v7152_v8 = vor.u32 %v7151_v63, %v7147_v22  ;;  %7873 = vmatmul.mubr.bf16.gmra.mrb[212].mxu0 %v10755_v30  ;;  %v10756_v17 = vcombine.low %v16172_v40, %v16170_v13  ;;  %v5227_v39 = vsel %vm12954_vm3, 0, %v5226_v18 }
 0x33b   : > { %v5281_v23 = vsel %vm12962_vm4, 0, %v5280_v31  ;;  %v10662_v34 = vrot.slane %v6295_v4, 9  ;;  %11969 = vmatmul.mubr.bf16.gmra.mrb[124].mxu1 %v10789_v45  ;;  %v7143_v41 = vrot.slane %v7142_v9, 4  ;;  %v7157_v11 = vrot.slane %v7155_v19, 5  ;;  %5228 = vst [vmem:[#allocation3] sm:$0x1] %v5227_v39 }
 0x33c   : > { %7880 = vmatprep.mubr.bf16.mxu0 %v10772_v50  ;;  %v7153_v57 = vrot.slane %v7152_v8, 4  ;;  %5282 = vst [vmem:[#allocation3 + $0x8] sm:$0x1] %v5281_v23  ;;  %v6361_v10 = vrot.slane %v16210_v36, 5  ;;  %v10757_v13 = vcombine.low %v16193_v52, %v16189_v54  ;;  %v10663_v40 = vrot.slane %v6296_v48, 9  ;;  %v12594_v23 = vld [vmem:[#allocation4 + $0x180] sm:$0xff]  }
 0x33d   : > { %v6368_v2 = vrot.slane %v16212_v32, 5  ;;  %v6375_v42 = vrot.slane %v16216_v35, 5  ;;  %v7148_v14 = vsel %vm13062_vm12, %v7143_v41, %v7147_v22  ;;  %v6371_v46 = vrot.slane %v16214_v61, 5  ;;  %v16260_v48 = vld [vmem:[#allocation3 + $0x28] sm:$0xf] }
 0x33e   : > { %v7158_v62 = vsel %vm13062_vm12, %v7153_v57, %v7157_v11  ;;  %v10664_v56 = vrot.slane %v6297_v51, 9  ;;  %v6362_v25 = vsel %vm13945_vm15, %v10662_v34, %v6361_v10  ;;  %v6363_v5 = vrot.slane %v6361_v10, 4  ;;  %v16267_v57 = vld [vmem:[#allocation3 + $0x2c] sm:$0x1] }
 0x33f   : > { %v10773_v37 = vcombine.low %v7148_v14, %v7158_v62  ;;  %v6370_v20 = vrot.slane %v6368_v2, 4  ;;  %v6377_v30 = vrot.slane %v6375_v42, 4  ;;  %v6378_v1 = vrot.slane %v16228_v15, 5  ;;  %v16275_v14 = vld [vmem:[#allocation3 + $0x18] sm:$0xf] }
 0x340   : > { %v5921_v3 = vshll.u32 %v16210_v36, 16  ;;  %v5925_v53 = vshrl.u32 %v16210_v36, 16  ;;  %v5936_v59 = vshrl.u32 %v16236_v0, 16  ;;  %v5939_v38 = vshll.u32 %v16236_v0, 16 }
 0x341   : > { %v6372_v29 = vsel %vm13945_vm15, %v6370_v20, %v6371_v46  ;;  %v5945_v16 = vshll.u32 %v16212_v32, 16  ;;  %v6369_v12 = vsel %vm13945_vm15, %v10663_v40, %v6368_v2  ;;  %v6379_v58 = vsel %vm13945_vm15, %v6377_v30, %v6378_v1  ;;  %v16271_v2 = vld [vmem:[#allocation3 + $0x34] sm:$0xf] }
 0x342   : > { %v5923_v26 = vrot.slane %v5921_v3, 5  ;;  %v5927_v18 = vrot.slane %v5925_v53, 4  ;;  %7881 = vmatmul.mubr.bf16.gmra.mrb[216].mxu0 %v10756_v17  ;;  %v10711_v28 = vcombine.low %v6369_v12, %v6372_v29  ;;  %v6376_v44 = vsel %vm13945_vm15, %v10664_v56, %v6375_v42  ;;  %v16254_v43 = vld [vmem:[#allocation3] sm:$0xf]  ;;  %v6298_v17 = vld [vmem:[#allocation3 + $0x24] sm:$0xe] }
 0x343   : > { %v5895_v27 = vld [vmem:[#allocation3 + $0x8] sm:$0x1]  ;;  %v5938_v31 = vrot.slane %v5936_v59, 4  ;;  %v5941_v33 = vrot.slane %v5939_v38, 5  ;;  %7888 = vmatprep.mubr.bf16.mxu0 %v10773_v37  ;;  %v5912_v22 = vshrl.u32 %v16254_v43, 16  ;;  %v5915_v63 = vshll.u32 %v16254_v43, 16 }
 0x344   : > { %v6364_v60 = vrot.slane %v5895_v27, 5  ;;  %v5928_v4 = vor.u32 %v5927_v18, %v5923_v26  ;;  %v10712_v7 = vcombine.low %v6376_v44, %v6379_v58  ;;  %v5931_v6 = vshll.u32 %v5895_v27, 16  ;;  %v6299_v3 = vld [vmem:[#allocation3 + $0x30] sm:$0xe]  ;;  %v12598_v12 = vld [vmem:[#allocation4 + $0x188] sm:$0xff]   ;;  %v12600_v44 = vld [vmem:[#allocation4 + $0x1d0] sm:$0xff]  }
 0x345   : > { %v5942_v49 = vor.u32 %v5941_v33, %v5938_v31  ;;  %v16258_v19 = vrot.slane %v5945_v16, 5  ;;  %v5914_v45 = vrot.slane %v5912_v22, 4  ;;  %v5917_v9 = vrot.slane %v5915_v63, 5 }
 0x346   : > { %v6365_v50 = vsel %vm13945_vm15, %v6363_v5, %v6364_v60  ;;  %v5929_v8 = vrot.slane %v5928_v4, 4  ;;  %v5933_v34 = vrot.slane %v5931_v6, 5  ;;  %v5949_v41 = vshrl.u32 %v16212_v32, 16  ;;  %v6300_v60 = vld [vmem:[#allocation3 + $0x3c] sm:$0xe] }
 0x347   : > { %v10710_v39 = vcombine.low %v6362_v25, %v6365_v50  ;;  %v16264_v51 = vrot.slane %v5942_v49, 4  ;;  %v5918_v11 = vor.u32 %v5917_v9, %v5914_v45  ;;  %v5955_v10 = vshll.u32 %v16214_v61, 16  ;;  %v12597_v25 = vld [vmem:[#allocation4 + $0x1c8] sm:$0xff]   ;;  %v16281_v61 = vld [vmem:[#allocation3 + $0x38] sm:$0x1] }
 0x348   : > { %v6382_v40 = vrot.slane %v16260_v48, 5  ;;  %v10679_v42 = vcombine.low %v16236_v0, %v16212_v32  ;;  %v5934_v62 = vsel %vm13062_vm12, %v5929_v8, %v5933_v34  ;;  %v10678_v46 = vcombine.low %v16254_v43, %v16210_v36  ;;  %v16309_v6 = vld [vmem:[#allocation3 + $0x4c] sm:$0xf]  ;;  %v16315_v9 = vld [vmem:[#allocation3 + $0x44] sm:$0x1] }
 0x349   : > { %11988 = vmatprep.mubr.bf16.mxu1 %v10710_v39  ;;  %v5951_v56 = vrot.slane %v5949_v41, 4  ;;  %v10665_v37 = vrot.slane %v6298_v17, 9  ;;  %v5919_v5 = vrot.slane %v5918_v11, 4  ;;  %v5948_v20 = vsel %vm13062_vm12, %v16264_v51, %v16258_v19  ;;  %v6301_v8 = vld [vmem:[#allocation3 + $0x48] sm:$0xe]  ;;  %v12603_v41 = vld [vmem:[#allocation4 + $0x1d8] sm:$0xff]  }
 0x34a   : > { %11989 = vmatmul.mubr.bf16.vlgmr.msra.gmra.mrb[96].mxu1 %v10711_v28  ;;  %v6384_v30 = vrot.slane %v6382_v40, 4  ;;  %v6385_v1 = vrot.slane %v16267_v57, 5  ;;  %7889 = vmatmul.mubr.bf16.gmra.mrb[220].mxu0 %v10757_v13  ;;  %v5957_v53 = vrot.slane %v5955_v10, 5  ;;  %v6389_v59 = vrot.slane %v16271_v2, 5  ;;  %v16302_v28 = vld [vmem:[#allocation3 + $0x40] sm:$0xf] }
 0x34b   : > { %11992 = vmatprep.mubr.bf16.mxu1 %v10712_v7  ;;  %v5952_v36 = vor.u32 %v5951_v56, %v16258_v19  ;;  %v6383_v29 = vsel %vm13945_vm15, %v10665_v37, %v6382_v40  ;;  %11645 = vmatpush3.bf16.msra.mxu1 %v12594_v23  ;;  %v5924_v38 = vsel %vm13062_vm12, %v5919_v5, %v5923_v26  ;;  %v5960_v54 = vshrl.u32 %v16275_v14, 16  ;;  %v12601_v17 = vld [vmem:[#allocation4 + $0x190] sm:$0xff]   ;;  %v16318_v51 = vld [vmem:[#allocation3 + $0x50] sm:$0x1]  ;;  %v16321_v56 = vld [vmem:[#allocation3 + $0x24] sm:$0xf] }
 0x34c   : > { %v6386_v16 = vsel %vm13945_vm15, %v6384_v30, %v6385_v1  ;;  %v5963_v52 = vshll.u32 %v16275_v14, 16  ;;  %v10694_v13 = vcombine.low %v5924_v38, %v5934_v62  ;;  %11646 = vmatprep.subr.bf16.mxu1 %v12597_v25  ;;  %v10666_v18 = vrot.slane %v6299_v3, 9 }
 0x34d   : > { %v5953_v58 = vrot.slane %v5952_v36, 4  ;;  %v6392_v27 = vrot.slane %v16281_v61, 5  ;;  %v6391_v43 = vrot.slane %v6389_v59, 4  ;;  %v5962_v31 = vrot.slane %v5960_v54, 4 }
 0x34e   : > { %v5965_v26 = vrot.slane %v5963_v52, 5  ;;  %v5969_v33 = vshll.u32 %v16216_v35, 16  ;;  %8234 = vmatprep.mubr.bf16.mxu0 %v10694_v13  ;;  %v10713_v63 = vcombine.low %v6383_v29, %v6386_v16  ;;  %v5973_v4 = vshrl.u32 %v16216_v35, 16  ;;  %v12606_v16 = vld [vmem:[#allocation4 + $0x1e0] sm:$0xff]  }
 0x34f   : > { %v5958_v22 = vsel %vm13062_vm12, %v5953_v58, %v5957_v53  ;;  %v5979_v7 = vshll.u32 %v16228_v15, 16  ;;  %v6390_v49 = vsel %vm13945_vm15, %v10666_v18, %v6389_v59  ;;  %v6393_v19 = vsel %vm13945_vm15, %v6391_v43, %v6392_v27  ;;  %11647 = vmatpush3.bf16.msra.mxu1 %v12598_v12  ;;  %v12604_v53 = vld [vmem:[#allocation4 + $0x198] sm:$0xff]   ;;  %v16339_v58 = vld [vmem:[#allocation3 + $0x58] sm:$0xf]  ;;  %v16341_v18 = vld [vmem:[#allocation3 + $0x5c] sm:$0x1] }
 0x350   : > { %v5966_v50 = vor.u32 %v5965_v26, %v5962_v31  ;;  %v5971_v45 = vrot.slane %v5969_v33, 5  ;;  %v10714_v39 = vcombine.low %v6390_v49, %v6393_v19  ;;  %v5975_v23 = vrot.slane %v5973_v4, 4  ;;  %11648 = vmatprep.subr.bf16.mxu1 %v12600_v44  ;;  %v6302_v26 = vld [vmem:[#allocation3 + $0x54] sm:$0xe]  ;;  %v16347_v33 = vld [vmem:[#allocation3 + $0x64] sm:$0xf] }
 0x351   : > { %v10667_v34 = vrot.slane %v6300_v60, 9  ;;  %v6396_v15 = vrot.slane %v16302_v28, 5  ;;  %v10695_v11 = vcombine.low %v5948_v20, %v5958_v22  ;;  %v5981_v40 = vrot.slane %v5979_v7, 5  ;;  %v6303_v7 = vld [vmem:[#allocation3 + $0x60] sm:$0xe]  ;;  %v12607_v49 = vld [vmem:[#allocation4 + $0x1a0] sm:$0xff]  }
 0x352   : > { %11993 = vmatmul.mubr.bf16.gmra.mrb[100].mxu1 %v10713_v63  ;;  %v5967_v10 = vrot.slane %v5966_v50, 4  ;;  %v6403_v62 = vrot.slane %v16309_v6, 5  ;;  %8235 = vmatmul.mubr.bf16.vlgmr.msra.gmra.mrb[224].mxu0 %v10678_v46  ;;  %v5976_v37 = vor.u32 %v5975_v23, %v5971_v45  ;;  %v6399_v5 = vrot.slane %v16315_v9, 5 }
 0x353   : > { %11996 = vmatprep.mubr.bf16.mxu1 %v10714_v39  ;;  %v6398_v25 = vrot.slane %v6396_v15, 4  ;;  %v10668_v30 = vrot.slane %v6301_v8, 9  ;;  %8242 = vmatprep.mubr.bf16.mxu0 %v10695_v11  ;;  %v6397_v20 = vsel %vm13945_vm15, %v10667_v34, %v6396_v15  ;;  %v6406_v36 = vrot.slane %v16318_v51, 5  ;;  %v12609_v39 = vld [vmem:[#allocation4 + $0x1e8] sm:$0xff]  }
 0x354   : > { %v5972_v1 = vsel %vm13062_vm12, %v5967_v10, %v5971_v45  ;;  %v6405_v3 = vrot.slane %v6403_v62, 4  ;;  %11649 = vmatpush3.bf16.msra.mxu1 %v12601_v17  ;;  %v5977_v29 = vrot.slane %v5976_v37, 4  ;;  %v5984_v59 = vshrl.u32 %v16321_v56, 16  ;;  %v16351_v17 = vld [vmem:[#allocation3 + $0x68] sm:$0x1] }
 0x355   : > { %v6400_v46 = vsel %vm13945_vm15, %v6398_v25, %v6399_v5  ;;  %v5987_v38 = vshll.u32 %v16321_v56, 16  ;;  %11650 = vmatprep.subr.bf16.mxu1 %v12603_v41  ;;  %v6404_v12 = vsel %vm13945_vm15, %v10668_v30, %v6403_v62  ;;  %v5993_v52 = vshll.u32 %v16260_v48, 16 }
 0x356   : > { %v6407_v54 = vsel %vm13945_vm15, %v6405_v3, %v6406_v36  ;;  %v5997_v13 = vshrl.u32 %v16260_v48, 16  ;;  %v5982_v27 = vsel %vm13062_vm12, %v5977_v29, %v5981_v40  ;;  %v10680_v44 = vcombine.low %v16275_v14, %v16216_v35  ;;  %v16369_v3 = vld [vmem:[#allocation3 + $0x70] sm:$0xf]  ;;  %v12612_v36 = vld [vmem:[#allocation4 + $0x1f0] sm:$0xff]  }
 0x357   : > { %v5986_v43 = vrot.slane %v5984_v59, 4  ;;  %v5989_v31 = vrot.slane %v5987_v38, 5  ;;  %v10715_v60 = vcombine.low %v6397_v20, %v6400_v46  ;;  %v5995_v22 = vrot.slane %v5993_v52, 5  ;;  %v16378_v38 = vld [vmem:[#allocation3 + $0x74] sm:$0x1] }
 0x358   : > { %v5999_v63 = vrot.slane %v5997_v13, 4  ;;  %v6003_v4 = vshll.u32 %v16267_v57, 16  ;;  %11651 = vmatpush3.bf16.msra.mxu1 %v12604_v53  ;;  %v10696_v19 = vcombine.low %v5972_v1, %v5982_v27  ;;  %v10716_v50 = vcombine.low %v6404_v12, %v6407_v54  ;;  %v16355_v57 = vld [vmem:[#allocation3 + $0x30] sm:$0xf]  ;;  %v12610_v1 = vld [vmem:[#allocation4 + $0x1a8] sm:$0xff]  }
 0x359   : > { %v5990_v45 = vor.u32 %v5989_v31, %v5986_v43  ;;  %v6410_v8 = vrot.slane %v16339_v58, 5  ;;  %11652 = vmatprep.subr.bf16.mxu1 %v12606_v16  ;;  %v10669_v34 = vrot.slane %v6302_v26, 9  ;;  %v6413_v15 = vrot.slane %v16341_v18, 5  ;;  %v6304_v16 = vld [vmem:[#allocation3 + $0x6c] sm:$0xe] }
 0x35a   : > { %11997 = vmatmul.mubr.bf16.gmra.mrb[104].mxu1 %v10715_v60  ;;  %v6000_v23 = vor.u32 %v5999_v63, %v5995_v22  ;;  %v6417_v41 = vrot.slane %v16347_v33, 5  ;;  %8243 = vmatmul.mubr.bf16.gmra.mrb[228].mxu0 %v10679_v42  ;;  %v6005_v10 = vrot.slane %v6003_v4, 5  ;;  %v10670_v62 = vrot.slane %v6303_v7, 9  ;;  %v16382_v27 = vld [vmem:[#allocation3 + $0x7c] sm:$0xf]  ;;  %v12613_v7 = vld [vmem:[#allocation4 + $0x1b0] sm:$0xff]  }
 0x35b   : > { %12000 = vmatprep.mubr.bf16.mxu1 %v10716_v50  ;;  %v5991_v11 = vrot.slane %v5990_v45, 4  ;;  %v6412_v40 = vrot.slane %v6410_v8, 4  ;;  %8250 = vmatprep.mubr.bf16.mxu0 %v10696_v19  ;;  %v6411_v25 = vsel %vm13945_vm15, %v10669_v34, %v6410_v8  ;;  %v6420_v30 = vrot.slane %v16351_v17, 5  ;;  %v6305_v43 = vld [vmem:[#allocation3 + $0x78] sm:$0xe]  ;;  %v12615_v8 = vld [vmem:[#allocation4 + $0x1f8] sm:$0xff]  }
 0x35c   : > { %v6001_v37 = vrot.slane %v6000_v23, 4  ;;  %v6419_v5 = vrot.slane %v6417_v41, 4  ;;  %11653 = vmatpush3.bf16.msra.mxu1 %v12607_v49  ;;  %v6418_v32 = vsel %vm13945_vm15, %v10670_v62, %v6417_v41  ;;  %v6008_v0 = vshrl.u32 %v16355_v57, 16  ;;  %v16388_v4 = vld [vmem:[#allocation3 + $0x80] sm:$0x1] }
 0x35d   : > { %v6414_v20 = vsel %vm13945_vm15, %v6412_v40, %v6413_v15  ;;  %v6011_v42 = vshll.u32 %v16355_v57, 16  ;;  %11654 = vmatprep.subr.bf16.mxu1 %v12609_v39  ;;  %v10681_v46 = vcombine.low %v16321_v56, %v16260_v48  ;;  %v6017_v59 = vshll.u32 %v16271_v2, 16  ;;  %v16391_v45 = vld [vmem:[#allocation3 + $0x3c] sm:$0xf] }
 0x35e   : > { %v6006_v53 = vsel %vm13062_vm12, %v6001_v37, %v6005_v10  ;;  %v6421_v29 = vsel %vm13945_vm15, %v6419_v5, %v6420_v30  ;;  %v5996_v12 = vsel %vm13062_vm12, %v5991_v11, %v5995_v22  ;;  %v10717_v54 = vcombine.low %v6411_v25, %v6414_v20  ;;  %v12616_v5 = vld [vmem:[#allocation4 + $0x1b8] sm:$0xff]   ;;  %v16411_v20 = vld [vmem:[#allocation4 + $0x200] sm:$0xff]  }
 0x35f   : > { %v6010_v52 = vrot.slane %v6008_v0, 4  ;;  %v6013_v13 = vrot.slane %v6011_v42, 5  ;;  %v10697_v31 = vcombine.low %v5996_v12, %v6006_v53  ;;  %v16384_v26 = vrot.slane %v6017_v59, 5  ;;  %v6306_v53 = vld [vmem:[#allocation3 + $0x84] sm:$0xe] }
 0x360   : > { %v6021_v60 = vshrl.u32 %v16271_v2, 16  ;;  %v6027_v63 = vshll.u32 %v16281_v61, 16  ;;  %11655 = vmatpush3.bf16.msra.mxu1 %v12610_v1  ;;  %v10718_v49 = vcombine.low %v6418_v32, %v6421_v29  ;;  %v10671_v22 = vrot.slane %v6304_v16, 9  ;;  %v16409_v1 = vld [vmem:[#allocation3 + $0x88] sm:$0xf] }
 0x361   : > { %v6014_v19 = vor.u32 %v6013_v13, %v6010_v52  ;;  %v6424_v50 = vrot.slane %v16369_v3, 5  ;;  %11656 = vmatprep.subr.bf16.mxu1 %v12612_v36  ;;  %v6427_v23 = vrot.slane %v16378_v38, 5  ;;  %v10672_v34 = vrot.slane %v6305_v43, 9  ;;  %v16425_v52 = vld [vmem:[#allocation3 + $0x8c] sm:$0x1] }
 0x362   : > { %12001 = vmatmul.mubr.bf16.gmra.mrb[108].mxu1 %v10717_v54  ;;  %v6023_v39 = vrot.slane %v6021_v60, 4  ;;  %v6431_v61 = vrot.slane %v16382_v27, 5  ;;  %8251 = vmatmul.mubr.bf16.gmra.mrb[232].mxu0 %v10680_v44  ;;  %v6029_v41 = vrot.slane %v6027_v63, 5  ;;  %v6434_v10 = vrot.slane %v16388_v4, 5  ;;  %v16427_v13 = vld [vmem:[#allocation3 + $0x48] sm:$0xf] }
 0x363   : > { %12004 = vmatprep.mubr.bf16.mxu1 %v10718_v49  ;;  %v6015_v15 = vrot.slane %v6014_v19, 4  ;;  %v6426_v11 = vrot.slane %v6424_v50, 4  ;;  %8258 = vmatprep.mubr.bf16.mxu0 %v10697_v31  ;;  %v6425_v62 = vsel %vm13945_vm15, %v10671_v22, %v6424_v50  ;;  %v6032_v25 = vshrl.u32 %v16391_v45, 16 }
 0x364   : > { %v6024_v40 = vor.u32 %v6023_v39, %v16384_v26  ;;  %v6433_v37 = vrot.slane %v6431_v61, 4  ;;  %11657 = vmatpush3.bf16.msra.mxu1 %v12613_v7  ;;  %v10682_v14 = vcombine.low %v16355_v57, %v16271_v2  ;;  %v6035_v44 = vshll.u32 %v16391_v45, 16  ;;  %v6307_v39 = vld [vmem:[#allocation3 + $0x90] sm:$0xe] }
 0x365   : > { %v6428_v35 = vsel %vm13945_vm15, %v6426_v11, %v6427_v23  ;;  %v6041_v30 = vshll.u32 %v16302_v28, 16  ;;  %11658 = vmatprep.subr.bf16.mxu1 %v12615_v8  ;;  %v6432_v0 = vsel %vm13945_vm15, %v10672_v34, %v6431_v61  ;;  %v6034_v36 = vrot.slane %v6032_v25, 4 }
 0x366   : > { %v6025_v32 = vrot.slane %v6024_v40, 4  ;;  %v6435_v42 = vsel %vm13945_vm15, %v6433_v37, %v6434_v10  ;;  %v16417_v29 = vpop.f32.mrb[160].mxu0  ;;  %v6020_v59 = vsel %vm13062_vm12, %v6015_v15, %v16384_v26  ;;  %v6037_v16 = vrot.slane %v6035_v44, 5  ;;  %v16435_v26 = vld [vmem:[#allocation3 + $0x94] sm:$0xf] }
 0x367   : > { %v16422_v12 = vrot.slane %v6041_v30, 5  ;;  %v6045_v54 = vshrl.u32 %v16302_v28, 16  ;;  %v16429_v43 = vpop.f32.mrb[161].mxu0  ;;  %v10719_v60 = vcombine.low %v6425_v62, %v6428_v35  ;;  %v6051_v63 = vshll.u32 %v16315_v9, 16  ;;  %v6308_v30 = vld [vmem:[#allocation3 + $0x9c] sm:$0xe] }
 0x368   : > { %v6030_v31 = vsel %vm13062_vm12, %v6025_v32, %v6029_v41  ;;  %v6438_v7 = vrot.slane %v16409_v1, 5  ;;  %11659 = vmatpush3.bf16.msra.mxu1 %v12616_v5  ;;  %v16437_v49 = vpop.f32.mrb[162].mxu0  ;;  %v10720_v19 = vcombine.low %v6432_v0, %v6435_v42  ;;  %v6038_v22 = vor.u32 %v6037_v16, %v6034_v36  ;;  %v16443_v41 = vld [vmem:[#allocation3 + $0x98] sm:$0x1] }
 0x369   : > { %v6047_v50 = vrot.slane %v6045_v54, 4  ;;  %v10673_v8 = vrot.slane %v6306_v53, 9  ;;  %12020 = vmatprep.subr.bf16.mxu1 %v16411_v20  ;;  %v16440_v23 = vpop.f32.mrb[163].mxu0  ;;  %v10698_v34 = vcombine.low %v6020_v59, %v6030_v31  ;;  %v6053_v61 = vrot.slane %v6051_v63, 5  ;;  %v16463_v53 = vld [vmem:[#allocation3 + $0xa0] sm:$0xf] }
 0x36a   : > { %12005 = vmatmul.mubr.bf16.gmra.mrb[112].mxu1 %v10719_v60  ;;  %v6440_v9 = vrot.slane %v6438_v7, 4  ;;  %v6441_v15 = vrot.slane %v16425_v52, 5  ;;  %8259 = vmatmul.mubr.bf16.gmra.mrb[236].mxu0 %v10681_v46  ;;  %v6039_v11 = vrot.slane %v6038_v22, 4  ;;  %v6445_v62 = vrot.slane %v16435_v26, 5  ;;  %v16469_v31 = vld [vmem:[#allocation3 + $0xac] sm:$0xf] }
 0x36b   : > { %12008 = vmatprep.mubr.bf16.mxu1 %v10720_v19  ;;  %v6048_v10 = vor.u32 %v6047_v50, %v16422_v12  ;;  %v6439_v40 = vsel %vm13945_vm15, %v10673_v8, %v6438_v7  ;;  %8266 = vmatprep.mubr.bf16.mxu0 %v10698_v34  ;;  %v10674_v25 = vrot.slane %v6307_v39, 9  ;;  %v6056_v5 = vshrl.u32 %v16427_v13, 16  ;;  %v16475_v22 = vld [vmem:[#allocation3 + $0xa4] sm:$0x1]  ;;  %v6309_v50 = vld [vmem:[#allocation3 + $0xa8] sm:$0xe] }
 0x36c   : > { %v6442_v37 = vsel %vm13945_vm15, %v6440_v9, %v6441_v15  ;;  %v6059_v35 = vshll.u32 %v16427_v13, 16  ;;  %v6044_v48 = vsel %vm13062_vm12, %v6039_v11, %v16422_v12  ;;  %v6448_v46 = vrot.slane %v16443_v41, 5  ;;  %v16478_v9 = vld [vmem:[#allocation3 + $0xb0] sm:$0x1] }
 0x36d   : > { %v6049_v56 = vrot.slane %v6048_v10, 4  ;;  %v10683_v44 = vcombine.low %v16391_v45, %v16302_v28  ;;  %v6447_v32 = vrot.slane %v6445_v62, 4  ;;  %v6058_v0 = vrot.slane %v6056_v5, 4 }
 0x36e   : > { %v6061_v42 = vrot.slane %v6059_v35, 5  ;;  %v6065_v36 = vshll.u32 %v16309_v6, 16  ;;  %v10721_v16 = vcombine.low %v6439_v40, %v6442_v37  ;;  %v6069_v12 = vshrl.u32 %v16309_v6, 16  ;;  %v16481_v40 = vld [vmem:[#allocation3 + $0x54] sm:$0xf] }
 0x36f   : > { %v6054_v59 = vsel %vm13062_vm12, %v6049_v56, %v6053_v61  ;;  %v6075_v54 = vshll.u32 %v16318_v51, 16  ;;  %v6446_v60 = vsel %vm13945_vm15, %v10674_v25, %v6445_v62  ;;  %v6449_v63 = vsel %vm13945_vm15, %v6447_v32, %v6448_v46 }
 0x370   : > { %v6062_v7 = vor.u32 %v6061_v42, %v6058_v0  ;;  %v6067_v19 = vrot.slane %v6065_v36, 5  ;;  %v10722_v8 = vcombine.low %v6446_v60, %v6449_v63  ;;  %v6071_v39 = vrot.slane %v6069_v12, 4  ;;  %v6310_v42 = vld [vmem:[#allocation3 + $0xb4] sm:$0xe]  ;;  %v16508_v60 = vld [vmem:[#allocation3 + $0xb8] sm:$0xf] }
 0x371   : > { %v10675_v34 = vrot.slane %v6308_v30, 9  ;;  %v6452_v61 = vrot.slane %v16463_v53, 5  ;;  %v10699_v51 = vcombine.low %v6044_v48, %v6054_v59  ;;  %v6077_v11 = vrot.slane %v6075_v54, 5 }
 0x372   : > { %12009 = vmatmul.mubr.bf16.gmra.mrb[116].mxu1 %v10721_v16  ;;  %v6063_v15 = vrot.slane %v6062_v7, 4  ;;  %v6459_v10 = vrot.slane %v16469_v31, 5  ;;  %8267 = vmatmul.mubr.bf16.gmra.mrb[240].mxu0 %v10682_v14  ;;  %v6072_v62 = vor.u32 %v6071_v39, %v6067_v19  ;;  %v6455_v25 = vrot.slane %v16475_v22, 5  ;;  %v16514_v39 = vld [vmem:[#allocation3 + $0xbc] sm:$0x1] }
 0x373   : > { %12012 = vmatprep.mubr.bf16.mxu1 %v10722_v8  ;;  %v6454_v37 = vrot.slane %v6452_v61, 4  ;;  %v10676_v5 = vrot.slane %v6309_v50, 9  ;;  %v16487_v35 = vpop.f32.mrb[164].mxu0  ;;  %8274 = vmatprep.mubr.bf16.mxu0 %v10699_v51  ;;  %v6453_v56 = vsel %vm13945_vm15, %v10675_v34, %v6452_v61  ;;  %v6462_v30 = vrot.slane %v16478_v9, 5  ;;  %v16516_v34 = vld [vmem:[#allocation3 + $0x18] sm:$0xf] }
 0x374   : > { %v6068_v48 = vsel %vm13062_vm12, %v6063_v15, %v6067_v19  ;;  %v6461_v46 = vrot.slane %v6459_v10, 4  ;;  %v16494_v2 = vpop.f32.mrb[165].mxu0  ;;  %v6073_v57 = vrot.slane %v6072_v62, 4  ;;  %v6080_v32 = vshrl.u32 %v16481_v40, 16  ;;  %v16519_v62 = vld [vmem:[#allocation3 + $0x1c] sm:$0xf] }
 0x375   : > { %v6456_v14 = vsel %vm13945_vm15, %v6454_v37, %v6455_v25  ;;  %v6083_v0 = vshll.u32 %v16481_v40, 16  ;;  %v16500_v36 = vpop.f32.mrb[166].mxu0  ;;  %v6460_v59 = vsel %vm13945_vm15, %v10676_v5, %v6459_v10  ;;  %v6089_v12 = vshll.u32 %v16339_v58, 16 }
 0x376   : > { %v6463_v16 = vsel %vm13945_vm15, %v6461_v46, %v6462_v30  ;;  %v6093_v54 = vshrl.u32 %v16339_v58, 16  ;;  %v16510_v63 = vpop.f32.mrb[167].mxu0  ;;  %v6078_v7 = vsel %vm13062_vm12, %v6073_v57, %v6077_v11  ;;  %v10723_v19 = vcombine.low %v6453_v56, %v6456_v14  ;;  %v8557_v30 = vld [vmem:[#allocation3 + $0x20] sm:$0x1] }
 0x377   : > { %v6082_v50 = vrot.slane %v6080_v32, 4  ;;  %v6085_v8 = vrot.slane %v6083_v0, 5  ;;  %v10724_v61 = vcombine.low %v6460_v59, %v6463_v16  ;;  %v6091_v51 = vrot.slane %v6089_v12, 5 }
 0x378   : > { %v6095_v15 = vrot.slane %v6093_v54, 4  ;;  %v6099_v10 = vshll.u32 %v16341_v18, 16  ;;  %v10700_v37 = vcombine.low %v6068_v48, %v6078_v7  ;;  %v10677_v5 = vrot.slane %v6310_v42, 9  ;;  %v16530_v54 = vld [vmem:[#allocation3 + $0x60] sm:$0xf] }
 0x379   : > { %v6086_v25 = vor.u32 %v6085_v8, %v6082_v50  ;;  %v6466_v46 = vrot.slane %v16508_v60, 5  ;;  %v6469_v56 = vrot.slane %v16514_v39, 5  ;;  %v8574_v57 = vshrl.u32 %v16516_v34, 16 }
 0x37a   : > { %12013 = vmatmul.mubr.bf16.gmra.mrb[120].mxu1 %v10723_v19  ;;  %v6096_v11 = vor.u32 %v6095_v15, %v6091_v51  ;;  %v8577_v14 = vshll.u32 %v16516_v34, 16  ;;  %8275 = vmatmul.mubr.bf16.gmra.mrb[244].mxu0 %v10683_v44  ;;  %v6101_v48 = vrot.slane %v6099_v10, 5  ;;  %v8583_v0 = vshll.u32 %v16519_v62, 16 }
 0x37b   : > { %12016 = vmatprep.mubr.bf16.mxu1 %v10724_v61  ;;  %v6087_v18 = vrot.slane %v6086_v25, 4  ;;  %v6468_v32 = vrot.slane %v6466_v46, 4  ;;  %8282 = vmatprep.mubr.bf16.mxu0 %v10700_v37  ;;  %v8576_v59 = vrot.slane %v8574_v57, 4  ;;  %v8587_v12 = vshrl.u32 %v16519_v62, 16 }
 0x37c   : > { %v6097_v42 = vrot.slane %v6096_v11, 4  ;;  %v8579_v16 = vrot.slane %v8577_v14, 5  ;;  %v6467_v7 = vsel %vm13945_vm15, %v10677_v5, %v6466_v46  ;;  %v8585_v45 = vrot.slane %v8583_v0, 5 }
 0x37d   : > { %v6470_v28 = vsel %vm13945_vm15, %v6468_v32, %v6469_v56  ;;  %v8593_v44 = vshll.u32 %v8557_v30, 16  ;;  %v6092_v19 = vsel %vm13062_vm12, %v6087_v18, %v6091_v51  ;;  %v8589_v61 = vrot.slane %v8587_v12, 4  ;;  %v16545_v30 = vld [vmem:[#allocation3 + $0x24] sm:$0xf] }
 0x37e   : > { %v6102_v50 = vsel %vm13062_vm12, %v6097_v42, %v6101_v48  ;;  %v8580_v8 = vor.u32 %v8579_v16, %v8576_v59  ;;  %v10684_v15 = vcombine.low %v16427_v13, %v16309_v6  ;;  %v10725_v37 = vcombine.low %v6467_v7, %v6470_v28  ;;  %v16550_v6 = vld [vmem:[#allocation3 + $0x28] sm:$0xf] }
 0x37f   : > { %v10701_v10 = vcombine.low %v6092_v19, %v6102_v50  ;;  %v6104_v25 = vshrl.u32 %v16530_v54, 16  ;;  %v8590_v46 = vor.u32 %v8589_v61, %v8585_v45  ;;  %v6107_v11 = vshll.u32 %v16530_v54, 16  ;;  %v16566_v50 = vld [vmem:[#allocation3 + $0x6c] sm:$0xf] }
 0x380   : > { %v8581_v5 = vrot.slane %v8580_v8, 4  ;;  %v6113_v56 = vshll.u32 %v16347_v33, 16  ;;  %v8595_v51 = vrot.slane %v8593_v44, 5  ;;  %v10685_v57 = vcombine.low %v16481_v40, %v16339_v58  ;;  %v8558_v40 = vld [vmem:[#allocation3 + $0x2c] sm:$0x1] }
 0x381   : > { %v6106_v14 = vrot.slane %v6104_v25, 4  ;;  %v6117_v18 = vshrl.u32 %v16347_v33, 16  ;;  %v8591_v13 = vrot.slane %v8590_v46, 4  ;;  %v6109_v48 = vrot.slane %v6107_v11, 5 }
 0x382   : > { %12017 = vmatmul.mubr.bf16.gmra.mrb[124].mxu1 %v10725_v37  ;;  %v6115_v32 = vrot.slane %v6113_v56, 5  ;;  %v6123_v0 = vshll.u32 %v16351_v17, 16  ;;  %v16553_v42 = vpop.f32.mrb[168].mxu0  ;;  %8283 = vmatmul.mubr.bf16.gmra.mrb[248].mxu0 %v10684_v15  ;;  %v8586_v59 = vsel %vm13062_vm12, %v8581_v5, %v8585_v45  ;;  %v10686_v58 = vcombine.low %v16530_v54, %v16347_v33 }
 0x383   : > { %v6119_v16 = vrot.slane %v6117_v18, 4  ;;  %v8598_v12 = vshrl.u32 %v16545_v30, 16  ;;  %v16560_v7 = vpop.f32.mrb[169].mxu0  ;;  %8290 = vmatprep.mubr.bf16.mxu0 %v10701_v10  ;;  %v8596_v28 = vsel %vm13062_vm12, %v8591_v13, %v8595_v51  ;;  %v6110_v17 = vor.u32 %v6109_v48, %v6106_v14 }
 0x384   : > { %v8601_v44 = vshll.u32 %v16545_v30, 16  ;;  %v8607_v19 = vshll.u32 %v16550_v6, 16  ;;  %v16568_v45 = vpop.f32.mrb[170].mxu0  ;;  %v10870_v8 = vcombine.low %v8586_v59, %v8596_v28  ;;  %v8611_v37 = vshrl.u32 %v16550_v6, 16 }
 0x385   : > { %v6120_v61 = vor.u32 %v6119_v16, %v6115_v32  ;;  %v8600_v15 = vrot.slane %v8598_v12, 4  ;;  %v16571_v25 = vpop.f32.mrb[171].mxu0  ;;  %v6111_v10 = vrot.slane %v6110_v17, 4  ;;  %v6125_v5 = vrot.slane %v6123_v0, 5  ;;  %v12625_v12 = vld [vmem:[#allocation4 + $0x208] sm:$0xff]  }
 0x386   : > { %v8603_v46 = vrot.slane %v8601_v44, 5  ;;  %v8609_v11 = vrot.slane %v8607_v19, 5  ;;  %9566 = vmatprep.mubr.bf16.mxu1 %v10870_v8  ;;  %v8613_v51 = vrot.slane %v8611_v37, 4  ;;  %v8617_v14 = vshll.u32 %v8558_v40, 16 }
 0x387   : > { %v6121_v56 = vrot.slane %v6120_v61, 4  ;;  %v6128_v18 = vshrl.u32 %v16566_v50, 16  ;;  %v6116_v13 = vsel %vm13062_vm12, %v6111_v10, %v6115_v32  ;;  %v10854_v48 = vcombine.low %v16516_v34, %v16519_v62  ;;  %v16583_v61 = vld [vmem:[#allocation3 + $0x30] sm:$0xf]  ;;  %v16587_v10 = vld [vmem:[#allocation3 + $0x34] sm:$0xf] }
 0x388   : > { %v8604_v59 = vor.u32 %v8603_v46, %v8600_v15  ;;  %v6131_v16 = vshll.u32 %v16566_v50, 16  ;;  %v8614_v28 = vor.u32 %v8613_v51, %v8609_v11  ;;  %v6137_v44 = vshll.u32 %v16369_v3, 16 }
 0x389   : > { %v6126_v0 = vsel %vm13062_vm12, %v6121_v56, %v6125_v5  ;;  %v6130_v17 = vrot.slane %v6128_v18, 4  ;;  %v6141_v32 = vshrl.u32 %v16369_v3, 16  ;;  %v8619_v62 = vrot.slane %v8617_v14, 5 }
 0x38a   : > { %v10702_v40 = vcombine.low %v6116_v13, %v6126_v0  ;;  %9567 = vmatmul.mubr.bf16.vlgmr.msra.gmra.mrb[128].mxu1 %v10854_v48  ;;  %v8605_v19 = vrot.slane %v8604_v59, 4  ;;  %v6133_v8 = vrot.slane %v6131_v16, 5  ;;  %8291 = vmatmul.mubr.bf16.gmra.mrb[252].mxu0 %v10685_v57  ;;  %v8615_v34 = vrot.slane %v8614_v28, 4  ;;  %v12630_v57 = vld [vmem:[#allocation4 + $0x210] sm:$0xff]   ;;  %v16599_v48 = vld [vmem:[#allocation3 + $0x78] sm:$0xf] }
 0x38b   : > { %12021 = vmatpush3.bf16.msra.mxu1 %v16411_v20  ;;  %v6139_v15 = vrot.slane %v6137_v44, 5  ;;  %v6147_v37 = vshll.u32 %v16378_v38, 16  ;;  %v6143_v56 = vrot.slane %v6141_v32, 4  ;;  %v10687_v51 = vcombine.low %v16566_v50, %v16369_v3  ;;  %v8559_v38 = vld [vmem:[#allocation3 + $0x38] sm:$0x1] }
 0x38c   : > { %8298 = vmatprep.mubr.bf16.mxu0 %v10702_v40  ;;  %v8610_v5 = vsel %vm13062_vm12, %v8605_v19, %v8609_v11  ;;  %v6134_v46 = vor.u32 %v6133_v8, %v6130_v17  ;;  %12022 = vmatprep.subr.bf16.mxu1 %v12625_v12  ;;  %v8620_v14 = vsel %vm13062_vm12, %v8615_v34, %v8619_v62  ;;  %v8622_v18 = vshrl.u32 %v16583_v61, 16  ;;  %v12635_v62 = vld [vmem:[#allocation4 + $0x218] sm:$0xff]  }
 0x38d   : > { %v10855_v20 = vcombine.low %v16545_v30, %v16550_v6  ;;  %v8625_v13 = vshll.u32 %v16583_v61, 16  ;;  %v10871_v11 = vcombine.low %v8610_v5, %v8620_v14  ;;  %v6144_v16 = vor.u32 %v6143_v56, %v6139_v15 }
 0x38e   : > { %v6135_v59 = vrot.slane %v6134_v46, 4  ;;  %v8631_v0 = vshll.u32 %v16587_v10, 16  ;;  %v16602_v28 = vpop.f32.mrb[172].mxu0  ;;  %v6149_v17 = vrot.slane %v6147_v37, 5  ;;  %v8624_v44 = vrot.slane %v8622_v18, 4 }
 0x38f   : > { %v8627_v40 = vrot.slane %v8625_v13, 5  ;;  %v8635_v19 = vshrl.u32 %v16587_v10, 16  ;;  %12023 = vmatpush3.bf16.msra.mxu1 %v12625_v12  ;;  %v16605_v30 = vpop.f32.mrb[173].mxu0  ;;  %9574 = vmatprep.mubr.bf16.mxu1 %v10871_v11  ;;  %v6145_v6 = vrot.slane %v6144_v16, 4  ;;  %v8641_v32 = vshll.u32 %v8559_v38, 16 }
 0x390   : > { %v8633_v8 = vrot.slane %v8631_v0, 5  ;;  %v6152_v34 = vshrl.u32 %v16599_v48, 16  ;;  %12024 = vmatprep.subr.bf16.mxu1 %v12630_v57  ;;  %v16608_v5 = vpop.f32.mrb[174].mxu0  ;;  %v6140_v37 = vsel %vm13062_vm12, %v6135_v59, %v6139_v15  ;;  %v6155_v14 = vshll.u32 %v16599_v48, 16 }
 0x391   : > { %v8628_v46 = vor.u32 %v8627_v40, %v8624_v44  ;;  %v8637_v56 = vrot.slane %v8635_v19, 4  ;;  %v16613_v12 = vpop.f32.mrb[175].mxu0  ;;  %v6150_v18 = vsel %vm13062_vm12, %v6145_v6, %v6149_v17  ;;  %v6161_v13 = vshll.u32 %v16382_v27, 16  ;;  %v16622_v44 = vld [vmem:[#allocation3 + $0x3c] sm:$0xf] }
 0x392   : > { %9575 = vmatmul.mubr.bf16.gmra.mrb[132].mxu1 %v10855_v20  ;;  %v6154_v38 = vrot.slane %v6152_v34, 4  ;;  %v6165_v11 = vshrl.u32 %v16382_v27, 16  ;;  %8299 = vmatmul.mubr.bf16.gmra.mrb[0].mxu0 %v10686_v58  ;;  %v10703_v15 = vcombine.low %v6140_v37, %v6150_v18  ;;  %v6157_v0 = vrot.slane %v6155_v14, 5  ;;  %v16624_v40 = vld [vmem:[#allocation3 + $0x40] sm:$0xf]  ;;  %v12639_v34 = vld [vmem:[#allocation4 + $0x220] sm:$0xff]  }
 0x393   : > { %v8629_v59 = vrot.slane %v8628_v46, 4  ;;  %v8638_v16 = vor.u32 %v8637_v56, %v8633_v8  ;;  %12025 = vmatpush3.bf16.msra.mxu1 %v12630_v57  ;;  %v8643_v17 = vrot.slane %v8641_v32, 5  ;;  %v6163_v20 = vrot.slane %v6161_v13, 5  ;;  %v8560_v14 = vld [vmem:[#allocation3 + $0x44] sm:$0x1] }
 0x394   : > { %v6167_v19 = vrot.slane %v6165_v11, 4  ;;  %v6171_v6 = vshll.u32 %v16388_v4, 16  ;;  %12026 = vmatprep.subr.bf16.mxu1 %v12635_v62  ;;  %8306 = vmatprep.mubr.bf16.mxu0 %v10703_v15  ;;  %v6158_v58 = vor.u32 %v6157_v0, %v6154_v38  ;;  %v10856_v37 = vcombine.low %v16583_v61, %v16587_v10  ;;  %v16637_v11 = vld [vmem:[#allocation3 + $0x84] sm:$0xf] }
 0x395   : > { %v8634_v33 = vsel %vm13062_vm12, %v8629_v59, %v8633_v8  ;;  %v8639_v54 = vrot.slane %v8638_v16, 4  ;;  %v8646_v57 = vshrl.u32 %v16622_v44, 16  ;;  %v8649_v32 = vshll.u32 %v16622_v44, 16 }
 0x396   : > { %v6168_v46 = vor.u32 %v6167_v19, %v6163_v20  ;;  %v6173_v56 = vrot.slane %v6171_v6, 5  ;;  %v6159_v18 = vrot.slane %v6158_v58, 4  ;;  %v8655_v13 = vshll.u32 %v16624_v40, 16 }
 0x397   : > { %v8644_v4 = vsel %vm13062_vm12, %v8639_v54, %v8643_v17  ;;  %v8659_v8 = vshrl.u32 %v16624_v40, 16  ;;  %12027 = vmatpush3.bf16.msra.mxu1 %v12635_v62  ;;  %v8648_v10 = vrot.slane %v8646_v57, 4  ;;  %v8651_v15 = vrot.slane %v8649_v32, 5  ;;  %v12642_v17 = vld [vmem:[#allocation4 + $0x228] sm:$0xff]  }
 0x398   : > { %v10872_v38 = vcombine.low %v8634_v33, %v8644_v4  ;;  %v6169_v61 = vrot.slane %v6168_v46, 4  ;;  %12028 = vmatprep.subr.bf16.mxu1 %v12639_v34  ;;  %v6164_v59 = vsel %vm13062_vm12, %v6159_v18, %v6163_v20  ;;  %v8657_v16 = vrot.slane %v8655_v13, 5  ;;  %v16652_v18 = vld [vmem:[#allocation3 + $0x48] sm:$0xf] }
 0x399   : > { %v8661_v0 = vrot.slane %v8659_v8, 4  ;;  %v8665_v19 = vshll.u32 %v8560_v14, 16  ;;  %v8652_v54 = vor.u32 %v8651_v15, %v8648_v10  ;;  %v6176_v58 = vshrl.u32 %v16637_v11, 16 }
 0x39a   : > { %9582 = vmatprep.mubr.bf16.mxu1 %v10872_v38  ;;  %v6174_v6 = vsel %vm13062_vm12, %v6169_v61, %v6173_v56  ;;  %v6179_v62 = vshll.u32 %v16637_v11, 16  ;;  %8307 = vmatmul.mubr.bf16.gmra.mrb[4].mxu0 %v10687_v51  ;;  %v10688_v20 = vcombine.low %v16599_v48, %v16382_v27  ;;  %v6185_v14 = vshll.u32 %v16409_v1, 16  ;;  %v12645_v27 = vld [vmem:[#allocation4 + $0x230] sm:$0xff]  }
 0x39b   : > { %v10704_v33 = vcombine.low %v6164_v59, %v6174_v6  ;;  %9583 = vmatmul.mubr.bf16.gmra.mrb[136].mxu1 %v10856_v37  ;;  %v8662_v46 = vor.u32 %v8661_v0, %v8657_v16  ;;  %v8653_v57 = vrot.slane %v8652_v54, 4  ;;  %v6178_v32 = vrot.slane %v6176_v58, 4  ;;  %v16659_v61 = vld [vmem:[#allocation3 + $0x4c] sm:$0xf]  ;;  %v8561_v59 = vld [vmem:[#allocation3 + $0x50] sm:$0x1] }
 0x39c   : > { %v6181_v56 = vrot.slane %v6179_v62, 5  ;;  %v6189_v4 = vshrl.u32 %v16409_v1, 16  ;;  %12029 = vmatpush3.bf16.msra.mxu1 %v12639_v34  ;;  %v8667_v3 = vrot.slane %v8665_v19, 5  ;;  %v6187_v50 = vrot.slane %v6185_v14, 5  ;;  %v16675_v62 = vld [vmem:[#allocation3 + $0x90] sm:$0xf] }
 0x39d   : > { %8314 = vmatprep.mubr.bf16.mxu0 %v10704_v33  ;;  %v8663_v13 = vrot.slane %v8662_v46, 4  ;;  %v6195_v51 = vshll.u32 %v16425_v52, 16  ;;  %12030 = vmatprep.subr.bf16.mxu1 %v12642_v17  ;;  %v8658_v48 = vsel %vm13062_vm12, %v8653_v57, %v8657_v16  ;;  %v10689_v38 = vcombine.low %v16637_v11, %v16409_v1  ;;  %v12648_v14 = vld [vmem:[#allocation4 + $0x238] sm:$0xff]  }
 0x39e   : > { %v6182_v37 = vor.u32 %v6181_v56, %v6178_v32  ;;  %v6191_v8 = vrot.slane %v6189_v4, 4  ;;  %v16661_v10 = vpop.f32.mrb[176].mxu0  ;;  %v10857_v52 = vcombine.low %v16622_v44, %v16624_v40  ;;  %v16669_v15 = vadd.f32 %v16429_v43, %v16417_v29 }
 0x39f   : > { %v8668_v34 = vsel %vm13062_vm12, %v8663_v13, %v8667_v3  ;;  %v8670_v16 = vshrl.u32 %v16652_v18, 16  ;;  %v16672_v0 = vpop.f32.mrb[177].mxu0  ;;  %v8673_v58 = vshll.u32 %v16652_v18, 16  ;;  %v6197_v44 = vrot.slane %v6195_v51, 5 }
 0x3a0   : > { %v10873_v19 = vcombine.low %v8658_v48, %v8668_v34  ;;  %v6183_v6 = vrot.slane %v6182_v37, 4  ;;  %v6192_v54 = vor.u32 %v6191_v8, %v6187_v50  ;;  %v16677_v33 = vpop.f32.mrb[178].mxu0  ;;  %12031 = vmatpush3.bf16.msra.mxu1 %v12642_v17  ;;  %v8679_v29 = vshll.u32 %v16659_v61, 16 }
 0x3a1   : > { %v8672_v40 = vrot.slane %v8670_v16, 4  ;;  %v8683_v43 = vshrl.u32 %v16659_v61, 16  ;;  %v16681_v46 = vpop.f32.mrb[179].mxu0  ;;  %12032 = vmatprep.subr.bf16.mxu1 %v12645_v27  ;;  %v8675_v32 = vrot.slane %v8673_v58, 5  ;;  %v8689_v56 = vshll.u32 %v8561_v59, 16 }
 0x3a2   : > { %9590 = vmatprep.mubr.bf16.mxu1 %v10873_v19  ;;  %v6193_v57 = vrot.slane %v6192_v54, 4  ;;  %v16685_v4 = vadd.f32 %v16440_v23, %v16437_v49  ;;  %8315 = vmatmul.mubr.bf16.gmra.mrb[8].mxu0 %v10688_v20  ;;  %v6188_v17 = vsel %vm13062_vm12, %v6183_v6, %v6187_v50  ;;  %v8681_v13 = vrot.slane %v8679_v29, 5  ;;  %v16695_v6 = vld [vmem:[#allocation3 + $0x54] sm:$0xf] }
 0x3a3   : > { %9591 = vmatmul.mubr.bf16.gmra.mrb[140].mxu1 %v10857_v52  ;;  %v8685_v3 = vrot.slane %v8683_v43, 4  ;;  %v6200_v51 = vshrl.u32 %v16675_v62, 16  ;;  %v8676_v37 = vor.u32 %v8675_v32, %v8672_v40  ;;  %v6203_v8 = vshll.u32 %v16675_v62, 16  ;;  %v16700_v40 = vld [vmem:[#allocation3 + $0x58] sm:$0xf] }
 0x3a4   : > { %v6198_v48 = vsel %vm13062_vm12, %v6193_v57, %v6197_v44  ;;  %v6209_v34 = vshll.u32 %v16435_v26, 16  ;;  %12033 = vmatpush3.bf16.msra.mxu1 %v12645_v27  ;;  %v6213_v59 = vshrl.u32 %v16435_v26, 16  ;;  %v8691_v52 = vrot.slane %v8689_v56, 5 }
 0x3a5   : > { %v10705_v49 = vcombine.low %v6188_v17, %v6198_v48  ;;  %v8686_v23 = vor.u32 %v8685_v3, %v8681_v13  ;;  %v6202_v20 = vrot.slane %v6200_v51, 4  ;;  %12034 = vmatprep.subr.bf16.mxu1 %v12648_v14  ;;  %v8677_v50 = vrot.slane %v8676_v37, 4  ;;  %v8562_v17 = vld [vmem:[#allocation3 + $0x5c] sm:$0x1] }
 0x3a6   : > { %v6205_v16 = vrot.slane %v6203_v8, 5  ;;  %v6211_v19 = vrot.slane %v6209_v34, 5  ;;  %v6215_v58 = vrot.slane %v6213_v59, 4  ;;  %v6219_v44 = vshll.u32 %v16443_v41, 16 }
 0x3a7   : > { %8322 = vmatprep.mubr.bf16.mxu0 %v10705_v49  ;;  %v8687_v54 = vrot.slane %v8686_v23, 4  ;;  %v10690_v27 = vcombine.low %v16675_v62, %v16435_v26  ;;  %v8682_v29 = vsel %vm13062_vm12, %v8677_v50, %v8681_v13  ;;  %v10858_v57 = vcombine.low %v16652_v18, %v16659_v61  ;;  %v16716_v61 = vld [vmem:[#allocation3 + $0x9c] sm:$0xf] }
 0x3a8   : > { %v6206_v43 = vor.u32 %v6205_v16, %v6202_v20  ;;  %v16708_v32 = vadd.f32 %v16494_v2, %v16487_v35  ;;  %12035 = vmatpush3.bf16.msra.mxu1 %v12648_v14  ;;  %v6216_v56 = vor.u32 %v6215_v58, %v6211_v19  ;;  %v8694_v26 = vshrl.u32 %v16695_v6, 16 }
 0x3a9   : > { %v8692_v41 = vsel %vm13062_vm12, %v8687_v54, %v8691_v52  ;;  %v8697_v62 = vshll.u32 %v16695_v6, 16  ;;  %v8703_v51 = vshll.u32 %v16700_v40, 16  ;;  %v8707_v18 = vshrl.u32 %v16700_v40, 16 }
 0x3aa   : > { %v10874_v3 = vcombine.low %v8682_v29, %v8692_v41  ;;  %v6207_v13 = vrot.slane %v6206_v43, 4  ;;  %v16718_v35 = vpop.f32.mrb[180].mxu0  ;;  %8323 = vmatmul.mubr.bf16.gmra.mrb[12].mxu0 %v10689_v38  ;;  %v6217_v2 = vrot.slane %v6216_v56, 4  ;;  %v6221_v14 = vrot.slane %v6219_v44, 5  ;;  %v16742_v43 = vld [vmem:[#allocation3 + $0x60] sm:$0xf] }
 0x3ab   : > { %v8696_v48 = vrot.slane %v8694_v26, 4  ;;  %v8699_v37 = vrot.slane %v8697_v62, 5  ;;  %v16723_v8 = vpop.f32.mrb[181].mxu0  ;;  %v8705_v34 = vrot.slane %v8703_v51, 5  ;;  %v8709_v49 = vrot.slane %v8707_v18, 4 }
 0x3ac   : > { %9598 = vmatprep.mubr.bf16.mxu1 %v10874_v3  ;;  %v8713_v23 = vshll.u32 %v8562_v17, 16  ;;  %v16727_v20 = vadd.f32 %v16510_v63, %v16500_v36  ;;  %v16729_v59 = vpop.f32.mrb[182].mxu0  ;;  %v6212_v1 = vsel %vm13062_vm12, %v6207_v13, %v6211_v19  ;;  %v6222_v11 = vsel %vm13062_vm12, %v6217_v2, %v6221_v14  ;;  %v16744_v26 = vld [vmem:[#allocation3 + $0x64] sm:$0xf]  ;;  %v16750_v18 = vld [vmem:[#allocation3 + $0x68] sm:$0x1] }
 0x3ad   : > { %9599 = vmatmul.mubr.bf16.gmra.mrb[144].mxu1 %v10858_v57  ;;  %v8700_v38 = vor.u32 %v8699_v37, %v8696_v48  ;;  %v6224_v50 = vshrl.u32 %v16716_v61, 16  ;;  %v16736_v52 = vpop.f32.mrb[183].mxu0  ;;  %v10706_v16 = vcombine.low %v6212_v1, %v6222_v11  ;;  %v8710_v54 = vor.u32 %v8709_v49, %v8705_v34 }
 0x3ae   : > { %v6227_v58 = vshll.u32 %v16716_v61, 16  ;;  %v6233_v36 = vshll.u32 %v16463_v53, 16  ;;  %v6237_v29 = vshrl.u32 %v16463_v53, 16  ;;  %v6243_v19 = vshll.u32 %v16475_v22, 16 }
 0x3af   : > { %v8701_v63 = vrot.slane %v8700_v38, 4  ;;  %v6226_v44 = vrot.slane %v6224_v50, 4  ;;  %8330 = vmatprep.mubr.bf16.mxu0 %v10706_v16  ;;  %v8711_v57 = vrot.slane %v8710_v54, 4  ;;  %v8715_v41 = vrot.slane %v8713_v23, 5 }
 0x3b0   : > { %v6229_v56 = vrot.slane %v6227_v58, 5  ;;  %v6235_v17 = vrot.slane %v6233_v36, 5  ;;  %v6239_v3 = vrot.slane %v6237_v29, 4  ;;  %v6245_v13 = vrot.slane %v6243_v19, 5 }
 0x3b1   : > { %v8706_v62 = vsel %vm13062_vm12, %v8701_v63, %v8705_v34  ;;  %v10859_v51 = vcombine.low %v16695_v6, %v16700_v40  ;;  %v8716_v22 = vsel %vm13062_vm12, %v8711_v57, %v8715_v41  ;;  %v16756_v14 = vadd.f32 %v16560_v7, %v16553_v42  ;;  %v16761_v6 = vld [vmem:[#allocation3 + $0xa8] sm:$0xf] }
 0x3b2   : > { %v6230_v2 = vor.u32 %v6229_v56, %v6226_v44  ;;  %v8718_v48 = vshrl.u32 %v16742_v43, 16  ;;  %v10875_v37 = vcombine.low %v8706_v62, %v8716_v22  ;;  %8331 = vmatmul.mubr.bf16.gmra.mrb[16].mxu0 %v10690_v27  ;;  %v6240_v34 = vor.u32 %v6239_v3, %v6235_v17  ;;  %v16779_v3 = vld [vmem:[#allocation3 + $0x6c] sm:$0xf] }
 0x3b3   : > { %v8721_v49 = vshll.u32 %v16742_v43, 16  ;;  %v8727_v23 = vshll.u32 %v16744_v26, 16  ;;  %v8731_v38 = vshrl.u32 %v16744_v26, 16  ;;  %v8737_v50 = vshll.u32 %v16750_v18, 16 }
 0x3b4   : > { %v6231_v1 = vrot.slane %v6230_v2, 4  ;;  %v8720_v11 = vrot.slane %v8718_v48, 4  ;;  %9606 = vmatprep.mubr.bf16.mxu1 %v10875_v37  ;;  %v6241_v42 = vrot.slane %v6240_v34, 4  ;;  %v16767_v27 = vadd.f32 %v16571_v25, %v16568_v45  ;;  %v16784_v48 = vld [vmem:[#allocation3 + $0x70] sm:$0xf] }
 0x3b5   : > { %v8723_v7 = vrot.slane %v8721_v49, 5  ;;  %v8729_v16 = vrot.slane %v8727_v23, 5  ;;  %v10691_v58 = vcombine.low %v16716_v61, %v16463_v53  ;;  %9607 = vmatmul.mubr.bf16.gmra.mrb[148].mxu1 %v10859_v51  ;;  %v8733_v36 = vrot.slane %v8731_v38, 4 }
 0x3b6   : > { %v6236_v54 = vsel %vm13062_vm12, %v6231_v1, %v6235_v17  ;;  %v6248_v63 = vshrl.u32 %v16761_v6, 16  ;;  %v6246_v44 = vsel %vm13062_vm12, %v6241_v42, %v6245_v13  ;;  %v6251_v19 = vshll.u32 %v16761_v6, 16 }
 0x3b7   : > { %v8724_v29 = vor.u32 %v8723_v7, %v8720_v11  ;;  %v6257_v57 = vshll.u32 %v16469_v31, 16  ;;  %v10707_v45 = vcombine.low %v6236_v54, %v6246_v44  ;;  %v8734_v25 = vor.u32 %v8733_v36, %v8729_v16  ;;  %v16800_v11 = vld [vmem:[#allocation3 + $0x74] sm:$0x1] }
 0x3b8   : > { %v6250_v41 = vrot.slane %v6248_v63, 4  ;;  %v6261_v56 = vshrl.u32 %v16469_v31, 16  ;;  %v8739_v62 = vrot.slane %v8737_v50, 5  ;;  %v6253_v53 = vrot.slane %v6251_v19, 5 }
 0x3b9   : > { %v8725_v17 = vrot.slane %v8724_v29, 4  ;;  %v6259_v61 = vrot.slane %v6257_v57, 5  ;;  %8338 = vmatprep.mubr.bf16.mxu0 %v10707_v45  ;;  %v8735_v51 = vrot.slane %v8734_v25, 4  ;;  %v6267_v13 = vshll.u32 %v16478_v9, 16 }
 0x3ba   : > { %v6263_v22 = vrot.slane %v6261_v56, 4  ;;  %v10692_v2 = vcombine.low %v16761_v6, %v16469_v31  ;;  %v16786_v37 = vpop.f32.mrb[184].mxu0  ;;  %8339 = vmatmul.mubr.bf16.gmra.mrb[20].mxu0 %v10691_v58  ;;  %v6254_v49 = vor.u32 %v6253_v53, %v6250_v41  ;;  %v10860_v23 = vcombine.low %v16742_v43, %v16744_v26 }
 0x3bb   : > { %v8730_v34 = vsel %vm13062_vm12, %v8725_v17, %v8729_v16  ;;  %v16794_v1 = vadd.f32 %v16605_v30, %v16602_v28  ;;  %v16796_v9 = vpop.f32.mrb[185].mxu0  ;;  %v8740_v31 = vsel %vm13062_vm12, %v8735_v51, %v8739_v62  ;;  %v8742_v38 = vshrl.u32 %v16779_v3, 16  ;;  %v16808_v30 = vld [vmem:[#allocation3 + $0xb4] sm:$0xf] }
 0x3bc   : > { %v6264_v6 = vor.u32 %v6263_v22, %v6259_v61  ;;  %v8745_v50 = vshll.u32 %v16779_v3, 16  ;;  %v16804_v42 = vpop.f32.mrb[186].mxu0  ;;  %v10876_v7 = vcombine.low %v8730_v34, %v8740_v31  ;;  %v6255_v43 = vrot.slane %v6254_v49, 4 }
 0x3bd   : > { %v8751_v16 = vshll.u32 %v16784_v48, 16  ;;  %v8755_v28 = vshrl.u32 %v16784_v48, 16  ;;  %v16810_v54 = vpop.f32.mrb[187].mxu0  ;;  %v6269_v36 = vrot.slane %v6267_v13, 5  ;;  %v8744_v63 = vrot.slane %v8742_v38, 4 }
 0x3be   : > { %v6265_v58 = vrot.slane %v6264_v6, 4  ;;  %v8747_v44 = vrot.slane %v8745_v50, 5  ;;  %9614 = vmatprep.mubr.bf16.mxu1 %v10876_v7  ;;  %v8761_v57 = vshll.u32 %v16800_v11, 16  ;;  %v16815_v45 = vadd.f32 %v16613_v12, %v16608_v5  ;;  %v16828_v38 = vld [vmem:[#allocation3 + $0x7c] sm:$0xf] }
 0x3bf   : > { %v8753_v29 = vrot.slane %v8751_v16, 5  ;;  %v8757_v19 = vrot.slane %v8755_v28, 4  ;;  %v6260_v25 = vsel %vm13062_vm12, %v6255_v43, %v6259_v61  ;;  %9615 = vmatmul.mubr.bf16.gmra.mrb[152].mxu1 %v10860_v23  ;;  %v6272_v17 = vshrl.u32 %v16808_v30, 16  ;;  %v16826_v61 = vld [vmem:[#allocation3 + $0x78] sm:$0xf] }
 0x3c0   : > { %v6270_v41 = vsel %vm13062_vm12, %v6265_v58, %v6269_v36  ;;  %v8748_v56 = vor.u32 %v8747_v44, %v8744_v63  ;;  %v6275_v51 = vshll.u32 %v16808_v30, 16  ;;  %v6281_v22 = vshll.u32 %v16508_v60, 16  ;;  %v16834_v28 = vld [vmem:[#allocation3 + $0x80] sm:$0x1] }
 0x3c1   : > { %v10708_v62 = vcombine.low %v6260_v25, %v6270_v41  ;;  %v8758_v53 = vor.u32 %v8757_v19, %v8753_v29  ;;  %v6274_v34 = vrot.slane %v6272_v17, 4  ;;  %v6285_v5 = vshrl.u32 %v16508_v60, 16 }
 0x3c2   : > { %v8749_v13 = vrot.slane %v8748_v56, 4  ;;  %v6291_v12 = vshll.u32 %v16514_v39, 16  ;;  %v8763_v23 = vrot.slane %v8761_v57, 5  ;;  %v6277_v31 = vrot.slane %v6275_v51, 5  ;;  %v16847_v56 = vld [vmem:[#allocation3 + $0x84] sm:$0xf] }
 0x3c3   : > { %8346 = vmatprep.mubr.bf16.mxu0 %v10708_v62  ;;  %v8759_v49 = vrot.slane %v8758_v53, 4  ;;  %v6283_v6 = vrot.slane %v6281_v22, 5  ;;  %v6287_v7 = vrot.slane %v6285_v5, 4  ;;  %v10861_v16 = vcombine.low %v16779_v3, %v16784_v48  ;;  %v16853_v53 = vld [vmem:[#allocation3 + $0x88] sm:$0xf] }
 0x3c4   : > { %v8754_v50 = vsel %vm13062_vm12, %v8749_v13, %v8753_v29  ;;  %8347 = vmatmul.mubr.bf16.gmra.mrb[24].mxu0 %v10692_v2  ;;  %v6293_v43 = vrot.slane %v6291_v12, 5  ;;  %v6278_v58 = vor.u32 %v6277_v31, %v6274_v34  ;;  %v16840_v36 = vadd.f32 %v16672_v0, %v16661_v10  ;;  %v16859_v12 = vld [vmem:[#allocation3 + $0x8c] sm:$0x1] }
 0x3c5   : > { %v8764_v39 = vsel %vm13062_vm12, %v8759_v49, %v8763_v23  ;;  %v8766_v63 = vshrl.u32 %v16826_v61, 16  ;;  %v6288_v29 = vor.u32 %v6287_v7, %v6283_v6  ;;  %v8769_v2 = vshll.u32 %v16826_v61, 16 }
 0x3c6   : > { %17917 = vst [vmem:[#allocation29_spill] sm:$0xff] %v16840_v36  ;;  %v10877_v44 = vcombine.low %v8754_v50, %v8764_v39  ;;  %v8775_v19 = vshll.u32 %v16828_v38, 16  ;;  %v6279_v57 = vrot.slane %v6278_v58, 4  ;;  %v8779_v25 = vshrl.u32 %v16828_v38, 16 }
 0x3c7   : > { %v8768_v3 = vrot.slane %v8766_v63, 4  ;;  %v8785_v41 = vshll.u32 %v16834_v28, 16  ;;  %v6289_v17 = vrot.slane %v6288_v29, 4  ;;  %v8771_v10 = vrot.slane %v8769_v2, 5 }
 0x3c8   : > { %9622 = vmatprep.mubr.bf16.mxu1 %v10877_v44  ;;  %v8777_v0 = vrot.slane %v8775_v19, 5  ;;  %v16851_v62 = vadd.f32 %v16681_v46, %v16677_v33  ;;  %v11430_v51 = vpop.f32.mrb[188].mxu0  ;;  %v6284_v22 = vsel %vm13062_vm12, %v6279_v57, %v6283_v6  ;;  %v10693_v13 = vcombine.low %v16808_v30, %v16508_v60  ;;  %v16874_v44 = vld [vmem:[#allocation3 + $0x90] sm:$0xf]  ;;  %v16880_v19 = vld [vmem:[#allocation3 + $0x94] sm:$0xf] }
 0x3c9   : > { %9623 = vmatmul.mubr.bf16.gmra.mrb[156].mxu1 %v10861_v16  ;;  %v8781_v34 = vrot.slane %v8779_v25, 4  ;;  %v8787_v5 = vrot.slane %v8785_v41, 5  ;;  %v11431_v49 = vpop.f32.mrb[189].mxu0  ;;  %v6294_v23 = vsel %vm13062_vm12, %v6289_v17, %v6293_v43  ;;  %v8772_v33 = vor.u32 %v8771_v10, %v8768_v3  ;;  %v16886_v17 = vld [vmem:[#allocation3 + $0x98] sm:$0x1] }
 0x3ca   : > { %17918 = vst [vmem:[#allocation30_spill] sm:$0xff] %v16851_v62  ;;  %v16865_v46 = vadd.f32 %v16723_v8, %v16718_v35  ;;  %v8790_v31 = vshrl.u32 %v16847_v56, 16  ;;  %v16868_v6 = vpop.f32.mrb[190].mxu0  ;;  %v10709_v50 = vcombine.low %v6284_v22, %v6294_v23  ;;  %v8793_v30 = vshll.u32 %v16847_v56, 16 }
 0x3cb   : > { %v8782_v60 = vor.u32 %v8781_v34, %v8777_v0  ;;  %v8799_v7 = vshll.u32 %v16853_v53, 16  ;;  %v11434_v16 = vpop.f32.mrb[191].mxu0  ;;  %v8773_v39 = vrot.slane %v8772_v33, 4  ;;  %v8803_v43 = vshrl.u32 %v16853_v53, 16 }
 0x3cc   : > { %17919 = vst [vmem:[#allocation21_spill] sm:$0xff] %v16865_v46  ;;  %v8792_v58 = vrot.slane %v8790_v31, 4  ;;  %v8809_v63 = vshll.u32 %v16859_v12, 16  ;;  %8354 = vmatprep.mubr.bf16.mxu0 %v10709_v50  ;;  %v8795_v8 = vrot.slane %v8793_v30, 5  ;;  %v16878_v2 = vadd.f32 %v16736_v52, %v16729_v59  ;;  %v8957_v46 = vld [vmem:[#allocation3 + $0x18] sm:$0xe] }
 0x3cd   : > { %v8783_v35 = vrot.slane %v8782_v60, 4  ;;  %v8801_v29 = vrot.slane %v8799_v7, 5  ;;  %v8778_v57 = vsel %vm13062_vm12, %v8773_v39, %v8777_v0  ;;  %8355 = vmatmul.mubr.bf16.gmra.mrb[28].mxu0 %v10693_v13  ;;  %v10862_v3 = vcombine.low %v16826_v61, %v16828_v38  ;;  %v16905_v7 = vld [vmem:[#allocation3 + $0xa0] sm:$0xf] }
 0x3ce   : > { %17920 = vst [vmem:[#allocation22_spill] sm:$0xff] %v16878_v2  ;;  %v8805_v25 = vrot.slane %v8803_v43, 4  ;;  %v8811_v41 = vrot.slane %v8809_v63, 5  ;;  %v8796_v22 = vor.u32 %v8795_v8, %v8792_v58  ;;  %v16892_v59 = vadd.f32 %v16796_v9, %v16786_v37 }
 0x3cf   : > { %v8788_v10 = vsel %vm13062_vm12, %v8783_v35, %v8787_v5  ;;  %v8814_v52 = vshrl.u32 %v16874_v44, 16  ;;  %v8817_v13 = vshll.u32 %v16874_v44, 16  ;;  %v8823_v61 = vshll.u32 %v16880_v19, 16  ;;  %v16899_v5 = vld [vmem:[#allocation3 + $0x9c] sm:$0xf] }
 0x3d0   : > { %17921 = vst [vmem:[#allocation47_spill] sm:$0xff] %v16892_v59  ;;  %v10878_v34 = vcombine.low %v8778_v57, %v8788_v10  ;;  %v8806_v0 = vor.u32 %v8805_v25, %v8801_v29  ;;  %v8797_v23 = vrot.slane %v8796_v22, 4  ;;  %v8827_v31 = vshrl.u32 %v16880_v19, 16  ;;  %v16914_v10 = vld [vmem:[#allocation3 + $0xa4] sm:$0x1] }
 0x3d1   : > { %v8816_v33 = vrot.slane %v8814_v52, 4  ;;  %v8833_v50 = vshll.u32 %v16886_v17, 16  ;;  %v8819_v37 = vrot.slane %v8817_v13, 5  ;;  %v8825_v9 = vrot.slane %v8823_v61, 5 }
 0x3d2   : > { %9630 = vmatprep.mubr.bf16.mxu1 %v10878_v34  ;;  %v8807_v60 = vrot.slane %v8806_v0, 4  ;;  %v16903_v30 = vadd.f32 %v16810_v54, %v16804_v42  ;;  %v8802_v39 = vsel %vm13062_vm12, %v8797_v23, %v8801_v29  ;;  %v8829_v58 = vrot.slane %v8827_v31, 4  ;;  %v16924_v23 = vld [vmem:[#allocation3 + $0xac] sm:$0xf] }
 0x3d3   : > { %9631 = vmatmul.mubr.bf16.gmra.mrb[160].mxu1 %v10862_v3  ;;  %v8820_v63 = vor.u32 %v8819_v37, %v8816_v33  ;;  %v16911_v35 = vadd.f32 %v11431_v49, %v11430_v51  ;;  %v8838_v8 = vshrl.u32 %v16899_v5, 16  ;;  %v8841_v42 = vshll.u32 %v16899_v5, 16  ;;  %v16918_v3 = vld [vmem:[#allocation3 + $0xa8] sm:$0xf] }
 0x3d4   : > { %17922 = vst [vmem:[#allocation48_spill] sm:$0xff] %v16903_v30  ;;  %v8812_v43 = vsel %vm13062_vm12, %v8807_v60, %v8811_v41  ;;  %v8830_v25 = vor.u32 %v8829_v58, %v8825_v9  ;;  %v8847_v54 = vshll.u32 %v16905_v7, 16  ;;  %v8835_v22 = vrot.slane %v8833_v50, 5 }
 0x3d5   : > { %17923 = vst [vmem:[#allocation35_spill] sm:$0xff] %v16911_v35  ;;  %v10879_v57 = vcombine.low %v8802_v39, %v8812_v43  ;;  %v8821_v29 = vrot.slane %v8820_v63, 4  ;;  %v8840_v52 = vrot.slane %v8838_v8, 4  ;;  %v8851_v41 = vshrl.u32 %v16905_v7, 16  ;;  %v5331_v35 = vld [vmem:[#allocation3 + $0xd4] sm:$0x1] }
 0x3d6   : > { %v8831_v51 = vrot.slane %v8830_v25, 4  ;;  %v8843_v49 = vrot.slane %v8841_v42, 5  ;;  %v8849_v0 = vrot.slane %v8847_v54, 5  ;;  %v16922_v13 = vadd.f32 %v11434_v16, %v16868_v6 }
 0x3d7   : > { %v11436_v34 = vpop.f32.mrb[192].mxu0  ;;  %9638 = vmatprep.mubr.bf16.mxu1 %v10879_v57  ;;  %v10863_v33 = vcombine.low %v16847_v56, %v16853_v53  ;;  %v8826_v31 = vsel %vm13062_vm12, %v8821_v29, %v8825_v9  ;;  %v8853_v50 = vrot.slane %v8851_v41, 4  ;;  %v8857_v60 = vshll.u32 %v16914_v10, 16  ;;  %v16938_v9 = vld [vmem:[#allocation3 + $0xb0] sm:$0x1] }
 0x3d8   : > { %17924 = vst [vmem:[#allocation36_spill] sm:$0xff] %v16922_v13  ;;  %v11437_v61 = vpop.f32.mrb[193].mxu0  ;;  %v8836_v39 = vsel %vm13062_vm12, %v8831_v51, %v8835_v22  ;;  %v8844_v58 = vor.u32 %v8843_v49, %v8840_v52  ;;  %v8862_v6 = vshrl.u32 %v16918_v3, 16  ;;  %v8865_v56 = vshll.u32 %v16918_v3, 16  ;;  %v16943_v41 = vld [vmem:[#allocation3 + $0xb8] sm:$0xf] }
 0x3d9   : > { %v11439_v37 = vpop.f32.mrb[194].mxu0  ;;  %v16933_v43 = vadd.f32 %v11437_v61, %v11436_v34  ;;  %v10880_v63 = vcombine.low %v8826_v31, %v8836_v39  ;;  %v8854_v8 = vor.u32 %v8853_v50, %v8849_v0  ;;  %v8871_v57 = vshll.u32 %v16924_v23, 16  ;;  %v16945_v61 = vld [vmem:[#allocation3 + $0xb4] sm:$0xf] }
 0x3da   : > { %v11440_v16 = vpop.f32.mrb[195].mxu0  ;;  %v8864_v25 = vrot.slane %v8862_v6, 4  ;;  %v8875_v42 = vshrl.u32 %v16924_v23, 16  ;;  %v8867_v29 = vrot.slane %v8865_v56, 5  ;;  %v8845_v34 = vrot.slane %v8844_v58, 4 }
 0x3db   : > { %17925 = vst [vmem:[#allocation49_spill] sm:$0xff] %v16933_v43  ;;  %9639 = vmatmul.mubr.bf16.gmra.mrb[164].mxu1 %v10863_v33  ;;  %v8855_v54 = vrot.slane %v8854_v8, 4  ;;  %v8873_v22 = vrot.slane %v8871_v57, 5  ;;  %v16941_v52 = vadd.f32 %v11440_v16, %v11439_v37  ;;  %v8859_v51 = vrot.slane %v8857_v60, 5  ;;  %v16958_v57 = vld [vmem:[#allocation3 + $0xbc] sm:$0x1] }
 0x3dc   : > { %9646 = vmatprep.mubr.bf16.mxu1 %v10880_v63  ;;  %v8877_v49 = vrot.slane %v8875_v42, 4  ;;  %v8895_v50 = vshll.u32 %v16943_v41, 16  ;;  %v8899_v39 = vshrl.u32 %v16943_v41, 16  ;;  %v8868_v6 = vor.u32 %v8867_v29, %v8864_v25  ;;  %v16960_v25 = vld [vmem:[#allocation3 + $0xc4] sm:$0xf] }
 0x3dd   : > { %17926 = vst [vmem:[#allocation50_spill] sm:$0xff] %v16941_v52  ;;  %v8860_v33 = vsel %vm13062_vm12, %v8855_v54, %v8859_v51  ;;  %v8881_v63 = vshll.u32 %v16938_v9, 16  ;;  %v8886_v37 = vshrl.u32 %v16945_v61, 16  ;;  %v8889_v16 = vshll.u32 %v16945_v61, 16  ;;  %v5277_v29 = vld [vmem:[#allocation3 + $0xcc] sm:$0x1] }
 0x3de   : > { %v8878_v31 = vor.u32 %v8877_v49, %v8873_v22  ;;  %v10864_v60 = vcombine.low %v16874_v44, %v16880_v19  ;;  %v8850_v58 = vsel %vm13062_vm12, %v8845_v34, %v8849_v0  ;;  %v8897_v42 = vrot.slane %v8895_v50, 5 }
 0x3df   : > { %v10881_v8 = vcombine.low %v8850_v58, %v8860_v33  ;;  %v8901_v54 = vrot.slane %v8899_v39, 4  ;;  %v8869_v51 = vrot.slane %v8868_v6, 4  ;;  %v8883_v49 = vrot.slane %v8881_v63, 5  ;;  %v16969_v39 = vld [vmem:[#allocation3 + $0xc0] sm:$0xf] }
 0x3e0   : > { %v8879_v56 = vrot.slane %v8878_v31, 4  ;;  %v8888_v43 = vrot.slane %v8886_v37, 4  ;;  %v8891_v13 = vrot.slane %v8889_v16, 5  ;;  %v10865_v0 = vcombine.low %v16899_v5, %v16905_v7  ;;  %v16971_v6 = vld [vmem:[#allocation3 + $0xd0] sm:$0xf] }
 0x3e1   : > { %v8905_v31 = vshll.u32 %v16958_v57, 16  ;;  %v8902_v63 = vor.u32 %v8901_v54, %v8897_v42  ;;  %v8919_v16 = vshll.u32 %v16960_v25, 16  ;;  %v5278_v5 = vsel %vm12954_vm3, 0, %v5277_v29 }
 0x3e2   : > { %v8884_v34 = vsel %vm13062_vm12, %v8879_v56, %v8883_v49  ;;  %v8892_v58 = vor.u32 %v8891_v13, %v8888_v43  ;;  %5279 = vst [vmem:[#allocation3 + $0xcc] sm:$0x1] %v5278_v5  ;;  %v5332_v56 = vsel %vm12962_vm4, 0, %v5331_v35  ;;  %v8910_v54 = vshrl.u32 %v16969_v39, 16 }
 0x3e3   : > { %9647 = vmatmul.mubr.bf16.gmra.mrb[168].mxu1 %v10864_v60  ;;  %v8923_v60 = vshrl.u32 %v16960_v25, 16  ;;  %v8913_v49 = vshll.u32 %v16969_v39, 16  ;;  %5333 = vst [vmem:[#allocation3 + $0xd4] sm:$0x1] %v5332_v56  ;;  %v8947_v24 = vshrl.u32 %v16971_v6, 16  ;;  %v10866_v56 = vcombine.low %v16918_v3, %v16924_v23 }
 0x3e4   : > { %9654 = vmatprep.mubr.bf16.mxu1 %v10881_v8  ;;  %v11442_v52 = vpop.f32.mrb[196].mxu0  ;;  %v8893_v43 = vrot.slane %v8892_v58, 4  ;;  %v8912_v21 = vrot.slane %v8910_v54, 4  ;;  %v12708_v58 = vld [vmem:[#allocation3 + $0x1c] sm:$0xf] }
 0x3e5   : > { %v11443_v44 = vpop.f32.mrb[197].mxu0  ;;  %v8925_v13 = vrot.slane %v8923_v60, 4  ;;  %v8915_v35 = vrot.slane %v8913_v49, 5  ;;  %v8949_v5 = vrot.slane %v8947_v24, 4  ;;  %v9023_v54 = vrot.slane %v12708_v58, 5 }
 0x3e6   : > { %v16966_v33 = vadd.f32 %v11443_v44, %v11442_v52  ;;  %v11445_v50 = vpop.f32.mrb[198].mxu0  ;;  %v8874_v52 = vsel %vm13062_vm12, %v8869_v51, %v8873_v22  ;;  %v8943_v44 = vshll.u32 %v16971_v6, 16  ;;  %v8921_v22 = vrot.slane %v8919_v16, 5 }
 0x3e7   : > { %v11446_v37 = vpop.f32.mrb[199].mxu0  ;;  %v10882_v29 = vcombine.low %v8874_v52, %v8884_v34  ;;  %v8907_v51 = vrot.slane %v8905_v31, 5  ;;  %v8898_v49 = vsel %vm13062_vm12, %v8893_v43, %v8897_v42  ;;  %v8916_v3 = vor.u32 %v8915_v35, %v8912_v21 }
 0x3e8   : > { %17927 = vst [vmem:[#allocation38_spill] sm:$0xff] %v16966_v33  ;;  %v16979_v8 = vadd.f32 %v11446_v37, %v11445_v50  ;;  %v8903_v33 = vrot.slane %v8902_v63, 4  ;;  %v16987_v50 = vld [vmem:[#allocation3 + $0xc8] sm:$0x1]  ;;  %v16989_v37 = vrot.slane %v8943_v44, 5  ;;  %v9025_v58 = vrot.slane %v9023_v54, 4 }
 0x3e9   : > { %v16995_v63 = vld [vmem:[#allocation3 + $0xcc] sm:$0xf]  ;;  %v8929_v16 = vshll.u32 %v16987_v50, 16  ;;  %v8917_v42 = vrot.slane %v8916_v3, 4  ;;  %v10868_v3 = vcombine.low %v16969_v39, %v16960_v25 }
 0x3ea   : > { %17928 = vst [vmem:[#allocation40_spill] sm:$0xff] %v16979_v8  ;;  %v8908_v34 = vsel %vm13062_vm12, %v8903_v33, %v8907_v51  ;;  %v16998_v60 = vld [vmem:[#allocation3 + $0xd4] sm:$0x1]  ;;  %v8934_v31 = vshrl.u32 %v16995_v63, 16  ;;  %v8937_v52 = vshll.u32 %v16995_v63, 16  ;;  %v8950_v44 = vor.u32 %v8949_v5, %v16989_v37 }
 0x3eb   : > { %9655 = vmatmul.mubr.bf16.gmra.mrb[172].mxu1 %v10865_v0  ;;  %v8926_v0 = vor.u32 %v8925_v13, %v8921_v22  ;;  %v8953_v33 = vshll.u32 %v16998_v60, 16  ;;  %v10883_v24 = vcombine.low %v8898_v49, %v8908_v34  ;;  %v8931_v59 = vrot.slane %v8929_v16, 5  ;;  %v12709_v34 = vld [vmem:[#allocation3 + $0x20] sm:$0x1] }
 0x3ec   : > { %9662 = vmatprep.mubr.bf16.mxu1 %v10882_v29  ;;  %v8936_v29 = vrot.slane %v8934_v31, 4  ;;  %v8939_v13 = vrot.slane %v8937_v52, 5  ;;  %v8951_v21 = vrot.slane %v8950_v44, 4  ;;  %v9026_v31 = vrot.slane %v12709_v34, 5  ;;  %v17008_v52 = vld [vmem:[#allocation3 + $0x28] sm:$0xf] }
 0x3ed   : > { %v8927_v8 = vrot.slane %v8926_v0, 4  ;;  %v8955_v35 = vrot.slane %v8953_v33, 5  ;;  %v10838_v49 = vrot.slane %v8957_v46, 9  ;;  %v8964_v44 = vld [vmem:[#allocation3 + $0x6c] sm:$0xe] }
 0x3ee   : > { %v8940_v2 = vor.u32 %v8939_v13, %v8936_v29  ;;  %v8965_v33 = vld [vmem:[#allocation3 + $0x78] sm:$0xe]  ;;  %v17038_v29 = vld [vmem:[#allocation3 + $0x34] sm:$0xf]  ;;  %v9072_v13 = vrot.slane %v16784_v48, 5 }
 0x3ef   : > { %v8932_v0 = vsel %vm13062_vm12, %v8927_v8, %v8931_v59  ;;  %v8956_v46 = vsel %vm13062_vm12, %v8951_v21, %v8955_v35  ;;  %v9075_v21 = vrot.slane %v16800_v11, 5  ;;  %v8967_v35 = vld [vmem:[#allocation3 + $0x90] sm:$0xe]  ;;  %v9086_v11 = vrot.slane %v16853_v53, 5 }
 0x3f0   : > { %v8941_v36 = vrot.slane %v8940_v2, 4  ;;  %v17021_v2 = vsel %vm13945_vm15, %v9025_v58, %v9026_v31 }
 0x3f2   : > { %v8946_v59 = vsel %vm13062_vm12, %v8941_v36, %v16989_v37  ;;  %v10845_v36 = vrot.slane %v8964_v44, 9  ;;  %v10846_v37 = vrot.slane %v8965_v33, 9 }
 0x3f3   : > { %9663 = vmatmul.mubr.bf16.gmra.mrb[176].mxu1 %v10866_v56  ;;  %v11448_v51 = vpop.f32.mrb[200].mxu0  ;;  %v9030_v56 = vrot.slane %v17008_v52, 5  ;;  %v10885_v58 = vcombine.low %v8946_v59, %v8956_v46  ;;  %v10848_v59 = vrot.slane %v8967_v35, 9  ;;  %v8968_v46 = vld [vmem:[#allocation3 + $0x9c] sm:$0xe] }
 0x3f4   : > { %9670 = vmatprep.mubr.bf16.mxu1 %v10883_v24  ;;  %v11449_v30 = vpop.f32.mrb[201].mxu0  ;;  %v8922_v24 = vsel %vm13062_vm12, %v8917_v42, %v8921_v22  ;;  %v9037_v22 = vrot.slane %v17038_v29, 5  ;;  %v10869_v42 = vcombine.low %v16995_v63, %v16971_v6  ;;  %v17050_v48 = vsel %vm13945_vm15, %v10845_v36, %v9072_v13  ;;  %v12713_v63 = vld [vmem:[#allocation3 + $0x38] sm:$0x1] }
 0x3f5   : > { %v17006_v62 = vadd.f32 %v11449_v30, %v11448_v51  ;;  %v11451_v43 = vpop.f32.mrb[202].mxu0  ;;  %v10867_v30 = vcombine.low %v16945_v61, %v16943_v41  ;;  %v17032_v61 = vsel %vm13945_vm15, %v10838_v49, %v9023_v54  ;;  %v10884_v39 = vcombine.low %v8922_v24, %v8932_v0  ;;  %v8966_v51 = vld [vmem:[#allocation3 + $0x84] sm:$0xe] }
 0x3f6   : > { %v11452_v5 = vpop.f32.mrb[203].mxu0  ;;  %v17036_v8 = vrot.slane %v9030_v56, 4  ;;  %v10886_v55 = vcombine.low %v17032_v61, %v17021_v2  ;;  %v9079_v54 = vrot.slane %v16828_v38, 5  ;;  %v9082_v38 = vrot.slane %v16834_v28, 5 }
 0x3f7   : > { %v17013_v16 = vadd.f32 %v11452_v5, %v11451_v43  ;;  %v9074_v43 = vrot.slane %v9072_v13, 4  ;;  %v10847_v49 = vrot.slane %v8966_v51, 9  ;;  %v9093_v28 = vrot.slane %v16880_v19, 5 }
 0x3f8   : > { %v17054_v5 = vsel %vm13945_vm15, %v10846_v37, %v9079_v54  ;;  %v9081_v34 = vrot.slane %v9079_v54, 4  ;;  %v9088_v36 = vrot.slane %v9086_v11, 4  ;;  %v8969_v37 = vld [vmem:[#allocation3 + $0xa8] sm:$0xe] }
 0x3f9   : > { %v17059_v0 = vsel %vm13945_vm15, %v9074_v43, %v9075_v21  ;;  %v17077_v51 = vsel %vm13945_vm15, %v10847_v49, %v9086_v11  ;;  %v17081_v43 = vsel %vm13945_vm15, %v10848_v59, %v9093_v28  ;;  %v9095_v19 = vrot.slane %v9093_v28, 4  ;;  %v8971_v59 = vld [vmem:[#allocation3 + $0xc0] sm:$0xe] }
 0x3fa   : > { %v10893_v33 = vcombine.low %v17050_v48, %v17059_v0  ;;  %v17067_v24 = vsel %vm13945_vm15, %v9081_v34, %v9082_v38  ;;  %v9100_v21 = vrot.slane %v16905_v7, 5  ;;  %v9103_v38 = vrot.slane %v16914_v10, 5 }
 0x3fb   : > { %9671 = vmatmul.mubr.bf16.gmra.mrb[180].mxu1 %v10867_v30  ;;  %v9089_v30 = vrot.slane %v16859_v12, 5  ;;  %v10894_v53 = vcombine.low %v17054_v5, %v17067_v24  ;;  %v9096_v12 = vrot.slane %v16886_v17, 5  ;;  %v10849_v17 = vrot.slane %v8968_v46, 9  ;;  %v8972_v46 = vld [vmem:[#allocation3 + $0xcc] sm:$0xe] }
 0x3fc   : > { %9678 = vmatprep.mubr.bf16.mxu1 %v10884_v39  ;;  %v10850_v7 = vrot.slane %v8969_v37, 9  ;;  %v9107_v10 = vrot.slane %v16924_v23, 5  ;;  %v9121_v23 = vrot.slane %v16960_v25, 5  ;;  %v9124_v25 = vrot.slane %v16987_v50, 5 }
 0x3fd   : > { %v11454_v31 = vpop.f32.mrb[204].mxu0  ;;  %v17088_v34 = vsel %vm13945_vm15, %v9088_v36, %v9089_v30  ;;  %v17095_v11 = vsel %vm13945_vm15, %v9095_v19, %v9096_v12  ;;  %v17101_v28 = vsel %vm13945_vm15, %v10849_v17, %v9100_v21  ;;  %v9114_v12 = vrot.slane %v16943_v41, 5 }
 0x3fe   : > { %v11455_v44 = vpop.f32.mrb[205].mxu0  ;;  %v10895_v49 = vcombine.low %v17077_v51, %v17088_v34  ;;  %v9109_v19 = vrot.slane %v9107_v10, 4  ;;  %v17929_v48 = vcombine.low %v17081_v43, %v17095_v11 }
 0x3ff   : > { %v17070_v39 = vadd.f32 %v11455_v44, %v11454_v31  ;;  %v11457_v13 = vpop.f32.mrb[206].mxu0  ;;  %v8970_v31 = vld [vmem:[#allocation3 + $0xb4] sm:$0xe]  ;;  %v9102_v44 = vrot.slane %v9100_v21, 4  ;;  %v10852_v21 = vrot.slane %v8971_v59, 9  ;;  %v9116_v41 = vrot.slane %v9114_v12, 4 }
 0x400   : > { %v11458_v54 = vpop.f32.mrb[207].mxu0  ;;  %v10851_v36 = vrot.slane %v8970_v31, 9  ;;  %v10853_v31 = vrot.slane %v8972_v46, 9  ;;  %v9123_v59 = vrot.slane %v9121_v23, 4  ;;  %v9128_v46 = vrot.slane %v16971_v6, 5 }
 0x401   : > { %v17084_v35 = vadd.f32 %v11458_v54, %v11457_v13  ;;  %v17107_v13 = vsel %vm13945_vm15, %v9102_v44, %v9103_v38  ;;  %v17143_v50 = vsel %vm13945_vm15, %v10852_v21, %v9121_v23  ;;  %v12712_v23 = vld [vmem:[#allocation3 + $0x2c] sm:$0x1]  ;;  %v8959_v6 = vld [vmem:[#allocation3 + $0x30] sm:$0xe] }
 0x402   : > { %v17120_v38 = vsel %vm13945_vm15, %v10851_v36, %v9114_v12  ;;  %v9131_v36 = vrot.slane %v16998_v60, 5  ;;  %v9039_v60 = vrot.slane %v9037_v22, 4  ;;  %v9130_v21 = vrot.slane %v9128_v46, 4 }
 0x403   : > { %9679 = vmatmul.mubr.bf16.gmra.mrb[184].mxu1 %v10868_v3  ;;  %v9110_v3 = vrot.slane %v16938_v9, 5  ;;  %v17116_v9 = vsel %vm13945_vm15, %v10850_v7, %v9107_v10  ;;  %v10840_v61 = vrot.slane %v8959_v6, 9  ;;  %v17930_v51 = vcombine.low %v17101_v28, %v17107_v13 }
 0x404   : > { %9686 = vmatprep.mubr.bf16.mxu1 %v10885_v58  ;;  %v9117_v58 = vrot.slane %v16958_v57, 5 }
 0x405   : > { %v11460_v37 = vpop.f32.mrb[208].mxu0  ;;  %v17126_v54 = vsel %vm13945_vm15, %v9109_v19, %v9110_v3  ;;  %v17158_v19 = vsel %vm13945_vm15, %v10853_v31, %v9128_v46  ;;  %v8963_v3 = vld [vmem:[#allocation3 + $0x60] sm:$0xe] }
 0x406   : > { %v11461_v17 = vpop.f32.mrb[209].mxu0  ;;  %v10898_v7 = vcombine.low %v17116_v9, %v17126_v54  ;;  %v17133_v10 = vsel %vm13945_vm15, %v9116_v41, %v9117_v58  ;;  %v8958_v58 = vld [vmem:[#allocation3 + $0x24] sm:$0xe]  ;;  %v17165_v41 = vsel %vm13945_vm15, %v9130_v21, %v9131_v36 }
 0x407   : > { %v17122_v57 = vadd.f32 %v11461_v17, %v11460_v37  ;;  %v11463_v44 = vpop.f32.mrb[210].mxu0  ;;  %v17147_v37 = vsel %vm13945_vm15, %v9123_v59, %v9124_v25  ;;  %v9033_v17 = vrot.slane %v12712_v23, 5  ;;  %v10839_v59 = vrot.slane %v8958_v58, 9  ;;  %v12714_v25 = vld [vmem:[#allocation3 + $0x40] sm:$0xf] }
 0x408   : > { %v11464_v30 = vpop.f32.mrb[211].mxu0  ;;  %v9044_v46 = vrot.slane %v12714_v25, 5  ;;  %v17931_v28 = vcombine.low %v17120_v38, %v17133_v10  ;;  %v17932_v13 = vcombine.low %v17143_v50, %v17147_v37  ;;  %v17934_v38 = vcombine.low %v17158_v19, %v17165_v41  ;;  %v17935_v10 = vld [vmem:[#allocation30_spill] sm:$0xff] }
 0x409   : > { %v17137_v12 = vadd.f32 %v11464_v30, %v11463_v44  ;;  %v9034_v31 = vsel %vm13945_vm15, %v17036_v8, %v9033_v17  ;;  %v9031_v36 = vsel %vm13945_vm15, %v10839_v59, %v9030_v56  ;;  %v9038_v17 = vsel %vm13945_vm15, %v10840_v61, %v9037_v22  ;;  %v12717_v59 = vld [vmem:[#allocation3 + $0x50] sm:$0x1] }
 0x40a   : > { %v10887_v21 = vcombine.low %v9031_v36, %v9034_v31  ;;  %v9058_v22 = vrot.slane %v16700_v40, 5 }
 0x40b   : > { %9687 = vmatmul.mubr.bf16.gmra.mrb[188].mxu1 %v10869_v42  ;;  %v9040_v42 = vrot.slane %v12713_v63, 5  ;;  %v12715_v63 = vld [vmem:[#allocation3 + $0x4c] sm:$0xf] }
 0x40c   : > { %12036 = vmatprep.mubr.bf16.mxu1 %v10886_v55  ;;  %v9051_v30 = vrot.slane %v12715_v63, 5  ;;  %v12716_v63 = vld [vmem:[#allocation3 + $0x44] sm:$0x1] }
 0x40d   : > { %v11466_v44 = vpop.f32.mrb[212].mxu0  ;;  %v9041_v55 = vsel %vm13945_vm15, %v9039_v60, %v9040_v42  ;;  %v9046_v60 = vrot.slane %v9044_v46, 4  ;;  %v8960_v42 = vld [vmem:[#allocation3 + $0x3c] sm:$0xe]  ;;  %v9047_v56 = vrot.slane %v12716_v63, 5 }
 0x40e   : > { %v11467_v2 = vpop.f32.mrb[213].mxu0  ;;  %v10888_v25 = vcombine.low %v9038_v17, %v9041_v55  ;;  %v9053_v52 = vrot.slane %v9051_v30, 4  ;;  %v10841_v36 = vrot.slane %v8960_v42, 9 }
 0x40f   : > { %v17178_v58 = vadd.f32 %v11467_v2, %v11466_v44  ;;  %v11469_v8 = vpop.f32.mrb[214].mxu0  ;;  %v8961_v44 = vld [vmem:[#allocation3 + $0x48] sm:$0xe]  ;;  %v9054_v2 = vrot.slane %v12717_v59, 5  ;;  %v9048_v29 = vsel %vm13945_vm15, %v9046_v60, %v9047_v56  ;;  %v8962_v59 = vld [vmem:[#allocation3 + $0x54] sm:$0xe] }
 0x410   : > { %v11470_v6 = vpop.f32.mrb[215].mxu0  ;;  %v10842_v55 = vrot.slane %v8961_v44, 9  ;;  %v9045_v17 = vsel %vm13945_vm15, %v10841_v36, %v9044_v46  ;;  %v9060_v44 = vrot.slane %v9058_v22, 4  ;;  %v9068_v46 = vrot.slane %v16750_v18, 5 }
 0x411   : > { %v17184_v23 = vadd.f32 %v11470_v6, %v11469_v8  ;;  %v9055_v8 = vsel %vm13945_vm15, %v9053_v52, %v9054_v2  ;;  %v10889_v63 = vcombine.low %v9045_v17, %v9048_v29  ;;  %v10843_v36 = vrot.slane %v8962_v59, 9 }
 0x412   : > { %v9052_v42 = vsel %vm13945_vm15, %v10842_v55, %v9051_v30 }
 0x413   : > { %12037 = vmatmul.mubr.bf16.vlgmr.msra.gmra.mrb[96].mxu1 %v10887_v21  ;;  %v9065_v21 = vrot.slane %v16744_v26, 5  ;;  %v10890_v56 = vcombine.low %v9052_v42, %v9055_v8  ;;  %v12718_v26 = vld [vmem:[#allocation3 + $0x5c] sm:$0x1]  ;;  %v9059_v8 = vsel %vm13945_vm15, %v10843_v36, %v9058_v22 }
 0x414   : > { %12040 = vmatprep.mubr.bf16.mxu1 %v10888_v25  ;;  %v9061_v2 = vrot.slane %v12718_v26, 5 }
 0x415   : > { %v11472_v31 = vpop.f32.mrb[216].mxu0  ;;  %v9067_v52 = vrot.slane %v9065_v21, 4 }
 0x416   : > { %v11473_v61 = vpop.f32.mrb[217].mxu0  ;;  %v9062_v29 = vsel %vm13945_vm15, %v9060_v44, %v9061_v2 }
 0x417   : > { %v17194_v6 = vadd.f32 %v11473_v61, %v11472_v31  ;;  %v11475_v25 = vpop.f32.mrb[218].mxu0  ;;  %v10844_v61 = vrot.slane %v8963_v3, 9  ;;  %v9069_v55 = vsel %vm13945_vm15, %v9067_v52, %v9068_v46 }
 0x418   : > { %v11476_v60 = vpop.f32.mrb[219].mxu0 }
 0x419   : > { %v17198_v40 = vadd.f32 %v11476_v60, %v11475_v25  ;;  %v9066_v18 = vsel %vm13945_vm15, %v10844_v61, %v9065_v21 }
 0x41a   : > { %v10892_v60 = vcombine.low %v9066_v18, %v9069_v55  ;;  %v17933_v18 = vld [vmem:[#allocation29_spill] sm:$0xff] }
 0x41b   : > { %12041 = vmatmul.mubr.bf16.gmra.mrb[100].mxu1 %v10889_v63  ;;  %v10891_v63 = vcombine.low %v9059_v8, %v9062_v29 }
 0x41c   : > { %12044 = vmatprep.mubr.bf16.mxu1 %v10890_v56 }
 0x41d   : > { %v11478_v31 = vpop.f32.mrb[220].mxu0 }
 0x41e   : > { %v11479_v30 = vpop.f32.mrb[221].mxu0 }
 0x41f   : > { %v17207_v17 = vadd.f32 %v11479_v30, %v11478_v31  ;;  %v11481_v25 = vpop.f32.mrb[222].mxu0 }
 0x420   : > { %v11482_v42 = vpop.f32.mrb[223].mxu0 }
 0x421   : > { %v17211_v56 = vadd.f32 %v11482_v42, %v11481_v25 }
 0x423   : > { %12045 = vmatmul.mubr.bf16.gmra.mrb[104].mxu1 %v10891_v63 }
 0x424   : > { %12048 = vmatprep.mubr.bf16.mxu1 %v10892_v60 }
 0x425   : > { %v11524_v3 = vpop.f32.mrb[224].mxu0 }
 0x426   : > { %v11525_v44 = vpop.f32.mrb[225].mxu0 }
 0x427   : > { %v11526_v59 = vadd.f32 %v11525_v44, %v11524_v3  ;;  %v11527_v52 = vpop.f32.mrb[226].mxu0 }
 0x428   : > { %v11528_v26 = vpop.f32.mrb[227].mxu0 }
 0x429   : > { %v17214_v22 = vadd.f32 %v11526_v59, %v16669_v15  ;;  %v11529_v2 = vadd.f32 %v11528_v26, %v11527_v52  ;;  %v17936_v59 = vld [vmem:[#allocation21_spill] sm:$0xff] }
 0x42b   : > { %12049 = vmatmul.mubr.bf16.gmra.mrb[108].mxu1 %v10893_v33  ;;  %v17223_v47 = vadd.f32 %v11529_v2, %v16685_v4  ;;  %v17937_v2 = vld [vmem:[#allocation22_spill] sm:$0xff] }
 0x42c   : > { %12052 = vmatprep.mubr.bf16.mxu1 %v10894_v53 }
 0x42d   : > { %v11530_v21 = vpop.f32.mrb[228].mxu0 }
 0x42e   : > { %v11531_v46 = vpop.f32.mrb[229].mxu0 }
 0x42f   : > { %v11532_v31 = vadd.f32 %v11531_v46, %v11530_v21  ;;  %v11533_v36 = vpop.f32.mrb[230].mxu0 }
 0x430   : > { %v11534_v29 = vpop.f32.mrb[231].mxu0 }
 0x431   : > { %v17226_v15 = vadd.f32 %v11532_v31, %v16708_v32  ;;  %v11535_v30 = vadd.f32 %v11534_v29, %v11533_v36  ;;  %v17938_v29 = vld [vmem:[#allocation47_spill] sm:$0xff] }
 0x433   : > { %12053 = vmatmul.mubr.bf16.gmra.mrb[112].mxu1 %v10895_v49  ;;  %v17235_v4 = vadd.f32 %v11535_v30, %v16727_v20 }
 0x434   : > { %12056 = vmatprep.mubr.bf16.mxu1 %v17929_v48 }
 0x435   : > { %v11536_v5 = vpop.f32.mrb[232].mxu0 }
 0x436   : > { %v11537_v0 = vpop.f32.mrb[233].mxu0 }
 0x437   : > { %v11538_v33 = vadd.f32 %v11537_v0, %v11536_v5  ;;  %v11539_v24 = vpop.f32.mrb[234].mxu0  ;;  %v17939_v5 = vld [vmem:[#allocation48_spill] sm:$0xff] }
 0x438   : > { %v11540_v53 = vpop.f32.mrb[235].mxu0 }
 0x439   : > { %v17238_v32 = vadd.f32 %v11538_v33, %v16756_v14  ;;  %v11541_v61 = vadd.f32 %v11540_v53, %v11539_v24 }
 0x43b   : > { %12057 = vmatmul.mubr.bf16.gmra.mrb[116].mxu1 %v17930_v51  ;;  %v17247_v20 = vadd.f32 %v11541_v61, %v16767_v27 }
 0x43c   : > { %12060 = vmatprep.mubr.bf16.mxu1 %v10898_v7 }
 0x43d   : > { %v11542_v43 = vpop.f32.mrb[236].mxu0 }
 0x43e   : > { %v11543_v34 = vpop.f32.mrb[237].mxu0 }
 0x43f   : > { %v11544_v49 = vadd.f32 %v11543_v34, %v11542_v43  ;;  %v11545_v11 = vpop.f32.mrb[238].mxu0 }
 0x440   : > { %v11546_v55 = vpop.f32.mrb[239].mxu0 }
 0x441   : > { %v17250_v14 = vadd.f32 %v11544_v49, %v16794_v1  ;;  %v11547_v8 = vadd.f32 %v11546_v55, %v11545_v11 }
 0x443   : > { %12061 = vmatmul.mubr.bf16.gmra.mrb[120].mxu1 %v17931_v28  ;;  %v17259_v27 = vadd.f32 %v11547_v8, %v16815_v45  ;;  %v17940_v28 = vld [vmem:[#allocation35_spill] sm:$0xff] }
 0x444   : > { %12064 = vmatprep.mubr.bf16.mxu1 %v17932_v13 }
 0x445   : > { %v11548_v54 = vpop.f32.mrb[240].mxu0 }
 0x446   : > { %v11549_v9 = vpop.f32.mrb[241].mxu0 }
 0x447   : > { %v11550_v7 = vadd.f32 %v11549_v9, %v11548_v54  ;;  %v11551_v25 = vpop.f32.mrb[242].mxu0  ;;  %v17941_v9 = vld [vmem:[#allocation36_spill] sm:$0xff] }
 0x448   : > { %v11552_v63 = vpop.f32.mrb[243].mxu0 }
 0x449   : > { %v17262_v1 = vadd.f32 %v11550_v7, %v17933_v18  ;;  %v11553_v42 = vadd.f32 %v11552_v63, %v11551_v25 }
 0x44b   : > { %12065 = vmatmul.mubr.bf16.gmra.mrb[124].mxu1 %v17934_v38  ;;  %v17268_v60 = vadd.f32 %v11553_v42, %v17935_v10 }
 0x44d   : > { %v11554_v50 = vpop.f32.mrb[244].mxu0 }
 0x44e   : > { %v11555_v37 = vpop.f32.mrb[245].mxu0 }
 0x44f   : > { %v11556_v45 = vadd.f32 %v11555_v37, %v11554_v50  ;;  %v11557_v3 = vpop.f32.mrb[246].mxu0 }
 0x450   : > { %v11558_v44 = vpop.f32.mrb[247].mxu0 }
 0x451   : > { %v17271_v52 = vadd.f32 %v11556_v45, %v17936_v59  ;;  %v11559_v26 = vadd.f32 %v11558_v44, %v11557_v3 }
 0x453   : > { %v17274_v21 = vadd.f32 %v11559_v26, %v17937_v2  ;;  %v17942_v26 = vld [vmem:[#allocation49_spill] sm:$0xff] }
 0x455   : > { %v11560_v46 = vpop.f32.mrb[248].mxu0 }
 0x456   : > { %v11561_v31 = vpop.f32.mrb[249].mxu0 }
 0x457   : > { %v11562_v36 = vadd.f32 %v11561_v31, %v11560_v46  ;;  %v11563_v19 = vpop.f32.mrb[250].mxu0  ;;  %v17943_v31 = vld [vmem:[#allocation50_spill] sm:$0xff] }
 0x458   : > { %v11564_v41 = vpop.f32.mrb[251].mxu0 }
 0x459   : > { %v17277_v30 = vadd.f32 %v11562_v36, %v17938_v29  ;;  %v11565_v48 = vadd.f32 %v11564_v41, %v11563_v19 }
 0x45b   : > { %v17280_v0 = vadd.f32 %v11565_v48, %v17939_v5 }
 0x45d   : > { %v11660_v33 = vpop.f32.mrb[128].mxu1  ;;  %v11566_v24 = vpop.f32.mrb[252].mxu0 }
 0x45e   : > { %v11661_v53 = vpop.f32.mrb[129].mxu1  ;;  %v11567_v61 = vpop.f32.mrb[253].mxu0 }
 0x45f   : > { %v11662_v51 = vadd.f32 %v11661_v53, %v11660_v33  ;;  %v11663_v43 = vpop.f32.mrb[130].mxu1  ;;  %v11568_v34 = vadd.f32 %v11567_v61, %v11566_v24  ;;  %v11569_v49 = vpop.f32.mrb[254].mxu0 }
 0x460   : > { %v11664_v11 = vpop.f32.mrb[131].mxu1  ;;  %v11570_v55 = vpop.f32.mrb[255].mxu0 }
 0x461   : > { %v11665_v8 = vadd.f32 %v11664_v11, %v11663_v43  ;;  %v17283_v13 = vadd.f32 %v11568_v34, %v17940_v28  ;;  %v11571_v54 = vadd.f32 %v11570_v55, %v11569_v49  ;;  %v17944_v34 = vld [vmem:[#allocation38_spill] sm:$0xff]  ;;  %v17301_v55 = vadd.f32 %v17214_v22, %v11662_v51 }
 0x463   : > { %v17286_v7 = vadd.f32 %v11571_v54, %v17941_v9  ;;  %v17945_v54 = vld [vmem:[#allocation40_spill] sm:$0xff] }
 0x465   : > { %v11666_v25 = vpop.f32.mrb[132].mxu1  ;;  %v11572_v63 = vpop.f32.mrb[0].mxu0 }
 0x466   : > { %v11667_v18 = vpop.f32.mrb[133].mxu1  ;;  %v11573_v42 = vpop.f32.mrb[1].mxu0 }
 0x467   : > { %v11668_v38 = vadd.f32 %v11667_v18, %v11666_v25  ;;  %v11669_v10 = vpop.f32.mrb[134].mxu1  ;;  %v11574_v50 = vadd.f32 %v11573_v42, %v11572_v63  ;;  %v11575_v37 = vpop.f32.mrb[2].mxu0  ;;  %v17310_v25 = vadd.f32 %v17223_v47, %v11665_v8 }
 0x468   : > { %v11670_v45 = vpop.f32.mrb[135].mxu1  ;;  %v11576_v3 = vpop.f32.mrb[3].mxu0 }
 0x469   : > { %v11671_v44 = vadd.f32 %v11670_v45, %v11669_v10  ;;  %v17289_v59 = vadd.f32 %v17226_v15, %v11668_v38  ;;  %v17292_v2 = vadd.f32 %v11574_v50, %v17942_v26  ;;  %v11577_v46 = vadd.f32 %v11576_v3, %v11575_v37 }
 0x46b   : > { %v17295_v36 = vadd.f32 %v11577_v46, %v17943_v31  ;;  %v17304_v28 = vadd.f32 %v17235_v4, %v11671_v44 }
 0x46d   : > { %v11578_v19 = vpop.f32.mrb[4].mxu0 }
 0x46e   : > { %v11672_v41 = vpop.f32.mrb[136].mxu1  ;;  %v11579_v29 = vpop.f32.mrb[5].mxu0 }
 0x46f   : > { %v11673_v48 = vpop.f32.mrb[137].mxu1  ;;  %v11580_v5 = vadd.f32 %v11579_v29, %v11578_v19  ;;  %v11581_v33 = vpop.f32.mrb[6].mxu0 }
 0x470   : > { %v11674_v24 = vadd.f32 %v11673_v48, %v11672_v41  ;;  %v11675_v53 = vpop.f32.mrb[138].mxu1  ;;  %v11582_v61 = vpop.f32.mrb[7].mxu0 }
 0x471   : > { %v11676_v43 = vpop.f32.mrb[139].mxu1  ;;  %v17298_v15 = vadd.f32 %v11580_v5, %v17944_v34  ;;  %v11583_v49 = vadd.f32 %v11582_v61, %v11581_v33 }
 0x472   : > { %v11677_v11 = vadd.f32 %v11676_v43, %v11675_v53  ;;  %v17319_v47 = vadd.f32 %v17238_v32, %v11674_v24 }
 0x473   : > { %v17307_v9 = vadd.f32 %v11583_v49, %v17945_v54 }
 0x474   : > { %v17328_v19 = vadd.f32 %v17247_v20, %v11677_v11 }
 0x475   : > { %v11584_v63 = vpop.f32.mrb[8].mxu0 }
 0x476   : > { %v11678_v18 = vpop.f32.mrb[140].mxu1  ;;  %v11585_v42 = vpop.f32.mrb[9].mxu0 }
 0x477   : > { %v11679_v38 = vpop.f32.mrb[141].mxu1  ;;  %v11586_v10 = vadd.f32 %v11585_v42, %v11584_v63  ;;  %v11587_v50 = vpop.f32.mrb[10].mxu0 }
 0x478   : > { %v11680_v37 = vadd.f32 %v11679_v38, %v11678_v18  ;;  %v11681_v45 = vpop.f32.mrb[142].mxu1  ;;  %v11588_v3 = vpop.f32.mrb[11].mxu0 }
 0x479   : > { %v11682_v22 = vpop.f32.mrb[143].mxu1  ;;  %v17313_v51 = vadd.f32 %v11586_v10, %v17006_v62  ;;  %v11589_v4 = vadd.f32 %v11588_v3, %v11587_v50 }
 0x47a   : > { %v11683_v44 = vadd.f32 %v11682_v22, %v11681_v45  ;;  %v17316_v26 = vadd.f32 %v17250_v14, %v11680_v37 }
 0x47b   : > { %v17322_v8 = vadd.f32 %v11589_v4, %v17013_v16 }
 0x47c   : > { %v17325_v46 = vadd.f32 %v17259_v27, %v11683_v44 }
 0x47d   : > { %v11590_v31 = vpop.f32.mrb[12].mxu0 }
 0x47e   : > { %v11591_v62 = vpop.f32.mrb[13].mxu0 }
 0x47f   : > { %v11592_v41 = vadd.f32 %v11591_v62, %v11590_v31  ;;  %v11593_v29 = vpop.f32.mrb[14].mxu0 }
 0x480   : > { %v11684_v48 = vpop.f32.mrb[144].mxu1  ;;  %v11594_v5 = vpop.f32.mrb[15].mxu0 }
 0x481   : > { %v11685_v14 = vpop.f32.mrb[145].mxu1  ;;  %v17331_v33 = vadd.f32 %v11592_v41, %v17070_v39  ;;  %v11595_v32 = vadd.f32 %v11594_v5, %v11593_v29 }
 0x482   : > { %v11686_v24 = vadd.f32 %v11685_v14, %v11684_v48  ;;  %v11687_v16 = vpop.f32.mrb[146].mxu1 }
 0x483   : > { %v11688_v53 = vpop.f32.mrb[147].mxu1  ;;  %v17334_v27 = vadd.f32 %v11595_v32, %v17084_v35 }
 0x484   : > { %v11689_v61 = vadd.f32 %v11688_v53, %v11687_v16  ;;  %v17337_v20 = vadd.f32 %v17262_v1, %v11686_v24 }
 0x485   : > { %v11596_v43 = vpop.f32.mrb[16].mxu0 }
 0x486   : > { %v17340_v34 = vadd.f32 %v17268_v60, %v11689_v61  ;;  %v11597_v49 = vpop.f32.mrb[17].mxu0 }
 0x487   : > { %v11598_v11 = vadd.f32 %v11597_v49, %v11596_v43  ;;  %v11599_v54 = vpop.f32.mrb[18].mxu0 }
 0x488   : > { %v11600_v39 = vpop.f32.mrb[19].mxu0  ;;  %v11690_v63 = vpop.f32.mrb[148].mxu1 }
 0x489   : > { %v17343_v18 = vadd.f32 %v11598_v11, %v17122_v57  ;;  %v11601_v42 = vadd.f32 %v11600_v39, %v11599_v54  ;;  %v11691_v38 = vpop.f32.mrb[149].mxu1 }
 0x48a   : > { %v11692_v35 = vadd.f32 %v11691_v38, %v11690_v63  ;;  %v11693_v10 = vpop.f32.mrb[150].mxu1 }
 0x48b   : > { %v17346_v50 = vadd.f32 %v11601_v42, %v17137_v12  ;;  %v11694_v1 = vpop.f32.mrb[151].mxu1 }
 0x48c   : > { %v11695_v37 = vadd.f32 %v11694_v1, %v11693_v10  ;;  %v17349_v60 = vadd.f32 %v17271_v52, %v11692_v35 }
 0x48d   : > { %v11602_v45 = vpop.f32.mrb[20].mxu0 }
 0x48e   : > { %v11603_v3 = vpop.f32.mrb[21].mxu0  ;;  %v17352_v22 = vadd.f32 %v17274_v21, %v11695_v37 }
 0x48f   : > { %v11604_v4 = vadd.f32 %v11603_v3, %v11602_v45  ;;  %v11605_v57 = vpop.f32.mrb[22].mxu0 }
 0x490   : > { %v11606_v44 = vpop.f32.mrb[23].mxu0 }
 0x491   : > { %v17355_v31 = vadd.f32 %v11604_v4, %v17178_v58  ;;  %v11607_v62 = vadd.f32 %v11606_v44, %v11605_v57 }
 0x492   : > { %v11696_v41 = vpop.f32.mrb[152].mxu1 }
 0x493   : > { %v17358_v12 = vadd.f32 %v11607_v62, %v17184_v23  ;;  %v11697_v29 = vpop.f32.mrb[153].mxu1 }
 0x494   : > { %v11698_v48 = vadd.f32 %v11697_v29, %v11696_v41  ;;  %v11699_v52 = vpop.f32.mrb[154].mxu1 }
 0x495   : > { %v11700_v5 = vpop.f32.mrb[155].mxu1 }
 0x496   : > { %v11701_v14 = vadd.f32 %v11700_v5, %v11699_v52  ;;  %v17361_v21 = vadd.f32 %v17277_v30, %v11698_v48 }
 0x497   : > { %v11608_v32 = vpop.f32.mrb[24].mxu0 }
 0x498   : > { %v11609_v24 = vpop.f32.mrb[25].mxu0  ;;  %v17364_v58 = vadd.f32 %v17280_v0, %v11701_v14 }
 0x499   : > { %v11610_v16 = vadd.f32 %v11609_v24, %v11608_v32  ;;  %v11611_v53 = vpop.f32.mrb[26].mxu0 }
 0x49a   : > { %v11612_v61 = vpop.f32.mrb[27].mxu0 }
 0x49b   : > { %v17367_v43 = vadd.f32 %v11610_v16, %v17194_v6  ;;  %v11613_v23 = vadd.f32 %v11612_v61, %v11611_v53 }
 0x49c   : > { %v11702_v49 = vpop.f32.mrb[156].mxu1 }
 0x49d   : > { %v17370_v11 = vadd.f32 %v11613_v23, %v17198_v40  ;;  %v11703_v54 = vpop.f32.mrb[157].mxu1 }
 0x49e   : > { %v11704_v39 = vadd.f32 %v11703_v54, %v11702_v49  ;;  %v11705_v63 = vpop.f32.mrb[158].mxu1 }
 0x49f   : > { %v11706_v30 = vpop.f32.mrb[159].mxu1 }
 0x4a0   : > { %v11707_v42 = vadd.f32 %v11706_v30, %v11705_v63  ;;  %v17373_v38 = vadd.f32 %v17283_v13, %v11704_v39  ;;  %v11614_v35 = vpop.f32.mrb[28].mxu0 }
 0x4a1   : > { %v11615_v0 = vpop.f32.mrb[29].mxu0 }
 0x4a2   : > { %v17376_v10 = vadd.f32 %v17286_v7, %v11707_v42  ;;  %v11616_v6 = vadd.f32 %v11615_v0, %v11614_v35  ;;  %v11617_v1 = vpop.f32.mrb[30].mxu0 }
 0x4a3   : > { %v11618_v37 = vpop.f32.mrb[31].mxu0 }
 0x4a4   : > { %v17379_v45 = vadd.f32 %v11616_v6, %v17207_v17  ;;  %v11619_v40 = vadd.f32 %v11618_v37, %v11617_v1 }
 0x4a6   : > { %v11708_v3 = vpop.f32.mrb[160].mxu1  ;;  %v17382_v4 = vadd.f32 %v11619_v40, %v17211_v56 }
 0x4a7   : > { %v11709_v57 = vpop.f32.mrb[161].mxu1 }
 0x4a8   : > { %v11710_v44 = vadd.f32 %v11709_v57, %v11708_v3  ;;  %v11711_v13 = vpop.f32.mrb[162].mxu1 }
 0x4a9   : > { %v11712_v62 = vpop.f32.mrb[163].mxu1 }
 0x4aa   : > { %v11713_v41 = vadd.f32 %v11712_v62, %v11711_v13  ;;  %v17385_v29 = vadd.f32 %v17292_v2, %v11710_v44 }
 0x4ac   : > { %v17388_v7 = vadd.f32 %v17295_v36, %v11713_v41 }
 0x4ae   : > { %v11714_v48 = vpop.f32.mrb[164].mxu1 }
 0x4af   : > { %v11715_v52 = vpop.f32.mrb[165].mxu1 }
 0x4b0   : > { %v11716_v17 = vadd.f32 %v11715_v52, %v11714_v48  ;;  %v11717_v5 = vpop.f32.mrb[166].mxu1 }
 0x4b1   : > { %v11718_v14 = vpop.f32.mrb[167].mxu1 }
 0x4b2   : > { %v11719_v32 = vadd.f32 %v11718_v14, %v11717_v5  ;;  %v17391_v56 = vadd.f32 %v17298_v15, %v11716_v17 }
 0x4b4   : > { %v17394_v24 = vadd.f32 %v17307_v9, %v11719_v32 }
 0x4b6   : > { %v11720_v16 = vpop.f32.mrb[168].mxu1 }
 0x4b7   : > { %v11721_v53 = vpop.f32.mrb[169].mxu1 }
 0x4b8   : > { %v11722_v61 = vadd.f32 %v11721_v53, %v11720_v16  ;;  %v11723_v2 = vpop.f32.mrb[170].mxu1 }
 0x4b9   : > { %v11724_v23 = vpop.f32.mrb[171].mxu1 }
 0x4ba   : > { %v11725_v49 = vadd.f32 %v11724_v23, %v11723_v2  ;;  %v17397_v36 = vadd.f32 %v17313_v51, %v11722_v61 }
 0x4bc   : > { %v17400_v54 = vadd.f32 %v17322_v8, %v11725_v49 }
 0x4be   : > { %v11726_v39 = vpop.f32.mrb[172].mxu1 }
 0x4bf   : > { %v11727_v63 = vpop.f32.mrb[173].mxu1 }
 0x4c0   : > { %v11728_v30 = vadd.f32 %v11727_v63, %v11726_v39  ;;  %v11729_v15 = vpop.f32.mrb[174].mxu1 }
 0x4c1   : > { %v11730_v42 = vpop.f32.mrb[175].mxu1 }
 0x4c2   : > { %v11731_v35 = vadd.f32 %v11730_v42, %v11729_v15  ;;  %v17403_v9 = vadd.f32 %v17331_v33, %v11728_v30  ;;  %v17441_v42 = vld [vmem:[%s17653_s6] ss:$0 sm:$0xff] }
 0x4c4   : > { %v17406_v0 = vadd.f32 %v17334_v27, %v11731_v35 }
 0x4c6   : > { %v11732_v6 = vpop.f32.mrb[176].mxu1 }
 0x4c7   : > { %v11733_v1 = vpop.f32.mrb[177].mxu1 }
 0x4c8   : > { %v11734_v37 = vadd.f32 %v11733_v1, %v11732_v6  ;;  %v11735_v51 = vpop.f32.mrb[178].mxu1 }
 0x4c9   : > { %v11736_v40 = vpop.f32.mrb[179].mxu1 }
 0x4ca   : > { %v11737_v3 = vadd.f32 %v11736_v40, %v11735_v51  ;;  %v17409_v8 = vadd.f32 %v17343_v18, %v11734_v37  ;;  %v12719_v37 = vld [vmem:[%s12990_s19 + $0x10] sm:$0xff] }
 0x4cb   : > { %v9968_v51 = vsel %vm463_vm5, %v12719_v37, 0.0 }
 0x4cc   : > { %v17412_v57 = vadd.f32 %v17346_v50, %v11737_v3 }
 0x4ce   : > { %v11738_v44 = vpop.f32.mrb[180].mxu1 }
 0x4cf   : > { %v11739_v13 = vpop.f32.mrb[181].mxu1 }
 0x4d0   : > { %v11740_v62 = vadd.f32 %v11739_v13, %v11738_v44  ;;  %v11741_v33 = vpop.f32.mrb[182].mxu1  ;;  %v12720_v44 = vld [vmem:[%s12990_s19] sm:$0xff] }
 0x4d1   : > { %v11742_v41 = vpop.f32.mrb[183].mxu1 }
 0x4d2   : > { %v11743_v48 = vadd.f32 %v11742_v41, %v11741_v33  ;;  %v17415_v27 = vadd.f32 %v17355_v31, %v11740_v62  ;;  %v12721_v62 = vld [vmem:[%s12990_s19 + $0x18] sm:$0xff] }
 0x4d3   : > { %v9969_v33 = vsel %vm463_vm5, %v12721_v62, 0.0 }
 0x4d4   : > { %v17418_v52 = vadd.f32 %v17358_v12, %v11743_v48 }
 0x4d6   : > { %v11744_v17 = vpop.f32.mrb[184].mxu1 }
 0x4d7   : > { %v11745_v5 = vpop.f32.mrb[185].mxu1 }
 0x4d8   : > { %v11746_v14 = vadd.f32 %v11745_v5, %v11744_v17  ;;  %v11747_v18 = vpop.f32.mrb[186].mxu1  ;;  %v12722_v17 = vld [vmem:[%s12990_s19 + $0x8] sm:$0xff] }
 0x4d9   : > { %v11748_v32 = vpop.f32.mrb[187].mxu1  ;;  %v9967_v5 = vsel %vm463_vm5, %v12722_v17, 0.0  ;;  %v12726_v17 = vld [vmem:[%s12990_s19 + $0x28] sm:$0xff] }
 0x4da   : > { %v11749_v16 = vadd.f32 %v11748_v32, %v11747_v18  ;;  %v17421_v50 = vadd.f32 %v17367_v43, %v11746_v14  ;;  %v17435_v43 = vld [vmem:[%s17652_s5] ss:$0 sm:$0xff] }
 0x4dc   : > { %v17424_v53 = vadd.f32 %v17370_v11, %v11749_v16  ;;  %v12723_v16 = vld [vmem:[%s12990_s19 + $0x30] sm:$0xff] }
 0x4de   : > { %v11750_v61 = vpop.f32.mrb[188].mxu1 }
 0x4df   : > { %v11751_v2 = vpop.f32.mrb[189].mxu1 }
 0x4e0   : > { %v11752_v23 = vadd.f32 %v11751_v2, %v11750_v61  ;;  %v11753_v31 = vpop.f32.mrb[190].mxu1  ;;  %v9972_v61 = vsel %vm463_vm5, %v12723_v16, 0.0  ;;  %v12724_v2 = vld [vmem:[%s12990_s19 + $0x20] sm:$0xff] }
 0x4e1   : > { %v11754_v49 = vpop.f32.mrb[191].mxu1 }
 0x4e2   : > { %v11755_v12 = vadd.f32 %v11754_v49, %v11753_v31  ;;  %v17427_v39 = vadd.f32 %v17379_v45, %v11752_v23  ;;  %v9970_v23 = vsel %vm463_vm5, %v12724_v2, 0.0 }
 0x4e4   : > { %v17430_v63 = vadd.f32 %v17382_v4, %v11755_v12 }
 0x4e6   : > { %v12038_v30 = vpop.f32.mrb[96].mxu1 }
 0x4e7   : > { %v12198_v11 = vadd.f32 %v17289_v59, %v12038_v30  ;;  %v9729_v15 = vpop.f32.mrb[97].mxu1 }
 0x4e8   : > { %v12201_v45 = vadd.f32 %v17301_v55, %v9729_v15  ;;  %v12039_v4 = vpop.f32.mrb[98].mxu1  ;;  %v9966_v55 = vsel %vm463_vm5, %v12720_v44, 0.0 }
 0x4e9   : > { %v9897_v35 = vmul.f32 %v12198_v11, %v17435_v43  ;;  %v12204_v6 = vadd.f32 %v17304_v28, %v12039_v4  ;;  %v9732_v1 = vpop.f32.mrb[99].mxu1 }
 0x4ea   : > { %v9895_v59 = vmul.f32 %v12201_v45, %v17435_v43  ;;  %v12207_v40 = vadd.f32 %v17310_v25, %v9732_v1 }
 0x4eb   : > { %v9936_v3 = vadd.f32 %v17441_v42, %v9897_v35  ;;  %v9898_v13 = vmul.f32 %v12204_v6, %v17435_v43 }
 0x4ec   : > { %v9934_v28 = vadd.f32 %v17441_v42, %v9895_v59  ;;  %v9896_v41 = vmul.f32 %v12207_v40, %v17435_v43 }
 0x4ed   : > { %v10000_v48 = vadd.f32 %v9968_v51, %v9936_v3  ;;  %v9937_v25 = vadd.f32 %v17441_v42, %v9898_v13 }
 0x4ee   : > { %v9998_v14 = vadd.f32 %v9966_v55, %v9934_v28  ;;  %v9935_v18 = vadd.f32 %v17441_v42, %v9896_v41  ;;  %v12042_v32 = vpop.f32.mrb[100].mxu1 }
 0x4ef   : > { %vm10032_vm3 = vcmp.ge.f32.partialorder %v10000_v48, 0.0  ;;  %v10064_v31 = vmul.f32 0.01, %v10000_v48  ;;  %v10001_v49 = vadd.f32 %v9969_v33, %v9937_v25  ;;  %v12210_v12 = vadd.f32 %v17316_v26, %v12042_v32  ;;  %v9745_v30 = vpop.f32.mrb[101].mxu1  ;;  %v12725_v33 = vld [vmem:[%s12990_s19 + $0x38] sm:$0xff] }
 0x4f0   : > { %vm10030_vm4 = vcmp.ge.f32.partialorder %v9998_v14, 0.0  ;;  %v10062_v11 = vmul.f32 0.01, %v9998_v14  ;;  %v9999_v15 = vadd.f32 %v9967_v5, %v9935_v18  ;;  %v12213_v45 = vadd.f32 %v17319_v47, %v9745_v30  ;;  %v12043_v4 = vpop.f32.mrb[102].mxu1  ;;  %v12728_v18 = vld [vmem:[%s12990_s19 + $0x40] sm:$0xff] }
 0x4f1   : > { %v10096_v35 = vsel %vm10032_vm3, %v10000_v48, %v10064_v31  ;;  %vm10033_vm9 = vcmp.ge.f32.partialorder %v10001_v49, 0.0  ;;  %v10065_v6 = vmul.f32 0.01, %v10001_v49  ;;  %v9901_v1 = vmul.f32 %v12210_v12, %v17435_v43  ;;  %v9748_v37 = vpop.f32.mrb[103].mxu1 }
 0x4f2   : > { %10128 = vst [vmem:[%s17471_s23 + $0x10] sm:$0xff] %v10096_v35  ;;  %v10094_v51 = vsel %vm10030_vm4, %v9998_v14, %v10062_v11  ;;  %vm10031_vm10 = vcmp.ge.f32.partialorder %v9999_v15, 0.0  ;;  %v10063_v26 = vmul.f32 0.01, %v9999_v15  ;;  %v9899_v59 = vmul.f32 %v12213_v45, %v17435_v43 }
 0x4f3   : > { %10126 = vst [vmem:[%s17471_s23] sm:$0xff] %v10094_v51  ;;  %v10097_v40 = vsel %vm10033_vm9, %v10001_v49, %v10065_v6  ;;  %v9940_v47 = vadd.f32 %v17441_v42, %v9901_v1  ;;  %v12216_v3 = vadd.f32 %v17325_v46, %v12043_v4  ;;  %v12219_v44 = vadd.f32 %v17328_v19, %v9748_v37  ;;  %v12727_v19 = vld [vmem:[%s12990_s19 + $0x50] sm:$0xff] }
 0x4f4   : > { %10129 = vst [vmem:[%s17471_s23 + $0x18] sm:$0xff] %v10097_v40  ;;  %v10095_v55 = vsel %vm10031_vm10, %v9999_v15, %v10063_v26  ;;  %v9938_v13 = vadd.f32 %v17441_v42, %v9899_v59  ;;  %v9973_v41 = vsel %vm463_vm5, %v12725_v33, 0.0  ;;  %v9971_v46 = vsel %vm463_vm5, %v12726_v17, 0.0  ;;  %v12731_v17 = vld [vmem:[%s12990_s19 + $0x70] sm:$0xff] }
 0x4f5   : > { %10127 = vst [vmem:[%s17471_s23 + $0x8] sm:$0xff] %v10095_v55  ;;  %v10004_v28 = vadd.f32 %v9972_v61, %v9940_v47  ;;  %v9902_v62 = vmul.f32 %v12216_v3, %v17435_v43  ;;  %v9900_v48 = vmul.f32 %v12219_v44, %v17435_v43  ;;  %v9976_v14 = vsel %vm463_vm5, %v12727_v19, 0.0  ;;  %v12730_v55 = vld [vmem:[%s12990_s19 + $0x48] sm:$0xff]  ;;  %v12732_v19 = vld [vmem:[%s12990_s19 + $0x60] sm:$0xff] }
 0x4f6   : > { %v10002_v25 = vadd.f32 %v9970_v23, %v9938_v13  ;;  %v12046_v5 = vpop.f32.mrb[104].mxu1  ;;  %v9974_v32 = vsel %vm463_vm5, %v12728_v18, 0.0  ;;  %v9975_v13 = vsel %vm463_vm5, %v12730_v55, 0.0  ;;  %v9978_v18 = vsel %vm463_vm5, %v12732_v19, 0.0 }
 0x4f7   : > { %vm10036_vm12 = vcmp.ge.f32.partialorder %v10004_v28, 0.0  ;;  %v10068_v16 = vmul.f32 0.01, %v10004_v28  ;;  %v9941_v61 = vadd.f32 %v17441_v42, %v9902_v62  ;;  %v9939_v2 = vadd.f32 %v17441_v42, %v9900_v48  ;;  %v9761_v31 = vpop.f32.mrb[105].mxu1 }
 0x4f8   : > { %vm10034_vm15 = vcmp.ge.f32.partialorder %v10002_v25, 0.0  ;;  %v10066_v23 = vmul.f32 0.01, %v10002_v25  ;;  %v12222_v49 = vadd.f32 %v17349_v60, %v12046_v5  ;;  %v12225_v12 = vadd.f32 %v17337_v20, %v9761_v31  ;;  %v12047_v30 = vpop.f32.mrb[106].mxu1 }
 0x4f9   : > { %v10100_v11 = vsel %vm10036_vm12, %v10004_v28, %v10068_v16  ;;  %v10005_v15 = vadd.f32 %v9973_v41, %v9941_v61  ;;  %v10003_v45 = vadd.f32 %v9971_v46, %v9939_v2  ;;  %v12228_v4 = vadd.f32 %v17352_v22, %v12047_v30  ;;  %v9764_v35 = vpop.f32.mrb[107].mxu1  ;;  %v12733_v16 = vld [vmem:[%s12990_s19 + $0x78] sm:$0xff] }
 0x4fa   : > { %10132 = vst [vmem:[%s17471_s23 + $0x30] sm:$0xff] %v10100_v11  ;;  %v10098_v6 = vsel %vm10034_vm15, %v10002_v25, %v10066_v23  ;;  %v9905_v1 = vmul.f32 %v12222_v49, %v17435_v43  ;;  %v9903_v37 = vmul.f32 %v12225_v12, %v17435_v43  ;;  %v12231_v51 = vadd.f32 %v17340_v34, %v9764_v35  ;;  %v12729_v34 = vld [vmem:[%s12990_s19 + $0x58] sm:$0xff] }
 0x4fb   : > { %10130 = vst [vmem:[%s17471_s23 + $0x20] sm:$0xff] %v10098_v6  ;;  %vm10037_vm8 = vcmp.ge.f32.partialorder %v10005_v15, 0.0  ;;  %v10069_v20 = vmul.f32 0.01, %v10005_v15  ;;  %vm10035_vm11 = vcmp.ge.f32.partialorder %v10003_v45, 0.0  ;;  %v9906_v59 = vmul.f32 %v12228_v4, %v17435_v43 }
 0x4fc   : > { %v10067_v60 = vmul.f32 0.01, %v10003_v45  ;;  %v9944_v22 = vadd.f32 %v17441_v42, %v9905_v1  ;;  %v9942_v26 = vadd.f32 %v17441_v42, %v9903_v37  ;;  %v9904_v40 = vmul.f32 %v12231_v51, %v17435_v43 }
 0x4fd   : > { %v10101_v47 = vsel %vm10037_vm8, %v10005_v15, %v10069_v20  ;;  %v9977_v44 = vsel %vm463_vm5, %v12729_v34, 0.0  ;;  %v9945_v33 = vadd.f32 %v17441_v42, %v9906_v59  ;;  %v9980_v46 = vsel %vm463_vm5, %v12731_v17, 0.0 }
 0x4fe   : > { %v10099_v3 = vsel %vm10035_vm11, %v10003_v45, %v10067_v60  ;;  %10133 = vst [vmem:[%s17471_s23 + $0x38] sm:$0xff] %v10101_v47  ;;  %v10008_v28 = vadd.f32 %v9976_v14, %v9944_v22  ;;  %v10006_v62 = vadd.f32 %v9974_v32, %v9942_v26  ;;  %v9943_v41 = vadd.f32 %v17441_v42, %v9904_v40  ;;  %v12050_v48 = vpop.f32.mrb[108].mxu1  ;;  %v12734_v45 = vld [vmem:[%s12990_s19 + $0x68] sm:$0xff]  ;;  %v12735_v60 = vld [vmem:[%s12990_s19 + $0x90] sm:$0xff]  ;;  %v12736_v26 = vld [vmem:[%s12990_s19 + $0x80] sm:$0xff] }
 0x4ff   : > { %10131 = vst [vmem:[%s17471_s23 + $0x28] sm:$0xff] %v10099_v3  ;;  %v12234_v25 = vadd.f32 %v17373_v38, %v12050_v48  ;;  %v9777_v5 = vpop.f32.mrb[109].mxu1  ;;  %v9981_v61 = vsel %vm463_vm5, %v12733_v16, 0.0  ;;  %v10009_v2 = vadd.f32 %v9977_v44, %v9945_v33  ;;  %v9979_v4 = vsel %vm463_vm5, %v12734_v45, 0.0 }
 0x500   : > { %vm10040_vm13 = vcmp.ge.f32.partialorder %v10008_v28, 0.0  ;;  %v10072_v14 = vmul.f32 0.01, %v10008_v28  ;;  %vm10038_vm14 = vcmp.ge.f32.partialorder %v10006_v62, 0.0  ;;  %v10070_v32 = vmul.f32 0.01, %v10006_v62 }
 0x501   : > { %v10007_v31 = vadd.f32 %v9975_v13, %v9943_v41  ;;  %v9909_v38 = vmul.f32 %v12234_v25, %v17435_v43  ;;  %v12237_v23 = vadd.f32 %v17361_v21, %v9777_v5  ;;  %v12051_v49 = vpop.f32.mrb[110].mxu1  ;;  %vm10041_vm0 = vcmp.ge.f32.partialorder %v10009_v2, 0.0  ;;  %v12737_v13 = vld [vmem:[%s12990_s19 + $0x98] sm:$0xff]  ;;  %v12739_v41 = vld [vmem:[%s12990_s19 + $0xb0] sm:$0xff] }
 0x502   : > { %v10104_v12 = vsel %vm10040_vm13, %v10008_v28, %v10072_v14  ;;  %v10102_v30 = vsel %vm10038_vm14, %v10006_v62, %v10070_v32  ;;  %v12240_v11 = vadd.f32 %v17376_v10, %v12051_v49  ;;  %v9780_v15 = vpop.f32.mrb[111].mxu1  ;;  %v10073_v35 = vmul.f32 0.01, %v10009_v2  ;;  %v12738_v62 = vld [vmem:[%s12990_s19 + $0x88] sm:$0xff] }
 0x503   : > { %10136 = vst [vmem:[%s17471_s23 + $0x50] sm:$0xff] %v10104_v12  ;;  %10134 = vst [vmem:[%s17471_s23 + $0x40] sm:$0xff] %v10102_v30  ;;  %vm10039_vm1 = vcmp.ge.f32.partialorder %v10007_v31, 0.0  ;;  %v10071_v6 = vmul.f32 0.01, %v10007_v31  ;;  %v9948_v21 = vadd.f32 %v17441_v42, %v9909_v38  ;;  %v9907_v1 = vmul.f32 %v12237_v23, %v17435_v43  ;;  %v12740_v12 = vld [vmem:[%s12990_s19 + $0xa0] sm:$0xff] }
 0x504   : > { %v9910_v10 = vmul.f32 %v12240_v11, %v17435_v43  ;;  %v12243_v37 = vadd.f32 %v17364_v58, %v9780_v15  ;;  %v10105_v51 = vsel %vm10041_vm0, %v10009_v2, %v10073_v35  ;;  %v9984_v22 = vsel %vm463_vm5, %v12735_v60, 0.0 }
 0x505   : > { %v10103_v20 = vsel %vm10039_vm1, %v10007_v31, %v10071_v6  ;;  %v9982_v59 = vsel %vm463_vm5, %v12736_v26, 0.0  ;;  %10137 = vst [vmem:[%s17471_s23 + $0x58] sm:$0xff] %v10105_v51  ;;  %v10012_v40 = vadd.f32 %v9980_v46, %v9948_v21  ;;  %v9946_v47 = vadd.f32 %v17441_v42, %v9907_v1  ;;  %v12741_v1 = vld [vmem:[%s12990_s19 + $0xb8] sm:$0xff] }
 0x506   : > { %10135 = vst [vmem:[%s17471_s23 + $0x48] sm:$0xff] %v10103_v20  ;;  %v9949_v3 = vadd.f32 %v17441_v42, %v9910_v10  ;;  %v9908_v58 = vmul.f32 %v12243_v37, %v17435_v43  ;;  %v12054_v34 = vpop.f32.mrb[112].mxu1  ;;  %v9985_v28 = vsel %vm463_vm5, %v12737_v13, 0.0  ;;  %v9983_v33 = vsel %vm463_vm5, %v12738_v62, 0.0 }
 0x507   : > { %v12246_v44 = vadd.f32 %v17391_v56, %v12054_v34  ;;  %v9793_v55 = vpop.f32.mrb[113].mxu1  ;;  %v17551_v48 = vsel %vm463_vm5, %v12739_v41, 0.0  ;;  %vm10044_vm2 = vcmp.ge.f32.partialorder %v10012_v40, 0.0  ;;  %v10076_v25 = vmul.f32 0.01, %v10012_v40 }
 0x508   : > { %v10010_v17 = vadd.f32 %v9978_v18, %v9946_v47  ;;  %v10013_v46 = vadd.f32 %v9981_v61, %v9949_v3  ;;  %v12055_v5 = vpop.f32.mrb[114].mxu1  ;;  %v9947_v19 = vadd.f32 %v17441_v42, %v9908_v58  ;;  %v12249_v16 = vadd.f32 %v17385_v29, %v9793_v55  ;;  %v12742_v55 = vld [vmem:[%s12990_s19 + $0xa8] sm:$0xff] }
 0x509   : > { %v9913_v56 = vmul.f32 %v12246_v44, %v17435_v43  ;;  %v12252_v14 = vadd.f32 %v17394_v24, %v12055_v5  ;;  %v9796_v32 = vpop.f32.mrb[115].mxu1  ;;  %v10108_v2 = vsel %vm10044_vm2, %v10012_v40, %v10076_v25  ;;  %v9986_v30 = vsel %vm463_vm5, %v12740_v12, 0.0 }
 0x50a   : > { %vm10042_vm6 = vcmp.ge.f32.partialorder %v10010_v17, 0.0  ;;  %v10074_v31 = vmul.f32 0.01, %v10010_v17  ;;  %vm10045_vm7 = vcmp.ge.f32.partialorder %v10013_v46, 0.0  ;;  %10140 = vst [vmem:[%s17471_s23 + $0x70] sm:$0xff] %v10108_v2  ;;  %v10011_v61 = vadd.f32 %v9979_v4, %v9947_v19  ;;  %v12744_v2 = vld [vmem:[%s12990_s19 + $0xc0] sm:$0xff] }
 0x50b   : > { %v10077_v18 = vmul.f32 0.01, %v10013_v46  ;;  %v9952_v38 = vadd.f32 %v17441_v42, %v9913_v56  ;;  %v9911_v23 = vmul.f32 %v12249_v16, %v17435_v43  ;;  %v9914_v29 = vmul.f32 %v12252_v14, %v17435_v43 }
 0x50c   : > { %v10106_v49 = vsel %vm10042_vm6, %v10010_v17, %v10074_v31  ;;  %v12255_v24 = vadd.f32 %v17388_v7, %v9796_v32  ;;  %vm10043_vm3 = vcmp.ge.f32.partialorder %v10011_v61, 0.0  ;;  %v10075_v15 = vmul.f32 0.01, %v10011_v61  ;;  %v12745_v31 = vld [vmem:[%s12990_s19 + $0xd8] sm:$0xff] }
 0x50d   : > { %10138 = vst [vmem:[%s17471_s23 + $0x60] sm:$0xff] %v10106_v49  ;;  %v10109_v11 = vsel %vm10045_vm7, %v10013_v46, %v10077_v18  ;;  %v10016_v45 = vadd.f32 %v9984_v22, %v9952_v38  ;;  %v9950_v4 = vadd.f32 %v17441_v42, %v9911_v23  ;;  %v9953_v35 = vadd.f32 %v17441_v42, %v9914_v29  ;;  %v12743_v46 = vld [vmem:[%s12990_s19 + $0xd0] sm:$0xff] }
 0x50e   : > { %10141 = vst [vmem:[%s17471_s23 + $0x78] sm:$0xff] %v10109_v11  ;;  %v9912_v6 = vmul.f32 %v12255_v24, %v17435_v43  ;;  %v12058_v21 = vpop.f32.mrb[116].mxu1  ;;  %v9989_v7 = vsel %vm463_vm5, %v12741_v1, 0.0  ;;  %v10107_v10 = vsel %vm10043_vm3, %v10011_v61, %v10075_v15  ;;  %v9992_v5 = vsel %vm463_vm5, %v12743_v46, 0.0 }
 0x50f   : > { %vm10048_vm4 = vcmp.ge.f32.partialorder %v10016_v45, 0.0  ;;  %v10080_v37 = vmul.f32 0.01, %v10016_v45  ;;  %v12258_v51 = vadd.f32 %v17403_v9, %v12058_v21  ;;  %v9809_v20 = vpop.f32.mrb[117].mxu1  ;;  %10139 = vst [vmem:[%s17471_s23 + $0x68] sm:$0xff] %v10107_v10  ;;  %v10014_v60 = vadd.f32 %v9982_v59, %v9950_v4 }
 0x510   : > { %v10017_v22 = vadd.f32 %v9985_v28, %v9953_v35  ;;  %v9951_v26 = vadd.f32 %v17441_v42, %v9912_v6  ;;  %v12261_v40 = vadd.f32 %v17397_v36, %v9809_v20  ;;  %v12059_v47 = vpop.f32.mrb[118].mxu1  ;;  %v9987_v9 = vsel %vm463_vm5, %v12742_v55, 0.0 }
 0x511   : > { %v10112_v3 = vsel %vm10048_vm4, %v10016_v45, %v10080_v37  ;;  %v9917_v58 = vmul.f32 %v12258_v51, %v17435_v43  ;;  %v12264_v34 = vadd.f32 %v17406_v0, %v12059_v47  ;;  %v9812_v44 = vpop.f32.mrb[119].mxu1  ;;  %vm10046_vm9 = vcmp.ge.f32.partialorder %v10014_v60, 0.0 }
 0x512   : > { %10144 = vst [vmem:[%s17471_s23 + $0x90] sm:$0xff] %v10112_v3  ;;  %v10078_v59 = vmul.f32 0.01, %v10014_v60  ;;  %vm10049_vm10 = vcmp.ge.f32.partialorder %v10017_v22, 0.0  ;;  %v10081_v13 = vmul.f32 0.01, %v10017_v22  ;;  %v10015_v28 = vadd.f32 %v9983_v33, %v9951_v26 }
 0x513   : > { %v9956_v36 = vadd.f32 %v17441_v42, %v9917_v58  ;;  %v9915_v62 = vmul.f32 %v12261_v40, %v17435_v43  ;;  %v9918_v0 = vmul.f32 %v12264_v34, %v17435_v43  ;;  %v12267_v17 = vadd.f32 %v17400_v54, %v9812_v44  ;;  %v12746_v40 = vld [vmem:[%s12990_s19 + $0xc8] sm:$0xff]  ;;  %v12747_v3 = vld [vmem:[%s12990_s19 + $0xf0] sm:$0xff] }
 0x514   : > { %v10110_v41 = vsel %vm10046_vm9, %v10014_v60, %v10078_v59  ;;  %v10113_v25 = vsel %vm10049_vm10, %v10017_v22, %v10081_v13  ;;  %vm10047_vm12 = vcmp.ge.f32.partialorder %v10015_v28, 0.0  ;;  %v10079_v33 = vmul.f32 0.01, %v10015_v28 }
 0x515   : > { %10142 = vst [vmem:[%s17471_s23 + $0x80] sm:$0xff] %v10110_v41  ;;  %10145 = vst [vmem:[%s17471_s23 + $0x98] sm:$0xff] %v10113_v25  ;;  %v10020_v19 = vadd.f32 %v17551_v48, %v9956_v36  ;;  %v9954_v56 = vadd.f32 %v17441_v42, %v9915_v62  ;;  %v9957_v16 = vadd.f32 %v17441_v42, %v9918_v0  ;;  %v9990_v54 = vsel %vm463_vm5, %v12744_v2, 0.0  ;;  %v12748_v36 = vld [vmem:[%s12990_s19 + $0xe0] sm:$0xff] }
 0x516   : > { %v9916_v14 = vmul.f32 %v12267_v17, %v17435_v43  ;;  %v12062_v32 = vpop.f32.mrb[120].mxu1  ;;  %v9993_v18 = vsel %vm463_vm5, %v12745_v31, 0.0  ;;  %v10111_v61 = vsel %vm10047_vm12, %v10015_v28, %v10079_v33  ;;  %v9996_v58 = vsel %vm463_vm5, %v12747_v3, 0.0  ;;  %v12749_v31 = vld [vmem:[%s12990_s19 + $0xf8] sm:$0xff] }
 0x517   : > { %vm10052_vm15 = vcmp.ge.f32.partialorder %v10020_v19, 0.0  ;;  %v10084_v38 = vmul.f32 0.01, %v10020_v19  ;;  %v10018_v23 = vadd.f32 %v9986_v30, %v9954_v56  ;;  %v9825_v49 = vpop.f32.mrb[121].mxu1  ;;  %10143 = vst [vmem:[%s17471_s23 + $0x88] sm:$0xff] %v10111_v61  ;;  %v10021_v48 = vadd.f32 %v9989_v7, %v9957_v16 }
 0x518   : > { %v9955_v29 = vadd.f32 %v17441_v42, %v9916_v14  ;;  %v12270_v24 = vadd.f32 %v17415_v27, %v12062_v32  ;;  %v12273_v12 = vadd.f32 %v17409_v8, %v9825_v49  ;;  %v12063_v11 = vpop.f32.mrb[122].mxu1  ;;  %v9994_v62 = vsel %vm463_vm5, %v12748_v36, 0.0 }
 0x519   : > { %v10116_v15 = vsel %vm10052_vm15, %v10020_v19, %v10084_v38  ;;  %vm10050_vm8 = vcmp.ge.f32.partialorder %v10018_v23, 0.0  ;;  %v10082_v45 = vmul.f32 0.01, %v10018_v23  ;;  %v12276_v4 = vadd.f32 %v17418_v52, %v12063_v11  ;;  %v9828_v35 = vpop.f32.mrb[123].mxu1 }
 0x51a   : > { %10148 = vst [vmem:[%s17471_s23 + $0xb0] sm:$0xff] %v10116_v15  ;;  %vm10053_vm11 = vcmp.ge.f32.partialorder %v10021_v48, 0.0  ;;  %v10085_v30 = vmul.f32 0.01, %v10021_v48  ;;  %v10019_v6 = vadd.f32 %v9987_v9, %v9955_v29  ;;  %v9921_v21 = vmul.f32 %v12270_v24, %v17435_v43 }
 0x51b   : > { %v10114_v1 = vsel %vm10050_vm8, %v10018_v23, %v10082_v45  ;;  %v9919_v27 = vmul.f32 %v12273_v12, %v17435_v43  ;;  %v9922_v8 = vmul.f32 %v12276_v4, %v17435_v43  ;;  %v12279_v7 = vadd.f32 %v17412_v57, %v9828_v35  ;;  %v12750_v23 = vld [vmem:[%s12990_s19 + $0xe8] sm:$0xff] }
 0x51c   : > { %10146 = vst [vmem:[%s17471_s23 + $0xa0] sm:$0xff] %v10114_v1  ;;  %v10117_v52 = vsel %vm10053_vm11, %v10021_v48, %v10085_v30  ;;  %vm10051_vm13 = vcmp.ge.f32.partialorder %v10019_v6, 0.0  ;;  %v10083_v10 = vmul.f32 0.01, %v10019_v6  ;;  %v9960_v37 = vadd.f32 %v17441_v42, %v9921_v21 }
 0x51d   : > { %10149 = vst [vmem:[%s17471_s23 + $0xb8] sm:$0xff] %v10117_v52  ;;  %v9958_v51 = vadd.f32 %v17441_v42, %v9919_v27  ;;  %v9961_v20 = vadd.f32 %v17441_v42, %v9922_v8  ;;  %v9920_v60 = vmul.f32 %v12279_v7, %v17435_v43  ;;  %v9991_v57 = vsel %vm463_vm5, %v12746_v40, 0.0 }
 0x51e   : > { %v10115_v22 = vsel %vm10051_vm13, %v10019_v6, %v10083_v10  ;;  %v10024_v26 = vadd.f32 %v9992_v5, %v9960_v37  ;;  %v12066_v47 = vpop.f32.mrb[124].mxu1  ;;  %v9995_v49 = vsel %vm463_vm5, %v12750_v23, 0.0 }
 0x51f   : > { %10147 = vst [vmem:[%s17471_s23 + $0xa8] sm:$0xff] %v10115_v22  ;;  %v10022_v34 = vadd.f32 %v9990_v54, %v9958_v51  ;;  %v10025_v44 = vadd.f32 %v9993_v18, %v9961_v20  ;;  %v9959_v55 = vadd.f32 %v17441_v42, %v9920_v60  ;;  %v12282_v9 = vadd.f32 %v17427_v39, %v12066_v47  ;;  %v9841_v59 = vpop.f32.mrb[125].mxu1 }
 0x520   : > { %vm10056_vm14 = vcmp.ge.f32.partialorder %v10024_v26, 0.0  ;;  %v10088_v13 = vmul.f32 0.01, %v10024_v26  ;;  %v12285_v28 = vadd.f32 %v17421_v50, %v9841_v59  ;;  %v12067_v0 = vpop.f32.mrb[126].mxu1  ;;  %v9997_v18 = vsel %vm463_vm5, %v12749_v31, 0.0 }
 0x521   : > { %vm10054_vm0 = vcmp.ge.f32.partialorder %v10022_v34, 0.0  ;;  %v10086_v41 = vmul.f32 0.01, %v10022_v34  ;;  %vm10057_vm1 = vcmp.ge.f32.partialorder %v10025_v44, 0.0  ;;  %v10089_v25 = vmul.f32 0.01, %v10025_v44 }
 0x522   : > { %v10120_v17 = vsel %vm10056_vm14, %v10024_v26, %v10088_v13  ;;  %v10023_v46 = vadd.f32 %v9991_v57, %v9959_v55  ;;  %v9925_v39 = vmul.f32 %v12282_v9, %v17435_v43  ;;  %v9923_v5 = vmul.f32 %v12285_v28, %v17435_v43  ;;  %v9844_v33 = vpop.f32.mrb[127].mxu1 }
 0x523   : > { %10152 = vst [vmem:[%s17471_s23 + $0xd0] sm:$0xff] %v10120_v17  ;;  %v10118_v50 = vsel %vm10054_vm0, %v10022_v34, %v10086_v41  ;;  %v10121_v19 = vsel %vm10057_vm1, %v10025_v44, %v10089_v25  ;;  %v12288_v56 = vadd.f32 %v17430_v63, %v12067_v0  ;;  %v12291_v16 = vadd.f32 %v17424_v53, %v9844_v33 }
 0x524   : > { %10150 = vst [vmem:[%s17471_s23 + $0xc0] sm:$0xff] %v10118_v50  ;;  %10153 = vst [vmem:[%s17471_s23 + $0xd8] sm:$0xff] %v10121_v19  ;;  %vm10055_vm2 = vcmp.ge.f32.partialorder %v10023_v46, 0.0  ;;  %v10087_v14 = vmul.f32 0.01, %v10023_v46  ;;  %v9964_v32 = vadd.f32 %v17441_v42, %v9925_v39  ;;  %v9962_v2 = vadd.f32 %v17441_v42, %v9923_v5 }
 0x525   : > { %v9926_v54 = vmul.f32 %v12288_v56, %v17435_v43  ;;  %v9924_v61 = vmul.f32 %v12291_v16, %v17435_v43 }
 0x526   : > { %v10119_v38 = vsel %vm10055_vm2, %v10023_v46, %v10087_v14  ;;  %v10028_v63 = vadd.f32 %v9996_v58, %v9964_v32  ;;  %v10026_v53 = vadd.f32 %v9994_v62, %v9962_v2 }
 0x527   : > { %10151 = vst [vmem:[%s17471_s23 + $0xc8] sm:$0xff] %v10119_v38  ;;  %v9965_v48 = vadd.f32 %v17441_v42, %v9926_v54  ;;  %v9963_v29 = vadd.f32 %v17441_v42, %v9924_v61 }
 0x528   : > { %vm10060_vm6 = vcmp.ge.f32.partialorder %v10028_v63, 0.0  ;;  %v10092_v24 = vmul.f32 0.01, %v10028_v63  ;;  %vm10058_vm7 = vcmp.ge.f32.partialorder %v10026_v53, 0.0  ;;  %v10090_v12 = vmul.f32 0.01, %v10026_v53 }
 0x529   : > { %v10029_v43 = vadd.f32 %v9997_v18, %v9965_v48  ;;  %v10027_v11 = vadd.f32 %v9995_v49, %v9963_v29 }
 0x52a   : > { %v10124_v15 = vsel %vm10060_vm6, %v10028_v63, %v10092_v24  ;;  %v10122_v45 = vsel %vm10058_vm7, %v10026_v53, %v10090_v12 }
 0x52b   : > { %10156 = vst [vmem:[%s17471_s23 + $0xf0] sm:$0xff] %v10124_v15  ;;  %10154 = vst [vmem:[%s17471_s23 + $0xe0] sm:$0xff] %v10122_v45  ;;  %vm10061_vm3 = vcmp.ge.f32.partialorder %v10029_v43, 0.0  ;;  %v10093_v4 = vmul.f32 0.01, %v10029_v43  ;;  %vm10059_vm5 = vcmp.ge.f32.partialorder %v10027_v11, 0.0 }
 0x52c   : > { %v10091_v35 = vmul.f32 0.01, %v10027_v11 }
 0x52d   : > { %v10125_v30 = vsel %vm10061_vm3, %v10029_v43, %v10093_v4 }
 0x52e   : > { %v10123_v6 = vsel %vm10059_vm5, %v10027_v11, %v10091_v35  ;;  %10157 = vst [vmem:[%s17471_s23 + $0xf8] sm:$0xff] %v10125_v30 }
 0x52f   : > { %10155 = vst [vmem:[%s17471_s23 + $0xe8] sm:$0xff] %v10123_v6 }
 0x530 PF: > { %s18_s24 = sadd.s32 1, %s12789_s24  }
 0x531   : > { %p15_p3 = scmp.ge.s32.totalorder %s18_s24, 4  }
 0x533   :  { %17 = sbr.rel (!%p15_p3) target bundleno = 1 (0x1), region = 93 }
 0x53a   :  { %10179 = vsyncpa [#allocation5], 1 }
 0x53b   :  { %10181 = vsyncpa [#allocation5 + $0x1], 1 }

</bundles_post_ra>
